<compile_context>
chip_gen: v5e
topology: v5e:2x2
jax: 0.10.0
libtpu: 0.0.40
codegen_flags: <defaults>
</compile_context>

<pallas_src>
import functools

import jax
import jax.numpy as jnp
from jax.experimental import pallas as pl
from jax.experimental.pallas import tpu as pltpu

# Model hyper-parameters (consistent with the module's structure)
DIM = 3          # input point dimension
DIM_PAD = 4      # per-group input dim padded for clean MXU/bf16 layout
Z_DIM = 16       # latent z dimension
C_DIM = 16       # conditioning c dimension
HIDDEN = 32      # hidden size
N_BLOCKS = 5     # number of ResnetBlockFC blocks
OUT_DIM = 1      # output dimension (occupancy)


def _round_up(x, m):
    return (x + m - 1) // m * m


def _block_diag(w, g):
    """(..., out, in) -> (..., g*out, g*in) with w replicated on the diagonal."""
    out_f, in_f = w.shape[-2], w.shape[-1]
    eye = jnp.eye(g, dtype=w.dtype)
    bd = jnp.einsum('ab,...ij->...aibj', eye, w)
    return bd.reshape(*w.shape[:-2], g * out_f, g * in_f)


def _decoder_kernel(p_ref, bias_ref,
                    fcp_w, blk0_w, blk0_b, blk1_w, fco_w, fco_b,
                    out_ref, *, mm_dtype):
    """One grid step: one (batch, point-tile) slab, packed feature-major layout.

    p_ref:    (1, G*DIM_PAD, tc)         packed points (mm_dtype)
    bias_ref: (1, N_BLOCKS+1, G*H, 1)    per-batch bias columns (cond folded in)
    weights:  block-diagonal, pre-transposed to (out, in), mm_dtype
    out_ref:  (1, G*OUT_DIM, tc)         lane-dense output slab (f32)
    """
    f32 = jnp.float32
    x = p_ref[0]                                             # (G*DIM_PAD, tc)

    # net = fc_p(p) + cond[b, 0]   (cond folded into the bias column)
    net = jnp.dot(fcp_w[...], x, preferred_element_type=f32) + bias_ref[0, 0]

    for n in range(N_BLOCKS):
        # ResnetBlockFC: net + fc_1(relu(fc_0(relu(net)))); cond[b, n+1] is
        # folded into this block's fc_1 bias column (exact).
        a = jnp.maximum(net, 0.0).astype(mm_dtype)
        h = jnp.dot(blk0_w[n], a, preferred_element_type=f32) + blk0_b[n]
        hr = jnp.maximum(h, 0.0).astype(mm_dtype)
        dx = jnp.dot(blk1_w[n], hr, preferred_element_type=f32) + bias_ref[0, n + 1]
        net = net + dx

    # out = fc_out(relu(net))  -> (G*OUT_DIM, tc) lane-dense slab store
    a = jnp.maximum(net, 0.0).astype(mm_dtype)
    out_ref[0] = jnp.dot(fco_w[...], a, preferred_element_type=f32) + fco_b[...]


def _choose_tiling(batch, T, group, t_tile):
    """Pick a point-tile (multiple of 128*group) minimizing padding waste,
    with a lower bound of 128*group and >= 2 grid steps for v7x megacore."""
    unit = group * 128
    t_pad_min = _round_up(T, unit)
    max_tile = _round_up(min(max(t_tile, unit), t_pad_min), unit)
    best_pad, best_tile = None, unit
    tile = unit
    while tile <= max_tile:
        pad = _round_up(T, tile) - T
        if best_pad is None or pad < best_pad or (pad == best_pad and tile > best_tile):
            best_pad, best_tile = pad, tile
        tile += unit
    tile = best_tile
    t_pad = _round_up(T, tile)
    # v7x has 2 TensorCores: make sure the ("parallel","parallel") grid has at
    # least 2 steps so both cores get work (only matters for batch == 1).
    while batch * (t_pad // tile) < 2 and tile > unit:
        tile -= unit
        t_pad = _round_up(T, tile)
    return tile, t_pad


def decoder_forward(p, z, c, params, *, t_tile=2048, group=8,
                    matmul_dtype=jnp.bfloat16):
    """p: (B, T, DIM), z: (B, Z_DIM), c: (B, C_DIM) -> (B, T).

    group: block-diagonal packing factor (8 fills the 256-wide MXU on
           v6e/v7x; use 4 on v5e's 128-wide MXU).
    matmul_dtype: MXU operand dtype; accumulation is always f32.
    """
    B, T, _ = p.shape
    (fc_p_w, fc_p_b, fc_z_w, fc_z_b, fc_c_w, fc_c_b,
     blk0_w, blk0_b, blk1_w, blk1_b, fc_out_w, fc_out_b) = params
    G = group
    GH = G * HIDDEN

    tile, t_pad = _choose_tiling(B, T, G, t_tile)
    tc = tile // G            # lane-columns per grid step (multiple of 128)
    t_pack = t_pad // G       # packed point-column extent per batch element

    # --- Hoisted per-batch conditioning, folded into bias columns (exact) ----
    # cond[b, n] = fc_z[n](z[b]) + fc_c[n](c[b]); cond[b,0] goes into fc_p's
    # bias, cond[b, n] (n>=1) into blk1 bias of block n-1, last block plain.
    cond = (jnp.einsum('bz,nzh->bnh', z, fc_z_w) + fc_z_b[None]
            + jnp.einsum('bc,nch->bnh', c, fc_c_w) + fc_c_b[None])   # (B, N, H)
    bias0 = fc_p_b[None, :] + cond[:, 0]                             # (B, H)
    cond_rest = jnp.pad(cond[:, 1:], ((0, 0), (0, 1), (0, 0)))       # (B, N, H)
    bias_blk1 = blk1_b[None] + cond_rest                             # (B, N, H)
    bias_all = jnp.concatenate([bias0[:, None], bias_blk1], axis=1)  # (B, N+1, H)
    bias_all = jnp.tile(bias_all, (1, 1, G))[..., None].astype(jnp.float32)
    # -> (B, N_BLOCKS+1, G*HIDDEN, 1)

    # --- Packed, feature-major, lane-dense point layout (single fused chain) -
    # Point i -> (group i // t_pack, lane-column i % t_pack).
    p_packed = (jnp.pad(p, ((0, 0), (0, t_pad - T), (0, DIM_PAD - DIM)))
                .reshape(B, G, t_pack, DIM_PAD)
                .transpose(0, 1, 3, 2)
                .reshape(B, G * DIM_PAD, t_pack)
                .astype(matmul_dtype))

    # --- Block-diagonal packed weights (mm dtype) + tiled static biases ------
    fc_p_w_pad = jnp.pad(fc_p_w, ((0, DIM_PAD - DIM), (0, 0)))       # (DIM_PAD, H)
    weights = (
        _block_diag(fc_p_w_pad.T, G).astype(matmul_dtype),                    # (GH, G*DIM_PAD)
        _block_diag(jnp.transpose(blk0_w, (0, 2, 1)), G).astype(matmul_dtype),# (N, GH, GH)
        jnp.tile(blk0_b, (1, G))[..., None].astype(jnp.float32),              # (N, GH, 1)
        _block_diag(jnp.transpose(blk1_w, (0, 2, 1)), G).astype(matmul_dtype),# (N, GH, GH)
        _block_diag(fc_out_w.T, G).astype(matmul_dtype),                      # (G*OUT, GH)
        jnp.tile(fc_out_b, G)[:, None].astype(jnp.float32),                   # (G*OUT, 1)
    )

    def const_spec(arr):
        nd = arr.ndim
        return pl.BlockSpec(arr.shape, lambda b, t, _nd=nd: (0,) * _nd)

    grid = (B, t_pack // tc)
    kernel = functools.partial(_decoder_kernel, mm_dtype=matmul_dtype)
    out_packed = pl.pallas_call(
        kernel,
        out_shape=jax.ShapeDtypeStruct((B, G * OUT_DIM, t_pack), jnp.float32),
        grid_spec=pltpu.PrefetchScalarGridSpec(
            num_scalar_prefetch=0,
            grid=grid,
            in_specs=[
                # packed points: (1, G*DIM_PAD, tc) slab, lane-dense on points
                pl.BlockSpec((1, G * DIM_PAD, tc), lambda b, t: (b, 0, t)),
                # per-batch folded bias columns (re-DMA'd only when b changes)
                pl.BlockSpec((1, N_BLOCKS + 1, GH, 1), lambda b, t: (b, 0, 0, 0)),
            ] + [const_spec(w) for w in weights],
            out_specs=pl.BlockSpec((1, G * OUT_DIM, tc), lambda b, t: (b, 0, t)),
        ),
        compiler_params=pltpu.CompilerParams(
            dimension_semantics=("parallel", "parallel")),
    )(p_packed, bias_all, *weights)

    # Un-pack (B, G, t_pack) -> (B, t_pad), crop padding; `.squeeze(-1)` of the
    # PyTorch module (out_dim == 1).
    return out_packed.reshape(B, t_pad)[:, :T]


def decoder_reference(p, z, c, params, *, matmul_dtype=jnp.float32):
    """Pure-JAX reference of the same forward pass (for verification)."""
    (fc_p_w, fc_p_b, fc_z_w, fc_z_b, fc_c_w, fc_c_b,
     blk0_w, blk0_b, blk1_w, blk1_b, fc_out_w, fc_out_b) = params

    def mm(a, w):
        return jnp.dot(a.astype(matmul_dtype), w.astype(matmul_dtype),
                       preferred_element_type=jnp.float32)

    net = mm(p, fc_p_w) + fc_p_b
    for n in range(N_BLOCKS):
        net = net + (z @ fc_z_w[n] + fc_z_b[n])[:, None, :]
        net = net + (c @ fc_c_w[n] + fc_c_b[n])[:, None, :]
        h = mm(jnp.maximum(net, 0.0), blk0_w[n]) + blk0_b[n]
        dx = mm(jnp.maximum(h, 0.0), blk1_w[n]) + blk1_b[n]
        net = net + dx
    out = mm(jnp.maximum(net, 0.0), fc_out_w) + fc_out_b
    return out[..., 0]


def init_params(key):
    """Deterministic synthetic weights (shapes follow the module's __init__)."""
    ks = jax.random.split(key, 12)
    s = 0.1
    fc_p_w = s * jax.random.normal(ks[0], (DIM, HIDDEN), jnp.float32)
    fc_p_b = s * jax.random.normal(ks[1], (HIDDEN,), jnp.float32)
    fc_z_w = s * jax.random.normal(ks[2], (N_BLOCKS, Z_DIM, HIDDEN), jnp.float32)
    fc_z_b = s * jax.random.normal(ks[3], (N_BLOCKS, HIDDEN), jnp.float32)
    fc_c_w = s * jax.random.normal(ks[4], (N_BLOCKS, C_DIM, HIDDEN), jnp.float32)
    fc_c_b = s * jax.random.normal(ks[5], (N_BLOCKS, HIDDEN), jnp.float32)
    blk0_w = s * jax.random.normal(ks[6], (N_BLOCKS, HIDDEN, HIDDEN), jnp.float32)
    blk0_b = s * jax.random.normal(ks[7], (N_BLOCKS, HIDDEN), jnp.float32)
    blk1_w = s * jax.random.normal(ks[8], (N_BLOCKS, HIDDEN, HIDDEN), jnp.float32)
    blk1_b = s * jax.random.normal(ks[9], (N_BLOCKS, HIDDEN), jnp.float32)
    fc_out_w = s * jax.random.normal(ks[10], (HIDDEN, OUT_DIM), jnp.float32)
    fc_out_b = s * jax.random.normal(ks[11], (OUT_DIM,), jnp.float32)
    return (fc_p_w, fc_p_b, fc_z_w, fc_z_b, fc_c_w, fc_c_b,
            blk0_w, blk0_b, blk1_w, blk1_b, fc_out_w, fc_out_b)


if __name__ == "__main__":
    key = jax.random.PRNGKey(0)
    k_p, k_z, k_c, k_w, k_p2 = jax.random.split(key, 5)
    params = init_params(k_w)

    # Small shapes consistent with the module (batch=2, seq=8 points, dim=3).
    B, T = 2, 8
    p = jax.random.normal(k_p, (B, T, DIM), jnp.float32)
    z = jax.random.normal(k_z, (B, Z_DIM), jnp.float32)
    c = jax.random.normal(k_c, (B, C_DIM), jnp.float32)

    out = jax.block_until_ready(decoder_forward(p, z, c, params))
    assert out.shape == (B, T)
    # bf16 matmul operands (f32 accumulation): compare against a matching
    # bf16-operand reference tightly, and the pure-f32 reference loosely.
    ref_bf = decoder_reference(p, z, c, params, matmul_dtype=jnp.bfloat16)
    ref_f32 = decoder_reference(p, z, c, params)
    assert jnp.allclose(out, ref_bf, atol=1e-2, rtol=1e-2)
    assert jnp.allclose(out, ref_f32, atol=5e-2, rtol=5e-2)

    # Larger, non-multiple point count: exercises padding + multi-tile grid.
    T2 = 3000
    p2 = jax.random.normal(k_p2, (B, T2, DIM), jnp.float32)
    out2 = jax.block_until_ready(decoder_forward(p2, z, c, params))
    ref2_bf = decoder_reference(p2, z, c, params, matmul_dtype=jnp.bfloat16)
    ref2_f32 = decoder_reference(p2, z, c, params)
    assert out2.shape == (B, T2)
    assert jnp.allclose(out2, ref2_bf, atol=1e-2, rtol=1e-2)
    assert jnp.allclose(out2, ref2_f32, atol=5e-2, rtol=5e-2)

    print("KERNEL_OK")
</pallas_src>

<mosaic_0001>
module attributes {stable_mosaic.version = 11 : i64} {
  func.func @_decoder_kernel(%arg0: i32, %arg1: i32, %arg2: memref<1x32x128xbf16, #tpu.memory_space<vmem>>, %arg3: memref<1x6x256x1xf32, #tpu.memory_space<vmem>>, %arg4: memref<256x32xbf16, #tpu.memory_space<vmem>>, %arg5: memref<5x256x256xbf16, #tpu.memory_space<vmem>>, %arg6: memref<5x256x1xf32, #tpu.memory_space<vmem>>, %arg7: memref<5x256x256xbf16, #tpu.memory_space<vmem>>, %arg8: memref<8x256xbf16, #tpu.memory_space<vmem>>, %arg9: memref<8x1xf32, #tpu.memory_space<vmem>>, %arg10: memref<1x8x128xf32, #tpu.memory_space<vmem>>) attributes {dimension_semantics = [#tpu.dimension_semantics<parallel>, #tpu.dimension_semantics<parallel>], iteration_bounds = array<i64: 2, 1>, scalar_prefetch = 0 : i64, scratch_operands = 0 : i64, tpu.core_type = #tpu.core_type<tc>, window_params = [{transform_indices = @transform_0, window_bounds = array<i64: 1, 32, 128>}, {transform_indices = @transform_1, window_bounds = array<i64: 1, 6, 256, 1>}, {pipeline_mode = #tpu.pipeline_mode<synchronous>, transform_indices = @transform_2, window_bounds = array<i64: 256, 32>}, {pipeline_mode = #tpu.pipeline_mode<synchronous>, transform_indices = @transform_3, window_bounds = array<i64: 5, 256, 256>}, {pipeline_mode = #tpu.pipeline_mode<synchronous>, transform_indices = @transform_4, window_bounds = array<i64: 5, 256, 1>}, {pipeline_mode = #tpu.pipeline_mode<synchronous>, transform_indices = @transform_5, window_bounds = array<i64: 5, 256, 256>}, {pipeline_mode = #tpu.pipeline_mode<synchronous>, transform_indices = @transform_6, window_bounds = array<i64: 8, 256>}, {pipeline_mode = #tpu.pipeline_mode<synchronous>, transform_indices = @transform_7, window_bounds = array<i64: 8, 1>}, {transform_indices = @transform_8, window_bounds = array<i64: 1, 8, 128>}]} {
    %c0 = arith.constant 0 : index
    %c0_0 = arith.constant 0 : index
    %c0_1 = arith.constant 0 : index
    %0 = vector.load %arg2[%c0, %c0_0, %c0_1] : memref<1x32x128xbf16, #tpu.memory_space<vmem>>, vector<1x32x128xbf16>
    %1 = vector.shape_cast %0 : vector<1x32x128xbf16> to vector<32x128xbf16>
    %c0_2 = arith.constant 0 : index
    %c0_3 = arith.constant 0 : index
    %2 = vector.load %arg4[%c0_2, %c0_3] : memref<256x32xbf16, #tpu.memory_space<vmem>>, vector<256x32xbf16>
    %cst = arith.constant dense<0.000000e+00> : vector<256x128xf32>
    %3 = tpu.matmul %2, %1, %cst {dimension_numbers = #tpu.dot_dimension_numbers<[1], [0], [0], [1], [0, 0, 1, 1], [], []>} : vector<256x32xbf16>, vector<32x128xbf16>, vector<256x128xf32> -> vector<256x128xf32>
    %c0_4 = arith.constant 0 : index
    %c0_5 = arith.constant 0 : index
    %c0_6 = arith.constant 0 : index
    %c0_7 = arith.constant 0 : index
    %4 = vector.load %arg3[%c0_4, %c0_5, %c0_6, %c0_7] : memref<1x6x256x1xf32, #tpu.memory_space<vmem>>, vector<1x1x256x1xf32>
    %5 = vector.shape_cast %4 : vector<1x1x256x1xf32> to vector<256x1xf32>
    %6 = vector.broadcast %5 : vector<256x1xf32> to vector<256x128xf32>
    %7 = arith.addf %3, %6 : vector<256x128xf32>
    %cst_8 = arith.constant 0.000000e+00 : f32
    %8 = vector.broadcast %cst_8 : f32 to vector<256x128xf32>
    %9 = arith.maximumf %7, %8 : vector<256x128xf32>
    %10 = arith.truncf %9 : vector<256x128xf32> to vector<256x128xbf16>
    %c0_9 = arith.constant 0 : index
    %c0_10 = arith.constant 0 : index
    %c0_11 = arith.constant 0 : index
    %11 = vector.load %arg5[%c0_9, %c0_10, %c0_11] : memref<5x256x256xbf16, #tpu.memory_space<vmem>>, vector<1x256x256xbf16>
    %12 = vector.shape_cast %11 : vector<1x256x256xbf16> to vector<256x256xbf16>
    %cst_12 = arith.constant dense<0.000000e+00> : vector<256x128xf32>
    %13 = tpu.matmul %12, %10, %cst_12 {dimension_numbers = #tpu.dot_dimension_numbers<[1], [0], [0], [1], [0, 0, 1, 1], [], []>} : vector<256x256xbf16>, vector<256x128xbf16>, vector<256x128xf32> -> vector<256x128xf32>
    %c0_13 = arith.constant 0 : index
    %c0_14 = arith.constant 0 : index
    %c0_15 = arith.constant 0 : index
    %14 = vector.load %arg6[%c0_13, %c0_14, %c0_15] : memref<5x256x1xf32, #tpu.memory_space<vmem>>, vector<1x256x1xf32>
    %15 = vector.shape_cast %14 : vector<1x256x1xf32> to vector<256x1xf32>
    %16 = vector.broadcast %15 : vector<256x1xf32> to vector<256x128xf32>
    %17 = arith.addf %13, %16 : vector<256x128xf32>
    %cst_16 = arith.constant 0.000000e+00 : f32
    %18 = vector.broadcast %cst_16 : f32 to vector<256x128xf32>
    %19 = arith.maximumf %17, %18 : vector<256x128xf32>
    %20 = arith.truncf %19 : vector<256x128xf32> to vector<256x128xbf16>
    %c0_17 = arith.constant 0 : index
    %c0_18 = arith.constant 0 : index
    %c0_19 = arith.constant 0 : index
    %21 = vector.load %arg7[%c0_17, %c0_18, %c0_19] : memref<5x256x256xbf16, #tpu.memory_space<vmem>>, vector<1x256x256xbf16>
    %22 = vector.shape_cast %21 : vector<1x256x256xbf16> to vector<256x256xbf16>
    %cst_20 = arith.constant dense<0.000000e+00> : vector<256x128xf32>
    %23 = tpu.matmul %22, %20, %cst_20 {dimension_numbers = #tpu.dot_dimension_numbers<[1], [0], [0], [1], [0, 0, 1, 1], [], []>} : vector<256x256xbf16>, vector<256x128xbf16>, vector<256x128xf32> -> vector<256x128xf32>
    %c0_21 = arith.constant 0 : index
    %c1 = arith.constant 1 : index
    %c0_22 = arith.constant 0 : index
    %c0_23 = arith.constant 0 : index
    %24 = vector.load %arg3[%c0_21, %c1, %c0_22, %c0_23] : memref<1x6x256x1xf32, #tpu.memory_space<vmem>>, vector<1x1x256x1xf32>
    %25 = vector.shape_cast %24 : vector<1x1x256x1xf32> to vector<256x1xf32>
    %26 = vector.broadcast %25 : vector<256x1xf32> to vector<256x128xf32>
    %27 = arith.addf %23, %26 : vector<256x128xf32>
    %28 = arith.addf %7, %27 : vector<256x128xf32>
    %cst_24 = arith.constant 0.000000e+00 : f32
    %29 = vector.broadcast %cst_24 : f32 to vector<256x128xf32>
    %30 = arith.maximumf %28, %29 : vector<256x128xf32>
    %31 = arith.truncf %30 : vector<256x128xf32> to vector<256x128xbf16>
    %c1_25 = arith.constant 1 : index
    %c0_26 = arith.constant 0 : index
    %c0_27 = arith.constant 0 : index
    %32 = vector.load %arg5[%c1_25, %c0_26, %c0_27] : memref<5x256x256xbf16, #tpu.memory_space<vmem>>, vector<1x256x256xbf16>
    %33 = vector.shape_cast %32 : vector<1x256x256xbf16> to vector<256x256xbf16>
    %cst_28 = arith.constant dense<0.000000e+00> : vector<256x128xf32>
    %34 = tpu.matmul %33, %31, %cst_28 {dimension_numbers = #tpu.dot_dimension_numbers<[1], [0], [0], [1], [0, 0, 1, 1], [], []>} : vector<256x256xbf16>, vector<256x128xbf16>, vector<256x128xf32> -> vector<256x128xf32>
    %c1_29 = arith.constant 1 : index
    %c0_30 = arith.constant 0 : index
    %c0_31 = arith.constant 0 : index
    %35 = vector.load %arg6[%c1_29, %c0_30, %c0_31] : memref<5x256x1xf32, #tpu.memory_space<vmem>>, vector<1x256x1xf32>
    %36 = vector.shape_cast %35 : vector<1x256x1xf32> to vector<256x1xf32>
    %37 = vector.broadcast %36 : vector<256x1xf32> to vector<256x128xf32>
    %38 = arith.addf %34, %37 : vector<256x128xf32>
    %cst_32 = arith.constant 0.000000e+00 : f32
    %39 = vector.broadcast %cst_32 : f32 to vector<256x128xf32>
    %40 = arith.maximumf %38, %39 : vector<256x128xf32>
    %41 = arith.truncf %40 : vector<256x128xf32> to vector<256x128xbf16>
    %c1_33 = arith.constant 1 : index
    %c0_34 = arith.constant 0 : index
    %c0_35 = arith.constant 0 : index
    %42 = vector.load %arg7[%c1_33, %c0_34, %c0_35] : memref<5x256x256xbf16, #tpu.memory_space<vmem>>, vector<1x256x256xbf16>
    %43 = vector.shape_cast %42 : vector<1x256x256xbf16> to vector<256x256xbf16>
    %cst_36 = arith.constant dense<0.000000e+00> : vector<256x128xf32>
    %44 = tpu.matmul %43, %41, %cst_36 {dimension_numbers = #tpu.dot_dimension_numbers<[1], [0], [0], [1], [0, 0, 1, 1], [], []>} : vector<256x256xbf16>, vector<256x128xbf16>, vector<256x128xf32> -> vector<256x128xf32>
    %c0_37 = arith.constant 0 : index
    %c2 = arith.constant 2 : index
    %c0_38 = arith.constant 0 : index
    %c0_39 = arith.constant 0 : index
    %45 = vector.load %arg3[%c0_37, %c2, %c0_38, %c0_39] : memref<1x6x256x1xf32, #tpu.memory_space<vmem>>, vector<1x1x256x1xf32>
    %46 = vector.shape_cast %45 : vector<1x1x256x1xf32> to vector<256x1xf32>
    %47 = vector.broadcast %46 : vector<256x1xf32> to vector<256x128xf32>
    %48 = arith.addf %44, %47 : vector<256x128xf32>
    %49 = arith.addf %28, %48 : vector<256x128xf32>
    %cst_40 = arith.constant 0.000000e+00 : f32
    %50 = vector.broadcast %cst_40 : f32 to vector<256x128xf32>
    %51 = arith.maximumf %49, %50 : vector<256x128xf32>
    %52 = arith.truncf %51 : vector<256x128xf32> to vector<256x128xbf16>
    %c2_41 = arith.constant 2 : index
    %c0_42 = arith.constant 0 : index
    %c0_43 = arith.constant 0 : index
    %53 = vector.load %arg5[%c2_41, %c0_42, %c0_43] : memref<5x256x256xbf16, #tpu.memory_space<vmem>>, vector<1x256x256xbf16>
    %54 = vector.shape_cast %53 : vector<1x256x256xbf16> to vector<256x256xbf16>
    %cst_44 = arith.constant dense<0.000000e+00> : vector<256x128xf32>
    %55 = tpu.matmul %54, %52, %cst_44 {dimension_numbers = #tpu.dot_dimension_numbers<[1], [0], [0], [1], [0, 0, 1, 1], [], []>} : vector<256x256xbf16>, vector<256x128xbf16>, vector<256x128xf32> -> vector<256x128xf32>
    %c2_45 = arith.constant 2 : index
    %c0_46 = arith.constant 0 : index
    %c0_47 = arith.constant 0 : index
    %56 = vector.load %arg6[%c2_45, %c0_46, %c0_47] : memref<5x256x1xf32, #tpu.memory_space<vmem>>, vector<1x256x1xf32>
    %57 = vector.shape_cast %56 : vector<1x256x1xf32> to vector<256x1xf32>
    %58 = vector.broadcast %57 : vector<256x1xf32> to vector<256x128xf32>
    %59 = arith.addf %55, %58 : vector<256x128xf32>
    %cst_48 = arith.constant 0.000000e+00 : f32
    %60 = vector.broadcast %cst_48 : f32 to vector<256x128xf32>
    %61 = arith.maximumf %59, %60 : vector<256x128xf32>
    %62 = arith.truncf %61 : vector<256x128xf32> to vector<256x128xbf16>
    %c2_49 = arith.constant 2 : index
    %c0_50 = arith.constant 0 : index
    %c0_51 = arith.constant 0 : index
    %63 = vector.load %arg7[%c2_49, %c0_50, %c0_51] : memref<5x256x256xbf16, #tpu.memory_space<vmem>>, vector<1x256x256xbf16>
    %64 = vector.shape_cast %63 : vector<1x256x256xbf16> to vector<256x256xbf16>
    %cst_52 = arith.constant dense<0.000000e+00> : vector<256x128xf32>
    %65 = tpu.matmul %64, %62, %cst_52 {dimension_numbers = #tpu.dot_dimension_numbers<[1], [0], [0], [1], [0, 0, 1, 1], [], []>} : vector<256x256xbf16>, vector<256x128xbf16>, vector<256x128xf32> -> vector<256x128xf32>
    %c0_53 = arith.constant 0 : index
    %c3 = arith.constant 3 : index
    %c0_54 = arith.constant 0 : index
    %c0_55 = arith.constant 0 : index
    %66 = vector.load %arg3[%c0_53, %c3, %c0_54, %c0_55] : memref<1x6x256x1xf32, #tpu.memory_space<vmem>>, vector<1x1x256x1xf32>
    %67 = vector.shape_cast %66 : vector<1x1x256x1xf32> to vector<256x1xf32>
    %68 = vector.broadcast %67 : vector<256x1xf32> to vector<256x128xf32>
    %69 = arith.addf %65, %68 : vector<256x128xf32>
    %70 = arith.addf %49, %69 : vector<256x128xf32>
    %cst_56 = arith.constant 0.000000e+00 : f32
    %71 = vector.broadcast %cst_56 : f32 to vector<256x128xf32>
    %72 = arith.maximumf %70, %71 : vector<256x128xf32>
    %73 = arith.truncf %72 : vector<256x128xf32> to vector<256x128xbf16>
    %c3_57 = arith.constant 3 : index
    %c0_58 = arith.constant 0 : index
    %c0_59 = arith.constant 0 : index
    %74 = vector.load %arg5[%c3_57, %c0_58, %c0_59] : memref<5x256x256xbf16, #tpu.memory_space<vmem>>, vector<1x256x256xbf16>
    %75 = vector.shape_cast %74 : vector<1x256x256xbf16> to vector<256x256xbf16>
    %cst_60 = arith.constant dense<0.000000e+00> : vector<256x128xf32>
    %76 = tpu.matmul %75, %73, %cst_60 {dimension_numbers = #tpu.dot_dimension_numbers<[1], [0], [0], [1], [0, 0, 1, 1], [], []>} : vector<256x256xbf16>, vector<256x128xbf16>, vector<256x128xf32> -> vector<256x128xf32>
    %c3_61 = arith.constant 3 : index
    %c0_62 = arith.constant 0 : index
    %c0_63 = arith.constant 0 : index
    %77 = vector.load %arg6[%c3_61, %c0_62, %c0_63] : memref<5x256x1xf32, #tpu.memory_space<vmem>>, vector<1x256x1xf32>
    %78 = vector.shape_cast %77 : vector<1x256x1xf32> to vector<256x1xf32>
    %79 = vector.broadcast %78 : vector<256x1xf32> to vector<256x128xf32>
    %80 = arith.addf %76, %79 : vector<256x128xf32>
    %cst_64 = arith.constant 0.000000e+00 : f32
    %81 = vector.broadcast %cst_64 : f32 to vector<256x128xf32>
    %82 = arith.maximumf %80, %81 : vector<256x128xf32>
    %83 = arith.truncf %82 : vector<256x128xf32> to vector<256x128xbf16>
    %c3_65 = arith.constant 3 : index
    %c0_66 = arith.constant 0 : index
    %c0_67 = arith.constant 0 : index
    %84 = vector.load %arg7[%c3_65, %c0_66, %c0_67] : memref<5x256x256xbf16, #tpu.memory_space<vmem>>, vector<1x256x256xbf16>
    %85 = vector.shape_cast %84 : vector<1x256x256xbf16> to vector<256x256xbf16>
    %cst_68 = arith.constant dense<0.000000e+00> : vector<256x128xf32>
    %86 = tpu.matmul %85, %83, %cst_68 {dimension_numbers = #tpu.dot_dimension_numbers<[1], [0], [0], [1], [0, 0, 1, 1], [], []>} : vector<256x256xbf16>, vector<256x128xbf16>, vector<256x128xf32> -> vector<256x128xf32>
    %c0_69 = arith.constant 0 : index
    %c4 = arith.constant 4 : index
    %c0_70 = arith.constant 0 : index
    %c0_71 = arith.constant 0 : index
    %87 = vector.load %arg3[%c0_69, %c4, %c0_70, %c0_71] : memref<1x6x256x1xf32, #tpu.memory_space<vmem>>, vector<1x1x256x1xf32>
    %88 = vector.shape_cast %87 : vector<1x1x256x1xf32> to vector<256x1xf32>
    %89 = vector.broadcast %88 : vector<256x1xf32> to vector<256x128xf32>
    %90 = arith.addf %86, %89 : vector<256x128xf32>
    %91 = arith.addf %70, %90 : vector<256x128xf32>
    %cst_72 = arith.constant 0.000000e+00 : f32
    %92 = vector.broadcast %cst_72 : f32 to vector<256x128xf32>
    %93 = arith.maximumf %91, %92 : vector<256x128xf32>
    %94 = arith.truncf %93 : vector<256x128xf32> to vector<256x128xbf16>
    %c4_73 = arith.constant 4 : index
    %c0_74 = arith.constant 0 : index
    %c0_75 = arith.constant 0 : index
    %95 = vector.load %arg5[%c4_73, %c0_74, %c0_75] : memref<5x256x256xbf16, #tpu.memory_space<vmem>>, vector<1x256x256xbf16>
    %96 = vector.shape_cast %95 : vector<1x256x256xbf16> to vector<256x256xbf16>
    %cst_76 = arith.constant dense<0.000000e+00> : vector<256x128xf32>
    %97 = tpu.matmul %96, %94, %cst_76 {dimension_numbers = #tpu.dot_dimension_numbers<[1], [0], [0], [1], [0, 0, 1, 1], [], []>} : vector<256x256xbf16>, vector<256x128xbf16>, vector<256x128xf32> -> vector<256x128xf32>
    %c4_77 = arith.constant 4 : index
    %c0_78 = arith.constant 0 : index
    %c0_79 = arith.constant 0 : index
    %98 = vector.load %arg6[%c4_77, %c0_78, %c0_79] : memref<5x256x1xf32, #tpu.memory_space<vmem>>, vector<1x256x1xf32>
    %99 = vector.shape_cast %98 : vector<1x256x1xf32> to vector<256x1xf32>
    %100 = vector.broadcast %99 : vector<256x1xf32> to vector<256x128xf32>
    %101 = arith.addf %97, %100 : vector<256x128xf32>
    %cst_80 = arith.constant 0.000000e+00 : f32
    %102 = vector.broadcast %cst_80 : f32 to vector<256x128xf32>
    %103 = arith.maximumf %101, %102 : vector<256x128xf32>
    %104 = arith.truncf %103 : vector<256x128xf32> to vector<256x128xbf16>
    %c4_81 = arith.constant 4 : index
    %c0_82 = arith.constant 0 : index
    %c0_83 = arith.constant 0 : index
    %105 = vector.load %arg7[%c4_81, %c0_82, %c0_83] : memref<5x256x256xbf16, #tpu.memory_space<vmem>>, vector<1x256x256xbf16>
    %106 = vector.shape_cast %105 : vector<1x256x256xbf16> to vector<256x256xbf16>
    %cst_84 = arith.constant dense<0.000000e+00> : vector<256x128xf32>
    %107 = tpu.matmul %106, %104, %cst_84 {dimension_numbers = #tpu.dot_dimension_numbers<[1], [0], [0], [1], [0, 0, 1, 1], [], []>} : vector<256x256xbf16>, vector<256x128xbf16>, vector<256x128xf32> -> vector<256x128xf32>
    %c0_85 = arith.constant 0 : index
    %c5 = arith.constant 5 : index
    %c0_86 = arith.constant 0 : index
    %c0_87 = arith.constant 0 : index
    %108 = vector.load %arg3[%c0_85, %c5, %c0_86, %c0_87] : memref<1x6x256x1xf32, #tpu.memory_space<vmem>>, vector<1x1x256x1xf32>
    %109 = vector.shape_cast %108 : vector<1x1x256x1xf32> to vector<256x1xf32>
    %110 = vector.broadcast %109 : vector<256x1xf32> to vector<256x128xf32>
    %111 = arith.addf %107, %110 : vector<256x128xf32>
    %112 = arith.addf %91, %111 : vector<256x128xf32>
    %cst_88 = arith.constant 0.000000e+00 : f32
    %113 = vector.broadcast %cst_88 : f32 to vector<256x128xf32>
    %114 = arith.maximumf %112, %113 : vector<256x128xf32>
    %115 = arith.truncf %114 : vector<256x128xf32> to vector<256x128xbf16>
    %c0_89 = arith.constant 0 : index
    %c0_90 = arith.constant 0 : index
    %116 = vector.load %arg8[%c0_89, %c0_90] : memref<8x256xbf16, #tpu.memory_space<vmem>>, vector<8x256xbf16>
    %cst_91 = arith.constant dense<0.000000e+00> : vector<8x128xf32>
    %117 = tpu.matmul %116, %115, %cst_91 {dimension_numbers = #tpu.dot_dimension_numbers<[1], [0], [0], [1], [0, 0, 1, 1], [], []>} : vector<8x256xbf16>, vector<256x128xbf16>, vector<8x128xf32> -> vector<8x128xf32>
    %c0_92 = arith.constant 0 : index
    %c0_93 = arith.constant 0 : index
    %118 = vector.load %arg9[%c0_92, %c0_93] : memref<8x1xf32, #tpu.memory_space<vmem>>, vector<8x1xf32>
    %119 = vector.broadcast %118 : vector<8x1xf32> to vector<8x128xf32>
    %120 = arith.addf %117, %119 : vector<8x128xf32>
    %c0_94 = arith.constant 0 : index
    %c0_95 = arith.constant 0 : index
    %c0_96 = arith.constant 0 : index
    %121 = vector.load %arg10[%c0_94, %c0_95, %c0_96] : memref<1x8x128xf32, #tpu.memory_space<vmem>>, vector<1x8x128xf32>
    %122 = vector.shape_cast %121 : vector<1x8x128xf32> to vector<8x128xf32>
    %123 = vector.shape_cast %120 : vector<8x128xf32> to vector<1x8x128xf32>
    tpu.vector_store %arg10[%c0_94, %c0_95, %c0_96], %123 {strides = array<i32>} : memref<1x8x128xf32, #tpu.memory_space<vmem>>, vector<1x8x128xf32>,
    return
  }
  func.func @transform_0(%arg0: i32, %arg1: i32) -> (i32, i32, i32) {
    %c0_i32 = arith.constant 0 : i32
    %c0_i32_0 = arith.constant 0 : i32
    return %arg0, %c0_i32, %arg1 : i32, i32, i32
  }
  func.func @transform_1(%arg0: i32, %arg1: i32) -> (i32, i32, i32, i32) {
    %c0_i32 = arith.constant 0 : i32
    %c0_i32_0 = arith.constant 0 : i32
    %c0_i32_1 = arith.constant 0 : i32
    %c0_i32_2 = arith.constant 0 : i32
    return %arg0, %c0_i32, %c0_i32_0, %c0_i32_1 : i32, i32, i32, i32
  }
  func.func @transform_2(%arg0: i32, %arg1: i32) -> (i32, i32) {
    %c0_i32 = arith.constant 0 : i32
    %c0_i32_0 = arith.constant 0 : i32
    %c0_i32_1 = arith.constant 0 : i32
    return %c0_i32, %c0_i32_0 : i32, i32
  }
  func.func @transform_3(%arg0: i32, %arg1: i32) -> (i32, i32, i32) {
    %c0_i32 = arith.constant 0 : i32
    %c0_i32_0 = arith.constant 0 : i32
    %c0_i32_1 = arith.constant 0 : i32
    %c0_i32_2 = arith.constant 0 : i32
    return %c0_i32, %c0_i32_0, %c0_i32_1 : i32, i32, i32
  }
  func.func @transform_4(%arg0: i32, %arg1: i32) -> (i32, i32, i32) {
    %c0_i32 = arith.constant 0 : i32
    %c0_i32_0 = arith.constant 0 : i32
    %c0_i32_1 = arith.constant 0 : i32
    %c0_i32_2 = arith.constant 0 : i32
    return %c0_i32, %c0_i32_0, %c0_i32_1 : i32, i32, i32
  }
  func.func @transform_5(%arg0: i32, %arg1: i32) -> (i32, i32, i32) {
    %c0_i32 = arith.constant 0 : i32
    %c0_i32_0 = arith.constant 0 : i32
    %c0_i32_1 = arith.constant 0 : i32
    %c0_i32_2 = arith.constant 0 : i32
    return %c0_i32, %c0_i32_0, %c0_i32_1 : i32, i32, i32
  }
  func.func @transform_6(%arg0: i32, %arg1: i32) -> (i32, i32) {
    %c0_i32 = arith.constant 0 : i32
    %c0_i32_0 = arith.constant 0 : i32
    %c0_i32_1 = arith.constant 0 : i32
    return %c0_i32, %c0_i32_0 : i32, i32
  }
  func.func @transform_7(%arg0: i32, %arg1: i32) -> (i32, i32) {
    %c0_i32 = arith.constant 0 : i32
    %c0_i32_0 = arith.constant 0 : i32
    %c0_i32_1 = arith.constant 0 : i32
    return %c0_i32, %c0_i32_0 : i32, i32
  }
  func.func @transform_8(%arg0: i32, %arg1: i32) -> (i32, i32, i32) {
    %c0_i32 = arith.constant 0 : i32
    %c0_i32_0 = arith.constant 0 : i32
    return %arg0, %c0_i32, %arg1 : i32, i32, i32
  }
}

</mosaic_0001>

<bundles_post_ra>
// kernel: tpu_custom_call.1
= control target key start
LH: loop header
LB: loop body
LE: loop exit
PB: predicated region body
PF: predicated region fallthrough
CT: control target
= control target key end

     0   :  { %s14770_s0 = inlined_call_operand.vmem [shape: bf16[2,32,128], index: 0, kind: input, shape index: {}]   ;;  %s14771_s1 = inlined_call_operand.vmem [shape: f32[2,6,256,1], index: 1, kind: input, shape index: {}]   ;;  %s14772_s2 = inlined_call_operand.vmem [shape: bf16[256,32], index: 2, kind: input, shape index: {}]   ;;  %s14773_s3 = inlined_call_operand.vmem [shape: bf16[5,256,256], index: 3, kind: input, shape index: {}]   ;;  %s14774_s4 = inlined_call_operand.vmem [shape: f32[5,256,1], index: 4, kind: input, shape index: {}]   ;;  %s14775_s5 = inlined_call_operand.vmem [shape: bf16[5,256,256], index: 5, kind: input, shape index: {}]   ;;  %s14776_s6 = inlined_call_operand.vmem [shape: bf16[8,256], index: 6, kind: input, shape index: {}]   ;;  %s14777_s7 = inlined_call_operand.vmem [shape: f32[8,1], index: 7, kind: input, shape index: {}]   ;;  %s14778_s8 = inlined_call_operand.hbm [shape: f32[2,8,128], index: 8, kind: output, shape index: {}]  }
   0x1   :  { %14889 = sst [smem:[#allocation142_spill]] %s14770_s0 }
   0x2   :  { %13 = vsyncpa [#allocation3], 0 }
   0x3   :  { %15 = vsyncpa [#allocation3 + $0x1], 0  ;;  %s9733_s27 = smov 0   ;;  %s9735_s28 = smov 0  }
   0x4   :  { %s9737_s29 = smov 0   ;;  %s9739_s30 = smov 0  }
   0x5   :  { %s9741_s9 = smov 0   ;;  %s9743_s10 = smov 0  }
   0x6 LB: > { %s7277_s11 = sadd.s32 4294967295, %s9685_s10   ;;  %s7278_s12 = sadd.s32 4294967294, %s9685_s10   ;;  %s9685_s10 = sphi %s9743_s10, %s21_s10   ;;  %s9681_s9 = sphi %s9741_s9, %s15359_s9   ;;  %s9677_s30 = sphi %s9739_s30, %s15358_s30   ;;  %s9673_s29 = sphi %s9737_s29, %s15357_s29   ;;  %s9669_s28 = sphi %s9735_s28, %s15356_s28   ;;  %s9665_s27 = sphi %s9733_s27, %s15355_s27  }
   0x7   : > { %s33_s13 = sadd.s32 1, %s9681_s9  ;;  %s222_s14 = sadd.s32 1, %s9673_s29 }
   0x8   : > { %p35_p0 = scmp.ge.s32.totalorder %s33_s13, 2  ;;  %p232_p1 = scmp.ne.s32.totalorder %s9673_s29, %s9669_s28 }
   0x9   : > { %p233_p2 = scmp.eq.s32.totalorder %s7277_s11, 1  ;;  %p238_p3 = scmp.ne.s32.totalorder %s9669_s28, %s9665_s27 }
   0xa   : > { %s15361_s13 = smov (%p35_p0, %s33_s13), 0  ;;  %p239_p5 = scmp.eq.s32.totalorder %s7278_s12, 1 }
   0xb   : > { %p9773_p4 = por %p233_p2, %p232_p1  ;;  %s217_s16 = ssub.s32 %s9681_s9, %s15361_s13 }
   0xc   : > { %p7281_p6 = scmp.ge.s32.totalorder %s9685_s10, 1  ;;  %p220_p7 = scmp.eq.s32.totalorder %s217_s16, 0 }
   0xd   : > { %p9780_p8 = por %p239_p5, %p238_p3  ;;  %p294_p9 = scmp.lt.s32.totalorder %s9685_s10, 3 }
   0xe   : > { %s9786_s18 = scalar_select %p220_p7, %s9673_s29, %s222_s14  }
   0xf   : > { %p295_p10 = pnand %p7281_p6, %p294_p9 }
  0x11   : > { %298 = sbr.rel (%p295_p10) target bundleno = 4571 (0x11db), region = 52 }
  0x16   : > { %p336_p11 = scmp.lt.s32.totalorder %s9677_s30, 1  ;;  %v9687_v0 = vmov 0   ;;  %s14892_s0 = sld [smem:[#allocation142_spill]]  ;;  %v9205_v8 = vld [vmem:[%s14772_s2] sm:$0xff]  ;;  %vm670_vm0 = vcmask 261120   ;;  %v9212_v10 = vld [vmem:[%s14772_s2 + $0x38] sm:$0xff] }
  0x17   : > { %9606 = vset.pattern.permute.xlu2 %v9687_v0  ;;  %9605 = vset.pattern.permute.xlu1 %v9687_v0  ;;  %v9216_v11 = vld [vmem:[%s14772_s2 + $0x58] sm:$0xff]  ;;  %v9210_v12 = vld [vmem:[%s14772_s2 + $0x28] sm:$0xff]  ;;  %v9213_v20 = vld [vmem:[%s14772_s2 + $0x40] sm:$0xff]  ;;  %s333_s22 = sand.u32 1, %s9669_s28  }
  0x18   : > { %9604 = vset.pattern.permute.xlu0 %v9687_v0  ;;  %s337_s19 = scalar_select %p336_p11, %s9677_s30, 1  ;;  %v9206_v18 = vld [vmem:[%s14772_s2 + $0x8] sm:$0xff]  ;;  %v9217_v21 = vld [vmem:[%s14772_s2 + $0x60] sm:$0xff]  ;;  %v9211_v22 = vld [vmem:[%s14772_s2 + $0x30] sm:$0xff] }
  0x19   : > { %v9207_v28 = vld [vmem:[%s14772_s2 + $0x10] sm:$0xff]  ;;  %v9214_v30 = vld [vmem:[%s14772_s2 + $0x48] sm:$0xff]  ;;  %v9208_v37 = vld [vmem:[%s14772_s2 + $0x18] sm:$0xff]  ;;  %s7282_s23 = sshll.u32 %s333_s22, 3 }
  0x1a   : > { %s9547_s20 = smul.u32 1536, %s337_s19  ;;  %s9202_s21 = sshll.u32 %s337_s19, 4  ;;  %v9218_v31 = vld [vmem:[%s14772_s2 + $0x68] sm:$0xff]  ;;  %v9215_v39 = vld [vmem:[%s14772_s2 + $0x50] sm:$0xff]  ;;  %v9209_v46 = vld [vmem:[%s14772_s2 + $0x20] sm:$0xff] }
  0x1b   : > { %v9219_v40 = vld [vmem:[%s14772_s2 + $0x70] sm:$0xff]  ;;  %v9220_v48 = vld [vmem:[%s14772_s2 + $0x78] sm:$0xff]  ;;  %v901_v52 = vld [vmem:[%s14774_s4 + $0x68] sm:$0xff]  ;;  %s335_s12 = scalar_lea.vmem [#allocation2], %s7282_s23  ;;  %s7175_s19 = scalar_lea.sflag [#allocation3], %s333_s22 }
  0x1c   : > { %s343_s24 = scalar_lea.vmem %s14892_s0, %s9202_s21  ;;  %s9796_s11 = scalar_lea.vmem %s14771_s1, %s9547_s20  ;;  %v902_v49 = vld [vmem:[%s14774_s4 + $0x70] sm:$0xff]  ;;  %v903_v53 = vld [vmem:[%s14774_s4 + $0x78] sm:$0xff]  ;;  %v900_v54 = vld [vmem:[%s14774_s4 + $0x60] sm:$0xff] }
  0x1d   : > { %v9204_v1 = vld [vmem:[%s343_s24 + $0x8] sm:$0xff]  ;;  %v416_v2 = vld [vmem:[%s9796_s11 + $0xf0] sm:$0xff]  ;;  %v414_v3 = vld [vmem:[%s9796_s11 + $0xe0] sm:$0xff]  ;;  %s7188_s14 = sshll.u32 %s335_s12, 4  ;;  %s7189_s14 = int_to_ptr.vmem [resolvable:$true] %s7188_s14 }
  0x1e   : > { %v400_v4 = vld [vmem:[%s9796_s11 + $0x70] sm:$0xff]  ;;  %570 = vperm.xlu0 %9604, %v416_v2   ;;  %560 = vperm.xlu2 %9606, %v414_v3   ;;  %v9203_v5 = vld [vmem:[%s343_s24] sm:$0xff]  ;;  %v417_v6 = vld [vmem:[%s9796_s11 + $0xf8] sm:$0xff] }
  0x1f   : > { %490 = vperm.xlu1 %9605, %v400_v4   ;;  %725 = vmatpush.bf16.msra.mxu0 %v9204_v1  ;;  %v415_v7 = vld [vmem:[%s9796_s11 + $0xe8] sm:$0xff]  ;;  %v401_v9 = vld [vmem:[%s9796_s11 + $0x78] sm:$0xff]  ;;  %v412_v13 = vld [vmem:[%s9796_s11 + $0xd0] sm:$0xff] }
  0x20   : > { %9542 = vmatpush.bf16.msra.mxu2 %v9204_v1  ;;  %9543 = vmatpush.bf16.msra.mxu3 %v9204_v1  ;;  %v398_v14 = vld [vmem:[%s9796_s11 + $0x60] sm:$0xff]  ;;  %v399_v15 = vld [vmem:[%s9796_s11 + $0x68] sm:$0xff]  ;;  %v413_v16 = vld [vmem:[%s9796_s11 + $0xd8] sm:$0xff] }
  0x21   : > { %9541 = vmatpush.bf16.msra.mxu1 %v9204_v1  ;;  %v397_v17 = vld [vmem:[%s9796_s11 + $0x58] sm:$0xff]  ;;  %v396_v19 = vld [vmem:[%s9796_s11 + $0x50] sm:$0xff]  ;;  %v410_v23 = vld [vmem:[%s9796_s11 + $0xc0] sm:$0xff] }
  0x22   : > { %v394_v24 = vld [vmem:[%s9796_s11 + $0x40] sm:$0xff]  ;;  %v411_v25 = vld [vmem:[%s9796_s11 + $0xc8] sm:$0xff]  ;;  %v409_v27 = vld [vmem:[%s9796_s11 + $0xb8] sm:$0xff] }
  0x23   : > { %726 = vmatpush.bf16.msra.mxu0 %v9203_v5  ;;  %v395_v26 = vld [vmem:[%s9796_s11 + $0x48] sm:$0xff]  ;;  %v408_v29 = vld [vmem:[%s9796_s11 + $0xb0] sm:$0xff]  ;;  %v406_v32 = vld [vmem:[%s9796_s11 + $0xa0] sm:$0xff] }
  0x24   : > { %9545 = vmatpush.bf16.msra.mxu2 %v9203_v5  ;;  %9546 = vmatpush.bf16.msra.mxu3 %v9203_v5  ;;  %v392_v33 = vld [vmem:[%s9796_s11 + $0x30] sm:$0xff]  ;;  %v393_v34 = vld [vmem:[%s9796_s11 + $0x38] sm:$0xff]  ;;  %v407_v35 = vld [vmem:[%s9796_s11 + $0xa8] sm:$0xff] }
  0x25   : > { %9544 = vmatpush.bf16.msra.mxu1 %v9203_v5  ;;  %v391_v36 = vld [vmem:[%s9796_s11 + $0x28] sm:$0xff]  ;;  %v390_v38 = vld [vmem:[%s9796_s11 + $0x20] sm:$0xff]  ;;  %v404_v41 = vld [vmem:[%s9796_s11 + $0x90] sm:$0xff] }
  0x26   : > { %575 = vperm.xlu0 %9604, %v417_v6   ;;  %565 = vperm.xlu2 %9606, %v415_v7   ;;  %v388_v42 = vld [vmem:[%s9796_s11 + $0x10] sm:$0xff]  ;;  %v405_v43 = vld [vmem:[%s9796_s11 + $0x98] sm:$0xff]  ;;  %v403_v45 = vld [vmem:[%s9796_s11 + $0x88] sm:$0xff] }
  0x27   : > { %495 = vperm.xlu1 %9605, %v401_v9   ;;  %7358 = vmatmul.msk.bf16.vlgmr.msra.gmra.mxu0 %vm670_vm0, %v9205_v8  ;;  %v389_v44 = vld [vmem:[%s9796_s11 + $0x18] sm:$0xff]  ;;  %v402_v47 = vld [vmem:[%s9796_s11 + $0x80] sm:$0xff]  ;;  %v387_v51 = vld [vmem:[%s9796_s11 + $0x8] sm:$0xff] }
  0x28   : > { %7365 = vmatmul.msk.bf16.vlgmr.msra.gmra.mxu2 %vm670_vm0, %v9212_v10  ;;  %7369 = vmatmul.msk.bf16.vlgmr.msra.gmra.mxu3 %vm670_vm0, %v9216_v11  ;;  %v386_v50 = vld [vmem:[%s9796_s11] sm:$0xff]  ;;  %v918_v55 = vld [vmem:[%s14774_s4 + $0xf0] sm:$0xff]  ;;  %v899_v57 = vld [vmem:[%s14774_s4 + $0x58] sm:$0xff] }
  0x29   : > { %7363 = vmatmul.msk.bf16.vlgmr.msra.gmra.mxu1 %vm670_vm0, %v9210_v12  ;;  %v898_v56 = vld [vmem:[%s14774_s4 + $0x50] sm:$0xff]  ;;  %v897_v58 = vld [vmem:[%s14774_s4 + $0x48] sm:$0xff]  ;;  %v919_v59 = vld [vmem:[%s14774_s4 + $0xf8] sm:$0xff] }
  0x2a   : > { %v896_v60 = vld [vmem:[%s14774_s4 + $0x40] sm:$0xff]  ;;  %v894_v61 = vld [vmem:[%s14774_s4 + $0x30] sm:$0xff]  ;;  %v917_v63 = vld [vmem:[%s14774_s4 + $0xe8] sm:$0xff] }
  0x2b   : > { %v916_v62 = vld [vmem:[%s14774_s4 + $0xe0] sm:$0xff]  ;;  %v915_v2 = vld [vmem:[%s14774_s4 + $0xd8] sm:$0xff]  ;;  %v914_v4 = vld [vmem:[%s14774_s4 + $0xd0] sm:$0xff] }
  0x2c   : > { %v895_v3 = vld [vmem:[%s14774_s4 + $0x38] sm:$0xff]  ;;  %v912_v5 = vld [vmem:[%s14774_s4 + $0xc0] sm:$0xff]  ;;  %v893_v8 = vld [vmem:[%s14774_s4 + $0x28] sm:$0xff] }
  0x2d   : > { %v892_v6 = vld [vmem:[%s14774_s4 + $0x20] sm:$0xff]  ;;  %v891_v11 = vld [vmem:[%s14774_s4 + $0x18] sm:$0xff]  ;;  %v913_v12 = vld [vmem:[%s14774_s4 + $0xc8] sm:$0xff] }
  0x2e   : > { %550 = vperm.xlu2 %9606, %v412_v13   ;;  %480 = vperm.xlu0 %9604, %v398_v14   ;;  %v890_v14 = vld [vmem:[%s14774_s4 + $0x10] sm:$0xff] }
  0x2f   : > { %485 = vperm.xlu1 %9605, %v399_v15  }
  0x36   : > { %555 = vperm.xlu0 %9604, %v413_v16   ;;  %475 = vperm.xlu2 %9606, %v397_v17  }
  0x37   : > { %470 = vperm.xlu1 %9605, %v396_v19   ;;  %7359 = vmatmul.msk.bf16.gmra.mxu0 %vm670_vm0, %v9206_v18 }
  0x38   : > { %7366 = vmatmul.msk.bf16.gmra.mxu2 %vm670_vm0, %v9213_v20  ;;  %7370 = vmatmul.msk.bf16.gmra.mxu3 %vm670_vm0, %v9217_v21  ;;  %v888_v21 = vld [vmem:[%s14774_s4] sm:$0xff] }
  0x39   : > { %7364 = vmatmul.msk.bf16.gmra.mxu1 %vm670_vm0, %v9211_v22  ;;  %v910_v22 = vld [vmem:[%s14774_s4 + $0xb0] sm:$0xff] }
  0x3e   : > { %540 = vperm.xlu0 %9604, %v410_v23   ;;  %460 = vperm.xlu2 %9606, %v394_v24   ;;  %v911_v24 = vld [vmem:[%s14774_s4 + $0xb8] sm:$0xff] }
  0x3f   : > { %545 = vperm.xlu1 %9605, %v411_v25  }
  0x46   : > { %465 = vperm.xlu0 %9604, %v395_v26   ;;  %535 = vperm.xlu2 %9606, %v409_v27  }
  0x47   : > { %530 = vperm.xlu1 %9605, %v408_v29   ;;  %7360 = vmatmul.msk.bf16.gmra.mxu0 %vm670_vm0, %v9207_v28 }
  0x48   : > { %7367 = vmatmul.msk.bf16.gmra.mxu2 %vm670_vm0, %v9214_v30  ;;  %7371 = vmatmul.msk.bf16.gmra.mxu3 %vm670_vm0, %v9218_v31 }
  0x4e   : > { %520 = vperm.xlu2 %9606, %v406_v32   ;;  %450 = vperm.xlu0 %9604, %v392_v33   ;;  %v909_v32 = vld [vmem:[%s14774_s4 + $0xa8] sm:$0xff] }
  0x4f   : > { %455 = vperm.xlu1 %9605, %v393_v34   ;;  %v889_v33 = vld [vmem:[%s14774_s4 + $0x8] sm:$0xff] }
  0x56   : > { %525 = vperm.xlu0 %9604, %v407_v35   ;;  %445 = vperm.xlu2 %9606, %v391_v36  }
  0x57   : > { %440 = vperm.xlu1 %9605, %v390_v38   ;;  %7361 = vmatmul.msk.bf16.gmra.mxu0 %vm670_vm0, %v9208_v37  ;;  %v908_v37 = vld [vmem:[%s14774_s4 + $0xa0] sm:$0xff] }
  0x58   : > { %7368 = vmatmul.msk.bf16.gmra.mxu2 %vm670_vm0, %v9215_v39  ;;  %7372 = vmatmul.msk.bf16.gmra.mxu3 %vm670_vm0, %v9219_v40 }
  0x5e   : > { %510 = vperm.xlu0 %9604, %v404_v41   ;;  %430 = vperm.xlu2 %9606, %v388_v42  }
  0x5f   : > { %515 = vperm.xlu1 %9605, %v405_v43  }
  0x66   : > { %435 = vperm.xlu0 %9604, %v389_v44   ;;  %505 = vperm.xlu2 %9606, %v403_v45   ;;  %v904_v45 = vld [vmem:[%s14774_s4 + $0x80] sm:$0xff] }
  0x67   : > { %500 = vperm.xlu1 %9605, %v402_v47   ;;  %7362 = vmatmul.msk.bf16.gmra.mxu0 %vm670_vm0, %v9209_v46  ;;  %v906_v46 = vld [vmem:[%s14774_s4 + $0x90] sm:$0xff] }
  0x68   : > { %7373 = vmatmul.msk.bf16.gmra.mxu3 %vm670_vm0, %v9220_v48 }
  0x6e   : > { %992 = vperm.xlu2 %9606, %v902_v49   ;;  %420 = vperm.xlu0 %9604, %v386_v50   ;;  %v907_v49 = vld [vmem:[%s14774_s4 + $0x98] sm:$0xff] }
  0x6f   : > { %425 = vperm.xlu1 %9605, %v387_v51  }
  0x76   : > { %987 = vperm.xlu2 %9606, %v901_v52   ;;  %997 = vperm.xlu0 %9604, %v903_v53  }
  0x77   : > { %982 = vperm.xlu1 %9605, %v900_v54  }
  0x78   : > { %v9955_v10 = vpop.permute.xlu2 %560 }
  0x7e   : > { %1072 = vperm.xlu2 %9606, %v918_v55   ;;  %972 = vperm.xlu0 %9604, %v898_v56  }
  0x7f   : > { %977 = vperm.xlu1 %9605, %v899_v57  }
  0x80   : > { %v9968_v18 = vpop.permute.xlu2 %565 }
  0x86   : > { %967 = vperm.xlu2 %9606, %v897_v58   ;;  %1077 = vperm.xlu0 %9604, %v919_v59  }
  0x87   : > { %962 = vperm.xlu1 %9605, %v896_v60   ;;  %v7533_v60 = vld [vmem:[%s9796_s11 + $0x1f8] sm:$0xff] }
  0x88   : > { %v9987_v29 = vpop.permute.xlu2 %550 }
  0x8e   : > { %952 = vperm.xlu2 %9606, %v894_v61   ;;  %1062 = vperm.xlu0 %9604, %v916_v62   ;;  %v905_v61 = vld [vmem:[%s14774_s4 + $0x88] sm:$0xff] }
  0x8f   : > { %1067 = vperm.xlu1 %9605, %v917_v63  }
  0x90   : > { %v9933_v0 = vpop.permute.xlu0 %570  ;;  %v476_v47 = vpop.permute.xlu2 %475 }
  0x91   : > { %v491_v1 = vpop.permute.xlu1 %490 }
  0x96   : > { %1057 = vperm.xlu2 %9606, %v915_v2   ;;  %957 = vperm.xlu0 %9604, %v895_v3  }
  0x97   : > { %1052 = vperm.xlu1 %9605, %v914_v4  }
  0x98   : > { %v9950_v7 = vpop.permute.xlu0 %575 }
  0x99   : > { %v496_v9 = vpop.permute.xlu1 %495 }
  0x9e   : > { %1042 = vperm.xlu2 %9606, %v912_v5   ;;  %942 = vperm.xlu0 %9604, %v892_v6   ;;  %v7530_v5 = vld [vmem:[%s9796_s11 + $0x1e0] sm:$0xff]  ;;  %v7516_v6 = vld [vmem:[%s9796_s11 + $0x170] sm:$0xff] }
  0x9f   : > { %947 = vperm.xlu1 %9605, %v893_v8  }
  0xa0   : > { %v481_v15 = vpop.permute.xlu0 %480 }
  0xa1   : > { %v486_v17 = vpop.permute.xlu1 %485 }
  0xa4   : > { %v9963_v13 = vpop.f32.mrf.mxu0 }
  0xa6   : > { %v753_v16 = vpop.f32.mrf.mxu1  ;;  %937 = vperm.xlu2 %9606, %v891_v11   ;;  %1047 = vperm.xlu0 %9604, %v913_v12   ;;  %v461_v11 = vpop.permute.xlu2 %460 }
  0xa7   : > { %932 = vperm.xlu1 %9605, %v890_v14  }
  0xa8   : > { %v9983_v26 = vpop.permute.xlu0 %555 }
  0xa9   : > { %v471_v28 = vpop.permute.xlu1 %470 }
  0xaa   : > { %v10025_v50 = vadd.f32 %v753_v16, %v471_v28 }
  0xab   : > { %v763_v19 = vpop.f32.mrf.mxu2  ;;  %v9970_v20 = vpop.f32.mrf.mxu3 }
  0xac   : > { %v9978_v23 = vpop.f32.mrf.mxu0  ;;  %v9985_v27 = vadd.f32 %v763_v19, %v491_v1  ;;  %14895 = vst [vmem:[#allocation7_spill] sm:$0xff] %v10025_v50  ;;  %v818_v56 = vmax.f32 %v10025_v50, 0.0  ;;  %v7532_v1 = vld [vmem:[%s9796_s11 + $0x1f0] sm:$0xff]  ;;  %v7531_v19 = vld [vmem:[%s9796_s11 + $0x1e8] sm:$0xff]  ;;  %v8473_v50 = vld [vmem:[%s14774_s4 + $0x358] sm:$0xff] }
  0xae   : > { %v755_v25 = vpop.f32.mrf.mxu1  ;;  %922 = vperm.xlu2 %9606, %v888_v21   ;;  %1032 = vperm.xlu0 %9604, %v910_v22   ;;  %v822_v34 = vmax.f32 %v9985_v27, 0.0  ;;  %v7514_v22 = vld [vmem:[%s9796_s11 + $0x160] sm:$0xff] }
  0xaf   : > { %1037 = vperm.xlu1 %9605, %v911_v24   ;;  %v10027_v51 = vadd.f32 %v755_v25, %v476_v47  ;;  %v10060_v24 = vpop.permute.xlu2 %535 }
  0xb0   : > { %v10006_v41 = vpop.permute.xlu0 %540 }
  0xb1   : > { %v10008_v42 = vpop.permute.xlu1 %545  ;;  %14896 = vst [vmem:[#allocation8_spill] sm:$0xff] %v10027_v51  ;;  %v819_v57 = vmax.f32 %v10027_v51, 0.0 }
  0xb3   : > { %v765_v30 = vpop.f32.mrf.mxu2  ;;  %v9989_v31 = vpop.f32.mrf.mxu3  ;;  %v845_v3 = vpack.c.bf16 %v819_v57, %v818_v56 }
  0xb4   : > { %v9998_v35 = vadd.f32 %v765_v30, %v496_v9  ;;  %v10000_v36 = vpop.f32.mrf.mxu0  ;;  %v7517_v9 = vld [vmem:[%s9796_s11 + $0x178] sm:$0xff] }
  0xb6   : > { %14893 = vst [vmem:[#allocation5_spill] sm:$0xff] %v9998_v35  ;;  %v758_v38 = vpop.f32.mrf.mxu1  ;;  %1027 = vperm.xlu2 %9606, %v909_v32   ;;  %927 = vperm.xlu0 %9604, %v889_v33   ;;  %v823_v39 = vmax.f32 %v9998_v35, 0.0  ;;  %v7512_v33 = vld [vmem:[%s9796_s11 + $0x150] sm:$0xff]  ;;  %v8491_v35 = vld [vmem:[%s14774_s4 + $0x3e8] sm:$0xff] }
  0xb7   : > { %1022 = vperm.xlu1 %9605, %v908_v37   ;;  %v10010_v43 = vadd.f32 %v758_v38, %v481_v15  ;;  %v7529_v38 = vld [vmem:[%s9796_s11 + $0x1d8] sm:$0xff] }
  0xb8   : > { %v847_v40 = vpack.c.bf16 %v823_v39, %v822_v34  ;;  %v10041_v62 = vpop.permute.xlu0 %465  ;;  %v7528_v34 = vld [vmem:[%s9796_s11 + $0x1d0] sm:$0xff]  ;;  %v10069_v39 = vpop.permute.xlu2 %520 }
  0xb9   : > { %14894 = vst [vmem:[#allocation6_spill] sm:$0xff] %v10010_v43  ;;  %v820_v53 = vmax.f32 %v10010_v43, 0.0  ;;  %v10046_v2 = vpop.permute.xlu1 %530  ;;  %v8468_v43 = vld [vmem:[%s14774_s4 + $0x330] sm:$0xff] }
  0xba   : > { %1240 = vmatpush.bf16.msrb.mxu1 %v847_v40 }
  0xbb   : > { %v10012_v44 = vpop.f32.mrf.mxu3  ;;  %v10053_v12 = vpop.f32.mrf.mxu2 }
  0xbc   : > { %v10020_v48 = vpop.f32.mrf.mxu0 }
  0xbe   : > { %v760_v52 = vpop.f32.mrf.mxu1  ;;  %1002 = vperm.xlu2 %9606, %v904_v45   ;;  %1012 = vperm.xlu0 %9604, %v906_v46  }
  0xbf   : > { %v10030_v54 = vadd.f32 %v760_v52, %v486_v17  ;;  %1017 = vperm.xlu1 %9605, %v907_v49   ;;  %v7515_v17 = vld [vmem:[%s9796_s11 + $0x168] sm:$0xff]  ;;  %v7513_v52 = vld [vmem:[%s9796_s11 + $0x158] sm:$0xff] }
  0xc0   : > { %v451_v14 = vpop.permute.xlu0 %450  ;;  %v7527_v49 = vld [vmem:[%s9796_s11 + $0x1c8] sm:$0xff]  ;;  %v446_v56 = vpop.permute.xlu2 %445 }
  0xc1   : > { %14897 = vst [vmem:[#allocation9_spill] sm:$0xff] %v10030_v54  ;;  %v821_v55 = vmax.f32 %v10030_v54, 0.0  ;;  %v456_v15 = vpop.permute.xlu1 %455 }
  0xc3   : > { %v10035_v58 = vpop.f32.mrf.mxu3  ;;  %v846_v59 = vpack.c.bf16 %v821_v55, %v820_v53  ;;  %v10062_v25 = vpop.f32.mrf.mxu2  ;;  %v7526_v55 = vld [vmem:[%s9796_s11 + $0x1c0] sm:$0xff] }
  0xc4   : > { %v10043_v63 = vpop.f32.mrf.mxu0 }
  0xc5   : > { %1241 = vmatpush.bf16.msrb.mxu1 %v846_v59 }
  0xc6   : > { %1688 = vperm.xlu2 %9606, %v7533_v60   ;;  %1007 = vperm.xlu0 %9604, %v905_v61   ;;  %v7524_v60 = vld [vmem:[%s9796_s11 + $0x1b0] sm:$0xff]  ;;  %v7510_v61 = vld [vmem:[%s9796_s11 + $0x140] sm:$0xff] }
  0xc7   : > { %1683 = vperm.xlu1 %9605, %v7532_v1  }
  0xc8   : > { %v10064_v28 = vpop.permute.xlu0 %525 }
  0xc9   : > { %1242 = vmatpush.bf16.msrb.mxu1 %v845_v3  ;;  %v441_v30 = vpop.permute.xlu1 %440 }
  0xcb   : > { %v10048_v4 = vpop.f32.mrf.mxu3  ;;  %v10071_v40 = vpop.f32.mrf.mxu2 }
  0xcc   : > { %v740_v8 = vpop.f32.mrf.mxu0 }
  0xce   : > { %1673 = vperm.xlu2 %9606, %v7530_v5   ;;  %1603 = vperm.xlu0 %9604, %v7516_v6   ;;  %v7511_v5 = vld [vmem:[%s9796_s11 + $0x148] sm:$0xff] }
  0xcf   : > { %1608 = vperm.xlu1 %9605, %v7517_v9  }
  0xd0   : > { %v10073_v45 = vpop.permute.xlu0 %510 }
  0xd1   : > { %v10075_v46 = vpop.permute.xlu1 %515 }
  0xd3   : > { %v10055_v16 = vpop.f32.mrf.mxu3  ;;  %v10084_v1 = vpop.f32.mrf.mxu2 }
  0xd4   : > { %v743_v21 = vpop.f32.mrf.mxu0 }
  0xd6   : > { %1598 = vperm.xlu2 %9606, %v7515_v17   ;;  %1678 = vperm.xlu0 %9604, %v7531_v19  }
  0xd7   : > { %1593 = vperm.xlu1 %9605, %v7514_v22  }
  0xd8   : > { %v436_v9 = vpop.permute.xlu0 %435 }
  0xd9   : > { %v10087_v6 = vpop.permute.xlu1 %500 }
  0xdb   : > { %v798_v32 = vpop.f32.mrf.mxu3 }
  0xdc   : > { %v745_v37 = vpop.f32.mrf.mxu0 }
  0xdd   : > { %v10089_v17 = vadd.f32 %v745_v37, %v456_v15 }
  0xde   : > { %1583 = vperm.xlu2 %9606, %v7512_v33   ;;  %1663 = vperm.xlu0 %9604, %v7528_v34   ;;  %v10098_v34 = vadd.f32 %v740_v8, %v446_v56 }
  0xdf   : > { %1668 = vperm.xlu1 %9605, %v7529_v38   ;;  %14899 = vst [vmem:[#allocation11_spill] sm:$0xff] %v10089_v17  ;;  %v815_v15 = vmax.f32 %v10089_v17, 0.0 }
  0xe0   : > { %14902 = vst [vmem:[#allocation14_spill] sm:$0xff] %v10098_v34 }
  0xe3   : > { %v800_v47 = vpop.f32.mrf.mxu3 }
  0xe4   : > { %v748_v53 = vpop.f32.mrf.mxu0 }
  0xe5   : > { %v10080_v57 = vadd.f32 %v748_v53, %v461_v11  ;;  %v10094_v11 = vadd.f32 %v743_v21, %v451_v14  ;;  %v10111_v53 = vadd.f32 %v800_v47, %v9968_v18  ;;  %v421_v47 = vpop.permute.xlu0 %420 }
  0xe6   : > { %1658 = vperm.xlu2 %9606, %v7527_v49   ;;  %1588 = vperm.xlu0 %9604, %v7513_v52   ;;  %v7509_v49 = vld [vmem:[%s9796_s11 + $0x138] sm:$0xff] }
  0xe7   : > { %1653 = vperm.xlu1 %9605, %v7526_v55   ;;  %14898 = vst [vmem:[#allocation10_spill] sm:$0xff] %v10080_v57  ;;  %v816_v22 = vmax.f32 %v10080_v57, 0.0  ;;  %v814_v14 = vmax.f32 %v10094_v11, 0.0  ;;  %v7525_v52 = vld [vmem:[%s9796_s11 + $0x1b8] sm:$0xff]  ;;  %v7508_v55 = vld [vmem:[%s9796_s11 + $0x130] sm:$0xff] }
  0xe8   : > { %14901 = vst [vmem:[#allocation13_spill] sm:$0xff] %v10094_v11 }
  0xe9   : > { %14905 = vst [vmem:[#allocation17_spill] sm:$0xff] %v10111_v53  ;;  %v843_v56 = vpack.c.bf16 %v815_v15, %v814_v14  ;;  %v10150_v15 = vadd.f32 %v10035_v58, %v10008_v42  ;;  %v7522_v14 = vld [vmem:[%s9796_s11 + $0x1a0] sm:$0xff]  ;;  %v10165_v58 = vadd.f32 %v9970_v20, %v10046_v2 }
  0xeb   : > { %v803_v59 = vpop.f32.mrf.mxu3  ;;  %14914 = vst [vmem:[#allocation26_spill] sm:$0xff] %v10150_v15 }
  0xec   : > { %v750_v3 = vpop.f32.mrf.mxu0  ;;  %v10102_v37 = vadd.f32 %v803_v59, %v9933_v0  ;;  %v813_v0 = vmax.f32 %v10098_v34, 0.0  ;;  %v431_v59 = vpop.permute.xlu2 %430  ;;  %14916 = vst [vmem:[#allocation28_spill] sm:$0xff] %v10165_v58 }
  0xed   : > { %v10092_v19 = vadd.f32 %v750_v3, %v10041_v62  ;;  %v10105_v62 = vadd.f32 %v10043_v63, %v441_v30  ;;  %v10119_v63 = vadd.f32 %v10020_v48, %v436_v9  ;;  %v778_v30 = vpop.f32.mrf.mxu2  ;;  %v10128_v48 = vadd.f32 %v10000_v36, %v431_v59 }
  0xee   : > { %1643 = vperm.xlu2 %9606, %v7524_v60   ;;  %1573 = vperm.xlu0 %9604, %v7510_v61   ;;  %14903 = vst [vmem:[#allocation15_spill] sm:$0xff] %v10102_v37  ;;  %v10122_v60 = vadd.f32 %v798_v32, %v9955_v10  ;;  %v838_v61 = vmax.f32 %v10102_v37, 0.0  ;;  %v10132_v10 = vadd.f32 %v10055_v16, %v9983_v26  ;;  %v7506_v16 = vld [vmem:[%s9796_s11 + $0x120] sm:$0xff] }
  0xef   : > { %14900 = vst [vmem:[#allocation12_spill] sm:$0xff] %v10092_v19  ;;  %1578 = vperm.xlu1 %9605, %v7511_v5   ;;  %v817_v33 = vmax.f32 %v10092_v19, 0.0  ;;  %v812_v3 = vmax.f32 %v10105_v62, 0.0  ;;  %v837_v5 = vmax.f32 %v10111_v53, 0.0  ;;  %v10137_v9 = vadd.f32 %v10048_v4, %v9987_v29  ;;  %v7523_v4 = vld [vmem:[%s9796_s11 + $0x1a8] sm:$0xff] }
  0xf0   : > { %14904 = vst [vmem:[#allocation16_spill] sm:$0xff] %v10105_v62  ;;  %v10144_v36 = vadd.f32 %v9963_v13, %v421_v47  ;;  %v811_v26 = vmax.f32 %v10119_v63, 0.0  ;;  %v10158_v13 = vadd.f32 %v10012_v44, %v10006_v41  ;;  %v833_v44 = vmax.f32 %v10150_v15, 0.0  ;;  %v8083_v53 = vld [vmem:[%s14774_s4 + $0x228] sm:$0xff]  ;;  %v8096_v62 = vld [vmem:[%s14774_s4 + $0x290] sm:$0xff] }
  0xf1   : > { %v844_v38 = vpack.c.bf16 %v817_v33, %v816_v22  ;;  %14907 = vst [vmem:[#allocation19_spill] sm:$0xff] %v10119_v63  ;;  %v842_v22 = vpack.c.bf16 %v813_v0, %v812_v3  ;;  %v836_v33 = vmax.f32 %v10122_v60, 0.0  ;;  %v9222_v0 = vld [vmem:[%s14773_s3 + $0x4] sm:$0xf0] }
  0xf2   : > { %14908 = vst [vmem:[#allocation20_spill] sm:$0xff] %v10122_v60  ;;  %v832_v20 = vmax.f32 %v10158_v13, 0.0 }
  0xf3   : > { %v805_v21 = vpop.f32.mrf.mxu3  ;;  %1243 = vmatpush.bf16.msrb.mxu1 %v844_v38  ;;  %14909 = vst [vmem:[#allocation21_spill] sm:$0xff] %v10128_v48  ;;  %v854_v29 = vpack.c.bf16 %v837_v5, %v836_v33  ;;  %v830_v5 = vmax.f32 %v10165_v58, 0.0  ;;  %v10187_v33 = vadd.f32 %v778_v30, %v10069_v39  ;;  %v7908_v58 = vld [vmem:[%s9796_s11 + $0x2b0] sm:$0xff] }
  0xf4   : > { %v10114_v8 = vadd.f32 %v805_v21, %v9950_v7  ;;  %v426_v7 = vpop.permute.xlu1 %425  ;;  %14910 = vst [vmem:[#allocation22_spill] sm:$0xff] %v10132_v10  ;;  %v810_v21 = vmax.f32 %v10128_v48, 0.0  ;;  %v852_v3 = vpack.c.bf16 %v833_v44, %v832_v20  ;;  %v7706_v20 = vld [vmem:[%s14774_s4 + $0x160] sm:$0xff]  ;;  %v8101_v48 = vld [vmem:[%s14774_s4 + $0x2b8] sm:$0xff] }
  0xf5   : > { %14911 = vst [vmem:[#allocation23_spill] sm:$0xff] %v10137_v9  ;;  %v10141_v38 = vadd.f32 %v9978_v23, %v426_v7  ;;  %v835_v23 = vmax.f32 %v10132_v10, 0.0  ;;  %v780_v59 = vpop.f32.mrf.mxu2  ;;  %v7521_v7 = vld [vmem:[%s9796_s11 + $0x198] sm:$0xff]  ;;  %v828_v30 = vmax.f32 %v10187_v33, 0.0 }
  0xf6   : > { %14906 = vst [vmem:[#allocation18_spill] sm:$0xff] %v10114_v8  ;;  %1568 = vperm.xlu2 %9606, %v7509_v49   ;;  %1648 = vperm.xlu0 %9604, %v7525_v52   ;;  %v839_v18 = vmax.f32 %v10114_v8, 0.0  ;;  %v834_v49 = vmax.f32 %v10137_v9, 0.0  ;;  %v841_v52 = vpack.c.bf16 %v811_v26, %v810_v21  ;;  %v10181_v47 = vadd.f32 %v780_v59, %v10064_v28  ;;  %v8102_v8 = vld [vmem:[%s14774_s4 + $0x2c0] sm:$0xff] }
  0xf7   : > { %1563 = vperm.xlu1 %9605, %v7508_v55   ;;  %1244 = vmatpush.bf16.msrb.mxu1 %v843_v56  ;;  %14912 = vst [vmem:[#allocation24_spill] sm:$0xff] %v10141_v38  ;;  %v808_v55 = vmax.f32 %v10144_v36, 0.0  ;;  %v809_v42 = vmax.f32 %v10141_v38, 0.0  ;;  %v7376_v56 = vld [vmem:[%s14773_s3] sm:$0xf]  ;;  %v10196_v28 = vadd.f32 %v10084_v1, %v10075_v46  ;;  %v506_v46 = vpop.permute.xlu2 %505  ;;  %v7504_v1 = vld [vmem:[%s9796_s11 + $0x110] sm:$0xff] }
  0xf8   : > { %v855_v32 = vpack.c.bf16 %v839_v18, %v838_v61  ;;  %14913 = vst [vmem:[#allocation25_spill] sm:$0xff] %v10144_v36  ;;  %v853_v41 = vpack.c.bf16 %v835_v23, %v834_v49  ;;  %v10176_v61 = vadd.f32 %v9989_v31, %v10060_v24  ;;  %v7377_v18 = vor.u32 %v9222_v0, %v7376_v56  ;;  %v7384_v23 = vld [vmem:[%s14773_s3 + $0x10] sm:$0xf]  ;;  %v9224_v49 = vld [vmem:[%s14773_s3 + $0x14] sm:$0xf0]  ;;  %v7502_v56 = vld [vmem:[%s9796_s11 + $0x100] sm:$0xff] }
  0xf9   : > { %14915 = vst [vmem:[#allocation27_spill] sm:$0xff] %v10158_v13  ;;  %v840_v2 = vpack.c.bf16 %v809_v42, %v808_v55  ;;  %v10192_v24 = vadd.f32 %v10071_v40, %v10073_v45  ;;  %v829_v39 = vmax.f32 %v10181_v47, 0.0  ;;  %v827_v45 = vmax.f32 %v10196_v28, 0.0  ;;  %v7378_v55 = vld [vmem:[%s14773_s3 + $0x8] sm:$0xf0] }
  0xfa   : > { %1329 = vmatpush.bf16.msrb.mxu2 %v855_v32  ;;  %14917 = vst [vmem:[#allocation29_spill] sm:$0xff] %v10176_v61  ;;  %v7520_v32 = vld [vmem:[%s9796_s11 + $0x190] sm:$0xff]  ;;  %v831_v31 = vmax.f32 %v10176_v61, 0.0  ;;  %v10210_v21 = vadd.f32 %v10062_v25, %v506_v46  ;;  %v7385_v42 = vor.u32 %v9224_v49, %v7384_v23  ;;  %v7519_v0 = vld [vmem:[%s9796_s11 + $0x188] sm:$0xff]  ;;  %v9225_v46 = vld [vmem:[%s14773_s3 + $0x24] sm:$0xf] }
  0xfb   : > { %1245 = vmatpush.bf16.msrb.mxu1 %v842_v22  ;;  %14918 = vst [vmem:[#allocation30_spill] sm:$0xff] %v10181_v47  ;;  %v7507_v22 = vld [vmem:[%s9796_s11 + $0x128] sm:$0xff]  ;;  %v826_v40 = vmax.f32 %v10192_v24, 0.0  ;;  %v7722_v23 = vld [vmem:[%s14774_s4 + $0x1e0] sm:$0xff] }
  0xfc   : > { %14919 = vst [vmem:[#allocation31_spill] sm:$0xff] %v10187_v33  ;;  %v851_v26 = vpack.c.bf16 %v831_v31, %v830_v5  ;;  %v825_v25 = vmax.f32 %v10210_v21, 0.0  ;;  %v7386_v5 = vld [vmem:[%s14773_s3 + $0x18] sm:$0xf0]  ;;  %v7703_v49 = vld [vmem:[%s14774_s4 + $0x148] sm:$0xff] }
  0xfd   : > { %14920 = vst [vmem:[#allocation32_spill] sm:$0xff] %v10192_v24  ;;  %v7705_v31 = vld [vmem:[%s14774_s4 + $0x158] sm:$0xff] }
  0xfe   : > { %1330 = vmatpush.bf16.msrb.mxu2 %v854_v29  ;;  %1553 = vperm.xlu2 %9606, %v7506_v16   ;;  %14921 = vst [vmem:[#allocation33_spill] sm:$0xff] %v10196_v28  ;;  %v7518_v16 = vld [vmem:[%s9796_s11 + $0x180] sm:$0xff]  ;;  %v10203_v29 = vadd.f32 %v10053_v12, %v10087_v6  ;;  %v849_v12 = vpack.c.bf16 %v827_v45, %v826_v40  ;;  %v7400_v40 = vld [vmem:[%s14773_s3 + $0x30] sm:$0xf]  ;;  %v9228_v45 = vld [vmem:[%s14773_s3 + $0x34] sm:$0xf0] }
  0xff   : > { %1638 = vperm.xlu1 %9605, %v7523_v4   ;;  %1633 = vperm.xlu0 %9604, %v7522_v14   ;;  %v850_v4 = vpack.c.bf16 %v829_v39, %v828_v30  ;;  %v7505_v14 = vld [vmem:[%s9796_s11 + $0x118] sm:$0xff]  ;;  %14923 = vst [vmem:[#allocation35_spill] sm:$0xff] %v10210_v21  ;;  %v7707_v39 = vld [vmem:[%s14774_s4 + $0x168] sm:$0xff]  ;;  %v7892_v28 = vld [vmem:[%s9796_s11 + $0x230] sm:$0xff] }
 0x100   : > { %1246 = vmatpush.bf16.msrb.mxu1 %v841_v52  ;;  %14922 = vst [vmem:[#allocation34_spill] sm:$0xff] %v10203_v29  ;;  %v824_v6 = vmax.f32 %v10203_v29, 0.0  ;;  %v9221_v52 = vld [vmem:[%s14773_s3 + $0x4] sm:$0xf]  ;;  %v7909_v33 = vld [vmem:[%s9796_s11 + $0x2b8] sm:$0xff] }
 0x101   : > { %v7381_v59 = vor.u32 %v9221_v52, %v7378_v55  ;;  %v7720_v52 = vld [vmem:[%s14774_s4 + $0x1d0] sm:$0xff]  ;;  %v7701_v55 = vld [vmem:[%s14774_s4 + $0x138] sm:$0xff] }
 0x102   : > { %1331 = vmatpush.bf16.msrb.mxu2 %v853_v41  ;;  %v7503_v41 = vld [vmem:[%s9796_s11 + $0x108] sm:$0xff]  ;;  %v848_v44 = vpack.c.bf16 %v825_v25, %v824_v6 }
 0x103   : > { %v7723_v6 = vld [vmem:[%s14774_s4 + $0x1e8] sm:$0xff] }
 0x104   : > { %1247 = vmatpush.bf16.msrb.mxu1 %v840_v2  ;;  %v7709_v2 = vld [vmem:[%s14774_s4 + $0x178] sm:$0xff] }
 0x106   : > { %1332 = vmatpush.bf16.msrb.mxu2 %v852_v3  ;;  %1628 = vperm.xlu2 %9606, %v7521_v7   ;;  %v7392_v7 = vld [vmem:[%s14773_s3 + $0x20] sm:$0xf]  ;;  %v9226_v3 = vld [vmem:[%s14773_s3 + $0x24] sm:$0xf0] }
 0x107   : > { %1248 = vmatmul.bf16.vlgmr.msrb.gmra.mxu1 %v7377_v18  ;;  %1623 = vperm.xlu1 %9605, %v7520_v32   ;;  %v7708_v18 = vld [vmem:[%s14774_s4 + $0x170] sm:$0xff] }
 0x108   : > { %1558 = vperm.xlu0 %9604, %v7507_v22   ;;  %v9223_v32 = vld [vmem:[%s14773_s3 + $0x14] sm:$0xf]  ;;  %v7393_v22 = vor.u32 %v9226_v3, %v7392_v7  ;;  %v10319_v3 = vpop.permute.xlu2 %992 }
 0x109   : > { %v7389_v30 = vor.u32 %v9223_v32, %v7386_v5  ;;  %v7696_v32 = vld [vmem:[%s14774_s4 + $0x110] sm:$0xff]  ;;  %v7719_v5 = vld [vmem:[%s14774_s4 + $0x1c8] sm:$0xff] }
 0x10a   : > { %1333 = vmatpush.bf16.msrb.mxu2 %v851_v26  ;;  %v7704_v26 = vld [vmem:[%s14774_s4 + $0x150] sm:$0xff] }
 0x10e   : > { %1334 = vmatpush.bf16.msrb.mxu2 %v850_v4  ;;  %1613 = vperm.xlu2 %9606, %v7518_v16   ;;  %v7702_v16 = vld [vmem:[%s14774_s4 + $0x140] sm:$0xff]  ;;  %v7725_v4 = vld [vmem:[%s14774_s4 + $0x1f8] sm:$0xff] }
 0x10f   : > { %1548 = vperm.xlu1 %9605, %v7505_v14   ;;  %v7724_v14 = vld [vmem:[%s14774_s4 + $0x1f0] sm:$0xff] }
 0x110   : > { %1543 = vperm.xlu0 %9604, %v7504_v1   ;;  %v7394_v1 = vld [vmem:[%s14773_s3 + $0x28] sm:$0xf0] }
 0x111   : > { %v7397_v25 = vor.u32 %v9225_v46, %v7394_v1  ;;  %v7697_v46 = vld [vmem:[%s14774_s4 + $0x118] sm:$0xff] }
 0x112   : > { %1335 = vmatpush.bf16.msrb.mxu2 %v849_v12  ;;  %v7401_v12 = vor.u32 %v9228_v45, %v7400_v40  ;;  %v10347_v40 = vpop.permute.xlu2 %987  ;;  %v7716_v45 = vld [vmem:[%s14774_s4 + $0x1b0] sm:$0xff] }
 0x116   : > { %1336 = vmatpush.bf16.msrb.mxu2 %v848_v44  ;;  %1538 = vperm.xlu2 %9606, %v7503_v41   ;;  %v7408_v41 = vld [vmem:[%s14773_s3 + $0x40] sm:$0xf]  ;;  %v9230_v44 = vld [vmem:[%s14773_s3 + $0x44] sm:$0xf0] }
 0x117   : > { %1253 = vmatmul.bf16.gmra.mxu1 %v7385_v42  ;;  %1533 = vperm.xlu1 %9605, %v7502_v56   ;;  %v7700_v42 = vld [vmem:[%s14774_s4 + $0x130] sm:$0xff] }
 0x118   : > { %1618 = vperm.xlu0 %9604, %v7519_v0   ;;  %v9227_v56 = vld [vmem:[%s14773_s3 + $0x34] sm:$0xf]  ;;  %v7402_v0 = vld [vmem:[%s14773_s3 + $0x38] sm:$0xf0] }
 0x119   : > { %1337 = vmatmul.bf16.vlgmr.msrb.gmra.mxu2 %v7381_v59  ;;  %v7409_v59 = vor.u32 %v9230_v44, %v7408_v41  ;;  %v7405_v7 = vor.u32 %v9227_v56, %v7402_v0  ;;  %v7418_v41 = vld [vmem:[%s14773_s3 + $0x58] sm:$0xf0]  ;;  %v7712_v0 = vld [vmem:[%s14774_s4 + $0x190] sm:$0xff] }
 0x11a   : > { %v7713_v56 = vld [vmem:[%s14774_s4 + $0x198] sm:$0xff] }
 0x11e   : > { %2237 = vperm.xlu2 %9606, %v7706_v20   ;;  %v7699_v20 = vld [vmem:[%s14774_s4 + $0x128] sm:$0xff] }
 0x11f   : > { %2252 = vperm.xlu1 %9605, %v7709_v2   ;;  %v7698_v2 = vld [vmem:[%s14774_s4 + $0x120] sm:$0xff] }
 0x120   : > { %2247 = vperm.xlu0 %9604, %v7708_v18   ;;  %v7721_v18 = vld [vmem:[%s14774_s4 + $0x1d8] sm:$0xff] }
 0x126   : > { %2232 = vperm.xlu2 %9606, %v7705_v31   ;;  %v7416_v31 = vld [vmem:[%s14773_s3 + $0x50] sm:$0xf] }
 0x127   : > { %1258 = vmatmul.bf16.gmra.mxu1 %v7393_v22  ;;  %2227 = vperm.xlu1 %9605, %v7704_v26   ;;  %v7718_v22 = vld [vmem:[%s14774_s4 + $0x1c0] sm:$0xff]  ;;  %v9232_v26 = vld [vmem:[%s14773_s3 + $0x54] sm:$0xf0] }
 0x128   : > { %2242 = vperm.xlu0 %9604, %v7707_v39   ;;  %v10336_v39 = vpop.permute.xlu0 %997 }
 0x129   : > { %1342 = vmatmul.bf16.gmra.mxu2 %v7389_v30  ;;  %v9229_v30 = vld [vmem:[%s14773_s3 + $0x44] sm:$0xf] }
 0x12e   : > { %2217 = vperm.xlu2 %9606, %v7702_v16   ;;  %v7410_v16 = vld [vmem:[%s14773_s3 + $0x48] sm:$0xf0] }
 0x12f   : > { %2332 = vperm.xlu1 %9605, %v7725_v4   ;;  %v7417_v4 = vor.u32 %v9232_v26, %v7416_v31  ;;  %v7413_v1 = vor.u32 %v9229_v30, %v7410_v16  ;;  %v7432_v26 = vld [vmem:[%s14773_s3 + $0x70] sm:$0xf]  ;;  %v9236_v30 = vld [vmem:[%s14773_s3 + $0x74] sm:$0xf0] }
 0x130   : > { %2327 = vperm.xlu0 %9604, %v7724_v14   ;;  %v7717_v14 = vld [vmem:[%s14774_s4 + $0x1b8] sm:$0xff] }
 0x136   : > { %2322 = vperm.xlu2 %9606, %v7723_v6   ;;  %v10358_v6 = vpop.permute.xlu0 %972 }
 0x137   : > { %1263 = vmatmul.bf16.gmra.mxu1 %v7401_v12  ;;  %2317 = vperm.xlu1 %9605, %v7722_v23   ;;  %v7714_v12 = vld [vmem:[%s14774_s4 + $0x1a0] sm:$0xff]  ;;  %v7695_v23 = vld [vmem:[%s14774_s4 + $0x108] sm:$0xff] }
 0x138   : > { %2222 = vperm.xlu0 %9604, %v7703_v49   ;;  %v7694_v49 = vld [vmem:[%s14774_s4 + $0x100] sm:$0xff] }
 0x139   : > { %1347 = vmatmul.bf16.gmra.mxu2 %v7397_v25  ;;  %v10366_v25 = vpop.permute.xlu2 %1072 }
 0x13e   : > { %2307 = vperm.xlu2 %9606, %v7720_v52   ;;  %v7424_v52 = vld [vmem:[%s14773_s3 + $0x60] sm:$0xf] }
 0x13f   : > { %2212 = vperm.xlu1 %9605, %v7701_v55   ;;  %v9234_v55 = vld [vmem:[%s14773_s3 + $0x64] sm:$0xf0] }
 0x140   : > { %2207 = vperm.xlu0 %9604, %v7700_v42   ;;  %v9231_v42 = vld [vmem:[%s14773_s3 + $0x54] sm:$0xf]  ;;  %v7425_v44 = vor.u32 %v9234_v55, %v7424_v52  ;;  %v7898_v55 = vld [vmem:[%s9796_s11 + $0x260] sm:$0xff] }
 0x146   : > { %2202 = vperm.xlu2 %9606, %v7699_v20   ;;  %v7421_v20 = vor.u32 %v9231_v42, %v7418_v41  ;;  %v7915_v41 = vld [vmem:[%s9796_s11 + $0x2e8] sm:$0xff] }
 0x147   : > { %1268 = vmatmul.bf16.gmra.mxu1 %v7409_v59  ;;  %2197 = vperm.xlu1 %9605, %v7698_v2   ;;  %v7715_v59 = vld [vmem:[%s14774_s4 + $0x1a8] sm:$0xff]  ;;  %v10389_v2 = vpop.permute.xlu0 %1077 }
 0x148   : > { %2312 = vperm.xlu0 %9604, %v7721_v18   ;;  %v10391_v18 = vpop.permute.xlu2 %967 }
 0x149   : > { %1352 = vmatmul.bf16.gmra.mxu2 %v7405_v7  ;;  %v7916_v7 = vld [vmem:[%s9796_s11 + $0x2f0] sm:$0xff] }
 0x14e   : > { %2187 = vperm.xlu2 %9606, %v7696_v32   ;;  %v7711_v32 = vld [vmem:[%s14774_s4 + $0x188] sm:$0xff] }
 0x14f   : > { %2302 = vperm.xlu1 %9605, %v7719_v5   ;;  %v7710_v5 = vld [vmem:[%s14774_s4 + $0x180] sm:$0xff]  ;;  %v10402_v31 = vpop.permute.xlu0 %1062 }
 0x150   : > { %2297 = vperm.xlu0 %9604, %v7718_v22   ;;  %v10400_v22 = vpop.permute.xlu1 %982  ;;  %v10410_v16 = vpop.permute.xlu2 %952 }
 0x156   : > { %2292 = vperm.xlu2 %9606, %v7717_v14   ;;  %v7426_v14 = vld [vmem:[%s14773_s3 + $0x68] sm:$0xf0] }
 0x157   : > { %1273 = vmatmul.bf16.gmra.mxu1 %v7417_v4  ;;  %2287 = vperm.xlu1 %9605, %v7716_v45   ;;  %v9233_v4 = vld [vmem:[%s14773_s3 + $0x64] sm:$0xf]  ;;  %v7433_v45 = vor.u32 %v9236_v30, %v7432_v26  ;;  %v10423_v52 = vpop.permute.xlu0 %957 }
 0x158   : > { %2192 = vperm.xlu0 %9604, %v7697_v46   ;;  %v7901_v46 = vld [vmem:[%s9796_s11 + $0x278] sm:$0xff]  ;;  %v10426_v42 = vpop.permute.xlu2 %1057 }
 0x159   : > { %1357 = vmatmul.bf16.gmra.mxu2 %v7413_v1  ;;  %v7900_v1 = vld [vmem:[%s9796_s11 + $0x270] sm:$0xff] }
 0x15e   : > { %2277 = vperm.xlu2 %9606, %v7714_v12   ;;  %v7917_v12 = vld [vmem:[%s9796_s11 + $0x2f8] sm:$0xff] }
 0x15f   : > { %2182 = vperm.xlu1 %9605, %v7695_v23   ;;  %v7429_v23 = vor.u32 %v9233_v4, %v7426_v14  ;;  %v10445_v26 = vpop.permute.xlu0 %942  ;;  %v7912_v4 = vld [vmem:[%s9796_s11 + $0x2d0] sm:$0xff]  ;;  %v7899_v14 = vld [vmem:[%s9796_s11 + $0x268] sm:$0xff] }
 0x160   : > { %2177 = vperm.xlu0 %9604, %v7694_v49   ;;  %v10421_v49 = vpop.permute.xlu1 %977 }
 0x166   : > { %2272 = vperm.xlu2 %9606, %v7713_v56   ;;  %v7440_v56 = vld [vmem:[%s14773_s3 + $0x80] sm:$0xf] }
 0x167   : > { %1278 = vmatmul.bf16.gmra.mxu1 %v7425_v44  ;;  %2267 = vperm.xlu1 %9605, %v7712_v0   ;;  %v7914_v44 = vld [vmem:[%s9796_s11 + $0x2e0] sm:$0xff]  ;;  %v9238_v0 = vld [vmem:[%s14773_s3 + $0x84] sm:$0xf0] }
 0x168   : > { %2282 = vperm.xlu0 %9604, %v7715_v59   ;;  %v10436_v59 = vpop.permute.xlu1 %962 }
 0x169   : > { %1362 = vmatmul.bf16.gmra.mxu2 %v7421_v20  ;;  %v9235_v20 = vld [vmem:[%s14773_s3 + $0x74] sm:$0xf] }
 0x16e   : > { %2939 = vperm.xlu2 %9606, %v7916_v7   ;;  %v7434_v7 = vld [vmem:[%s14773_s3 + $0x78] sm:$0xf0] }
 0x16f   : > { %2262 = vperm.xlu1 %9605, %v7711_v32   ;;  %v7441_v32 = vor.u32 %v9238_v0, %v7440_v56  ;;  %v7448_v0 = vld [vmem:[%s14773_s3 + $0x90] sm:$0xf] }
 0x170   : > { %2257 = vperm.xlu0 %9604, %v7710_v5   ;;  %v7913_v5 = vld [vmem:[%s9796_s11 + $0x2d8] sm:$0xff] }
 0x176   : > { %2864 = vperm.xlu2 %9606, %v7901_v46   ;;  %v10449_v46 = vpop.permute.xlu2 %1042 }
 0x177   : > { %1283 = vmatmul.bf16.gmra.mxu1 %v7433_v45  ;;  %2859 = vperm.xlu1 %9605, %v7900_v1   ;;  %v7437_v45 = vor.u32 %v9235_v20, %v7434_v7  ;;  %v7910_v1 = vld [vmem:[%s9796_s11 + $0x2c0] sm:$0xff]  ;;  %v9240_v20 = vld [vmem:[%s14773_s3 + $0x94] sm:$0xf0] }
 0x178   : > { %2944 = vperm.xlu0 %9604, %v7917_v12   ;;  %v10452_v12 = vpop.permute.xlu1 %1067  ;;  %v9237_v7 = vld [vmem:[%s14773_s3 + $0x84] sm:$0xf] }
 0x179   : > { %1367 = vmatmul.bf16.gmra.mxu2 %v7429_v23 }
 0x17e   : > { %2849 = vperm.xlu2 %9606, %v7898_v55   ;;  %v7897_v55 = vld [vmem:[%s9796_s11 + $0x258] sm:$0xff]  ;;  %v10458_v56 = vpop.permute.xlu2 %937 }
 0x17f   : > { %2934 = vperm.xlu1 %9605, %v7915_v41   ;;  %v7896_v41 = vld [vmem:[%s9796_s11 + $0x250] sm:$0xff] }
 0x180   : > { %2929 = vperm.xlu0 %9604, %v7914_v44   ;;  %v10456_v44 = vpop.permute.xlu0 %1047 }
 0x184   : > { %v1249_v30 = vpop.f32.mrf.mxu1 }
 0x186   : > { %2924 = vperm.xlu2 %9606, %v7913_v5   ;;  %v7449_v5 = vor.u32 %v9240_v20, %v7448_v0  ;;  %v923_v21 = vpop.permute.xlu2 %922 }
 0x187   : > { %1288 = vmatmul.bf16.gmra.mxu1 %v7441_v32  ;;  %2919 = vperm.xlu1 %9605, %v7912_v4   ;;  %v7442_v32 = vld [vmem:[%s14773_s3 + $0x88] sm:$0xf0]  ;;  %v1250_v24 = vadd.f32 %v1249_v30, %v923_v21  ;;  %v9242_v21 = vld [vmem:[%s14773_s3 + $0xa4] sm:$0xf0] }
 0x188   : > { %2854 = vperm.xlu0 %9604, %v7899_v14   ;;  %v7895_v4 = vld [vmem:[%s9796_s11 + $0x248] sm:$0xff]  ;;  %v10477_v29 = vpop.permute.xlu0 %1032 }
 0x189   : > { %1372 = vmatmul.bf16.gmra.mxu2 %v7437_v45  ;;  %v7894_v45 = vld [vmem:[%s9796_s11 + $0x240] sm:$0xff] }
 0x18c   : > { %v1251_v23 = vpop.f32.mrf.mxu1 }
 0x18e   : > { %2909 = vperm.xlu2 %9606, %v7910_v1   ;;  %v7911_v1 = vld [vmem:[%s9796_s11 + $0x2c8] sm:$0xff] }
 0x18f   : > { %2844 = vperm.xlu1 %9605, %v7897_v55   ;;  %v7445_v55 = vor.u32 %v9237_v7, %v7442_v32  ;;  %v7456_v32 = vld [vmem:[%s14773_s3 + $0xa0] sm:$0xf] }
 0x190   : > { %2839 = vperm.xlu0 %9604, %v7896_v41   ;;  %v10475_v41 = vpop.permute.xlu1 %1052  ;;  %v928_v30 = vpop.permute.xlu0 %927 }
 0x194   : > { %v1254_v14 = vpop.f32.mrf.mxu1 }
 0x196   : > { %2834 = vperm.xlu2 %9606, %v7895_v4  }
 0x197   : > { %1293 = vmatmul.bf16.gmra.mxu1 %v7449_v5  ;;  %2829 = vperm.xlu1 %9605, %v7894_v45   ;;  %v7457_v5 = vor.u32 %v9242_v21, %v7456_v32  ;;  %v7904_v21 = vld [vmem:[%s9796_s11 + $0x290] sm:$0xff] }
 0x198   : > { %2914 = vperm.xlu0 %9604, %v7911_v1   ;;  %v10482_v7 = vpop.permute.xlu1 %947  ;;  %v7906_v1 = vld [vmem:[%s9796_s11 + $0x2a0] sm:$0xff] }
 0x199   : > { %1377 = vmatmul.bf16.gmra.mxu2 %v7445_v55 }
 0x19c   : > { %v1256_v0 = vpop.f32.mrf.mxu1  ;;  %v1338_v20 = vpop.f32.mrf.mxu2 }
 0x19d   : > { %v1339_v47 = vadd.f32 %v1338_v20, %v1250_v24  ;;  %v9239_v24 = vld [vmem:[%s14773_s3 + $0x94] sm:$0xf]  ;;  %v7893_v20 = vld [vmem:[%s9796_s11 + $0x238] sm:$0xff] }
 0x19e   : > { %2819 = vperm.xlu2 %9606, %v7892_v28   ;;  %v1252_v28 = vadd.f32 %v1251_v23, %v928_v30 }
 0x19f   : > { %2904 = vperm.xlu1 %9605, %v7909_v33   ;;  %v7450_v33 = vld [vmem:[%s14773_s3 + $0x98] sm:$0xf0]  ;;  %v1418_v13 = vmax.f32 %v1339_v47, 0.0  ;;  %v1257_v47 = vadd.f32 %v1256_v0, %v10458_v56  ;;  %v7886_v0 = vld [vmem:[%s9796_s11 + $0x200] sm:$0xff] }
 0x1a0   : > { %2899 = vperm.xlu0 %9604, %v7908_v58   ;;  %v7907_v58 = vld [vmem:[%s9796_s11 + $0x2a8] sm:$0xff]  ;;  %v7453_v61 = vor.u32 %v9239_v24, %v7450_v33  ;;  %v933_v23 = vpop.permute.xlu1 %932  ;;  %v7890_v24 = vld [vmem:[%s9796_s11 + $0x220] sm:$0xff]  ;;  %v7889_v33 = vld [vmem:[%s9796_s11 + $0x218] sm:$0xff] }
 0x1a1   : > { %v1255_v32 = vadd.f32 %v1254_v14, %v933_v23 }
 0x1a4   : > { %v1259_v4 = vpop.f32.mrf.mxu1  ;;  %v1340_v45 = vpop.f32.mrf.mxu2 }
 0x1a5   : > { %v1341_v55 = vadd.f32 %v1340_v45, %v1252_v28  ;;  %v7891_v28 = vld [vmem:[%s9796_s11 + $0x228] sm:$0xff]  ;;  %v1260_v56 = vadd.f32 %v1259_v4, %v10445_v26  ;;  %v9243_v26 = vld [vmem:[%s14773_s3 + $0xb4] sm:$0xf]  ;;  %v7466_v4 = vld [vmem:[%s14773_s3 + $0xb8] sm:$0xf0] }
 0x1a6   : > { %2894 = vperm.xlu2 %9606, %v7907_v58  }
 0x1a7   : > { %v1419_v15 = vmax.f32 %v1341_v55, 0.0  ;;  %1298 = vmatmul.bf16.gmra.mxu1 %v7457_v5  ;;  %2889 = vperm.xlu1 %9605, %v7906_v1   ;;  %v7888_v1 = vld [vmem:[%s9796_s11 + $0x210] sm:$0xff] }
 0x1a8   : > { %2824 = vperm.xlu0 %9604, %v7893_v20   ;;  %v7905_v20 = vld [vmem:[%s9796_s11 + $0x298] sm:$0xff] }
 0x1a9   : > { %1382 = vmatmul.bf16.gmra.mxu2 %v7453_v61  ;;  %v10499_v9 = vpack.c.bf16 %v1419_v15, %v1418_v13  ;;  %v7464_v61 = vld [vmem:[%s14773_s3 + $0xb0] sm:$0xf]  ;;  %v9244_v15 = vld [vmem:[%s14773_s3 + $0xb4] sm:$0xf0]  ;;  %v9241_v13 = vld [vmem:[%s14773_s3 + $0xa4] sm:$0xf] }
 0x1aa   : > { %v7465_v14 = vor.u32 %v9244_v15, %v7464_v61  ;;  %v7903_v15 = vld [vmem:[%s9796_s11 + $0x288] sm:$0xff] }
 0x1ac   : > { %v1261_v30 = vpop.f32.mrf.mxu1  ;;  %v1343_v10 = vpop.f32.mrf.mxu2 }
 0x1ad   : > { %v1344_v45 = vadd.f32 %v1343_v10, %v1255_v32  ;;  %v7458_v10 = vld [vmem:[%s14773_s3 + $0xa8] sm:$0xf0] }
 0x1ae   : > { %2879 = vperm.xlu2 %9606, %v7904_v21   ;;  %v7461_v23 = vor.u32 %v9241_v13, %v7458_v10  ;;  %v9246_v13 = vld [vmem:[%s14773_s3 + $0xc4] sm:$0xf0]  ;;  %v1262_v10 = vadd.f32 %v1261_v30, %v10482_v7 }
 0x1af   : > { %2814 = vperm.xlu1 %9605, %v7891_v28   ;;  %v1420_v32 = vmax.f32 %v1344_v45, 0.0  ;;  %v7472_v45 = vld [vmem:[%s14773_s3 + $0xc0] sm:$0xf] }
 0x1b0   : > { %2809 = vperm.xlu0 %9604, %v7890_v24  }
 0x1b4   : > { %v1264_v5 = vpop.f32.mrf.mxu1  ;;  %v1345_v58 = vpop.f32.mrf.mxu2 }
 0x1b5   : > { %v1346_v55 = vadd.f32 %v1345_v58, %v1257_v47  ;;  %v7902_v47 = vld [vmem:[%s9796_s11 + $0x280] sm:$0xff]  ;;  %v1265_v30 = vadd.f32 %v1264_v5, %v10410_v16  ;;  %v7480_v16 = vld [vmem:[%s14773_s3 + $0xd0] sm:$0xf]  ;;  %v9248_v5 = vld [vmem:[%s14773_s3 + $0xd4] sm:$0xf0] }
 0x1b6   : > { %2804 = vperm.xlu2 %9606, %v7889_v33   ;;  %v8093_v33 = vld [vmem:[%s14774_s4 + $0x278] sm:$0xff] }
 0x1b7   : > { %v1421_v21 = vmax.f32 %v1346_v55, 0.0  ;;  %1303 = vmatmul.bf16.gmra.mxu1 %v7465_v14  ;;  %2799 = vperm.xlu1 %9605, %v7888_v1   ;;  %v7473_v14 = vor.u32 %v9246_v13, %v7472_v45  ;;  %v8092_v55 = vld [vmem:[%s14774_s4 + $0x270] sm:$0xff]  ;;  %v8090_v45 = vld [vmem:[%s14774_s4 + $0x260] sm:$0xff]  ;;  %v10566_v13 = vpop.permute.xlu1 %1037 }
 0x1b8   : > { %2884 = vperm.xlu0 %9604, %v7905_v20  }
 0x1b9   : > { %1387 = vmatmul.bf16.gmra.mxu2 %v7461_v23  ;;  %v10520_v28 = vpack.c.bf16 %v1421_v21, %v1420_v32  ;;  %v7887_v23 = vld [vmem:[%s9796_s11 + $0x208] sm:$0xff]  ;;  %v7469_v32 = vor.u32 %v9243_v26, %v7466_v4  ;;  %v9245_v26 = vld [vmem:[%s14773_s3 + $0xc4] sm:$0xf] }
 0x1ba   : > { %v7474_v4 = vld [vmem:[%s14773_s3 + $0xc8] sm:$0xf0] }
 0x1bc   : > { %v1266_v24 = vpop.f32.mrf.mxu1  ;;  %v1348_v61 = vpop.f32.mrf.mxu2 }
 0x1bd   : > { %v1349_v60 = vadd.f32 %v1348_v61, %v1260_v56 }
 0x1be   : > { %2789 = vperm.xlu2 %9606, %v7886_v0   ;;  %v8088_v0 = vld [vmem:[%s14774_s4 + $0x250] sm:$0xff] }
 0x1bf   : > { %2874 = vperm.xlu1 %9605, %v7903_v15   ;;  %v1422_v21 = vmax.f32 %v1349_v60, 0.0  ;;  %v8091_v60 = vld [vmem:[%s14774_s4 + $0x268] sm:$0xff] }
 0x1c0   : > { %2869 = vperm.xlu0 %9604, %v7902_v47  }
 0x1c4   : > { %v1269_v58 = vpop.f32.mrf.mxu1  ;;  %v1350_v1 = vpop.f32.mrf.mxu2 }
 0x1c5   : > { %v1351_v20 = vadd.f32 %v1350_v1, %v1262_v10  ;;  %v1267_v10 = vadd.f32 %v1266_v24, %v10423_v52 }
 0x1c6   : > { %3508 = vperm.xlu2 %9606, %v8093_v33   ;;  %v8109_v33 = vld [vmem:[%s14774_s4 + $0x2f8] sm:$0xff] }
 0x1c7   : > { %v1423_v56 = vmax.f32 %v1351_v20, 0.0  ;;  %1308 = vmatmul.bf16.gmra.mxu1 %v7473_v14  ;;  %3503 = vperm.xlu1 %9605, %v8092_v55   ;;  %v7481_v14 = vor.u32 %v9248_v5, %v7480_v16  ;;  %v8108_v20 = vld [vmem:[%s14774_s4 + $0x2f0] sm:$0xff]  ;;  %v10599_v16 = vpop.permute.xlu2 %1027 }
 0x1c8   : > { %2794 = vperm.xlu0 %9604, %v7887_v23  }
 0x1c9   : > { %1392 = vmatmul.bf16.gmra.mxu2 %v7469_v32  ;;  %v10546_v7 = vpack.c.bf16 %v1423_v56, %v1422_v21  ;;  %v8089_v32 = vld [vmem:[%s14774_s4 + $0x258] sm:$0xff]  ;;  %v7477_v21 = vor.u32 %v9245_v26, %v7474_v4  ;;  %v8086_v26 = vld [vmem:[%s14774_s4 + $0x240] sm:$0xff]  ;;  %v9247_v4 = vld [vmem:[%s14773_s3 + $0xd4] sm:$0xf] }
 0x1cc   : > { %v10552_v61 = vpop.f32.mrf.mxu1  ;;  %v1353_v15 = vpop.f32.mrf.mxu2 }
 0x1cd   : > { %v1354_v47 = vadd.f32 %v1353_v15, %v1265_v30  ;;  %v10588_v30 = vpop.permute.xlu1 %1022  ;;  %v8106_v15 = vld [vmem:[%s14774_s4 + $0x2e0] sm:$0xff] }
 0x1ce   : > { %3483 = vperm.xlu2 %9606, %v8088_v0   ;;  %v1270_v0 = vadd.f32 %v1269_v58, %v10436_v59  ;;  %v7488_v59 = vld [vmem:[%s14773_s3 + $0xe0] sm:$0xf]  ;;  %v9250_v58 = vld [vmem:[%s14773_s3 + $0xe4] sm:$0xf0] }
 0x1cf   : > { %3498 = vperm.xlu1 %9605, %v8091_v60   ;;  %v1424_v52 = vmax.f32 %v1354_v47, 0.0  ;;  %v8087_v47 = vld [vmem:[%s14774_s4 + $0x248] sm:$0xff] }
 0x1d0   : > { %3493 = vperm.xlu0 %9604, %v8090_v45  }
 0x1d4   : > { %v10578_v1 = vpop.f32.mrf.mxu1  ;;  %v1355_v55 = vpop.f32.mrf.mxu2 }
 0x1d5   : > { %v1356_v23 = vadd.f32 %v1355_v55, %v1267_v10  ;;  %v7482_v10 = vld [vmem:[%s14773_s3 + $0xd8] sm:$0xf0] }
 0x1d6   : > { %3588 = vperm.xlu2 %9606, %v8109_v33   ;;  %v8085_v33 = vld [vmem:[%s14774_s4 + $0x238] sm:$0xff] }
 0x1d7   : > { %v1425_v24 = vmax.f32 %v1356_v23, 0.0  ;;  %1313 = vmatmul.bf16.gmra.mxu1 %v7481_v14  ;;  %3583 = vperm.xlu1 %9605, %v8108_v20   ;;  %v7489_v14 = vor.u32 %v9250_v58, %v7488_v59  ;;  %v8084_v23 = vld [vmem:[%s14774_s4 + $0x230] sm:$0xff] }
 0x1d8   : > { %3488 = vperm.xlu0 %9604, %v8089_v32   ;;  %v10628_v32 = vpop.permute.xlu1 %1017  ;;  %v8104_v59 = vld [vmem:[%s14774_s4 + $0x2d0] sm:$0xff] }
 0x1d9   : > { %1397 = vmatmul.bf16.gmra.mxu2 %v7477_v21  ;;  %v10586_v56 = vpack.c.bf16 %v1425_v24, %v1424_v52  ;;  %v8107_v21 = vld [vmem:[%s14774_s4 + $0x2e8] sm:$0xff]  ;;  %v7485_v52 = vor.u32 %v9247_v4, %v7482_v10  ;;  %v10633_v24 = vpop.permute.xlu2 %1002  ;;  %v7496_v4 = vld [vmem:[%s14773_s3 + $0xf0] sm:$0xf]  ;;  %v9252_v10 = vld [vmem:[%s14773_s3 + $0xf4] sm:$0xf0] }
 0x1dc   : > { %v10594_v60 = vpop.f32.mrf.mxu1  ;;  %v1358_v45 = vpop.f32.mrf.mxu2 }
 0x1dd   : > { %v10601_v5 = vadd.f32 %v1358_v45, %v1270_v0  ;;  %v10635_v0 = vpop.permute.xlu0 %1012 }
 0x1de   : > { %3573 = vperm.xlu2 %9606, %v8106_v15   ;;  %v8082_v15 = vld [vmem:[%s14774_s4 + $0x220] sm:$0xff] }
 0x1df   : > { %3478 = vperm.xlu1 %9605, %v8087_v47  }
 0x1e0   : > { %3473 = vperm.xlu0 %9604, %v8086_v26   ;;  %v8105_v26 = vld [vmem:[%s14774_s4 + $0x2d8] sm:$0xff]  ;;  %v10650_v58 = vpop.permute.xlu1 %1683 }
 0x1e1   : > { %14924 = vst [vmem:[#allocation36_spill] sm:$0xff] %v10650_v58  ;;  %v8100_v58 = vld [vmem:[%s14774_s4 + $0x2b0] sm:$0xff] }
 0x1e4   : > { %v10621_v55 = vpop.f32.mrf.mxu1  ;;  %v10623_v20 = vpop.f32.mrf.mxu2 }
 0x1e6   : > { %3468 = vperm.xlu2 %9606, %v8085_v33   ;;  %v10660_v33 = vpop.permute.xlu0 %1007 }
 0x1e7   : > { %1318 = vmatmul.bf16.gmra.mxu1 %v7489_v14  ;;  %3463 = vperm.xlu1 %9605, %v8084_v23   ;;  %v10658_v14 = vpop.permute.xlu2 %1688  ;;  %v9249_v23 = vld [vmem:[%s14773_s3 + $0xe4] sm:$0xf] }
 0x1e8   : > { %3578 = vperm.xlu0 %9604, %v8107_v21   ;;  %14925 = vst [vmem:[#allocation37_spill] sm:$0xff] %v10658_v14  ;;  %v7490_v21 = vld [vmem:[%s14773_s3 + $0xe8] sm:$0xf0] }
 0x1e9   : > { %1402 = vmatmul.bf16.gmra.mxu2 %v7485_v52  ;;  %v7497_v52 = vor.u32 %v9252_v10, %v7496_v4  ;;  %v7493_v37 = vor.u32 %v9249_v23, %v7490_v21  ;;  %v10679_v4 = vpop.permute.xlu1 %1608  ;;  %v8081_v23 = vld [vmem:[%s14774_s4 + $0x218] sm:$0xff] }
 0x1ec   : > { %v10640_v45 = vpop.f32.mrf.mxu1  ;;  %v10642_v47 = vpop.f32.mrf.mxu2 }
 0x1ee   : > { %3453 = vperm.xlu2 %9606, %v8082_v15   ;;  %v8103_v15 = vld [vmem:[%s14774_s4 + $0x2c8] sm:$0xff]  ;;  %v10683_v14 = vpop.permute.xlu0 %1603 }
 0x1ef   : > { %3568 = vperm.xlu1 %9605, %v8105_v26   ;;  %v10681_v10 = vpop.permute.xlu2 %1673 }
 0x1f0   : > { %3563 = vperm.xlu0 %9604, %v8104_v59   ;;  %14926 = vst [vmem:[#allocation38_spill] sm:$0xff] %v10681_v10 }
 0x1f1   : > { %v10700_v21 = vpop.permute.xlu1 %1593 }
 0x1f4   : > { %v1284_v26 = vpop.f32.mrf.mxu1  ;;  %v10671_v59 = vpop.f32.mrf.mxu2 }
 0x1f6   : > { %3558 = vperm.xlu2 %9606, %v8103_v15  }
 0x1f7   : > { %1323 = vmatmul.bf16.gmra.mxu1 %v7497_v52  ;;  %3553 = vperm.xlu1 %9605, %v8102_v8   ;;  %v7498_v8 = vld [vmem:[%s14773_s3 + $0xf8] sm:$0xf0]  ;;  %v8079_v52 = vld [vmem:[%s14774_s4 + $0x208] sm:$0xff] }
 0x1f8   : > { %3458 = vperm.xlu0 %9604, %v8083_v53   ;;  %v8080_v53 = vld [vmem:[%s14774_s4 + $0x210] sm:$0xff] }
 0x1f9   : > { %1407 = vmatmul.bf16.gmra.mxu2 %v7493_v37  ;;  %v9251_v37 = vld [vmem:[%s14773_s3 + $0xf4] sm:$0xf]  ;;  %v10723_v17 = vpop.permute.xlu1 %1668 }
 0x1fa   : > { %v7501_v63 = vor.u32 %v9251_v37, %v7498_v8  ;;  %14928 = vst [vmem:[#allocation40_spill] sm:$0xff] %v10723_v17  ;;  %v8098_v37 = vld [vmem:[%s14774_s4 + $0x2a0] sm:$0xff]  ;;  %v1285_v8 = vadd.f32 %v1284_v26, %v10319_v3  ;;  %v8095_v17 = vld [vmem:[%s14774_s4 + $0x288] sm:$0xff] }
 0x1fc   : > { %v1286_v36 = vpop.f32.mrf.mxu1  ;;  %v1368_v38 = vpop.f32.mrf.mxu2 }
 0x1fe   : > { %3543 = vperm.xlu2 %9606, %v8100_v58   ;;  %v8078_v58 = vld [vmem:[%s14774_s4 + $0x200] sm:$0xff] }
 0x1ff   : > { %3448 = vperm.xlu1 %9605, %v8081_v23   ;;  %v10708_v23 = vpop.permute.xlu2 %1598 }
 0x200   : > { %3443 = vperm.xlu0 %9604, %v8080_v53   ;;  %v10710_v53 = vpop.permute.xlu0 %1678 }
 0x201   : > { %14927 = vst [vmem:[#allocation39_spill] sm:$0xff] %v10710_v53  ;;  %v8099_v53 = vld [vmem:[%s14774_s4 + $0x2a8] sm:$0xff] }
 0x204   : > { %v1289_v15 = vpop.f32.mrf.mxu1  ;;  %v1370_v10 = vpop.f32.mrf.mxu2 }
 0x206   : > { %3438 = vperm.xlu2 %9606, %v8079_v52   ;;  %v1282_v52 = vadd.f32 %v10640_v45, %v10347_v40 }
 0x207   : > { %3433 = vperm.xlu1 %9605, %v8078_v58   ;;  %v1287_v58 = vadd.f32 %v1286_v36, %v10336_v39  ;;  %v8097_v36 = vld [vmem:[%s14774_s4 + $0x298] sm:$0xff]  ;;  %v1277_v39 = vadd.f32 %v10594_v60, %v10421_v49  ;;  %v1290_v60 = vadd.f32 %v1289_v15, %v10633_v24 }
 0x208   : > { %3548 = vperm.xlu0 %9604, %v8101_v48   ;;  %v10728_v48 = vpop.permute.xlu2 %1583  ;;  %v1371_v3 = vadd.f32 %v1370_v10, %v1282_v52  ;;  %v1275_v10 = vadd.f32 %v10578_v1, %v10358_v6 }
 0x209   : > { %1412 = vmatmul.bf16.gmra.mxu2 %v7501_v63  ;;  %v10730_v63 = vpop.permute.xlu0 %1663 }
 0x20a   : > { %14929 = vst [vmem:[#allocation41_spill] sm:$0xff] %v10730_v63  ;;  %v8094_v63 = vld [vmem:[%s14774_s4 + $0x280] sm:$0xff] }
 0x20c   : > { %v10718_v34 = vpop.f32.mrf.mxu1  ;;  %v1373_v11 = vpop.f32.mrf.mxu2 }
 0x20d   : > { %v1374_v57 = vadd.f32 %v1373_v11, %v1285_v8  ;;  %v10747_v11 = vpop.permute.xlu1 %1653  ;;  %v1431_v8 = vmax.f32 %v1371_v3, 0.0 }
 0x20e   : > { %3523 = vperm.xlu2 %9606, %v8096_v62   ;;  %14930 = vst [vmem:[#allocation42_spill] sm:$0xff] %v10747_v11 }
 0x20f   : > { %3538 = vperm.xlu1 %9605, %v8099_v53   ;;  %v1280_v53 = vadd.f32 %v10621_v55, %v10400_v22  ;;  %v1432_v45 = vmax.f32 %v1374_v57, 0.0  ;;  %v1364_v57 = vadd.f32 %v10642_v47, %v1275_v10 }
 0x210   : > { %3533 = vperm.xlu0 %9604, %v8098_v37   ;;  %v10751_v22 = vpop.permute.xlu2 %1658 }
 0x211   : > { %v1369_v40 = vadd.f32 %v1368_v38, %v1280_v53  ;;  %14931 = vst [vmem:[#allocation43_spill] sm:$0xff] %v10751_v22  ;;  %v10753_v55 = vpop.permute.xlu0 %1588  ;;  %v1272_v38 = vadd.f32 %v10552_v61, %v10391_v18  ;;  %v8301_v53 = vld [vmem:[%s9796_s11 + $0x3f8] sm:$0xff]  ;;  %v1428_v18 = vmax.f32 %v1364_v57, 0.0 }
 0x212   : > { %v8289_v22 = vld [vmem:[%s9796_s11 + $0x398] sm:$0xff] }
 0x213   : > { %v1430_v49 = vmax.f32 %v1369_v40, 0.0  ;;  %v1361_v6 = vadd.f32 %v10623_v20, %v1272_v38 }
 0x214   : > { %v1294_v19 = vpop.f32.mrf.mxu1  ;;  %v1375_v62 = vpop.f32.mrf.mxu2 }
 0x215   : > { %v1376_v26 = vadd.f32 %v1375_v62, %v1287_v58  ;;  %v1456_v3 = vpack.c.bf16 %v1431_v8, %v1430_v49  ;;  %v10770_v61 = vpop.permute.xlu1 %1578  ;;  %v1427_v24 = vmax.f32 %v1361_v6, 0.0  ;;  %v8283_v49 = vld [vmem:[%s9796_s11 + $0x368] sm:$0xff] }
 0x216   : > { %3518 = vperm.xlu2 %9606, %v8095_v17   ;;  %v1366_v17 = vadd.f32 %v10671_v59, %v1277_v39  ;;  %14932 = vst [vmem:[#allocation44_spill] sm:$0xff] %v10770_v61  ;;  %v8299_v39 = vld [vmem:[%s9796_s11 + $0x3e8] sm:$0xff] }
 0x217   : > { %v1433_v37 = vmax.f32 %v1376_v26, 0.0  ;;  %3513 = vperm.xlu1 %9605, %v8094_v63   ;;  %v8284_v63 = vld [vmem:[%s9796_s11 + $0x370] sm:$0xff] }
 0x218   : > { %3528 = vperm.xlu0 %9604, %v8097_v36   ;;  %v1429_v1 = vmax.f32 %v1366_v17, 0.0  ;;  %v8300_v26 = vld [vmem:[%s9796_s11 + $0x3f0] sm:$0xff]  ;;  %v10772_v15 = vpop.permute.xlu2 %1643  ;;  %v1426_v36 = vmax.f32 %v10601_v5, 0.0  ;;  %v8285_v17 = vld [vmem:[%s9796_s11 + $0x378] sm:$0xff] }
 0x219   : > { %v1457_v52 = vpack.c.bf16 %v1433_v37, %v1432_v45  ;;  %14933 = vst [vmem:[#allocation45_spill] sm:$0xff] %v10772_v15  ;;  %v10774_v20 = vpop.permute.xlu0 %1573  ;;  %v8298_v37 = vld [vmem:[%s9796_s11 + $0x3e0] sm:$0xff]  ;;  %v8296_v5 = vld [vmem:[%s9796_s11 + $0x3d0] sm:$0xff] }
 0x21a   : > { %v1455_v47 = vpack.c.bf16 %v1429_v1, %v1428_v18  ;;  %v1454_v10 = vpack.c.bf16 %v1427_v24, %v1426_v36  ;;  %v8280_v1 = vld [vmem:[%s9796_s11 + $0x350] sm:$0xff]  ;;  %v8278_v36 = vld [vmem:[%s9796_s11 + $0x340] sm:$0xff] }
 0x21b   : > { %1851 = vmatpush.bf16.msrb.mxu3 %v1457_v52  ;;  %v1295_v52 = vadd.f32 %v1294_v19, %v10635_v0  ;;  %v8281_v19 = vld [vmem:[%s9796_s11 + $0x358] sm:$0xff]  ;;  %v9254_v0 = vld [vmem:[%s14775_s5 + $0x4] sm:$0xf0] }
 0x21c   : > { %v10763_v58 = vpop.f32.mrf.mxu1  ;;  %v1378_v62 = vpop.f32.mrf.mxu2 }
 0x21d   : > { %v10767_v59 = vadd.f32 %v1378_v62, %v1290_v60  ;;  %v10782_v8 = vpop.permute.xlu1 %1563  ;;  %v8282_v62 = vld [vmem:[%s9796_s11 + $0x360] sm:$0xff] }
 0x21e   : > { %4115 = vperm.xlu2 %9606, %v8284_v63  }
 0x21f   : > { %1852 = vmatpush.bf16.msrb.mxu3 %v1456_v3  ;;  %4200 = vperm.xlu1 %9605, %v8301_v53  }
 0x220   : > { %4195 = vperm.xlu0 %9604, %v8300_v26   ;;  %v10790_v60 = vpop.permute.xlu2 %1568 }
 0x221   : > { %v10795_v53 = vpop.permute.xlu0 %1648 }
 0x222   : > { %14934 = vst [vmem:[#allocation46_spill] sm:$0xff] %v10795_v53 }
 0x223   : > { %1853 = vmatpush.bf16.msrb.mxu3 %v1455_v47 }
 0x224   : > { %v1299_v40 = vpop.f32.mrf.mxu1  ;;  %v10778_v45 = vpop.f32.mrf.mxu2 }
 0x225   : > { %v10809_v3 = vpop.permute.xlu1 %1638  ;;  %v1300_v47 = vadd.f32 %v1299_v40, %v10588_v30  ;;  %v8293_v30 = vld [vmem:[%s9796_s11 + $0x3b8] sm:$0xff]  ;;  %v7544_v40 = vld [vmem:[%s14775_s5 + $0x10] sm:$0xf] }
 0x226   : > { %4190 = vperm.xlu2 %9606, %v8299_v39   ;;  %14935 = vst [vmem:[#allocation47_spill] sm:$0xff] %v10809_v3  ;;  %v8272_v3 = vld [vmem:[%s9796_s11 + $0x310] sm:$0xff] }
 0x227   : > { %1854 = vmatpush.bf16.msrb.mxu3 %v1454_v10  ;;  %4185 = vperm.xlu1 %9605, %v8298_v37   ;;  %v8295_v37 = vld [vmem:[%s9796_s11 + $0x3c8] sm:$0xff] }
 0x228   : > { %4120 = vperm.xlu0 %9604, %v8285_v17   ;;  %v10812_v18 = vpop.permute.xlu2 %1553  ;;  %v8294_v17 = vld [vmem:[%s9796_s11 + $0x3c0] sm:$0xff] }
 0x229   : > { %v10815_v24 = vpop.permute.xlu0 %1633 }
 0x22a   : > { %14936 = vst [vmem:[#allocation48_spill] sm:$0xff] %v10815_v24  ;;  %v8288_v24 = vld [vmem:[%s9796_s11 + $0x390] sm:$0xff] }
 0x22b   : > { %1855 = vmatpush.bf16.msrb.mxu3 %v10586_v56  ;;  %v7536_v56 = vld [vmem:[%s14775_s5] sm:$0xf] }
 0x22c   : > { %v10787_v38 = vpop.f32.mrf.mxu1  ;;  %v1383_v57 = vpop.f32.mrf.mxu2 }
 0x22d   : > { %v10792_v63 = vadd.f32 %v1383_v57, %v1295_v52  ;;  %v10823_v52 = vpop.permute.xlu1 %1623 }
 0x22e   : > { %4175 = vperm.xlu2 %9606, %v8296_v5   ;;  %14937 = vst [vmem:[#allocation49_spill] sm:$0xff] %v10823_v52 }
 0x22f   : > { %1856 = vmatpush.bf16.msrb.mxu3 %v10546_v7  ;;  %4110 = vperm.xlu1 %9605, %v8283_v49   ;;  %v8297_v7 = vld [vmem:[%s9796_s11 + $0x3d8] sm:$0xff] }
 0x230   : > { %4105 = vperm.xlu0 %9604, %v8282_v62   ;;  %v10827_v5 = vpop.permute.xlu2 %1628  ;;  %v9256_v49 = vld [vmem:[%s14775_s5 + $0x14] sm:$0xf0] }
 0x231   : > { %14938 = vst [vmem:[#allocation50_spill] sm:$0xff] %v10827_v5  ;;  %v10829_v57 = vpop.permute.xlu0 %1558 }
 0x233   : > { %1857 = vmatpush.bf16.msrb.mxu3 %v10520_v28  ;;  %v7537_v28 = vor.u32 %v9254_v0, %v7536_v56  ;;  %v8279_v56 = vld [vmem:[%s9796_s11 + $0x348] sm:$0xff]  ;;  %v7545_v0 = vor.u32 %v9256_v49, %v7544_v40  ;;  %v8276_v40 = vld [vmem:[%s9796_s11 + $0x330] sm:$0xff] }
 0x234   : > { %v10806_v6 = vpop.f32.mrf.mxu2  ;;  %v1304_v26 = vpop.f32.mrf.mxu1 }
 0x236   : > { %4100 = vperm.xlu2 %9606, %v8281_v19   ;;  %v8292_v19 = vld [vmem:[%s9796_s11 + $0x3b0] sm:$0xff] }
 0x237   : > { %1858 = vmatpush.bf16.msrb.mxu3 %v10499_v9  ;;  %4095 = vperm.xlu1 %9605, %v8280_v1   ;;  %v10842_v1 = vpop.permute.xlu1 %1548 }
 0x238   : > { %4180 = vperm.xlu0 %9604, %v8297_v7  }
 0x23a   : > { %1859 = vmatmul.bf16.vlgmr.msrb.gmra.mxu3 %v7537_v28  ;;  %v10844_v28 = vpop.permute.xlu2 %1613 }
 0x23b   : > { %14939 = vst [vmem:[#allocation51_spill] sm:$0xff] %v10844_v28 }
 0x23c   : > { %v1388_v39 = vpop.f32.mrf.mxu2  ;;  %v10825_v9 = vpop.f32.mrf.mxu1 }
 0x23d   : > { %v10820_v10 = vadd.f32 %v1388_v39, %v1300_v47  ;;  %v1305_v47 = vadd.f32 %v1304_v26, %v10477_v29  ;;  %v10848_v39 = vpop.permute.xlu0 %1543  ;;  %v7552_v29 = vld [vmem:[%s14775_s5 + $0x20] sm:$0xf]  ;;  %v9258_v26 = vld [vmem:[%s14775_s5 + $0x24] sm:$0xf0] }
 0x23e   : > { %4085 = vperm.xlu2 %9606, %v8278_v36   ;;  %v8290_v36 = vld [vmem:[%s9796_s11 + $0x3a0] sm:$0xff] }
 0x23f   : > { %4170 = vperm.xlu1 %9605, %v8295_v37   ;;  %v10854_v49 = vpop.permute.xlu1 %1533 }
 0x240   : > { %4165 = vperm.xlu0 %9604, %v8294_v17   ;;  %v8277_v17 = vld [vmem:[%s9796_s11 + $0x338] sm:$0xff] }
 0x244   : > { %v10838_v62 = vpop.f32.mrf.mxu2  ;;  %v1309_v7 = vpop.f32.mrf.mxu1 }
 0x245   : > { %v1310_v5 = vadd.f32 %v1309_v7, %v10449_v46  ;;  %v8287_v46 = vld [vmem:[%s9796_s11 + $0x388] sm:$0xff]  ;;  %v7560_v7 = vld [vmem:[%s14775_s5 + $0x30] sm:$0xf] }
 0x246   : > { %4160 = vperm.xlu2 %9606, %v8293_v30  }
 0x247   : > { %4155 = vperm.xlu1 %9605, %v8292_v19   ;;  %v8275_v19 = vld [vmem:[%s9796_s11 + $0x328] sm:$0xff]  ;;  %v10876_v11 = vpop.permute.xlu1 %2252 }
 0x248   : > { %4090 = vperm.xlu0 %9604, %v8279_v56   ;;  %14941 = vst [vmem:[#allocation53_spill] sm:$0xff] %v10876_v11 }
 0x24a   : > { %1864 = vmatmul.bf16.gmra.mxu3 %v7545_v0 }
 0x24c   : > { %v1393_v37 = vpop.f32.mrf.mxu2  ;;  %v10863_v56 = vpop.f32.mrf.mxu1 }
 0x24d   : > { %v10851_v30 = vadd.f32 %v1393_v37, %v1305_v47  ;;  %v8274_v47 = vld [vmem:[%s9796_s11 + $0x320] sm:$0xff]  ;;  %v8291_v37 = vld [vmem:[%s9796_s11 + $0x3a8] sm:$0xff] }
 0x24e   : > { %4145 = vperm.xlu2 %9606, %v8290_v36   ;;  %v10868_v36 = vpop.permute.xlu2 %1538 }
 0x24f   : > { %4080 = vperm.xlu1 %9605, %v8277_v17   ;;  %v10871_v17 = vpop.permute.xlu0 %1618 }
 0x250   : > { %4075 = vperm.xlu0 %9604, %v8276_v40   ;;  %14940 = vst [vmem:[#allocation52_spill] sm:$0xff] %v10871_v17  ;;  %v7553_v40 = vor.u32 %v9258_v26, %v7552_v29  ;;  %v8273_v26 = vld [vmem:[%s9796_s11 + $0x318] sm:$0xff] }
 0x254   : > { %v10865_v0 = vpop.f32.mrf.mxu2  ;;  %v10881_v52 = vpop.f32.mrf.mxu1 }
 0x255   : > { %v1315_v54 = vadd.f32 %v10881_v52, %v10475_v41  ;;  %v8467_v52 = vld [vmem:[%s14774_s4 + $0x328] sm:$0xff] }
 0x256   : > { %4070 = vperm.xlu2 %9606, %v8275_v19   ;;  %v10883_v19 = vpop.permute.xlu2 %2237 }
 0x257   : > { %4065 = vperm.xlu1 %9605, %v8274_v47   ;;  %14942 = vst [vmem:[#allocation54_spill] sm:$0xff] %v10883_v19  ;;  %v10885_v29 = vpop.permute.xlu0 %2247  ;;  %v10898_v47 = vpop.permute.xlu1 %2227  ;;  %v8476_v19 = vld [vmem:[%s14774_s4 + $0x370] sm:$0xff] }
 0x258   : > { %4150 = vperm.xlu0 %9604, %v8291_v37   ;;  %14943 = vst [vmem:[#allocation55_spill] sm:$0xff] %v10885_v29  ;;  %v8271_v29 = vld [vmem:[%s9796_s11 + $0x308] sm:$0xff] }
 0x259   : > { %14944 = vst [vmem:[#allocation56_spill] sm:$0xff] %v10898_v47  ;;  %v9262_v47 = vld [vmem:[%s14775_s5 + $0x44] sm:$0xf0] }
 0x25a   : > { %1869 = vmatmul.bf16.gmra.mxu3 %v7553_v40 }
 0x25c   : > { %v1398_v53 = vpop.f32.mrf.mxu2 }
 0x25d   : > { %v10878_v15 = vadd.f32 %v1398_v53, %v1310_v5  ;;  %v9260_v53 = vld [vmem:[%s14775_s5 + $0x34] sm:$0xf0] }
 0x25e   : > { %4055 = vperm.xlu2 %9606, %v8272_v3   ;;  %v8286_v3 = vld [vmem:[%s9796_s11 + $0x380] sm:$0xff]  ;;  %v10902_v37 = vpop.permute.xlu2 %2232 }
 0x25f   : > { %4140 = vperm.xlu1 %9605, %v8289_v22   ;;  %v7561_v22 = vor.u32 %v9260_v53, %v7560_v7  ;;  %14945 = vst [vmem:[#allocation57_spill] sm:$0xff] %v10902_v37  ;;  %v10904_v40 = vpop.permute.xlu0 %2242  ;;  %v10913_v7 = vpop.permute.xlu1 %2332 }
 0x260   : > { %4135 = vperm.xlu0 %9604, %v8288_v24   ;;  %v10900_v24 = vpop.f32.mrf.mxu1  ;;  %14946 = vst [vmem:[#allocation58_spill] sm:$0xff] %v10904_v40 }
 0x261   : > { %14947 = vst [vmem:[#allocation59_spill] sm:$0xff] %v10913_v7  ;;  %v8477_v7 = vld [vmem:[%s14774_s4 + $0x378] sm:$0xff] }
 0x264   : > { %v10894_v5 = vpop.f32.mrf.mxu2 }
 0x266   : > { %4130 = vperm.xlu2 %9606, %v8287_v46   ;;  %v8270_v46 = vld [vmem:[%s9796_s11 + $0x300] sm:$0xff] }
 0x267   : > { %4125 = vperm.xlu1 %9605, %v8286_v3   ;;  %v10915_v3 = vpop.permute.xlu2 %2217  ;;  %v10936_v40 = vpop.permute.xlu1 %2317 }
 0x268   : > { %4060 = vperm.xlu0 %9604, %v8273_v26   ;;  %v1319_v53 = vpop.f32.mrf.mxu1  ;;  %14948 = vst [vmem:[#allocation60_spill] sm:$0xff] %v10915_v3  ;;  %v8475_v26 = vld [vmem:[%s14774_s4 + $0x368] sm:$0xff] }
 0x269   : > { %14950 = vst [vmem:[#allocation62_spill] sm:$0xff] %v10936_v40 }
 0x26a   : > { %1874 = vmatmul.bf16.gmra.mxu3 %v7561_v22  ;;  %v7568_v22 = vld [vmem:[%s14775_s5 + $0x40] sm:$0xf] }
 0x26b   : > { %v7569_v37 = vor.u32 %v9262_v47, %v7568_v22  ;;  %v7576_v22 = vld [vmem:[%s14775_s5 + $0x50] sm:$0xf] }
 0x26c   : > { %v10909_v11 = vpop.f32.mrf.mxu2 }
 0x26e   : > { %4759 = vperm.xlu2 %9606, %v8476_v19   ;;  %v10926_v19 = vpop.permute.xlu0 %2327 }
 0x26f   : > { %4050 = vperm.xlu1 %9605, %v8271_v29   ;;  %14949 = vst [vmem:[#allocation61_spill] sm:$0xff] %v10926_v19  ;;  %v8492_v19 = vld [vmem:[%s14774_s4 + $0x3f0] sm:$0xff]  ;;  %v10947_v47 = vpop.permute.xlu2 %2322 }
 0x270   : > { %4045 = vperm.xlu0 %9604, %v8270_v46   ;;  %v8474_v46 = vld [vmem:[%s14774_s4 + $0x360] sm:$0xff]  ;;  %v1321_v3 = vpop.f32.mrf.mxu1  ;;  %14951 = vst [vmem:[#allocation63_spill] sm:$0xff] %v10947_v47 }
 0x271   : > { %v8470_v47 = vld [vmem:[%s14774_s4 + $0x340] sm:$0xff] }
 0x274   : > { %v10928_v29 = vpop.f32.mrf.mxu2 }
 0x276   : > { %4754 = vperm.xlu2 %9606, %v8475_v26   ;;  %v8472_v26 = vld [vmem:[%s14774_s4 + $0x350] sm:$0xff] }
 0x277   : > { %4749 = vperm.xlu1 %9605, %v8474_v46   ;;  %v9264_v46 = vld [vmem:[%s14775_s5 + $0x54] sm:$0xf0]  ;;  %v10968_v51 = vpop.permute.xlu2 %2307 }
 0x278   : > { %4764 = vperm.xlu0 %9604, %v8477_v7   ;;  %v10949_v7 = vpop.permute.xlu0 %2222  ;;  %14954 = vst [vmem:[#allocation66_spill] sm:$0xff] %v10968_v51  ;;  %v1322_v51 = vadd.f32 %v1321_v3, %v10452_v12  ;;  %v8488_v12 = vld [vmem:[%s14774_s4 + $0x3d0] sm:$0xff] }
 0x279   : > { %14952 = vst [vmem:[#allocation64_spill] sm:$0xff] %v10949_v7  ;;  %v7577_v7 = vor.u32 %v9264_v46, %v7576_v22 }
 0x27a   : > { %1879 = vmatmul.bf16.gmra.mxu3 %v7569_v37  ;;  %v8471_v37 = vld [vmem:[%s14774_s4 + $0x348] sm:$0xff] }
 0x27c   : > { %v1408_v17 = vpop.f32.mrf.mxu2 }
 0x27e   : > { %4839 = vperm.xlu2 %9606, %v8492_v19   ;;  %v10966_v19 = vpop.permute.xlu1 %2212 }
 0x27f   : > { %4744 = vperm.xlu1 %9605, %v8473_v50   ;;  %v8493_v50 = vld [vmem:[%s14774_s4 + $0x3f8] sm:$0xff]  ;;  %14953 = vst [vmem:[#allocation65_spill] sm:$0xff] %v10966_v19  ;;  %v10984_v46 = vpop.permute.xlu2 %2202 }
 0x280   : > { %4739 = vperm.xlu0 %9604, %v8472_v26   ;;  %v1324_v26 = vpop.f32.mrf.mxu1  ;;  %v10970_v28 = vpop.permute.xlu0 %2207  ;;  %14957 = vst [vmem:[#allocation69_spill] sm:$0xff] %v10984_v46 }
 0x281   : > { %14955 = vst [vmem:[#allocation67_spill] sm:$0xff] %v10970_v28 }
 0x284   : > { %v1410_v40 = vpop.f32.mrf.mxu2 }
 0x286   : > { %4734 = vperm.xlu2 %9606, %v8471_v37   ;;  %v8490_v37 = vld [vmem:[%s14774_s4 + $0x3e0] sm:$0xff] }
 0x287   : > { %4729 = vperm.xlu1 %9605, %v8470_v47   ;;  %v10981_v47 = vpop.permute.xlu1 %2197 }
 0x288   : > { %4844 = vperm.xlu0 %9604, %v8493_v50   ;;  %14956 = vst [vmem:[#allocation68_spill] sm:$0xff] %v10981_v47  ;;  %v1326_v22 = vpop.f32.mrf.mxu1  ;;  %v10986_v50 = vpop.permute.xlu0 %2312 }
 0x289   : > { %14958 = vst [vmem:[#allocation70_spill] sm:$0xff] %v10986_v50  ;;  %v1327_v19 = vadd.f32 %v1326_v22, %v10389_v2  ;;  %v1320_v2 = vadd.f32 %v1319_v53, %v10402_v31 }
 0x28a   : > { %1884 = vmatmul.bf16.gmra.mxu3 %v7577_v7  ;;  %v1325_v7 = vadd.f32 %v1324_v26, %v10366_v25  ;;  %v9266_v25 = vld [vmem:[%s14775_s5 + $0x64] sm:$0xf0] }
 0x28b   : > { %v1409_v50 = vadd.f32 %v1408_v17, %v1320_v2 }
 0x28c   : > { %v1413_v61 = vpop.f32.mrf.mxu2 }
 0x28d   : > { %v1414_v28 = vadd.f32 %v1413_v61, %v1325_v7  ;;  %v1411_v61 = vadd.f32 %v1410_v40, %v1322_v51  ;;  %v1317_v7 = vadd.f32 %v10900_v24, %v10426_v42  ;;  %v1404_v42 = vadd.f32 %v10909_v11, %v1315_v54  ;;  %v11019_v24 = vpop.permute.xlu2 %2187  ;;  %v8466_v54 = vld [vmem:[%s14774_s4 + $0x320] sm:$0xff] }
 0x28e   : > { %4719 = vperm.xlu2 %9606, %v8468_v43   ;;  %v8489_v43 = vld [vmem:[%s14774_s4 + $0x3d8] sm:$0xff]  ;;  %v1446_v17 = vmax.f32 %v1409_v50, 0.0  ;;  %v1307_v11 = vadd.f32 %v10825_v9, %v10566_v13  ;;  %v7592_v13 = vld [vmem:[%s14775_s5 + $0x70] sm:$0xf] }
 0x28f   : > { %4834 = vperm.xlu1 %9605, %v8491_v35   ;;  %v7584_v35 = vld [vmem:[%s14775_s5 + $0x60] sm:$0xf]  ;;  %v1448_v46 = vmax.f32 %v1414_v28, 0.0  ;;  %v1406_v51 = vadd.f32 %v10928_v29, %v1317_v7  ;;  %v1447_v31 = vmax.f32 %v1411_v61, 0.0  ;;  %v11011_v53 = vpop.permute.xlu1 %2302  ;;  %v9268_v9 = vld [vmem:[%s14775_s5 + $0x74] sm:$0xf0] }
 0x290   : > { %4829 = vperm.xlu0 %9604, %v8490_v37   ;;  %v8469_v37 = vld [vmem:[%s14774_s4 + $0x338] sm:$0xff]  ;;  %v7585_v22 = vor.u32 %v9266_v25, %v7584_v35  ;;  %v8486_v28 = vld [vmem:[%s14774_s4 + $0x3c0] sm:$0xff]  ;;  %v11021_v41 = vpop.permute.xlu0 %2297  ;;  %v1442_v35 = vmax.f32 %v10878_v15, 0.0 }
 0x291   : > { %v8465_v25 = vld [vmem:[%s14774_s4 + $0x318] sm:$0xff] }
 0x294   : > { %v1415_v26 = vpop.f32.mrf.mxu2 }
 0x295   : > { %v1416_v3 = vadd.f32 %v1415_v26, %v1327_v19  ;;  %v1312_v19 = vadd.f32 %v10863_v56, %v10456_v44  ;;  %v1464_v44 = vpack.c.bf16 %v1447_v31, %v1446_v17  ;;  %v1444_v56 = vmax.f32 %v1404_v42, 0.0  ;;  %v11054_v2 = vpop.permute.xlu2 %2292  ;;  %v8484_v42 = vld [vmem:[%s14774_s4 + $0x3b0] sm:$0xff] }
 0x296   : > { %4824 = vperm.xlu2 %9606, %v8489_v43   ;;  %v1292_v31 = vadd.f32 %v10718_v34, %v10660_v33  ;;  %v1436_v33 = vmax.f32 %v10792_v63, 0.0  ;;  %v9270_v63 = vld [vmem:[%s14775_s5 + $0x84] sm:$0xf0] }
 0x297   : > { %v1449_v47 = vmax.f32 %v1416_v3, 0.0  ;;  %4819 = vperm.xlu1 %9605, %v8488_v12   ;;  %v1401_v29 = vadd.f32 %v10894_v5, %v1312_v19  ;;  %v1302_v5 = vadd.f32 %v10787_v38, %v10599_v16  ;;  %v8464_v16 = vld [vmem:[%s14774_s4 + $0x310] sm:$0xff]  ;;  %v8487_v12 = vld [vmem:[%s14774_s4 + $0x3c8] sm:$0xff]  ;;  %v7593_v3 = vor.u32 %v9268_v9, %v7592_v13  ;;  %v8481_v13 = vld [vmem:[%s14774_s4 + $0x398] sm:$0xff] }
 0x298   : > { %4724 = vperm.xlu0 %9604, %v8469_v37   ;;  %v11056_v61 = vpop.permute.xlu0 %2192  ;;  %v1297_v37 = vadd.f32 %v10763_v58, %v10628_v32  ;;  %v8462_v32 = vld [vmem:[%s14774_s4 + $0x300] sm:$0xff]  ;;  %v8485_v58 = vld [vmem:[%s14774_s4 + $0x3b8] sm:$0xff]  ;;  %v8480_v9 = vld [vmem:[%s14774_s4 + $0x390] sm:$0xff] }
 0x299   : > { %v1465_v40 = vpack.c.bf16 %v1449_v47, %v1448_v46  ;;  %v1445_v47 = vmax.f32 %v1406_v51, 0.0  ;;  %v1396_v46 = vadd.f32 %v10865_v0, %v1307_v11  ;;  %v1443_v50 = vmax.f32 %v1401_v29, 0.0  ;;  %v11045_v0 = vpop.permute.xlu1 %2287  ;;  %v8483_v29 = vld [vmem:[%s14774_s4 + $0x3a8] sm:$0xff] }
 0x29a   : > { %1889 = vmatmul.bf16.gmra.mxu3 %v7585_v22  ;;  %v1391_v15 = vadd.f32 %v10838_v62, %v1302_v5  ;;  %v1440_v22 = vmax.f32 %v10851_v30, 0.0  ;;  %v1386_v62 = vadd.f32 %v10806_v6, %v1297_v37  ;;  %v1381_v30 = vadd.f32 %v10778_v45, %v1292_v31 }
 0x29b   : > { %1940 = vmatpush.bf16.msrb.mxu0 %v1465_v40  ;;  %v1463_v43 = vpack.c.bf16 %v1445_v47, %v1444_v56  ;;  %v1441_v38 = vmax.f32 %v1396_v46, 0.0  ;;  %v1462_v26 = vpack.c.bf16 %v1443_v50, %v1442_v35  ;;  %v1438_v40 = vmax.f32 %v10820_v10, 0.0  ;;  %v7600_v47 = vld [vmem:[%s14775_s5 + $0x80] sm:$0xf]  ;;  %v8463_v56 = vld [vmem:[%s14774_s4 + $0x308] sm:$0xff] }
 0x29c   : > { %v1439_v7 = vmax.f32 %v1391_v15, 0.0  ;;  %v1437_v6 = vmax.f32 %v1386_v62, 0.0  ;;  %v7601_v46 = vor.u32 %v9270_v63, %v7600_v47  ;;  %v8685_v15 = vld [vmem:[%s9796_s11 + $0x4f8] sm:$0xff]  ;;  %v8684_v62 = vld [vmem:[%s9796_s11 + $0x4f0] sm:$0xff]  ;;  %v8683_v47 = vld [vmem:[%s9796_s11 + $0x4e8] sm:$0xff] }
 0x29d   : > { %v1461_v51 = vpack.c.bf16 %v1441_v38, %v1440_v22  ;;  %v11078_v10 = vpop.permute.xlu2 %2277  ;;  %v7608_v38 = vld [vmem:[%s14775_s5 + $0x90] sm:$0xf] }
 0x29e   : > { %4809 = vperm.xlu2 %9606, %v8486_v28   ;;  %v1460_v19 = vpack.c.bf16 %v1439_v7, %v1438_v40  ;;  %v1435_v28 = vmax.f32 %v1381_v30, 0.0  ;;  %v1459_v45 = vpack.c.bf16 %v1437_v6, %v1436_v33  ;;  %v8479_v7 = vld [vmem:[%s14774_s4 + $0x388] sm:$0xff]  ;;  %v8682_v40 = vld [vmem:[%s9796_s11 + $0x4e0] sm:$0xff]  ;;  %v8668_v30 = vld [vmem:[%s9796_s11 + $0x470] sm:$0xff] }
 0x29f   : > { %1941 = vmatpush.bf16.msrb.mxu0 %v1464_v44  ;;  %4714 = vperm.xlu1 %9605, %v8467_v52   ;;  %v1434_v52 = vmax.f32 %v10767_v59, 0.0  ;;  %v9253_v44 = vld [vmem:[%s14775_s5 + $0x4] sm:$0xf]  ;;  %v7538_v59 = vld [vmem:[%s14775_s5 + $0x8] sm:$0xf0] }
 0x2a0   : > { %4709 = vperm.xlu0 %9604, %v8466_v54   ;;  %v11080_v17 = vpop.permute.xlu0 %2177  ;;  %v8482_v54 = vld [vmem:[%s14774_s4 + $0x3a0] sm:$0xff]  ;;  %v7541_v50 = vor.u32 %v9253_v44, %v7538_v59 }
 0x2a1   : > { %v11075_v34 = vpop.permute.xlu1 %2182  ;;  %v1458_v11 = vpack.c.bf16 %v1435_v28, %v1434_v52  ;;  %v7616_v33 = vld [vmem:[%s14775_s5 + $0xa0] sm:$0xf]  ;;  %v9274_v28 = vld [vmem:[%s14775_s5 + $0xa4] sm:$0xf0]  ;;  %v7554_v52 = vld [vmem:[%s14775_s5 + $0x28] sm:$0xf0] }
 0x2a2   : > { %v7617_v44 = vor.u32 %v9274_v28, %v7616_v33  ;;  %v8663_v28 = vld [vmem:[%s9796_s11 + $0x448] sm:$0xff] }
 0x2a3   : > { %1942 = vmatpush.bf16.msrb.mxu0 %v1463_v43 }
 0x2a5   : > { %v11106_v5 = vpop.permute.xlu2 %2272 }
 0x2a6   : > { %4704 = vperm.xlu2 %9606, %v8465_v25   ;;  %v8478_v25 = vld [vmem:[%s14774_s4 + $0x380] sm:$0xff] }
 0x2a7   : > { %1943 = vmatpush.bf16.msrb.mxu0 %v1462_v26  ;;  %4699 = vperm.xlu1 %9605, %v8464_v16   ;;  %v9272_v26 = vld [vmem:[%s14775_s5 + $0x94] sm:$0xf0] }
 0x2a8   : > { %4814 = vperm.xlu0 %9604, %v8487_v12   ;;  %v11108_v35 = vpop.permute.xlu0 %2282  ;;  %v9255_v12 = vld [vmem:[%s14775_s5 + $0x14] sm:$0xf] }
 0x2a9   : > { %v11104_v43 = vpop.permute.xlu1 %2267 }
 0x2aa   : > { %1894 = vmatmul.bf16.gmra.mxu3 %v7593_v3  ;;  %v7546_v3 = vld [vmem:[%s14775_s5 + $0x18] sm:$0xf0] }
 0x2ab   : > { %1944 = vmatpush.bf16.msrb.mxu0 %v1461_v51  ;;  %v7609_v51 = vor.u32 %v9272_v26, %v7608_v38  ;;  %v7549_v31 = vor.u32 %v9255_v12, %v7546_v3  ;;  %v7624_v38 = vld [vmem:[%s14775_s5 + $0xb0] sm:$0xf]  ;;  %v9276_v26 = vld [vmem:[%s14775_s5 + $0xb4] sm:$0xf0]  ;;  %v9259_v12 = vld [vmem:[%s14775_s5 + $0x34] sm:$0xf] }
 0x2ac   : > { %v7562_v3 = vld [vmem:[%s14775_s5 + $0x38] sm:$0xf0] }
 0x2ad   : > { %v11134_v37 = vpop.permute.xlu2 %2939 }
 0x2ae   : > { %4689 = vperm.xlu2 %9606, %v8462_v32   ;;  %14959 = vst [vmem:[#allocation71_spill] sm:$0xff] %v11134_v37  ;;  %v8861_v37 = vld [vmem:[%s14774_s4 + $0x478] sm:$0xff] }
 0x2af   : > { %1945 = vmatpush.bf16.msrb.mxu0 %v1460_v19  ;;  %4804 = vperm.xlu1 %9605, %v8485_v58   ;;  %v8669_v58 = vld [vmem:[%s9796_s11 + $0x478] sm:$0xff] }
 0x2b0   : > { %4799 = vperm.xlu0 %9604, %v8484_v42   ;;  %v11136_v22 = vpop.permute.xlu0 %2257  ;;  %v8667_v42 = vld [vmem:[%s9796_s11 + $0x468] sm:$0xff] }
 0x2b1   : > { %v11119_v16 = vpop.permute.xlu1 %2262 }
 0x2b3   : > { %1946 = vmatpush.bf16.msrb.mxu0 %v1459_v45  ;;  %v9257_v45 = vld [vmem:[%s14775_s5 + $0x24] sm:$0xf] }
 0x2b4   : > { %v7557_v59 = vor.u32 %v9257_v45, %v7554_v52  ;;  %v8662_v45 = vld [vmem:[%s9796_s11 + $0x440] sm:$0xff] }
 0x2b5   : > { %v11147_v6 = vpop.permute.xlu2 %2864 }
 0x2b6   : > { %4794 = vperm.xlu2 %9606, %v8483_v29   ;;  %14961 = vst [vmem:[#allocation73_spill] sm:$0xff] %v11147_v6  ;;  %v8666_v29 = vld [vmem:[%s9796_s11 + $0x460] sm:$0xff] }
 0x2b7   : > { %1947 = vmatpush.bf16.msrb.mxu0 %v1458_v11  ;;  %4789 = vperm.xlu1 %9605, %v8482_v54   ;;  %v9058_v6 = vld [vmem:[%s9796_s11 + $0x5a0] sm:$0xff] }
 0x2b8   : > { %4694 = vperm.xlu0 %9604, %v8463_v56   ;;  %v11149_v19 = vpop.permute.xlu0 %2944  ;;  %v8664_v56 = vld [vmem:[%s9796_s11 + $0x450] sm:$0xff] }
 0x2b9   : > { %v11143_v32 = vpop.permute.xlu1 %2859  ;;  %14962 = vst [vmem:[#allocation74_spill] sm:$0xff] %v11149_v19 }
 0x2ba   : > { %1899 = vmatmul.bf16.gmra.mxu3 %v7601_v46  ;;  %1948 = vmatmul.bf16.vlgmr.msrb.gmra.mxu0 %v7541_v50  ;;  %14960 = vst [vmem:[#allocation72_spill] sm:$0xff] %v11143_v32  ;;  %v8681_v46 = vld [vmem:[%s9796_s11 + $0x4d8] sm:$0xff]  ;;  %v8680_v50 = vld [vmem:[%s9796_s11 + $0x4d0] sm:$0xff] }
 0x2bd   : > { %v11168_v54 = vpop.permute.xlu2 %2849 }
 0x2be   : > { %4769 = vperm.xlu2 %9606, %v8478_v25   ;;  %14964 = vst [vmem:[#allocation76_spill] sm:$0xff] %v11168_v54  ;;  %v9047_v54 = vld [vmem:[%s9796_s11 + $0x548] sm:$0xff] }
 0x2bf   : > { %4784 = vperm.xlu1 %9605, %v8481_v13  }
 0x2c0   : > { %4779 = vperm.xlu0 %9604, %v8480_v9   ;;  %v11170_v11 = vpop.permute.xlu0 %2929 }
 0x2c1   : > { %v11166_v63 = vpop.permute.xlu1 %2934  ;;  %14965 = vst [vmem:[#allocation77_spill] sm:$0xff] %v11170_v11  ;;  %v8858_v11 = vld [vmem:[%s14774_s4 + $0x460] sm:$0xff] }
 0x2c2   : > { %14963 = vst [vmem:[#allocation75_spill] sm:$0xff] %v11166_v63 }
 0x2c5   : > { %v11177_v13 = vpop.permute.xlu2 %2924 }
 0x2c6   : > { %5456 = vperm.xlu2 %9606, %v8685_v15   ;;  %14967 = vst [vmem:[#allocation79_spill] sm:$0xff] %v11177_v13  ;;  %v8679_v15 = vld [vmem:[%s9796_s11 + $0x4c8] sm:$0xff]  ;;  %v8657_v13 = vld [vmem:[%s9796_s11 + $0x418] sm:$0xff] }
 0x2c7   : > { %5451 = vperm.xlu1 %9605, %v8684_v62   ;;  %v11194_v62 = vpop.f32.mrf.mxu3 }
 0x2c8   : > { %4774 = vperm.xlu0 %9604, %v8479_v7   ;;  %v11179_v9 = vpop.permute.xlu0 %2854  ;;  %v8678_v7 = vld [vmem:[%s9796_s11 + $0x4c0] sm:$0xff] }
 0x2c9   : > { %v11175_v25 = vpop.permute.xlu1 %2919  ;;  %14968 = vst [vmem:[#allocation80_spill] sm:$0xff] %v11179_v9 }
 0x2ca   : > { %1904 = vmatmul.bf16.gmra.mxu3 %v7609_v51  ;;  %1953 = vmatmul.bf16.gmra.mxu0 %v7549_v31  ;;  %14966 = vst [vmem:[#allocation78_spill] sm:$0xff] %v11175_v25  ;;  %v8665_v51 = vld [vmem:[%s9796_s11 + $0x458] sm:$0xff]  ;;  %v7625_v31 = vor.u32 %v9276_v26, %v7624_v38 }
 0x2ce   : > { %5441 = vperm.xlu2 %9606, %v8682_v40   ;;  %v7565_v40 = vor.u32 %v9259_v12, %v7562_v3 }
 0x2cf   : > { %5376 = vperm.xlu1 %9605, %v8669_v58   ;;  %v11207_v52 = vpop.f32.mrf.mxu3 }
 0x2d0   : > { %5371 = vperm.xlu0 %9604, %v8668_v30   ;;  %v8676_v30 = vld [vmem:[%s9796_s11 + $0x4b0] sm:$0xff]  ;;  %v11203_v33 = vpop.permute.xlu0 %2839 }
 0x2d1   : > { %v11198_v58 = vpop.permute.xlu1 %2844  ;;  %14971 = vst [vmem:[#allocation83_spill] sm:$0xff] %v11203_v33 }
 0x2d2   : > { %14969 = vst [vmem:[#allocation81_spill] sm:$0xff] %v11198_v58 }
 0x2d6   : > { %5366 = vperm.xlu2 %9606, %v8667_v42   ;;  %v11201_v42 = vpop.permute.xlu2 %2909 }
 0x2d7   : > { %5361 = vperm.xlu1 %9605, %v8666_v29   ;;  %14970 = vst [vmem:[#allocation82_spill] sm:$0xff] %v11201_v42  ;;  %v8661_v29 = vld [vmem:[%s9796_s11 + $0x438] sm:$0xff] }
 0x2d8   : > { %5446 = vperm.xlu0 %9604, %v8683_v47   ;;  %v7632_v47 = vld [vmem:[%s14775_s5 + $0xc0] sm:$0xf]  ;;  %v11228_v26 = vpop.permute.xlu0 %2914 }
 0x2d9   : > { %14974 = vst [vmem:[#allocation86_spill] sm:$0xff] %v11228_v26  ;;  %v8670_v26 = vld [vmem:[%s9796_s11 + $0x480] sm:$0xff] }
 0x2da   : > { %1909 = vmatmul.bf16.gmra.mxu3 %v7617_v44  ;;  %1958 = vmatmul.bf16.gmra.mxu0 %v7557_v59  ;;  %v9278_v44 = vld [vmem:[%s14775_s5 + $0xc4] sm:$0xf0]  ;;  %v9261_v59 = vld [vmem:[%s14775_s5 + $0x44] sm:$0xf] }
 0x2db   : > { %v7633_v12 = vor.u32 %v9278_v44, %v7632_v47  ;;  %v8673_v47 = vld [vmem:[%s9796_s11 + $0x498] sm:$0xff]  ;;  %v7640_v44 = vld [vmem:[%s14775_s5 + $0xd0] sm:$0xf] }
 0x2de   : > { %5351 = vperm.xlu2 %9606, %v8664_v56   ;;  %v7570_v56 = vld [vmem:[%s14775_s5 + $0x48] sm:$0xf0]  ;;  %v11226_v38 = vpop.permute.xlu2 %2834 }
 0x2df   : > { %5436 = vperm.xlu1 %9605, %v8681_v46   ;;  %v11222_v46 = vpop.permute.xlu1 %2829  ;;  %14973 = vst [vmem:[#allocation85_spill] sm:$0xff] %v11226_v38  ;;  %v7573_v3 = vor.u32 %v9261_v59, %v7570_v56  ;;  %v9280_v59 = vld [vmem:[%s14775_s5 + $0xd4] sm:$0xf0]  ;;  %v9263_v56 = vld [vmem:[%s14775_s5 + $0x54] sm:$0xf]  ;;  %v8854_v38 = vld [vmem:[%s14774_s4 + $0x440] sm:$0xff] }
 0x2e0   : > { %5431 = vperm.xlu0 %9604, %v8680_v50   ;;  %14972 = vst [vmem:[#allocation84_spill] sm:$0xff] %v11222_v46  ;;  %v8660_v50 = vld [vmem:[%s9796_s11 + $0x430] sm:$0xff] }
 0x2e6   : > { %5426 = vperm.xlu2 %9606, %v8679_v15   ;;  %v8677_v15 = vld [vmem:[%s9796_s11 + $0x4b8] sm:$0xff] }
 0x2e7   : > { %5421 = vperm.xlu1 %9605, %v8678_v7   ;;  %v11230_v7 = vpop.f32.mrf.mxu3 }
 0x2e8   : > { %5356 = vperm.xlu0 %9604, %v8665_v51   ;;  %v8658_v51 = vld [vmem:[%s9796_s11 + $0x420] sm:$0xff] }
 0x2ea   : > { %1914 = vmatmul.bf16.gmra.mxu3 %v7625_v31  ;;  %1963 = vmatmul.bf16.gmra.mxu0 %v7565_v40  ;;  %v8675_v31 = vld [vmem:[%s9796_s11 + $0x4a8] sm:$0xff]  ;;  %v8674_v40 = vld [vmem:[%s9796_s11 + $0x4a0] sm:$0xff] }
 0x2ee   : > { %5411 = vperm.xlu2 %9606, %v8676_v30   ;;  %v11235_v30 = vpop.permute.xlu1 %2904 }
 0x2ef   : > { %5346 = vperm.xlu1 %9605, %v8663_v28   ;;  %14975 = vst [vmem:[#allocation87_spill] sm:$0xff] %v11235_v30  ;;  %v11237_v28 = vpop.permute.xlu2 %2819 }
 0x2f0   : > { %5341 = vperm.xlu0 %9604, %v8662_v45   ;;  %14976 = vst [vmem:[#allocation88_spill] sm:$0xff] %v11237_v28  ;;  %v11239_v45 = vpop.permute.xlu0 %2899 }
 0x2f1   : > { %14977 = vst [vmem:[#allocation89_spill] sm:$0xff] %v11239_v45 }
 0x2f6   : > { %5336 = vperm.xlu2 %9606, %v8661_v29   ;;  %v11241_v29 = vpop.f32.mrf.mxu3 }
 0x2f7   : > { %5331 = vperm.xlu1 %9605, %v8660_v50   ;;  %v7578_v50 = vld [vmem:[%s14775_s5 + $0x58] sm:$0xf0] }
 0x2f8   : > { %5416 = vperm.xlu0 %9604, %v8677_v15   ;;  %v8672_v15 = vld [vmem:[%s9796_s11 + $0x490] sm:$0xff]  ;;  %v11262_v30 = vpop.permute.xlu0 %2824 }
 0x2f9   : > { %14980 = vst [vmem:[#allocation92_spill] sm:$0xff] %v11262_v30  ;;  %v9042_v30 = vld [vmem:[%s9796_s11 + $0x520] sm:$0xff] }
 0x2fa   : > { %1919 = vmatmul.bf16.gmra.mxu3 %v7633_v12  ;;  %1968 = vmatmul.bf16.gmra.mxu0 %v7573_v3  ;;  %v8659_v12 = vld [vmem:[%s9796_s11 + $0x428] sm:$0xff]  ;;  %v7641_v3 = vor.u32 %v9280_v59, %v7640_v44 }
 0x2fb   : > { %v8655_v59 = vld [vmem:[%s9796_s11 + $0x408] sm:$0xff] }
 0x2fe   : > { %5321 = vperm.xlu2 %9606, %v8658_v51   ;;  %v7581_v51 = vor.u32 %v9263_v56, %v7578_v50  ;;  %v11265_v25 = vpop.f32.mrf.mxu3  ;;  %v7648_v56 = vld [vmem:[%s14775_s5 + $0xe0] sm:$0xf]  ;;  %v9282_v50 = vld [vmem:[%s14775_s5 + $0xe4] sm:$0xf0] }
 0x2ff   : > { %5406 = vperm.xlu1 %9605, %v8675_v31   ;;  %v11258_v31 = vpop.permute.xlu1 %2889 }
 0x300   : > { %5401 = vperm.xlu0 %9604, %v8674_v40   ;;  %14978 = vst [vmem:[#allocation90_spill] sm:$0xff] %v11258_v31  ;;  %v11260_v40 = vpop.permute.xlu2 %2894 }
 0x301   : > { %14979 = vst [vmem:[#allocation91_spill] sm:$0xff] %v11260_v40  ;;  %v7649_v40 = vor.u32 %v9282_v50, %v7648_v56 }
 0x306   : > { %5396 = vperm.xlu2 %9606, %v8673_v47   ;;  %v8656_v47 = vld [vmem:[%s9796_s11 + $0x410] sm:$0xff] }
 0x307   : > { %5391 = vperm.xlu1 %9605, %v8672_v15   ;;  %v11269_v44 = vpop.permute.xlu1 %2814  ;;  %v9265_v15 = vld [vmem:[%s14775_s5 + $0x64] sm:$0xf] }
 0x308   : > { %5326 = vperm.xlu0 %9604, %v8659_v12   ;;  %14981 = vst [vmem:[#allocation93_spill] sm:$0xff] %v11269_v44  ;;  %v11286_v12 = vpop.permute.xlu0 %2809 }
 0x30a   : > { %1924 = vmatmul.bf16.gmra.mxu3 %v7641_v3  ;;  %1973 = vmatmul.bf16.gmra.mxu0 %v7581_v51  ;;  %v8654_v3 = vld [vmem:[%s9796_s11 + $0x400] sm:$0xff]  ;;  %v8671_v51 = vld [vmem:[%s9796_s11 + $0x488] sm:$0xff] }
 0x30e   : > { %5381 = vperm.xlu2 %9606, %v8670_v26   ;;  %v11284_v26 = vpop.permute.xlu2 %2879 }
 0x30f   : > { %5316 = vperm.xlu1 %9605, %v8657_v13   ;;  %v7586_v13 = vld [vmem:[%s14775_s5 + $0x68] sm:$0xf0]  ;;  %14982 = vst [vmem:[#allocation94_spill] sm:$0xff] %v11284_v26  ;;  %v11295_v63 = vpop.permute.xlu1 %2799 }
 0x310   : > { %5311 = vperm.xlu0 %9604, %v8656_v47   ;;  %v11290_v47 = vpop.f32.mrf.mxu3  ;;  %v7589_v19 = vor.u32 %v9265_v15, %v7586_v13  ;;  %v11305_v50 = vpop.permute.xlu0 %2884  ;;  %v7656_v15 = vld [vmem:[%s14775_s5 + $0xf0] sm:$0xf]  ;;  %v9284_v13 = vld [vmem:[%s14775_s5 + $0xf4] sm:$0xf0] }
 0x311   : > { %14983 = vst [vmem:[#allocation95_spill] sm:$0xff] %v11305_v50  ;;  %v7657_v50 = vor.u32 %v9284_v13, %v7656_v15  ;;  %v8876_v15 = vld [vmem:[%s14774_s4 + $0x4f0] sm:$0xff] }
 0x316   : > { %5306 = vperm.xlu2 %9606, %v8655_v59   ;;  %v8860_v59 = vld [vmem:[%s14774_s4 + $0x470] sm:$0xff]  ;;  %v11303_v56 = vpop.permute.xlu2 %2804 }
 0x317   : > { %5301 = vperm.xlu1 %9605, %v8654_v3   ;;  %v8856_v3 = vld [vmem:[%s14774_s4 + $0x450] sm:$0xff] }
 0x318   : > { %5386 = vperm.xlu0 %9604, %v8671_v51   ;;  %v8859_v51 = vld [vmem:[%s14774_s4 + $0x468] sm:$0xff]  ;;  %v11334_v31 = vpop.permute.xlu0 %2869 }
 0x319   : > { %14985 = vst [vmem:[#allocation97_spill] sm:$0xff] %v11334_v31  ;;  %v8872_v31 = vld [vmem:[%s14774_s4 + $0x4d0] sm:$0xff] }
 0x31a   : > { %1929 = vmatmul.bf16.gmra.mxu3 %v7649_v40  ;;  %1978 = vmatmul.bf16.gmra.mxu0 %v7589_v19  ;;  %v11307_v19 = vpop.f32.mrf.mxu3  ;;  %v8857_v40 = vld [vmem:[%s14774_s4 + $0x458] sm:$0xff] }
 0x31e   : > { %6005 = vperm.xlu2 %9606, %v8858_v11   ;;  %v9267_v11 = vld [vmem:[%s14775_s5 + $0x74] sm:$0xf]  ;;  %v11332_v45 = vpop.permute.xlu2 %2789 }
 0x31f   : > { %6020 = vperm.xlu1 %9605, %v8861_v37   ;;  %v7594_v37 = vld [vmem:[%s14775_s5 + $0x78] sm:$0xf0] }
 0x320   : > { %6015 = vperm.xlu0 %9604, %v8860_v59   ;;  %v11330_v59 = vpop.permute.xlu1 %2874  ;;  %v7597_v42 = vor.u32 %v9267_v11, %v7594_v37  ;;  %v9269_v37 = vld [vmem:[%s14775_s5 + $0x84] sm:$0xf] }
 0x321   : > { %14984 = vst [vmem:[#allocation96_spill] sm:$0xff] %v11330_v59 }
 0x322   : > { %v11336_v26 = vpop.f32.mrf.mxu3 }
 0x326   : > { %6000 = vperm.xlu2 %9606, %v8857_v40   ;;  %v8877_v40 = vld [vmem:[%s14774_s4 + $0x4f8] sm:$0xff]  ;;  %v11349_v11 = vpop.permute.xlu2 %3508 }
 0x327   : > { %5995 = vperm.xlu1 %9605, %v8856_v3   ;;  %14987 = vst [vmem:[#allocation99_spill] sm:$0xff] %v11349_v11  ;;  %v8874_v3 = vld [vmem:[%s14774_s4 + $0x4e0] sm:$0xff] }
 0x328   : > { %6010 = vperm.xlu0 %9604, %v8859_v51   ;;  %v11347_v13 = vpop.permute.xlu1 %3503  ;;  %v8855_v51 = vld [vmem:[%s14774_s4 + $0x448] sm:$0xff] }
 0x329   : > { %14986 = vst [vmem:[#allocation98_spill] sm:$0xff] %v11347_v13 }
 0x32a   : > { %1934 = vmatmul.bf16.gmra.mxu3 %v7657_v50  ;;  %1983 = vmatmul.bf16.gmra.mxu0 %v7597_v42  ;;  %v11351_v42 = vpop.permute.xlu0 %2794  ;;  %v8875_v50 = vld [vmem:[%s14774_s4 + $0x4e8] sm:$0xff] }
 0x32e   : > { %5985 = vperm.xlu2 %9606, %v8854_v38   ;;  %v7602_v38 = vld [vmem:[%s14775_s5 + $0x88] sm:$0xf0]  ;;  %v11377_v33 = vpop.permute.xlu2 %3483 }
 0x32f   : > { %6100 = vperm.xlu1 %9605, %v8877_v40   ;;  %v1861_v40 = vadd.f32 %v11194_v62, %v10854_v49  ;;  %14989 = vst [vmem:[#allocation101_spill] sm:$0xff] %v11377_v33  ;;  %v8853_v49 = vld [vmem:[%s14774_s4 + $0x438] sm:$0xff]  ;;  %v8852_v62 = vld [vmem:[%s14774_s4 + $0x430] sm:$0xff] }
 0x330   : > { %6095 = vperm.xlu0 %9604, %v8876_v15   ;;  %v7605_v15 = vor.u32 %v9269_v37, %v7602_v38  ;;  %v11372_v59 = vpop.permute.xlu1 %3498  ;;  %v8851_v38 = vld [vmem:[%s14774_s4 + $0x428] sm:$0xff]  ;;  %v8848_v33 = vld [vmem:[%s14774_s4 + $0x410] sm:$0xff] }
 0x331   : > { %14988 = vst [vmem:[#allocation100_spill] sm:$0xff] %v11372_v59 }
 0x332   : > { %v11379_v58 = vpop.permute.xlu0 %3493 }
 0x333   : > { %14990 = vst [vmem:[#allocation102_spill] sm:$0xff] %v11379_v58 }
 0x336   : > { %6090 = vperm.xlu2 %9606, %v8875_v50  }
 0x337   : > { %v1949_v11 = vpop.f32.mrf.mxu0  ;;  %6085 = vperm.xlu1 %9605, %v8874_v3   ;;  %v9271_v3 = vld [vmem:[%s14775_s5 + $0x94] sm:$0xf] }
 0x338   : > { %v11370_v13 = vadd.f32 %v1949_v11, %v1861_v40  ;;  %5990 = vperm.xlu0 %9604, %v8855_v51   ;;  %v1863_v11 = vadd.f32 %v11207_v52, %v10868_v36  ;;  %v7610_v51 = vld [vmem:[%s14775_s5 + $0x98] sm:$0xf0]  ;;  %v11400_v40 = vpop.permute.xlu1 %3583  ;;  %v8850_v36 = vld [vmem:[%s14774_s4 + $0x420] sm:$0xff]  ;;  %v11405_v52 = vpop.f32.mrf.mxu3 }
 0x339   : > { %14991 = vst [vmem:[#allocation103_spill] sm:$0xff] %v11400_v40 }
 0x33a   : > { %1988 = vmatmul.bf16.gmra.mxu0 %v7605_v15  ;;  %v11410_v15 = vpop.permute.xlu2 %3588 }
 0x33b   : > { %14992 = vst [vmem:[#allocation104_spill] sm:$0xff] %v11410_v15  ;;  %v8871_v15 = vld [vmem:[%s14774_s4 + $0x4c8] sm:$0xff] }
 0x33e   : > { %6075 = vperm.xlu2 %9606, %v8872_v31   ;;  %v8873_v31 = vld [vmem:[%s14774_s4 + $0x4d8] sm:$0xff] }
 0x33f   : > { %v1951_v50 = vpop.f32.mrf.mxu0  ;;  %5980 = vperm.xlu1 %9605, %v8853_v49   ;;  %v11412_v49 = vpop.permute.xlu0 %3488 }
 0x340   : > { %v11389_v37 = vadd.f32 %v1951_v50, %v1863_v11  ;;  %5975 = vperm.xlu0 %9604, %v8852_v62   ;;  %14993 = vst [vmem:[#allocation105_spill] sm:$0xff] %v11412_v49  ;;  %v1866_v62 = vadd.f32 %v11230_v7, %v10848_v39  ;;  %v7613_v11 = vor.u32 %v9271_v3, %v7610_v51  ;;  %v8870_v39 = vld [vmem:[%s14774_s4 + $0x4c0] sm:$0xff]  ;;  %v11427_v7 = vpop.permute.xlu1 %3478  ;;  %v11431_v3 = vpop.f32.mrf.mxu3 }
 0x341   : > { %14994 = vst [vmem:[#allocation106_spill] sm:$0xff] %v11427_v7 }
 0x346   : > { %5970 = vperm.xlu2 %9606, %v8851_v38   ;;  %v1868_v38 = vadd.f32 %v11241_v29, %v10842_v1  ;;  %v9273_v1 = vld [vmem:[%s14775_s5 + $0xa4] sm:$0xf]  ;;  %v8868_v29 = vld [vmem:[%s14774_s4 + $0x4b0] sm:$0xff] }
 0x347   : > { %v1954_v50 = vpop.f32.mrf.mxu0  ;;  %5965 = vperm.xlu1 %9605, %v8850_v36   ;;  %v11433_v36 = vpop.permute.xlu2 %3573 }
 0x348   : > { %v11416_v40 = vadd.f32 %v1954_v50, %v1866_v62  ;;  %6080 = vperm.xlu0 %9604, %v8873_v31   ;;  %14995 = vst [vmem:[#allocation107_spill] sm:$0xff] %v11433_v36  ;;  %v11435_v31 = vpop.permute.xlu0 %3473  ;;  %v1871_v50 = vadd.f32 %v11265_v25, %v10812_v18  ;;  %v11460_v7 = vpop.f32.mrf.mxu3  ;;  %v8866_v18 = vld [vmem:[%s14774_s4 + $0x4a0] sm:$0xff]  ;;  %v8847_v25 = vld [vmem:[%s14774_s4 + $0x408] sm:$0xff] }
 0x349   : > { %14996 = vst [vmem:[#allocation108_spill] sm:$0xff] %v11435_v31  ;;  %v8863_v31 = vld [vmem:[%s14774_s4 + $0x488] sm:$0xff] }
 0x34a   : > { %1993 = vmatmul.bf16.gmra.mxu0 %v7613_v11  ;;  %v8869_v11 = vld [vmem:[%s14774_s4 + $0x4b8] sm:$0xff] }
 0x34e   : > { %5955 = vperm.xlu2 %9606, %v8848_v33   ;;  %v7618_v33 = vld [vmem:[%s14775_s5 + $0xa8] sm:$0xf0] }
 0x34f   : > { %v1956_v51 = vpop.f32.mrf.mxu0  ;;  %6070 = vperm.xlu1 %9605, %v8871_v15   ;;  %v8849_v15 = vld [vmem:[%s14774_s4 + $0x418] sm:$0xff]  ;;  %v11462_v49 = vpop.permute.xlu2 %3468 }
 0x350   : > { %v11437_v62 = vadd.f32 %v1956_v51, %v1868_v38  ;;  %6065 = vperm.xlu0 %9604, %v8870_v39   ;;  %v7621_v39 = vor.u32 %v9273_v1, %v7618_v33  ;;  %v11456_v51 = vpop.permute.xlu1 %3463  ;;  %14998 = vst [vmem:[#allocation110_spill] sm:$0xff] %v11462_v49  ;;  %v11464_v58 = vpop.permute.xlu0 %3578  ;;  %v1873_v1 = vadd.f32 %v11290_v47, %v10829_v57  ;;  %v7626_v57 = vld [vmem:[%s14775_s5 + $0xb8] sm:$0xf0] }
 0x351   : > { %14997 = vst [vmem:[#allocation109_spill] sm:$0xff] %v11456_v51  ;;  %v9064_v51 = vld [vmem:[%s9796_s11 + $0x5d0] sm:$0xff] }
 0x352   : > { %14999 = vst [vmem:[#allocation111_spill] sm:$0xff] %v11464_v58 }
 0x356   : > { %6060 = vperm.xlu2 %9606, %v8869_v11   ;;  %v8846_v11 = vld [vmem:[%s14774_s4 + $0x400] sm:$0xff] }
 0x357   : > { %v1959_v38 = vpop.f32.mrf.mxu0  ;;  %6055 = vperm.xlu1 %9605, %v8868_v29   ;;  %v11492_v47 = vpop.permute.xlu2 %3453 }
 0x358   : > { %v11458_v36 = vadd.f32 %v1959_v38, %v1871_v50  ;;  %5960 = vperm.xlu0 %9604, %v8849_v15   ;;  %v11479_v15 = vpop.permute.xlu1 %3568  ;;  %v11481_v50 = vpop.f32.mrf.mxu3  ;;  %v9275_v38 = vld [vmem:[%s14775_s5 + $0xb4] sm:$0xf]  ;;  %15001 = vst [vmem:[#allocation113_spill] sm:$0xff] %v11492_v47 }
 0x359   : > { %15000 = vst [vmem:[#allocation112_spill] sm:$0xff] %v11479_v15  ;;  %v9048_v47 = vld [vmem:[%s9796_s11 + $0x550] sm:$0xff] }
 0x35a   : > { %1998 = vmatmul.bf16.gmra.mxu0 %v7621_v39  ;;  %v8865_v39 = vld [vmem:[%s14774_s4 + $0x498] sm:$0xff] }
 0x35e   : > { %6045 = vperm.xlu2 %9606, %v8866_v18   ;;  %v11494_v18 = vpop.permute.xlu0 %3563 }
 0x35f   : > { %v1961_v33 = vpop.f32.mrf.mxu0  ;;  %5950 = vperm.xlu1 %9605, %v8847_v25   ;;  %15002 = vst [vmem:[#allocation114_spill] sm:$0xff] %v11494_v18  ;;  %v8864_v25 = vld [vmem:[%s14774_s4 + $0x490] sm:$0xff] }
 0x360   : > { %v11477_v29 = vadd.f32 %v1961_v33, %v1873_v1  ;;  %5945 = vperm.xlu0 %9604, %v8846_v11   ;;  %v8867_v11 = vld [vmem:[%s14774_s4 + $0x4a8] sm:$0xff]  ;;  %v1876_v1 = vadd.f32 %v11307_v19, %v10782_v8  ;;  %v7629_v33 = vor.u32 %v9275_v38, %v7626_v57  ;;  %v9068_v18 = vld [vmem:[%s9796_s11 + $0x5f0] sm:$0xff]  ;;  %v11507_v59 = vpop.permute.xlu1 %3553  ;;  %v11512_v49 = vpop.f32.mrf.mxu3  ;;  %v8862_v8 = vld [vmem:[%s14774_s4 + $0x480] sm:$0xff] }
 0x361   : > { %15003 = vst [vmem:[#allocation115_spill] sm:$0xff] %v11507_v59  ;;  %v11517_v19 = vpop.permute.xlu2 %3558 }
 0x362   : > { %15004 = vst [vmem:[#allocation116_spill] sm:$0xff] %v11517_v19 }
 0x366   : > { %6040 = vperm.xlu2 %9606, %v8865_v39   ;;  %v1878_v39 = vadd.f32 %v11336_v26, %v10790_v60  ;;  %v9069_v60 = vld [vmem:[%s9796_s11 + $0x5f8] sm:$0xff] }
 0x367   : > { %v1964_v15 = vpop.f32.mrf.mxu0  ;;  %6035 = vperm.xlu1 %9605, %v8864_v25   ;;  %v9067_v25 = vld [vmem:[%s9796_s11 + $0x5e8] sm:$0xff] }
 0x368   : > { %v11504_v58 = vadd.f32 %v1964_v15, %v1876_v1  ;;  %6050 = vperm.xlu0 %9604, %v8867_v11   ;;  %v11519_v15 = vpop.permute.xlu0 %3458  ;;  %v9277_v11 = vld [vmem:[%s14775_s5 + $0xc4] sm:$0xf]  ;;  %v7634_v1 = vld [vmem:[%s14775_s5 + $0xc8] sm:$0xf0]  ;;  %v11534_v26 = vpop.permute.xlu1 %3448 }
 0x369   : > { %15005 = vst [vmem:[#allocation117_spill] sm:$0xff] %v11519_v15  ;;  %v9053_v15 = vld [vmem:[%s9796_s11 + $0x578] sm:$0xff] }
 0x36a   : > { %2003 = vmatmul.bf16.gmra.mxu0 %v7629_v33  ;;  %v9066_v33 = vld [vmem:[%s9796_s11 + $0x5e0] sm:$0xff]  ;;  %15006 = vst [vmem:[#allocation118_spill] sm:$0xff] %v11534_v26 }
 0x36e   : > { %6707 = vperm.xlu2 %9606, %v9068_v18   ;;  %v7637_v18 = vor.u32 %v9277_v11, %v7634_v1 }
 0x36f   : > { %v1966_v38 = vpop.f32.mrf.mxu0  ;;  %6030 = vperm.xlu1 %9605, %v8863_v31   ;;  %v1881_v31 = vadd.f32 %v11405_v52, %v10774_v20  ;;  %v9052_v20 = vld [vmem:[%s9796_s11 + $0x570] sm:$0xff] }
 0x370   : > { %v11523_v57 = vadd.f32 %v1966_v38, %v1878_v39  ;;  %6025 = vperm.xlu0 %9604, %v8862_v8   ;;  %v11538_v8 = vpop.f32.mrf.mxu3  ;;  %v11540_v38 = vpop.permute.xlu2 %3543 }
 0x371   : > { %15007 = vst [vmem:[#allocation119_spill] sm:$0xff] %v11540_v38  ;;  %v11542_v19 = vpop.permute.xlu0 %3443 }
 0x372   : > { %15008 = vst [vmem:[#allocation120_spill] sm:$0xff] %v11542_v19 }
 0x376   : > { %6702 = vperm.xlu2 %9606, %v9067_v25   ;;  %v11551_v25 = vpop.permute.xlu1 %3433 }
 0x377   : > { %v1969_v39 = vpop.f32.mrf.mxu0  ;;  %6697 = vperm.xlu1 %9605, %v9066_v33   ;;  %15009 = vst [vmem:[#allocation121_spill] sm:$0xff] %v11551_v25  ;;  %v9062_v25 = vld [vmem:[%s9796_s11 + $0x5c0] sm:$0xff] }
 0x378   : > { %v11544_v59 = vadd.f32 %v1969_v39, %v1881_v31  ;;  %6712 = vperm.xlu0 %9604, %v9069_v60   ;;  %v11553_v11 = vpop.f32.mrf.mxu3  ;;  %v11555_v1 = vpop.permute.xlu2 %3438  ;;  %v9051_v60 = vld [vmem:[%s9796_s11 + $0x568] sm:$0xff]  ;;  %v9279_v31 = vld [vmem:[%s14775_s5 + $0xd4] sm:$0xf] }
 0x379   : > { %15010 = vst [vmem:[#allocation122_spill] sm:$0xff] %v11555_v1  ;;  %v11557_v33 = vpop.permute.xlu0 %3548  ;;  %v9063_v1 = vld [vmem:[%s9796_s11 + $0x5c8] sm:$0xff]  ;;  %v1896_v46 = vadd.f32 %v11553_v11, %v10683_v14  ;;  %v1888_v14 = vadd.f32 %v11481_v50, %v10753_v55 }
 0x37a   : > { %2008 = vmatmul.bf16.gmra.mxu0 %v7637_v18  ;;  %15011 = vst [vmem:[#allocation123_spill] sm:$0xff] %v11557_v33  ;;  %v9065_v18 = vld [vmem:[%s9796_s11 + $0x5d8] sm:$0xff]  ;;  %v15030_v50 = vld [vmem:[#allocation44_spill] sm:$0xff] }
 0x37e   : > { %6687 = vperm.xlu2 %9606, %v9064_v51   ;;  %v7642_v51 = vld [vmem:[%s14775_s5 + $0xd8] sm:$0xf0]  ;;  %v11570_v33 = vpop.permute.xlu1 %3538 }
 0x37f   : > { %v11549_v52 = vpop.f32.mrf.mxu0  ;;  %6632 = vperm.xlu1 %9605, %v9053_v15   ;;  %v9050_v15 = vld [vmem:[%s9796_s11 + $0x560] sm:$0xff]  ;;  %v7645_v39 = vor.u32 %v9279_v31, %v7642_v51  ;;  %15012 = vst [vmem:[#allocation124_spill] sm:$0xff] %v11570_v33  ;;  %v9061_v31 = vld [vmem:[%s9796_s11 + $0x5b8] sm:$0xff] }
 0x380   : > { %6627 = vperm.xlu0 %9604, %v9052_v20   ;;  %v1897_v38 = vpop.f32.mrf.mxu3  ;;  %v11573_v26 = vpop.permute.xlu2 %3523  ;;  %v9281_v51 = vld [vmem:[%s14775_s5 + $0xe4] sm:$0xf]  ;;  %v9049_v33 = vld [vmem:[%s9796_s11 + $0x558] sm:$0xff] }
 0x381   : > { %15013 = vst [vmem:[#allocation125_spill] sm:$0xff] %v11573_v26  ;;  %v11575_v19 = vpop.permute.xlu0 %3533 }
 0x382   : > { %15014 = vst [vmem:[#allocation126_spill] sm:$0xff] %v11575_v19 }
 0x386   : > { %6622 = vperm.xlu2 %9606, %v9051_v60  }
 0x387   : > { %v11568_v20 = vpop.f32.mrf.mxu0  ;;  %6617 = vperm.xlu1 %9605, %v9050_v15   ;;  %v7650_v15 = vld [vmem:[%s14775_s5 + $0xe8] sm:$0xf0] }
 0x388   : > { %6692 = vperm.xlu0 %9604, %v9065_v18   ;;  %v11588_v18 = vpop.permute.xlu1 %3513  ;;  %v7653_v19 = vor.u32 %v9281_v51, %v7650_v15  ;;  %v9045_v51 = vld [vmem:[%s9796_s11 + $0x538] sm:$0xff]  ;;  %v9059_v15 = vld [vmem:[%s9796_s11 + $0x5a8] sm:$0xff] }
 0x389   : > { %15015 = vst [vmem:[#allocation127_spill] sm:$0xff] %v11588_v18  ;;  %v9046_v18 = vld [vmem:[%s9796_s11 + $0x540] sm:$0xff] }
 0x38a   : > { %2013 = vmatmul.bf16.gmra.mxu0 %v7645_v39  ;;  %v9060_v39 = vld [vmem:[%s9796_s11 + $0x5b0] sm:$0xff] }
 0x38e   : > { %6607 = vperm.xlu2 %9606, %v9048_v47   ;;  %v11591_v47 = vpop.f32.mrf.mxu3 }
 0x38f   : > { %v11579_v60 = vpop.f32.mrf.mxu0  ;;  %6682 = vperm.xlu1 %9605, %v9063_v1   ;;  %v11594_v1 = vpop.permute.xlu2 %3518 }
 0x390   : > { %6677 = vperm.xlu0 %9604, %v9062_v25   ;;  %15016 = vst [vmem:[#allocation128_spill] sm:$0xff] %v11594_v1  ;;  %v11596_v25 = vpop.permute.xlu0 %3528  ;;  %v11601_v9 = vpop.permute.xlu1 %4200 }
 0x391   : > { %15017 = vst [vmem:[#allocation129_spill] sm:$0xff] %v11596_v25 }
 0x392   : > { %15018 = vst [vmem:[#allocation130_spill] sm:$0xff] %v11601_v9 }
 0x396   : > { %6672 = vperm.xlu2 %9606, %v9061_v31   ;;  %v11603_v32 = vpop.f32.mrf.mxu3 }
 0x397   : > { %v1979_v26 = vpop.f32.mrf.mxu0  ;;  %6667 = vperm.xlu1 %9605, %v9060_v39   ;;  %v11605_v25 = vpop.permute.xlu2 %4115 }
 0x398   : > { %6612 = vperm.xlu0 %9604, %v9049_v33   ;;  %15019 = vst [vmem:[#allocation131_spill] sm:$0xff] %v11605_v25  ;;  %v11607_v31 = vpop.permute.xlu0 %4195  ;;  %v7658_v33 = vld [vmem:[%s14775_s5 + $0xf8] sm:$0xf0]  ;;  %v11618_v9 = vpop.permute.xlu1 %4185 }
 0x399   : > { %15020 = vst [vmem:[#allocation132_spill] sm:$0xff] %v11607_v31 }
 0x39a   : > { %2018 = vmatmul.bf16.gmra.mxu0 %v7653_v19  ;;  %v9283_v19 = vld [vmem:[%s14775_s5 + $0xf4] sm:$0xf]  ;;  %15021 = vst [vmem:[#allocation133_spill] sm:$0xff] %v11618_v9  ;;  %v1898_v9 = vadd.f32 %v1897_v38, %v10679_v4  ;;  %v1886_v4 = vadd.f32 %v11460_v7, %v10728_v48  ;;  %v15033_v7 = vld [vmem:[#allocation6_spill] sm:$0xff] }
 0x39c   : > { %v1975_v48 = vadd.f32 %v11568_v20, %v1886_v4 }
 0x39e   : > { %6657 = vperm.xlu2 %9606, %v9058_v6   ;;  %v9044_v6 = vld [vmem:[%s9796_s11 + $0x530] sm:$0xff] }
 0x39f   : > { %v1981_v1 = vpop.f32.mrf.mxu0  ;;  %6602 = vperm.xlu1 %9605, %v9047_v54   ;;  %v7661_v54 = vor.u32 %v9283_v19, %v7658_v33  ;;  %v11622_v31 = vpop.permute.xlu2 %4190  ;;  %v9057_v33 = vld [vmem:[%s9796_s11 + $0x598] sm:$0xff] }
 0x3a0   : > { %6597 = vperm.xlu0 %9604, %v9046_v18   ;;  %v11620_v18 = vpop.f32.mrf.mxu3  ;;  %15022 = vst [vmem:[#allocation134_spill] sm:$0xff] %v11622_v31  ;;  %v11624_v25 = vpop.permute.xlu0 %4120 }
 0x3a1   : > { %15023 = vst [vmem:[#allocation135_spill] sm:$0xff] %v11624_v25 }
 0x3a6   : > { %6592 = vperm.xlu2 %9606, %v9045_v51   ;;  %v1893_v51 = vadd.f32 %v11538_v8, %v10708_v23  ;;  %v15028_v8 = vld [vmem:[#allocation5_spill] sm:$0xff] }
 0x3a7   : > { %v1984_v39 = vpop.f32.mrf.mxu0  ;;  %6587 = vperm.xlu1 %9605, %v9044_v6   ;;  %v9056_v6 = vld [vmem:[%s9796_s11 + $0x590] sm:$0xff]  ;;  %v11657_v38 = vpop.permute.xlu2 %4175 }
 0x3a8   : > { %6662 = vperm.xlu0 %9604, %v9059_v15   ;;  %v1985_v19 = vadd.f32 %v1984_v39, %v1896_v46  ;;  %v1891_v15 = vadd.f32 %v11512_v49, %v10700_v21  ;;  %v1982_v28 = vadd.f32 %v1981_v1, %v1893_v51  ;;  %v11641_v46 = vpop.permute.xlu1 %4110  ;;  %v1977_v21 = vadd.f32 %v11579_v60, %v1888_v14  ;;  %v11659_v1 = vpop.permute.xlu0 %4105  ;;  %v9054_v39 = vld [vmem:[%s9796_s11 + $0x580] sm:$0xff] }
 0x3a9   : > { %15025 = vst [vmem:[#allocation137_spill] sm:$0xff] %v11641_v46  ;;  %v15035_v51 = vld [vmem:[#allocation51_spill] sm:$0xff] }
 0x3aa   : > { %2023 = vmatmul.bf16.gmra.mxu0 %v7661_v54  ;;  %v1980_v11 = vadd.f32 %v1979_v26, %v1891_v15  ;;  %v11639_v54 = vadd.f32 %v1985_v19, %v9985_v27  ;;  %v1883_v27 = vadd.f32 %v11431_v3, %v15030_v50  ;;  %v9055_v26 = vld [vmem:[%s9796_s11 + $0x588] sm:$0xff]  ;;  %15031 = vst [vmem:[#allocation44_spill] sm:$0xff] %v11657_v38 }
 0x3ab   : > { %15032 = vst [vmem:[#allocation138_spill] sm:$0xff] %v11659_v1  ;;  %v1901_v3 = vadd.f32 %v11591_v47, %v15035_v51  ;;  %v9043_v19 = vld [vmem:[%s9796_s11 + $0x528] sm:$0xff]  ;;  %v9040_v51 = vld [vmem:[%s9796_s11 + $0x510] sm:$0xff] }
 0x3ac   : > { %15024 = vst [vmem:[#allocation136_spill] sm:$0xff] %v11639_v54  ;;  %v11663_v60 = vadd.f32 %v1980_v11, %v15033_v7  ;;  %v15043_v7 = vld [vmem:[#allocation10_spill] sm:$0xff] }
 0x3ae   : > { %6577 = vperm.xlu2 %9606, %v9042_v30   ;;  %v15026_v30 = vld [vmem:[#allocation9_spill] sm:$0xff]  ;;  %15034 = vst [vmem:[#allocation6_spill] sm:$0xff] %v11663_v60  ;;  %v2073_v47 = vmax.f32 %v11663_v60, 0.0  ;;  %v15073_v60 = vld [vmem:[#allocation40_spill] sm:$0xff] }
 0x3af   : > { %v1986_v31 = vpop.f32.mrf.mxu0  ;;  %6652 = vperm.xlu1 %9605, %v9057_v33   ;;  %v11647_v49 = vadd.f32 %v1982_v28, %v15026_v30  ;;  %v2075_v28 = vmax.f32 %v11639_v54, 0.0  ;;  %v1972_v33 = vadd.f32 %v11549_v52, %v1883_v27  ;;  %v15040_v52 = vld [vmem:[#allocation12_spill] sm:$0xff]  ;;  %v9038_v27 = vld [vmem:[%s9796_s11 + $0x500] sm:$0xff] }
 0x3b0   : > { %v1987_v23 = vadd.f32 %v1986_v31, %v1898_v9  ;;  %6647 = vperm.xlu0 %9604, %v9056_v6   ;;  %v11654_v9 = vpop.f32.mrf.mxu3  ;;  %v15036_v6 = vld [vmem:[#allocation8_spill] sm:$0xff]  ;;  %v15074_v54 = vld [vmem:[#allocation15_spill] sm:$0xff] }
 0x3b1   : > { %15027 = vst [vmem:[#allocation9_spill] sm:$0xff] %v11647_v49  ;;  %v11673_v15 = vadd.f32 %v1977_v21, %v15036_v6  ;;  %v2074_v20 = vmax.f32 %v11647_v49, 0.0  ;;  %v11683_v21 = vadd.f32 %v1972_v33, %v15040_v52  ;;  %v15047_v33 = vld [vmem:[#allocation11_spill] sm:$0xff]  ;;  %v15051_v52 = vld [vmem:[#allocation14_spill] sm:$0xff] }
 0x3b2   : > { %v11650_v55 = vadd.f32 %v1987_v23, %v15028_v8  ;;  %v15038_v23 = vld [vmem:[#allocation7_spill] sm:$0xff]  ;;  %v11702_v6 = vadd.f32 %v11523_v57, %v15047_v33  ;;  %v11714_v57 = vadd.f32 %v11477_v29, %v15051_v52  ;;  %v15056_v33 = vld [vmem:[#allocation49_spill] sm:$0xff] }
 0x3b3   : > { %15037 = vst [vmem:[#allocation51_spill] sm:$0xff] %v11673_v15  ;;  %v11677_v4 = vadd.f32 %v1975_v48, %v15038_v23  ;;  %v2072_v8 = vmax.f32 %v11673_v15, 0.0  ;;  %v2099_v50 = vpack.c.bf16 %v2074_v20, %v2073_v47  ;;  %v2070_v20 = vmax.f32 %v11683_v21, 0.0 }
 0x3b4   : > { %15029 = vst [vmem:[#allocation5_spill] sm:$0xff] %v11650_v55  ;;  %v2076_v31 = vmax.f32 %v11650_v55, 0.0  ;;  %v1906_v29 = vadd.f32 %v11620_v18, %v15056_v33 }
 0x3b5   : > { %15039 = vst [vmem:[#allocation8_spill] sm:$0xff] %v11677_v4  ;;  %v2071_v48 = vmax.f32 %v11677_v4, 0.0 }
 0x3b6   : > { %6642 = vperm.xlu2 %9606, %v9055_v26   ;;  %v2100_v14 = vpack.c.bf16 %v2076_v31, %v2075_v28  ;;  %15041 = vst [vmem:[#allocation7_spill] sm:$0xff] %v11683_v21  ;;  %v11687_v26 = vpop.permute.xlu1 %4095  ;;  %v11691_v28 = vadd.f32 %v11544_v59, %v15043_v7  ;;  %v9041_v31 = vld [vmem:[%s9796_s11 + $0x518] sm:$0xff] }
 0x3b7   : > { %v1989_v11 = vpop.f32.mrf.mxu0  ;;  %6637 = vperm.xlu1 %9605, %v9054_v39   ;;  %15042 = vst [vmem:[#allocation12_spill] sm:$0xff] %v11687_v26  ;;  %v2098_v59 = vpack.c.bf16 %v2072_v8, %v2071_v48 }
 0x3b8   : > { %v11680_v30 = vadd.f32 %v1989_v11, %v1901_v3  ;;  %6582 = vperm.xlu0 %9604, %v9043_v19   ;;  %2495 = vmatpush.bf16.msra.mxu1 %v2100_v14  ;;  %15044 = vst [vmem:[#allocation10_spill] sm:$0xff] %v11691_v28  ;;  %v1910_v39 = vpop.f32.mrf.mxu3  ;;  %v11696_v3 = vpop.permute.xlu2 %4100  ;;  %v15049_v11 = vld [vmem:[#allocation13_spill] sm:$0xff]  ;;  %v2069_v47 = vmax.f32 %v11691_v28, 0.0 }
 0x3b9   : > { %15045 = vst [vmem:[#allocation139_spill] sm:$0xff] %v11696_v3  ;;  %v11698_v19 = vpop.permute.xlu0 %4180  ;;  %v11709_v23 = vadd.f32 %v11504_v58, %v15049_v11  ;;  %v7134_v58 = vld [vmem:[%s14777_s7] sm:$0xff]  ;;  %v15072_v28 = vld [vmem:[#allocation37_spill] sm:$0xff] }
 0x3ba   : > { %15046 = vst [vmem:[#allocation140_spill] sm:$0xff] %v11698_v19  ;;  %v2097_v7 = vpack.c.bf16 %v2070_v20, %v2069_v47  ;;  %v7736_v19 = vld [vmem:[%s14773_s3 + $0x110] sm:$0xf] }
 0x3bb   : > { %15048 = vst [vmem:[#allocation11_spill] sm:$0xff] %v11702_v6  ;;  %v2067_v48 = vmax.f32 %v11709_v23, 0.0 }
 0x3bc   : > { %2496 = vmatpush.bf16.msra.mxu1 %v2099_v50  ;;  %15050 = vst [vmem:[#allocation13_spill] sm:$0xff] %v11709_v23  ;;  %v2068_v50 = vmax.f32 %v11702_v6, 0.0 }
 0x3bd   : > { %15052 = vst [vmem:[#allocation14_spill] sm:$0xff] %v11714_v57 }
 0x3be   : > { %6557 = vperm.xlu2 %9606, %v9038_v27   ;;  %v15053_v27 = vld [vmem:[#allocation16_spill] sm:$0xff]  ;;  %v2096_v11 = vpack.c.bf16 %v2068_v50, %v2067_v48 }
 0x3bf   : > { %v11705_v14 = vpop.f32.mrf.mxu0  ;;  %6572 = vperm.xlu1 %9605, %v9041_v31   ;;  %v11719_v8 = vadd.f32 %v11458_v36, %v15053_v27  ;;  %v9039_v31 = vld [vmem:[%s9796_s11 + $0x508] sm:$0xff]  ;;  %v2066_v36 = vmax.f32 %v11714_v57, 0.0  ;;  %v15060_v27 = vld [vmem:[#allocation21_spill] sm:$0xff]  ;;  %s9199_s11 = sshll.u32 %s9677_s30, 3 }
 0x3c0   : > { %6567 = vperm.xlu0 %9604, %v9040_v51   ;;  %2497 = vmatpush.bf16.msra.mxu1 %v2098_v59  ;;  %v11726_v51 = vpop.permute.xlu1 %4170  ;;  %v15057_v59 = vld [vmem:[#allocation19_spill] sm:$0xff]  ;;  %v11735_v47 = vpop.f32.mrf.mxu3  ;;  %v11741_v38 = vadd.f32 %v11416_v40, %v15060_v27  ;;  %s7186_s26 = scalar_lea.hbm %s14778_s8, %s9199_s11  ;;  %s9627_s11 = scalar_lea.hbm %s14778_s8, 16 }
 0x3c1   : > { %15054 = vst [vmem:[#allocation16_spill] sm:$0xff] %v11719_v8  ;;  %v11732_v20 = vadd.f32 %v11437_v62, %v15057_v59  ;;  %v15062_v62 = vld [vmem:[#allocation24_spill] sm:$0xff]  ;;  %s7190_s16 = sshll.u32 %s7186_s26, 4  ;;  %s7191_s16 = int_to_ptr.hbm [resolvable:$true] %s7190_s16 }
 0x3c2   : > { %15055 = vst [vmem:[#allocation141_spill] sm:$0xff] %v11726_v51  ;;  %v2065_v51 = vmax.f32 %v11719_v8, 0.0  ;;  %v11748_v33 = vadd.f32 %v11389_v37, %v15062_v62  ;;  %v2063_v40 = vmax.f32 %v11741_v38, 0.0  ;;  %v7728_v37 = vld [vmem:[%s14773_s3 + $0x100] sm:$0xf]  ;;  %v15066_v62 = vld [vmem:[#allocation48_spill] sm:$0xff] }
 0x3c3   : > { %15058 = vst [vmem:[#allocation49_spill] sm:$0xff] %v11732_v20  ;;  %v2064_v50 = vmax.f32 %v11732_v20, 0.0  ;;  %v15069_v20 = vld [vmem:[#allocation36_spill] sm:$0xff]  ;;  %s9621_s20 = sshra.s32 %s7191_s16, 4  ;;  %s9622_s20 = int_to_ptr.hbm [resolvable:$true] %s9621_s20 }
 0x3c4   : > { %2498 = vmatpush.bf16.msra.mxu1 %v2097_v7  ;;  %v11737_v7 = vpop.permute.xlu0 %4165  ;;  %15061 = vst [vmem:[#allocation21_spill] sm:$0xff] %v11741_v38  ;;  %v2095_v48 = vpack.c.bf16 %v2066_v36, %v2065_v51  ;;  %v2062_v27 = vmax.f32 %v11748_v33, 0.0  ;;  %s9623_s30 = scalar_lea.hbm %s9622_s20, 8  ;;  %p9628_p1 = scmp.lt.s32.totalorder %s9622_s20, %s14778_s8 }
 0x3c5   : > { %15059 = vst [vmem:[#allocation19_spill] sm:$0xff] %v11737_v7  ;;  %v9290_v7 = vld [vmem:[%s14773_s3 + $0x124] sm:$0xf0]  ;;  %p9624_p12 = scmp.ne.s32.totalorder %s9622_s20, %s9623_s30  ;;  %p9629_p2 = scmp.lt.s32.totalorder %s9627_s11, %s9623_s30 }
 0x3c6   : > { %15063 = vst [vmem:[#allocation24_spill] sm:$0xff] %v11748_v33 }
 0x3c7   : > { %v1994_v52 = vpop.f32.mrf.mxu0  ;;  %7137 = vperm.xlu1 %9605, %v7134_v58   ;;  %v15064_v58 = vld [vmem:[#allocation25_spill] sm:$0xff]  ;;  %p9625_p13 = pnand %p9624_p12, %p9773_p4  ;;  %p9630_p3 = por %p9629_p2, %p9628_p1 }
 0x3c8   : > { %v11744_v18 = vadd.f32 %v1994_v52, %v1906_v29  ;;  %6562 = vperm.xlu0 %9604, %v9039_v31   ;;  %2499 = vmatpush.bf16.msra.mxu1 %v2096_v11  ;;  %v11753_v59 = vadd.f32 %v11370_v13, %v15064_v58  ;;  %v2094_v29 = vpack.c.bf16 %v2064_v50, %v2063_v40  ;;  %v9286_v13 = vld [vmem:[%s14773_s3 + $0x104] sm:$0xf0]  ;;  %v1915_v51 = vpop.f32.mrf.mxu3 }
 0x3c9   : > { %v7729_v11 = vor.u32 %v9286_v13, %v7728_v37  ;;  %v15067_v13 = vld [vmem:[#allocation45_spill] sm:$0xff]  ;;  %p9626_p0 = pneg %p9625_p13 }
 0x3ca   : > { %15065 = vst [vmem:[#allocation25_spill] sm:$0xff] %v11753_v59  ;;  %v2061_v31 = vmax.f32 %v11753_v59, 0.0 }
 0x3cb   : > { %p9631_p5 = pnand %p9630_p3, %p9626_p0 }
 0x3cc   : > { %2500 = vmatpush.bf16.msra.mxu1 %v2095_v48  ;;  %v2093_v36 = vpack.c.bf16 %v2062_v27, %v2061_v31  ;;  %v1911_v48 = vadd.f32 %v1910_v39, %v15066_v62  ;;  %v9288_v27 = vld [vmem:[%s14773_s3 + $0x114] sm:$0xf0]  ;;  %v1916_v39 = vadd.f32 %v1915_v51, %v15067_v13 }
 0x3cd   : > { %v7737_v31 = vor.u32 %v9288_v27, %v7736_v19  ;;  %v15068_v19 = vld [vmem:[#allocation42_spill] sm:$0xff] }
 0x3cf   : > { %v11757_v52 = vpop.f32.mrf.mxu0 }
 0x3d0   : > { %2501 = vmatpush.bf16.msra.mxu1 %v2094_v29  ;;  %v11769_v40 = vpop.f32.mrf.mxu3 }
 0x3d4   : > { %2502 = vmatpush.bf16.msra.mxu1 %v2093_v36 }
 0x3d7   : > { %v1999_v50 = vpop.f32.mrf.mxu0  ;;  %2503 = vmatmul.bf16.vlgmr.msra.gmra.mxu1 %v7729_v11 }
 0x3d8   : > { %v11767_v58 = vadd.f32 %v1999_v50, %v1911_v48  ;;  %v1920_v37 = vpop.f32.mrf.mxu3  ;;  %v7744_v50 = vld [vmem:[%s14773_s3 + $0x120] sm:$0xf] }
 0x3d9   : > { %v7745_v26 = vor.u32 %v9290_v7, %v7744_v50  ;;  %v1921_v27 = vadd.f32 %v1920_v37, %v15068_v19 }
 0x3df   : > { %v11771_v29 = vpop.f32.mrf.mxu0 }
 0x3e0   : > { %v1922_v62 = vpop.f32.mrf.mxu3 }
 0x3e7   : > { %v2004_v36 = vpop.f32.mrf.mxu0  ;;  %2508 = vmatmul.bf16.gmra.mxu1 %v7737_v31 }
 0x3e8   : > { %v11780_v11 = vadd.f32 %v2004_v36, %v1916_v39  ;;  %v1925_v31 = vpop.f32.mrf.mxu3  ;;  %v7752_v39 = vld [vmem:[%s14773_s3 + $0x130] sm:$0xf]  ;;  %v9292_v36 = vld [vmem:[%s14773_s3 + $0x134] sm:$0xf0] }
 0x3e9   : > { %v7753_v1 = vor.u32 %v9292_v36, %v7752_v39  ;;  %v7768_v39 = vld [vmem:[%s14773_s3 + $0x150] sm:$0xf] }
 0x3ef   : > { %v11782_v48 = vpop.f32.mrf.mxu0 }
 0x3f0   : > { %v1927_v25 = vpop.f32.mrf.mxu3 }
 0x3f1   : > { %v1928_v55 = vadd.f32 %v1927_v25, %v15073_v60  ;;  %v15077_v25 = vld [vmem:[#allocation18_spill] sm:$0xff] }
 0x3f7   : > { %v2009_v3 = vpop.f32.mrf.mxu0  ;;  %2513 = vmatmul.bf16.gmra.mxu1 %v7745_v26  ;;  %v7760_v26 = vld [vmem:[%s14773_s3 + $0x140] sm:$0xf] }
 0x3f8   : > { %v2010_v51 = vadd.f32 %v2009_v3, %v1921_v27  ;;  %v1930_v7 = vpop.f32.mrf.mxu3  ;;  %v9294_v3 = vld [vmem:[%s14773_s3 + $0x144] sm:$0xf0] }
 0x3f9   : > { %v7761_v37 = vor.u32 %v9294_v3, %v7760_v26  ;;  %v15070_v26 = vld [vmem:[#allocation39_spill] sm:$0xff] }
 0x3ff   : > { %v2011_v13 = vpop.f32.mrf.mxu0 }
 0x400   : > { %v1932_v19 = vpop.f32.mrf.mxu3 }
 0x401   : > { %v1933_v3 = vadd.f32 %v1932_v19, %v15070_v26  ;;  %v15082_v26 = vld [vmem:[#allocation23_spill] sm:$0xff] }
 0x407   : > { %v2014_v46 = vpop.f32.mrf.mxu0  ;;  %2518 = vmatmul.bf16.gmra.mxu1 %v7753_v1  ;;  %v9296_v1 = vld [vmem:[%s14773_s3 + $0x154] sm:$0xf0] }
 0x408   : > { %v1935_v36 = vpop.f32.mrf.mxu3  ;;  %v7769_v33 = vor.u32 %v9296_v1, %v7768_v39 }
 0x409   : > { %v1936_v8 = vadd.f32 %v1935_v36, %v15069_v20  ;;  %v7776_v20 = vld [vmem:[%s14773_s3 + $0x160] sm:$0xf]  ;;  %v15081_v36 = vld [vmem:[#allocation46_spill] sm:$0xff] }
 0x40f   : > { %v2016_v50 = vpop.f32.mrf.mxu0 }
 0x410   : > { %v1937_v57 = vpop.f32.mrf.mxu3 }
 0x411   : > { %v1938_v21 = vadd.f32 %v1937_v57, %v15072_v28  ;;  %v2017_v28 = vadd.f32 %v2016_v50, %v1928_v55  ;;  %v15076_v57 = vld [vmem:[#allocation17_spill] sm:$0xff] }
 0x417   : > { %v2019_v27 = vpop.f32.mrf.mxu0  ;;  %2523 = vmatmul.bf16.gmra.mxu1 %v7761_v37  ;;  %v15071_v37 = vld [vmem:[#allocation38_spill] sm:$0xff] }
 0x418   : > { %v1931_v6 = vadd.f32 %v1930_v7, %v15071_v37  ;;  %v15083_v37 = vld [vmem:[#allocation26_spill] sm:$0xff] }
 0x41a   : > { %v2020_v49 = vadd.f32 %v2019_v27, %v1931_v6 }
 0x41f   : > { %v2021_v59 = vpop.f32.mrf.mxu0 }
 0x420   : > { %v2022_v4 = vadd.f32 %v2021_v59, %v1933_v3 }
 0x422   : > { %v11825_v59 = vadd.f32 %v2022_v4, %v15076_v57 }
 0x424   : > { %v2090_v4 = vmax.f32 %v11825_v59, 0.0 }
 0x427   : > { %v2024_v38 = vpop.f32.mrf.mxu0  ;;  %2528 = vmatmul.bf16.gmra.mxu1 %v7769_v33 }
 0x428   : > { %v2025_v23 = vadd.f32 %v2024_v38, %v1936_v8  ;;  %v9298_v38 = vld [vmem:[%s14773_s3 + $0x164] sm:$0xf0]  ;;  %v15075_v8 = vld [vmem:[#allocation41_spill] sm:$0xff] }
 0x429   : > { %v1926_v33 = vadd.f32 %v1925_v31, %v15075_v8  ;;  %v15080_v31 = vld [vmem:[#allocation22_spill] sm:$0xff] }
 0x42a   : > { %v11815_v44 = vadd.f32 %v2025_v23, %v15074_v54  ;;  %v15078_v54 = vld [vmem:[#allocation43_spill] sm:$0xff]  ;;  %v15079_v23 = vld [vmem:[#allocation20_spill] sm:$0xff]  ;;  %v11837_v55 = vadd.f32 %v2017_v28, %v15080_v31 }
 0x42b   : > { %v1923_v6 = vadd.f32 %v1922_v62, %v15078_v54  ;;  %v11832_v7 = vadd.f32 %v2020_v49, %v15079_v23  ;;  %v1918_v62 = vadd.f32 %v11769_v40, %v15081_v36  ;;  %v15089_v23 = vld [vmem:[#allocation28_spill] sm:$0xff] }
 0x42c   : > { %v2091_v19 = vmax.f32 %v11815_v44, 0.0 }
 0x42d   : > { %v2012_v1 = vadd.f32 %v2011_v13, %v1923_v6  ;;  %v2089_v49 = vmax.f32 %v11832_v7, 0.0  ;;  %v2007_v3 = vadd.f32 %v11782_v48, %v1918_v62  ;;  %v15094_v62 = vld [vmem:[#allocation31_spill] sm:$0xff] }
 0x42f   : > { %v2026_v15 = vpop.f32.mrf.mxu0  ;;  %v11848_v13 = vadd.f32 %v2012_v1, %v15083_v37  ;;  %v15091_v1 = vld [vmem:[#allocation30_spill] sm:$0xff] }
 0x430   : > { %v2027_v39 = vadd.f32 %v2026_v15, %v1938_v21  ;;  %v7777_v15 = vor.u32 %v9298_v38, %v7776_v20  ;;  %v2015_v21 = vadd.f32 %v2014_v46, %v1926_v33  ;;  %v2107_v20 = vpack.c.bf16 %v2090_v4, %v2089_v49  ;;  %v15084_v38 = vld [vmem:[#allocation47_spill] sm:$0xff] }
 0x431   : > { %v1913_v8 = vadd.f32 %v11735_v47, %v15084_v38  ;;  %v15085_v33 = vld [vmem:[#allocation27_spill] sm:$0xff]  ;;  %v2086_v48 = vmax.f32 %v11848_v13, 0.0  ;;  %v11866_v47 = vadd.f32 %v11780_v11, %v15089_v23  ;;  %v15098_v38 = vld [vmem:[#allocation32_spill] sm:$0xff] }
 0x432   : > { %v11828_v60 = vadd.f32 %v2027_v39, %v15077_v25  ;;  %v11843_v46 = vadd.f32 %v2015_v21, %v15082_v26  ;;  %v2088_v39 = vmax.f32 %v11837_v55, 0.0  ;;  %v11854_v28 = vadd.f32 %v2010_v51, %v15085_v33  ;;  %v15086_v25 = vld [vmem:[#allocation29_spill] sm:$0xff]  ;;  %v9302_v23 = vld [vmem:[%s14773_s3 + $0x184] sm:$0xf0] }
 0x433   : > { %v2002_v57 = vadd.f32 %v11771_v29, %v1913_v8  ;;  %v11859_v54 = vadd.f32 %v2007_v3, %v15086_v25  ;;  %15090 = vst [vmem:[#allocation45_spill] sm:$0xff] %v11866_v47  ;;  %v7784_v29 = vld [vmem:[%s14773_s3 + $0x170] sm:$0xf]  ;;  %v11884_v26 = vadd.f32 %v11767_v58, %v15094_v62  ;;  %v2083_v49 = vmax.f32 %v11866_v47, 0.0  ;;  %v15100_v58 = vld [vmem:[#allocation35_spill] sm:$0xff] }
 0x434   : > { %v2092_v27 = vmax.f32 %v11828_v60, 0.0  ;;  %v2087_v40 = vmax.f32 %v11843_v46, 0.0  ;;  %v2085_v51 = vmax.f32 %v11854_v28, 0.0  ;;  %v11894_v8 = vadd.f32 %v11744_v18, %v15098_v38  ;;  %v7808_v62 = vld [vmem:[%s14773_s3 + $0x1a0] sm:$0xf] }
 0x435   : > { %15087 = vst [vmem:[#allocation48_spill] sm:$0xff] %v11859_v54  ;;  %v11877_v31 = vadd.f32 %v2002_v57, %v15091_v1  ;;  %v15102_v57 = vld [vmem:[#allocation34_spill] sm:$0xff]  ;;  %v7800_v1 = vld [vmem:[%s14773_s3 + $0x190] sm:$0xf] }
 0x436   : > { %v2108_v50 = vpack.c.bf16 %v2092_v27, %v2091_v19  ;;  %v2106_v6 = vpack.c.bf16 %v2088_v39, %v2087_v40  ;;  %v9300_v19 = vld [vmem:[%s14773_s3 + $0x174] sm:$0xf0]  ;;  %v2105_v11 = vpack.c.bf16 %v2086_v48, %v2085_v51  ;;  %15095 = vst [vmem:[#allocation36_spill] sm:$0xff] %v11884_v26  ;;  %v11903_v25 = vadd.f32 %v11680_v30, %v15102_v57  ;;  %v9285_v30 = vld [vmem:[%s14773_s3 + $0x104] sm:$0xf] }
 0x437   : > { %2533 = vmatmul.bf16.gmra.mxu1 %v7777_v15  ;;  %v15088_v15 = vld [vmem:[#allocation50_spill] sm:$0xff]  ;;  %15092 = vst [vmem:[#allocation42_spill] sm:$0xff] %v11877_v31  ;;  %v7785_v4 = vor.u32 %v9300_v19, %v7784_v29  ;;  %v2082_v39 = vmax.f32 %v11877_v31, 0.0  ;;  %v2079_v48 = vmax.f32 %v11894_v8, 0.0  ;;  %v7730_v51 = vld [vmem:[%s14773_s3 + $0x108] sm:$0xf0] }
 0x438   : > { %2584 = vmatpush.bf16.msra.mxu2 %v2108_v50  ;;  %v1908_v21 = vadd.f32 %v11654_v9, %v15088_v15  ;;  %v2084_v9 = vmax.f32 %v11859_v54, 0.0  ;;  %v15093_v50 = vld [vmem:[#allocation52_spill] sm:$0xff]  ;;  %15099 = vst [vmem:[#allocation38_spill] sm:$0xff] %v11894_v8  ;;  %v2077_v15 = vmax.f32 %v11903_v25, 0.0  ;;  %v7816_v38 = vld [vmem:[%s14773_s3 + $0x1b0] sm:$0xf] }
 0x439   : > { %v1903_v36 = vadd.f32 %v11603_v32, %v15093_v50  ;;  %v2081_v32 = vmax.f32 %v11884_v26, 0.0  ;;  %15103 = vst [vmem:[#allocation40_spill] sm:$0xff] %v11903_v25 }
 0x43a   : > { %v1997_v27 = vadd.f32 %v11757_v52, %v1908_v21  ;;  %v15096_v52 = vld [vmem:[#allocation33_spill] sm:$0xff]  ;;  %v7792_v21 = vld [vmem:[%s14773_s3 + $0x180] sm:$0xf] }
 0x43b   : > { %v1992_v3 = vadd.f32 %v11705_v14, %v1903_v36  ;;  %v2103_v14 = vpack.c.bf16 %v2082_v39, %v2081_v32  ;;  %v7793_v19 = vor.u32 %v9302_v23, %v7792_v21  ;;  %v9308_v32 = vld [vmem:[%s14773_s3 + $0x1b4] sm:$0xf0]  ;;  %v9293_v21 = vld [vmem:[%s14773_s3 + $0x144] sm:$0xf]  ;;  %v7762_v23 = vld [vmem:[%s14773_s3 + $0x148] sm:$0xf0] }
 0x43c   : > { %2585 = vmatpush.bf16.msra.mxu2 %v2107_v20  ;;  %v11889_v37 = vadd.f32 %v1997_v27, %v15096_v52  ;;  %v2104_v20 = vpack.c.bf16 %v2084_v9, %v2083_v49  ;;  %v7733_v27 = vor.u32 %v9285_v30, %v7730_v51  ;;  %v9304_v9 = vld [vmem:[%s14773_s3 + $0x194] sm:$0xf0]  ;;  %v9306_v49 = vld [vmem:[%s14773_s3 + $0x1a4] sm:$0xf0]  ;;  %v7746_v52 = vld [vmem:[%s14773_s3 + $0x128] sm:$0xf0]  ;;  %v7817_v57 = vor.u32 %v9308_v32, %v7816_v38 }
 0x43d   : > { %v11898_v33 = vadd.f32 %v1992_v3, %v15100_v58  ;;  %v7801_v50 = vor.u32 %v9304_v9, %v7800_v1  ;;  %v9289_v3 = vld [vmem:[%s14773_s3 + $0x124] sm:$0xf]  ;;  %v7809_v39 = vor.u32 %v9306_v49, %v7808_v62  ;;  %v9291_v58 = vld [vmem:[%s14773_s3 + $0x134] sm:$0xf]  ;;  %v7765_v51 = vor.u32 %v9293_v21, %v7762_v23  ;;  %v9312_v1 = vld [vmem:[%s14773_s3 + $0x1d4] sm:$0xf0] }
 0x43e   : > { %15097 = vst [vmem:[#allocation39_spill] sm:$0xff] %v11889_v37  ;;  %v2080_v40 = vmax.f32 %v11889_v37, 0.0  ;;  %v9295_v9 = vld [vmem:[%s14773_s3 + $0x154] sm:$0xf]  ;;  %v7840_v62 = vld [vmem:[%s14773_s3 + $0x1e0] sm:$0xf] }
 0x43f   : > { %15101 = vst [vmem:[#allocation37_spill] sm:$0xff] %v11898_v33  ;;  %v9314_v49 = vld [vmem:[%s14773_s3 + $0x1e4] sm:$0xf0]  ;;  %v9301_v23 = vld [vmem:[%s14773_s3 + $0x184] sm:$0xf]  ;;  %v15113_v37 = vld [vmem:[#allocation57_spill] sm:$0xff] }
 0x440   : > { %2586 = vmatpush.bf16.msra.mxu2 %v2106_v6  ;;  %v2078_v6 = vmax.f32 %v11898_v33, 0.0  ;;  %v2102_v18 = vpack.c.bf16 %v2080_v40, %v2079_v48  ;;  %v7754_v40 = vld [vmem:[%s14773_s3 + $0x138] sm:$0xf0] }
 0x441   : > { %v7757_v48 = vor.u32 %v9291_v58, %v7754_v40  ;;  %v7848_v58 = vld [vmem:[%s14773_s3 + $0x1f0] sm:$0xf]  ;;  %v9316_v40 = vld [vmem:[%s14773_s3 + $0x1f4] sm:$0xf0] }
 0x442   : > { %v2101_v29 = vpack.c.bf16 %v2078_v6, %v2077_v15  ;;  %v9310_v15 = vld [vmem:[%s14773_s3 + $0x1c4] sm:$0xf0] }
 0x444   : > { %2587 = vmatpush.bf16.msra.mxu2 %v2105_v11  ;;  %v9287_v11 = vld [vmem:[%s14773_s3 + $0x114] sm:$0xf] }
 0x447   : > { %2538 = vmatmul.bf16.gmra.mxu1 %v7785_v4  ;;  %v7738_v4 = vld [vmem:[%s14773_s3 + $0x118] sm:$0xf0] }
 0x448   : > { %2588 = vmatpush.bf16.msra.mxu2 %v2104_v20  ;;  %v7741_v36 = vor.u32 %v9287_v11, %v7738_v4  ;;  %v7749_v20 = vor.u32 %v9289_v3, %v7746_v52  ;;  %v7770_v11 = vld [vmem:[%s14773_s3 + $0x158] sm:$0xf0]  ;;  %v9297_v3 = vld [vmem:[%s14773_s3 + $0x164] sm:$0xf]  ;;  %v7778_v52 = vld [vmem:[%s14773_s3 + $0x168] sm:$0xf0] }
 0x449   : > { %v7781_v38 = vor.u32 %v9297_v3, %v7778_v52 }
 0x44c   : > { %2589 = vmatpush.bf16.msra.mxu2 %v2103_v14 }
 0x450   : > { %2590 = vmatpush.bf16.msra.mxu2 %v2102_v18  ;;  %v7824_v18 = vld [vmem:[%s14773_s3 + $0x1c0] sm:$0xf] }
 0x451   : > { %v7825_v30 = vor.u32 %v9310_v15, %v7824_v18  ;;  %v7849_v18 = vor.u32 %v9316_v40, %v7848_v58 }
 0x454   : > { %2591 = vmatpush.bf16.msra.mxu2 %v2101_v29  ;;  %v2504_v14 = vpop.f32.mrf.mxu1 }
 0x457   : > { %2543 = vmatmul.bf16.gmra.mxu1 %v7793_v19  ;;  %2592 = vmatmul.bf16.vlgmr.msra.gmra.mxu2 %v7733_v27  ;;  %v7832_v27 = vld [vmem:[%s14773_s3 + $0x1d0] sm:$0xf] }
 0x458   : > { %v7833_v4 = vor.u32 %v9312_v1, %v7832_v27  ;;  %v2505_v27 = vadd.f32 %v2504_v14, %v11080_v17 }
 0x45c   : > { %v2506_v6 = vpop.f32.mrf.mxu1 }
 0x464   : > { %v2509_v29 = vpop.f32.mrf.mxu1 }
 0x465   : > { %v2510_v14 = vadd.f32 %v2509_v29, %v11019_v24  ;;  %v15104_v29 = vld [vmem:[#allocation68_spill] sm:$0xff] }
 0x467   : > { %2548 = vmatmul.bf16.gmra.mxu1 %v7801_v50  ;;  %2597 = vmatmul.bf16.gmra.mxu2 %v7741_v36  ;;  %v7773_v50 = vor.u32 %v9295_v9, %v7770_v11  ;;  %v9303_v11 = vld [vmem:[%s14773_s3 + $0x194] sm:$0xf] }
 0x46c   : > { %v2511_v19 = vpop.f32.mrf.mxu1 }
 0x474   : > { %v2514_v36 = vpop.f32.mrf.mxu1 }
 0x477   : > { %2553 = vmatmul.bf16.gmra.mxu1 %v7809_v39  ;;  %2602 = vmatmul.bf16.gmra.mxu2 %v7749_v20  ;;  %v7841_v20 = vor.u32 %v9314_v49, %v7840_v62 }
 0x47c   : > { %v2516_v39 = vpop.f32.mrf.mxu1 }
 0x484   : > { %v2519_v32 = vpop.f32.mrf.mxu1 }
 0x487   : > { %2558 = vmatmul.bf16.gmra.mxu1 %v7817_v57  ;;  %2607 = vmatmul.bf16.gmra.mxu2 %v7757_v48  ;;  %v9299_v57 = vld [vmem:[%s14773_s3 + $0x174] sm:$0xf]  ;;  %v7786_v48 = vld [vmem:[%s14773_s3 + $0x178] sm:$0xf0] }
 0x488   : > { %v7789_v15 = vor.u32 %v9299_v57, %v7786_v48  ;;  %v9305_v57 = vld [vmem:[%s14773_s3 + $0x1a4] sm:$0xf] }
 0x48c   : > { %v2521_v21 = vpop.f32.mrf.mxu1 }
 0x494   : > { %v2524_v17 = vpop.f32.mrf.mxu1 }
 0x497   : > { %2563 = vmatmul.bf16.gmra.mxu1 %v7825_v30  ;;  %2612 = vmatmul.bf16.gmra.mxu2 %v7765_v51  ;;  %v7794_v30 = vld [vmem:[%s14773_s3 + $0x188] sm:$0xf0] }
 0x498   : > { %v7797_v51 = vor.u32 %v9301_v23, %v7794_v30 }
 0x49c   : > { %v12028_v48 = vpop.f32.mrf.mxu1 }
 0x4a7   : > { %2568 = vmatmul.bf16.gmra.mxu1 %v7833_v4  ;;  %2617 = vmatmul.bf16.gmra.mxu2 %v7773_v50  ;;  %v7802_v4 = vld [vmem:[%s14773_s3 + $0x198] sm:$0xf0]  ;;  %v2507_v50 = vadd.f32 %v2506_v6, %v11075_v34  ;;  %v7810_v34 = vld [vmem:[%s14773_s3 + $0x1a8] sm:$0xf0]  ;;  %v2512_v6 = vadd.f32 %v2511_v19, %v11056_v61  ;;  %v9307_v61 = vld [vmem:[%s14773_s3 + $0x1b4] sm:$0xf] }
 0x4a8   : > { %v7805_v3 = vor.u32 %v9303_v11, %v7802_v4  ;;  %v7813_v23 = vor.u32 %v9305_v57, %v7810_v34  ;;  %v12033_v11 = vpop.f32.mrf.mxu1  ;;  %v7818_v19 = vld [vmem:[%s14773_s3 + $0x1b8] sm:$0xf0]  ;;  %v15105_v4 = vld [vmem:[#allocation69_spill] sm:$0xff] }
 0x4b7   : > { %2573 = vmatmul.bf16.gmra.mxu1 %v7841_v20  ;;  %2622 = vmatmul.bf16.gmra.mxu2 %v7781_v38 }
 0x4c7   : > { %2578 = vmatmul.bf16.gmra.mxu1 %v7849_v18  ;;  %2627 = vmatmul.bf16.gmra.mxu2 %v7789_v15 }
 0x4d7   : > { %2632 = vmatmul.bf16.gmra.mxu2 %v7797_v51 }
 0x4da   : > { %v2593_v1 = vpop.f32.mrf.mxu2 }
 0x4db   : > { %v2594_v9 = vadd.f32 %v2593_v1, %v2505_v27  ;;  %v2515_v27 = vadd.f32 %v2514_v36, %v15104_v29  ;;  %v2531_v36 = vpop.f32.mrf.mxu1 }
 0x4dc   : > { %v2532_v26 = vadd.f32 %v2531_v36, %v15113_v37 }
 0x4dd   : > { %v2673_v52 = vmax.f32 %v2594_v9, 0.0 }
 0x4e2   : > { %v2595_v62 = vpop.f32.mrf.mxu2 }
 0x4e3   : > { %v2596_v49 = vadd.f32 %v2595_v62, %v2507_v50  ;;  %v2517_v50 = vadd.f32 %v2516_v39, %v15105_v4  ;;  %v7826_v39 = vld [vmem:[%s14773_s3 + $0x1c8] sm:$0xf0] }
 0x4e5   : > { %v2674_v20 = vmax.f32 %v2596_v49, 0.0 }
 0x4e7   : > { %2637 = vmatmul.bf16.gmra.mxu2 %v7805_v3  ;;  %v12018_v38 = vpack.c.bf16 %v2674_v20, %v2673_v52  ;;  %v7821_v3 = vor.u32 %v9307_v61, %v7818_v19 }
 0x4ea   : > { %v2598_v58 = vpop.f32.mrf.mxu2 }
 0x4eb   : > { %v2599_v40 = vadd.f32 %v2598_v58, %v2510_v14  ;;  %v15106_v58 = vld [vmem:[#allocation67_spill] sm:$0xff] }
 0x4ed   : > { %v2675_v30 = vmax.f32 %v2599_v40, 0.0  ;;  %v2520_v40 = vadd.f32 %v2519_v32, %v15106_v58 }
 0x4f2   : > { %v2600_v18 = vpop.f32.mrf.mxu2 }
 0x4f3   : > { %v2601_v15 = vadd.f32 %v2600_v18, %v2512_v6  ;;  %v2534_v6 = vpop.f32.mrf.mxu1  ;;  %v9309_v18 = vld [vmem:[%s14773_s3 + $0x1c4] sm:$0xf] }
 0x4f4   : > { %v7829_v29 = vor.u32 %v9309_v18, %v7826_v39 }
 0x4f5   : > { %v2676_v51 = vmax.f32 %v2601_v15, 0.0  ;;  %v15107_v15 = vld [vmem:[#allocation65_spill] sm:$0xff] }
 0x4f7   : > { %2642 = vmatmul.bf16.gmra.mxu2 %v7813_v23  ;;  %v12030_v24 = vpack.c.bf16 %v2676_v51, %v2675_v30  ;;  %v2522_v23 = vadd.f32 %v2521_v21, %v15107_v15  ;;  %v7834_v21 = vld [vmem:[%s14773_s3 + $0x1d8] sm:$0xf0]  ;;  %v9315_v15 = vld [vmem:[%s14773_s3 + $0x1f4] sm:$0xf] }
 0x4fa   : > { %v2603_v1 = vpop.f32.mrf.mxu2 }
 0x4fb   : > { %v2604_v9 = vadd.f32 %v2603_v1, %v2515_v27  ;;  %v2536_v19 = vpop.f32.mrf.mxu1 }
 0x4fd   : > { %v2677_v52 = vmax.f32 %v2604_v9, 0.0  ;;  %v15108_v9 = vld [vmem:[#allocation60_spill] sm:$0xff] }
 0x4fe   : > { %v2525_v61 = vadd.f32 %v2524_v17, %v15108_v9  ;;  %v9313_v17 = vld [vmem:[%s14773_s3 + $0x1e4] sm:$0xf] }
 0x4ff   : > { %v15109_v9 = vld [vmem:[#allocation55_spill] sm:$0xff] }
 0x502   : > { %v2605_v62 = vpop.f32.mrf.mxu2 }
 0x503   : > { %v2606_v49 = vadd.f32 %v2605_v62, %v2517_v50  ;;  %v9311_v62 = vld [vmem:[%s14773_s3 + $0x1d4] sm:$0xf] }
 0x505   : > { %v2678_v20 = vmax.f32 %v2606_v49, 0.0 }
 0x507   : > { %2647 = vmatmul.bf16.gmra.mxu2 %v7821_v3  ;;  %v12042_v14 = vpack.c.bf16 %v2678_v20, %v2677_v52  ;;  %v7837_v3 = vor.u32 %v9311_v62, %v7834_v21  ;;  %v2539_v52 = vpop.f32.mrf.mxu1  ;;  %v15111_v21 = vld [vmem:[#allocation53_spill] sm:$0xff] }
 0x50a   : > { %v2608_v57 = vpop.f32.mrf.mxu2 }
 0x50b   : > { %v2609_v34 = vadd.f32 %v2608_v57, %v2520_v40  ;;  %v7842_v40 = vld [vmem:[%s14773_s3 + $0x1e8] sm:$0xf0] }
 0x50d   : > { %v2679_v27 = vmax.f32 %v2609_v34, 0.0  ;;  %v7845_v34 = vor.u32 %v9313_v17, %v7842_v40 }
 0x50f   : > { %v2541_v58 = vpop.f32.mrf.mxu1 }
 0x512   : > { %v2610_v30 = vpop.f32.mrf.mxu2 }
 0x513   : > { %v2611_v51 = vadd.f32 %v2610_v30, %v2522_v23  ;;  %v7850_v23 = vld [vmem:[%s14773_s3 + $0x1f8] sm:$0xf0] }
 0x515   : > { %v2680_v1 = vmax.f32 %v2611_v51, 0.0 }
 0x517   : > { %2652 = vmatmul.bf16.gmra.mxu2 %v7829_v29  ;;  %v12052_v32 = vpack.c.bf16 %v2680_v1, %v2679_v27  ;;  %v2544_v18 = vpop.f32.mrf.mxu1  ;;  %v7853_v29 = vor.u32 %v9315_v15, %v7850_v23 }
 0x51a   : > { %v2613_v4 = vpop.f32.mrf.mxu2 }
 0x51b   : > { %v2614_v50 = vadd.f32 %v2613_v4, %v2525_v61  ;;  %v2540_v61 = vadd.f32 %v2539_v52, %v15109_v9  ;;  %v15110_v4 = vld [vmem:[#allocation58_spill] sm:$0xff] }
 0x51c   : > { %v2537_v62 = vadd.f32 %v2536_v19, %v15110_v4 }
 0x51f   : > { %v12073_v30 = vpop.f32.mrf.mxu1 }
 0x522   : > { %v2615_v49 = vpop.f32.mrf.mxu2 }
 0x527   : > { %2657 = vmatmul.bf16.gmra.mxu2 %v7837_v3  ;;  %v2549_v1 = vpop.f32.mrf.mxu1  ;;  %v2542_v3 = vadd.f32 %v2541_v58, %v15111_v21  ;;  %v15115_v58 = vld [vmem:[#allocation64_spill] sm:$0xff] }
 0x52a   : > { %v2618_v20 = vpop.f32.mrf.mxu2 }
 0x52f   : > { %v12080_v23 = vpop.f32.mrf.mxu1 }
 0x532   : > { %v2620_v57 = vpop.f32.mrf.mxu2 }
 0x533   : > { %v2621_v9 = vadd.f32 %v2620_v57, %v2532_v26 }
 0x535   : > { %v2684_v36 = vmax.f32 %v2621_v9, 0.0  ;;  %v7936_v9 = vld [vmem:[%s14775_s5 + $0x120] sm:$0xf] }
 0x537   : > { %2662 = vmatmul.bf16.gmra.mxu2 %v7845_v34  ;;  %v15112_v34 = vld [vmem:[#allocation54_spill] sm:$0xff] }
 0x538   : > { %v2535_v25 = vadd.f32 %v2534_v6, %v15112_v34  ;;  %v2545_v6 = vadd.f32 %v2544_v18, %v11136_v22  ;;  %v2550_v22 = vadd.f32 %v2549_v1, %v11104_v43  ;;  %v9318_v18 = vld [vmem:[%s14775_s5 + $0x104] sm:$0xf0] }
 0x53a   : > { %v2623_v39 = vpop.f32.mrf.mxu2 }
 0x53b   : > { %v2624_v31 = vadd.f32 %v2623_v39, %v2535_v25 }
 0x542   : > { %v2625_v51 = vpop.f32.mrf.mxu2 }
 0x543   : > { %v2626_v33 = vadd.f32 %v2625_v51, %v2537_v62 }
 0x545   : > { %v2686_v19 = vmax.f32 %v2626_v33, 0.0  ;;  %v2554_v33 = vpop.f32.mrf.mxu1 }
 0x546   : > { %v2555_v21 = vadd.f32 %v2554_v33, %v11078_v10  ;;  %v9326_v33 = vld [vmem:[%s14775_s5 + $0x144] sm:$0xf0] }
 0x547   : > { %2667 = vmatmul.bf16.gmra.mxu2 %v7853_v29  ;;  %v15114_v29 = vld [vmem:[#allocation56_spill] sm:$0xff] }
 0x548   : > { %v2530_v52 = vadd.f32 %v12033_v11, %v15114_v29 }
 0x54a   : > { %v2628_v27 = vpop.f32.mrf.mxu2  ;;  %v2619_v51 = vadd.f32 %v2618_v20, %v2530_v52 }
 0x54b   : > { %v2629_v17 = vadd.f32 %v2628_v27, %v2540_v61  ;;  %v2527_v27 = vadd.f32 %v12028_v48, %v15115_v58  ;;  %v2685_v61 = vmax.f32 %v2624_v31, 0.0 }
 0x54c   : > { %v2683_v62 = vmax.f32 %v2619_v51, 0.0 }
 0x54d   : > { %v2687_v47 = vmax.f32 %v2629_v17, 0.0  ;;  %v2616_v25 = vadd.f32 %v2615_v49, %v2527_v27  ;;  %v2711_v39 = vpack.c.bf16 %v2686_v19, %v2685_v61  ;;  %v12093_v31 = vpop.f32.mrf.mxu1  ;;  %v7928_v17 = vld [vmem:[%s14775_s5 + $0x110] sm:$0xf]  ;;  %v9322_v19 = vld [vmem:[%s14775_s5 + $0x124] sm:$0xf0] }
 0x54e   : > { %v2710_v26 = vpack.c.bf16 %v2684_v36, %v2683_v62  ;;  %v7937_v27 = vor.u32 %v9322_v19, %v7936_v9 }
 0x54f   : > { %v2682_v11 = vmax.f32 %v2616_v25, 0.0  ;;  %v9324_v25 = vld [vmem:[%s14775_s5 + $0x134] sm:$0xf0] }
 0x552   : > { %v2630_v40 = vpop.f32.mrf.mxu2 }
 0x553   : > { %v2631_v8 = vadd.f32 %v2630_v40, %v2542_v3  ;;  %v9320_v40 = vld [vmem:[%s14775_s5 + $0x114] sm:$0xf0] }
 0x555   : > { %v2688_v15 = vmax.f32 %v2631_v8, 0.0 }
 0x557   : > { %v2712_v4 = vpack.c.bf16 %v2688_v15, %v2687_v47  ;;  %v2681_v47 = vmax.f32 %v2614_v50, 0.0  ;;  %v7920_v50 = vld [vmem:[%s14775_s5 + $0x100] sm:$0xf]  ;;  %v7929_v15 = vor.u32 %v9320_v40, %v7928_v17  ;;  %v15116_v40 = vld [vmem:[#allocation61_spill] sm:$0xff] }
 0x558   : > { %v7921_v1 = vor.u32 %v9318_v18, %v7920_v50  ;;  %v7960_v50 = vld [vmem:[%s14775_s5 + $0x150] sm:$0xf]  ;;  %v9328_v18 = vld [vmem:[%s14775_s5 + $0x154] sm:$0xf0] }
 0x559   : > { %3107 = vmatpush.bf16.msra.mxu3 %v2712_v4  ;;  %v2709_v48 = vpack.c.bf16 %v2682_v11, %v2681_v47 }
 0x55a   : > { %v2633_v37 = vpop.f32.mrf.mxu2 }
 0x55b   : > { %v12087_v8 = vadd.f32 %v2633_v37, %v2545_v6  ;;  %v7944_v37 = vld [vmem:[%s14775_s5 + $0x130] sm:$0xf] }
 0x55d   : > { %3108 = vmatpush.bf16.msra.mxu3 %v2711_v39  ;;  %v7945_v39 = vor.u32 %v9324_v25, %v7944_v37  ;;  %v15119_v37 = vld [vmem:[#allocation62_spill] sm:$0xff] }
 0x561   : > { %3109 = vmatpush.bf16.msra.mxu3 %v2710_v26 }
 0x562   : > { %v12089_v57 = vpop.f32.mrf.mxu2 }
 0x565   : > { %3110 = vmatpush.bf16.msra.mxu3 %v2709_v48 }
 0x569   : > { %3111 = vmatpush.bf16.msra.mxu3 %v12052_v32  ;;  %v2559_v32 = vpop.f32.mrf.mxu1 }
 0x56a   : > { %v2638_v49 = vpop.f32.mrf.mxu2  ;;  %v2560_v10 = vadd.f32 %v2559_v32, %v11045_v0 }
 0x56b   : > { %v12095_v20 = vadd.f32 %v2638_v49, %v2550_v22 }
 0x56d   : > { %3112 = vmatpush.bf16.msra.mxu3 %v12042_v14 }
 0x571   : > { %3113 = vmatpush.bf16.msra.mxu3 %v12030_v24  ;;  %v12111_v24 = vpop.f32.mrf.mxu1 }
 0x572   : > { %v12105_v43 = vpop.f32.mrf.mxu2 }
 0x575   : > { %3114 = vmatpush.bf16.msra.mxu3 %v12018_v38 }
 0x578   : > { %3115 = vmatmul.bf16.vlgmr.msra.gmra.mxu3 %v7921_v1 }
 0x579   : > { %v2564_v38 = vpop.f32.mrf.mxu1 }
 0x57a   : > { %v2643_v14 = vpop.f32.mrf.mxu2  ;;  %v2565_v6 = vadd.f32 %v2564_v38, %v11021_v41  ;;  %v7952_v41 = vld [vmem:[%s14775_s5 + $0x140] sm:$0xf] }
 0x57b   : > { %v12109_v3 = vadd.f32 %v2643_v14, %v2555_v21  ;;  %v7953_v48 = vor.u32 %v9326_v33, %v7952_v41  ;;  %v7961_v21 = vor.u32 %v9328_v18, %v7960_v50  ;;  %v15117_v38 = vld [vmem:[#allocation63_spill] sm:$0xff] }
 0x581   : > { %v2566_v4 = vpop.f32.mrf.mxu1 }
 0x582   : > { %v12119_v34 = vpop.f32.mrf.mxu2 }
 0x588   : > { %3120 = vmatmul.bf16.gmra.mxu3 %v7929_v15 }
 0x589   : > { %v2569_v0 = vpop.f32.mrf.mxu1 }
 0x58a   : > { %v2648_v29 = vpop.f32.mrf.mxu2 }
 0x58b   : > { %v12122_v52 = vadd.f32 %v2648_v29, %v2560_v10  ;;  %v15118_v29 = vld [vmem:[#allocation59_spill] sm:$0xff] }
 0x591   : > { %v2571_v62 = vpop.f32.mrf.mxu1 }
 0x592   : > { %v2650_v58 = vpop.f32.mrf.mxu2 }
 0x598   : > { %3125 = vmatmul.bf16.gmra.mxu3 %v7937_v27  ;;  %v7968_v27 = vld [vmem:[%s14775_s5 + $0x160] sm:$0xf] }
 0x599   : > { %v2574_v26 = vpop.f32.mrf.mxu1 }
 0x59a   : > { %v2653_v51 = vpop.f32.mrf.mxu2  ;;  %v2575_v25 = vadd.f32 %v2574_v26, %v15119_v37 }
 0x59b   : > { %v12131_v61 = vadd.f32 %v2653_v51, %v2565_v6  ;;  %v9330_v6 = vld [vmem:[%s14775_s5 + $0x164] sm:$0xf0] }
 0x59c   : > { %v7969_v33 = vor.u32 %v9330_v6, %v7968_v27  ;;  %v2547_v6 = vadd.f32 %v12073_v30, %v11119_v16  ;;  %v9334_v16 = vld [vmem:[%s14775_s5 + $0x184] sm:$0xf0]  ;;  %v9317_v30 = vld [vmem:[%s14775_s5 + $0x104] sm:$0xf] }
 0x59d   : > { %v2697_v27 = vmax.f32 %v12131_v61, 0.0 }
 0x5a1   : > { %v2576_v22 = vpop.f32.mrf.mxu1 }
 0x5a2   : > { %v2655_v36 = vpop.f32.mrf.mxu2  ;;  %v2577_v10 = vadd.f32 %v2576_v22, %v15117_v38  ;;  %v2567_v38 = vadd.f32 %v2566_v4, %v11011_v53  ;;  %v7976_v53 = vld [vmem:[%s14775_s5 + $0x170] sm:$0xf] }
 0x5a4   : > { %v2656_v26 = vadd.f32 %v2655_v36, %v2567_v38  ;;  %v2552_v36 = vadd.f32 %v12080_v23, %v11106_v5  ;;  %v2691_v5 = vmax.f32 %v12095_v20, 0.0  ;;  %v8008_v38 = vld [vmem:[%s14775_s5 + $0x1b0] sm:$0xf] }
 0x5a8   : > { %3130 = vmatmul.bf16.gmra.mxu3 %v7945_v39 }
 0x5a9   : > { %v2579_v1 = vpop.f32.mrf.mxu1 }
 0x5aa   : > { %v2658_v11 = vpop.f32.mrf.mxu2  ;;  %v2580_v15 = vadd.f32 %v2579_v1, %v15116_v40 }
 0x5b1   : > { %v2581_v17 = vpop.f32.mrf.mxu1 }
 0x5b2   : > { %v2660_v47 = vpop.f32.mrf.mxu2  ;;  %v2582_v9 = vadd.f32 %v2581_v17, %v15118_v29 }
 0x5b8   : > { %3135 = vmatmul.bf16.gmra.mxu3 %v7953_v48  ;;  %v15120_v48 = vld [vmem:[#allocation70_spill] sm:$0xff] }
 0x5b9   : > { %v2572_v50 = vadd.f32 %v2571_v62, %v15120_v48  ;;  %v2562_v62 = vadd.f32 %v12111_v24, %v11054_v2  ;;  %v9319_v48 = vld [vmem:[%s14775_s5 + $0x114] sm:$0xf] }
 0x5ba   : > { %v2663_v49 = vpop.f32.mrf.mxu2 }
 0x5bb   : > { %v2664_v22 = vadd.f32 %v2663_v49, %v2575_v25  ;;  %v2661_v17 = vadd.f32 %v2660_v47, %v2572_v50  ;;  %v2557_v47 = vadd.f32 %v12093_v31, %v11108_v35  ;;  %v2695_v35 = vmax.f32 %v12122_v52, 0.0  ;;  %v7930_v50 = vld [vmem:[%s14775_s5 + $0x118] sm:$0xf0] }
 0x5bc   : > { %v2641_v31 = vadd.f32 %v12105_v43, %v2552_v36  ;;  %v2689_v43 = vmax.f32 %v12087_v8, 0.0  ;;  %v9327_v36 = vld [vmem:[%s14775_s5 + $0x154] sm:$0xf] }
 0x5bd   : > { %v2701_v54 = vmax.f32 %v2664_v22, 0.0  ;;  %v2646_v2 = vadd.f32 %v12119_v34, %v2557_v47  ;;  %v2636_v34 = vadd.f32 %v12089_v57, %v2547_v6  ;;  %v7922_v57 = vld [vmem:[%s14775_s5 + $0x108] sm:$0xf0]  ;;  %v9325_v47 = vld [vmem:[%s14775_s5 + $0x144] sm:$0xf] }
 0x5be   : > { %v2692_v37 = vmax.f32 %v2641_v31, 0.0  ;;  %v7925_v8 = vor.u32 %v9317_v30, %v7922_v57  ;;  %v8032_v6 = vld [vmem:[%s14775_s5 + $0x1e0] sm:$0xf]  ;;  %v7978_v30 = vld [vmem:[%s14775_s5 + $0x178] sm:$0xf0] }
 0x5bf   : > { %v2694_v61 = vmax.f32 %v2646_v2, 0.0  ;;  %v2690_v23 = vmax.f32 %v2636_v34, 0.0  ;;  %v9329_v34 = vld [vmem:[%s14775_s5 + $0x164] sm:$0xf] }
 0x5c0   : > { %v2714_v52 = vpack.c.bf16 %v2692_v37, %v2691_v5  ;;  %v7970_v37 = vld [vmem:[%s14775_s5 + $0x168] sm:$0xf0] }
 0x5c1   : > { %v2713_v20 = vpack.c.bf16 %v2690_v23, %v2689_v43  ;;  %v7973_v23 = vor.u32 %v9329_v34, %v7970_v37  ;;  %v8040_v43 = vld [vmem:[%s14775_s5 + $0x1f0] sm:$0xf]  ;;  %v9341_v37 = vld [vmem:[%s14775_s5 + $0x1c4] sm:$0xf] }
 0x5c2   : > { %v2665_v32 = vpop.f32.mrf.mxu2 }
 0x5c3   : > { %v2666_v39 = vadd.f32 %v2665_v32, %v2577_v10  ;;  %v2700_v32 = vmax.f32 %v2661_v17, 0.0  ;;  %v7938_v17 = vld [vmem:[%s14775_s5 + $0x128] sm:$0xf0] }
 0x5c5   : > { %v2702_v40 = vmax.f32 %v2666_v39, 0.0  ;;  %v7984_v39 = vld [vmem:[%s14775_s5 + $0x180] sm:$0xf] }
 0x5c7   : > { %v2719_v10 = vpack.c.bf16 %v2702_v40, %v2701_v54  ;;  %v9332_v54 = vld [vmem:[%s14775_s5 + $0x174] sm:$0xf0] }
 0x5c8   : > { %3140 = vmatmul.bf16.gmra.mxu3 %v7961_v21  ;;  %v15121_v21 = vld [vmem:[#allocation66_spill] sm:$0xff] }
 0x5ca   : > { %v2668_v14 = vpop.f32.mrf.mxu2 }
 0x5cb   : > { %v2669_v19 = vadd.f32 %v2668_v14, %v2580_v15  ;;  %v2570_v14 = vadd.f32 %v2569_v0, %v15121_v21  ;;  %v9338_v21 = vld [vmem:[%s14775_s5 + $0x1a4] sm:$0xf0] }
 0x5cd   : > { %v2703_v18 = vmax.f32 %v2669_v19, 0.0  ;;  %v2659_v29 = vadd.f32 %v2658_v11, %v2570_v14  ;;  %v2698_v19 = vmax.f32 %v2656_v26, 0.0  ;;  %v9321_v14 = vld [vmem:[%s14775_s5 + $0x124] sm:$0xf]  ;;  %v9323_v26 = vld [vmem:[%s14775_s5 + $0x134] sm:$0xf] }
 0x5cf   : > { %v2699_v49 = vmax.f32 %v2659_v29, 0.0  ;;  %v2717_v4 = vpack.c.bf16 %v2698_v19, %v2697_v27  ;;  %v9340_v29 = vld [vmem:[%s14775_s5 + $0x1b4] sm:$0xf0]  ;;  %v8016_v19 = vld [vmem:[%s14775_s5 + $0x1c0] sm:$0xf] }
 0x5d0   : > { %v7954_v27 = vld [vmem:[%s14775_s5 + $0x148] sm:$0xf0] }
 0x5d1   : > { %v2718_v0 = vpack.c.bf16 %v2700_v32, %v2699_v49  ;;  %v7946_v32 = vld [vmem:[%s14775_s5 + $0x138] sm:$0xf0] }
 0x5d2   : > { %v2670_v51 = vpop.f32.mrf.mxu2  ;;  %v7949_v49 = vor.u32 %v9323_v26, %v7946_v32 }
 0x5d3   : > { %v2671_v41 = vadd.f32 %v2670_v51, %v2582_v9  ;;  %v2651_v9 = vadd.f32 %v2650_v58, %v2562_v62  ;;  %v7977_v58 = vor.u32 %v9332_v54, %v7976_v53  ;;  %v2693_v51 = vmax.f32 %v12109_v3, 0.0 }
 0x5d4   : > { %v7985_v3 = vor.u32 %v9334_v16, %v7984_v39  ;;  %v8009_v62 = vor.u32 %v9340_v29, %v8008_v38  ;;  %v7957_v54 = vor.u32 %v9325_v47, %v7954_v27  ;;  %v9348_v39 = vld [vmem:[%s14775_s5 + $0x1f4] sm:$0xf0]  ;;  %v9331_v16 = vld [vmem:[%s14775_s5 + $0x174] sm:$0xf] }
 0x5d5   : > { %v2704_v1 = vmax.f32 %v2671_v41, 0.0  ;;  %v2696_v24 = vmax.f32 %v2651_v9, 0.0  ;;  %v2715_v25 = vpack.c.bf16 %v2694_v61, %v2693_v51  ;;  %v7992_v41 = vld [vmem:[%s14775_s5 + $0x190] sm:$0xf]  ;;  %v9346_v51 = vld [vmem:[%s14775_s5 + $0x1e4] sm:$0xf0]  ;;  %v8041_v57 = vor.u32 %v9348_v39, %v8040_v43 }
 0x5d6   : > { %v8033_v5 = vor.u32 %v9346_v51, %v8032_v6  ;;  %v15122_v47 = vld [vmem:[#allocation93_spill] sm:$0xff] }
 0x5d7   : > { %v2720_v15 = vpack.c.bf16 %v2704_v1, %v2703_v18  ;;  %v2716_v11 = vpack.c.bf16 %v2696_v24, %v2695_v35  ;;  %v7933_v18 = vor.u32 %v9319_v48, %v7930_v50  ;;  %v8000_v1 = vld [vmem:[%s14775_s5 + $0x1a0] sm:$0xf]  ;;  %v7962_v35 = vld [vmem:[%s14775_s5 + $0x158] sm:$0xf0] }
 0x5d8   : > { %3145 = vmatmul.bf16.gmra.mxu3 %v7969_v33  ;;  %v9336_v33 = vld [vmem:[%s14775_s5 + $0x194] sm:$0xf0]  ;;  %v8001_v40 = vor.u32 %v9338_v21, %v8000_v1  ;;  %v7965_v61 = vor.u32 %v9327_v36, %v7962_v35 }
 0x5d9   : > { %3196 = vmatpush.bf16.msra.mxu0 %v2720_v15  ;;  %v7993_v22 = vor.u32 %v9336_v33, %v7992_v41  ;;  %v7941_v15 = vor.u32 %v9321_v14, %v7938_v17  ;;  %v7986_v41 = vld [vmem:[%s14775_s5 + $0x188] sm:$0xf0]  ;;  %v9335_v14 = vld [vmem:[%s14775_s5 + $0x194] sm:$0xf]  ;;  %v7994_v17 = vld [vmem:[%s14775_s5 + $0x198] sm:$0xf0] }
 0x5dd   : > { %3197 = vmatpush.bf16.msra.mxu0 %v2719_v10 }
 0x5e1   : > { %3198 = vmatpush.bf16.msra.mxu0 %v2718_v0  ;;  %v9342_v0 = vld [vmem:[%s14775_s5 + $0x1c4] sm:$0xf0] }
 0x5e2   : > { %v8017_v53 = vor.u32 %v9342_v0, %v8016_v19 }
 0x5e5   : > { %3199 = vmatpush.bf16.msra.mxu0 %v2717_v4  ;;  %v8024_v4 = vld [vmem:[%s14775_s5 + $0x1d0] sm:$0xf] }
 0x5e8   : > { %3150 = vmatmul.bf16.gmra.mxu3 %v7977_v58  ;;  %v9344_v58 = vld [vmem:[%s14775_s5 + $0x1d4] sm:$0xf0] }
 0x5e9   : > { %3200 = vmatpush.bf16.msra.mxu0 %v2716_v11  ;;  %v8025_v31 = vor.u32 %v9344_v58, %v8024_v4  ;;  %v15123_v4 = vld [vmem:[#allocation88_spill] sm:$0xff] }
 0x5ed   : > { %3201 = vmatpush.bf16.msra.mxu0 %v2715_v25 }
 0x5f1   : > { %3202 = vmatpush.bf16.msra.mxu0 %v2714_v52 }
 0x5f5   : > { %3203 = vmatpush.bf16.msra.mxu0 %v2713_v20  ;;  %v7981_v20 = vor.u32 %v9331_v16, %v7978_v30 }
 0x5f8   : > { %3155 = vmatmul.bf16.gmra.mxu3 %v7985_v3  ;;  %3204 = vmatmul.bf16.vlgmr.msra.gmra.mxu0 %v7925_v8  ;;  %v9333_v8 = vld [vmem:[%s14775_s5 + $0x184] sm:$0xf] }
 0x5f9   : > { %v7989_v48 = vor.u32 %v9333_v8, %v7986_v41 }
 0x5fb   : > { %v3116_v10 = vpop.f32.mrf.mxu3 }
 0x5fc   : > { %v3117_v33 = vadd.f32 %v3116_v10, %v11332_v45 }
 0x603   : > { %v3118_v9 = vpop.f32.mrf.mxu3 }
 0x608   : > { %3160 = vmatmul.bf16.gmra.mxu3 %v7993_v22  ;;  %3209 = vmatmul.bf16.gmra.mxu0 %v7933_v18  ;;  %v3119_v18 = vadd.f32 %v3118_v9, %v11351_v42 }
 0x60b   : > { %v3121_v2 = vpop.f32.mrf.mxu3 }
 0x60c   : > { %v3122_v45 = vadd.f32 %v3121_v2, %v11295_v63  ;;  %v8002_v63 = vld [vmem:[%s14775_s5 + $0x1a8] sm:$0xf0] }
 0x613   : > { %v3123_v24 = vpop.f32.mrf.mxu3 }
 0x614   : > { %v3124_v42 = vadd.f32 %v3123_v24, %v11303_v56  ;;  %v9339_v24 = vld [vmem:[%s14775_s5 + $0x1b4] sm:$0xf] }
 0x618   : > { %3165 = vmatmul.bf16.gmra.mxu3 %v8001_v40  ;;  %3214 = vmatmul.bf16.gmra.mxu0 %v7941_v15  ;;  %v7997_v15 = vor.u32 %v9335_v14, %v7994_v17 }
 0x61b   : > { %v3126_v11 = vpop.f32.mrf.mxu3 }
 0x623   : > { %v3128_v25 = vpop.f32.mrf.mxu3 }
 0x624   : > { %v3129_v27 = vadd.f32 %v3128_v25, %v15122_v47  ;;  %v8018_v25 = vld [vmem:[%s14775_s5 + $0x1c8] sm:$0xf0] }
 0x628   : > { %3170 = vmatmul.bf16.gmra.mxu3 %v8009_v62  ;;  %3219 = vmatmul.bf16.gmra.mxu0 %v7949_v49  ;;  %v9337_v62 = vld [vmem:[%s14775_s5 + $0x1a4] sm:$0xf]  ;;  %v3127_v49 = vadd.f32 %v3126_v11, %v11286_v12  ;;  %v8010_v12 = vld [vmem:[%s14775_s5 + $0x1b8] sm:$0xf0]  ;;  %v15124_v11 = vld [vmem:[#allocation92_spill] sm:$0xff] }
 0x629   : > { %v8005_v9 = vor.u32 %v9337_v62, %v8002_v63  ;;  %v8013_v36 = vor.u32 %v9339_v24, %v8010_v12  ;;  %v15126_v63 = vld [vmem:[#allocation72_spill] sm:$0xff]  ;;  %v15129_v24 = vld [vmem:[#allocation73_spill] sm:$0xff] }
 0x62b   : > { %v3131_v52 = vpop.f32.mrf.mxu3 }
 0x62c   : > { %v3132_v58 = vadd.f32 %v3131_v52, %v15123_v4  ;;  %v8021_v52 = vor.u32 %v9341_v37, %v8018_v25  ;;  %v15132_v25 = vld [vmem:[#allocation83_spill] sm:$0xff] }
 0x633   : > { %v3133_v3 = vpop.f32.mrf.mxu3 }
 0x634   : > { %v3134_v6 = vadd.f32 %v3133_v3, %v15124_v11  ;;  %v8026_v3 = vld [vmem:[%s14775_s5 + $0x1d8] sm:$0xf0] }
 0x638   : > { %3175 = vmatmul.bf16.gmra.mxu3 %v8017_v53  ;;  %3224 = vmatmul.bf16.gmra.mxu0 %v7957_v54 }
 0x63b   : > { %v3136_v40 = vpop.f32.mrf.mxu3 }
 0x643   : > { %v12304_v26 = vpop.f32.mrf.mxu3 }
 0x648   : > { %3180 = vmatmul.bf16.gmra.mxu3 %v8025_v31  ;;  %3229 = vmatmul.bf16.gmra.mxu0 %v7965_v61 }
 0x64b   : > { %v3141_v56 = vpop.f32.mrf.mxu3 }
 0x653   : > { %v3143_v2 = vpop.f32.mrf.mxu3 }
 0x658   : > { %3185 = vmatmul.bf16.gmra.mxu3 %v8033_v5  ;;  %3234 = vmatmul.bf16.gmra.mxu0 %v7973_v23  ;;  %v15125_v5 = vld [vmem:[#allocation84_spill] sm:$0xff] }
 0x659   : > { %v3137_v23 = vadd.f32 %v3136_v40, %v15125_v5  ;;  %v3142_v5 = vadd.f32 %v3141_v56, %v15132_v25 }
 0x65b   : > { %v3146_v61 = vpop.f32.mrf.mxu3 }
 0x663   : > { %v3148_v43 = vpop.f32.mrf.mxu3 }
 0x668   : > { %3190 = vmatmul.bf16.gmra.mxu3 %v8041_v57  ;;  %3239 = vmatmul.bf16.gmra.mxu0 %v7981_v20  ;;  %v9343_v20 = vld [vmem:[%s14775_s5 + $0x1d4] sm:$0xf] }
 0x669   : > { %v8029_v8 = vor.u32 %v9343_v20, %v8026_v3 }
 0x66b   : > { %v3151_v57 = vpop.f32.mrf.mxu3 }
 0x675   : > { %v3205_v50 = vpop.f32.mrf.mxu0 }
 0x676   : > { %v12289_v22 = vadd.f32 %v3205_v50, %v3117_v33  ;;  %v3153_v33 = vpop.f32.mrf.mxu3  ;;  %v9345_v50 = vld [vmem:[%s14775_s5 + $0x1e4] sm:$0xf] }
 0x677   : > { %v3154_v12 = vadd.f32 %v3153_v33, %v15129_v24  ;;  %v15142_v24 = vld [vmem:[#allocation11_spill] sm:$0xff] }
 0x678   : > { %3244 = vmatmul.bf16.gmra.mxu0 %v7989_v48 }
 0x67d   : > { %v3207_v1 = vpop.f32.mrf.mxu0 }
 0x67e   : > { %v12292_v21 = vadd.f32 %v3207_v1, %v3119_v18  ;;  %v8034_v18 = vld [vmem:[%s14775_s5 + $0x1e8] sm:$0xf0]  ;;  %v3156_v1 = vpop.f32.mrf.mxu3 }
 0x67f   : > { %v8037_v14 = vor.u32 %v9345_v50, %v8034_v18 }
 0x685   : > { %v3210_v38 = vpop.f32.mrf.mxu0 }
 0x686   : > { %v12301_v29 = vadd.f32 %v3210_v38, %v3122_v45  ;;  %v12351_v40 = vpop.f32.mrf.mxu3  ;;  %v8042_v38 = vld [vmem:[%s14775_s5 + $0x1f8] sm:$0xf0] }
 0x688   : > { %3249 = vmatmul.bf16.gmra.mxu0 %v7997_v15  ;;  %v9347_v15 = vld [vmem:[%s14775_s5 + $0x1f4] sm:$0xf] }
 0x68d   : > { %v3212_v32 = vpop.f32.mrf.mxu0 }
 0x68e   : > { %v12306_v10 = vadd.f32 %v3212_v32, %v3124_v42  ;;  %v8045_v42 = vor.u32 %v9347_v15, %v8042_v38  ;;  %v3161_v62 = vpop.f32.mrf.mxu3 }
 0x695   : > { %v3215_v19 = vpop.f32.mrf.mxu0 }
 0x696   : > { %v12315_v0 = vadd.f32 %v3215_v19, %v3127_v49  ;;  %v3152_v49 = vadd.f32 %v3151_v57, %v15126_v63  ;;  %v12376_v3 = vpop.f32.mrf.mxu3 }
 0x698   : > { %3254 = vmatmul.bf16.gmra.mxu0 %v8005_v9  ;;  %v15127_v9 = vld [vmem:[#allocation80_spill] sm:$0xff] }
 0x699   : > { %v3149_v19 = vadd.f32 %v3148_v43, %v15127_v9  ;;  %v15134_v43 = vld [vmem:[#allocation5_spill] sm:$0xff] }
 0x69d   : > { %v3217_v53 = vpop.f32.mrf.mxu0 }
 0x69e   : > { %v12318_v54 = vadd.f32 %v3217_v53, %v3129_v27  ;;  %v15128_v27 = vld [vmem:[#allocation76_spill] sm:$0xff] }
 0x69f   : > { %v3147_v53 = vadd.f32 %v3146_v61, %v15128_v27  ;;  %v15135_v61 = vld [vmem:[#allocation85_spill] sm:$0xff] }
 0x6a0   : > { %v3139_v20 = vadd.f32 %v12304_v26, %v15135_v61  ;;  %v15147_v61 = vld [vmem:[#allocation49_spill] sm:$0xff] }
 0x6a5   : > { %v3220_v35 = vpop.f32.mrf.mxu0 }
 0x6a6   : > { %v12327_v31 = vadd.f32 %v3220_v35, %v3132_v58 }
 0x6a8   : > { %3259 = vmatmul.bf16.gmra.mxu0 %v8013_v36  ;;  %v15130_v36 = vld [vmem:[#allocation81_spill] sm:$0xff] }
 0x6a9   : > { %v3144_v35 = vadd.f32 %v3143_v2, %v15130_v36 }
 0x6ad   : > { %v3222_v51 = vpop.f32.mrf.mxu0 }
 0x6ae   : > { %v12330_v34 = vadd.f32 %v3222_v51, %v3134_v6  ;;  %v15131_v6 = vld [vmem:[#allocation136_spill] sm:$0xff] }
 0x6b5   : > { %v3225_v39 = vpop.f32.mrf.mxu0 }
 0x6b6   : > { %v3226_v16 = vadd.f32 %v3225_v39, %v3137_v23 }
 0x6b8   : > { %3264 = vmatmul.bf16.gmra.mxu0 %v8021_v52  ;;  %v15133_v52 = vld [vmem:[#allocation9_spill] sm:$0xff] }
 0x6bd   : > { %v3227_v30 = vpop.f32.mrf.mxu0 }
 0x6c5   : > { %v3230_v41 = vpop.f32.mrf.mxu0 }
 0x6c6   : > { %v3231_v2 = vadd.f32 %v3230_v41, %v3142_v5  ;;  %v15145_v5 = vld [vmem:[#allocation16_spill] sm:$0xff] }
 0x6c8   : > { %3269 = vmatmul.bf16.gmra.mxu0 %v8029_v8  ;;  %v15136_v8 = vld [vmem:[#allocation6_spill] sm:$0xff] }
 0x6cd   : > { %v3232_v48 = vpop.f32.mrf.mxu0 }
 0x6ce   : > { %v3233_v23 = vadd.f32 %v3232_v48, %v3144_v35  ;;  %v15137_v48 = vld [vmem:[#allocation97_spill] sm:$0xff] }
 0x6cf   : > { %v3157_v18 = vadd.f32 %v3156_v1, %v15137_v48  ;;  %v15143_v35 = vld [vmem:[#allocation13_spill] sm:$0xff] }
 0x6d5   : > { %v3235_v17 = vpop.f32.mrf.mxu0 }
 0x6d6   : > { %v3236_v11 = vadd.f32 %v3235_v17, %v3147_v53  ;;  %v15138_v17 = vld [vmem:[#allocation51_spill] sm:$0xff]  ;;  %v3166_v53 = vpop.f32.mrf.mxu3 }
 0x6d8   : > { %3274 = vmatmul.bf16.gmra.mxu0 %v8037_v14  ;;  %v12379_v33 = vadd.f32 %v3236_v11, %v15136_v8  ;;  %v3228_v14 = vadd.f32 %v3227_v30, %v3139_v20  ;;  %v12411_v11 = vadd.f32 %v12327_v31, %v15143_v35  ;;  %v12427_v20 = vadd.f32 %v12306_v10, %v15147_v61 }
 0x6da   : > { %v3329_v41 = vmax.f32 %v12379_v33, 0.0  ;;  %15148 = vst [vmem:[#allocation15_spill] sm:$0xff] %v12427_v20  ;;  %v3320_v10 = vmax.f32 %v12427_v20, 0.0 }
 0x6dd   : > { %v3237_v45 = vpop.f32.mrf.mxu0 }
 0x6de   : > { %v3238_v4 = vadd.f32 %v3237_v45, %v3149_v19  ;;  %v12385_v45 = vadd.f32 %v3233_v23, %v15138_v17  ;;  %v15141_v19 = vld [vmem:[#allocation10_spill] sm:$0xff]  ;;  %v12421_v23 = vadd.f32 %v12315_v0, %v15145_v5  ;;  %v12430_v8 = vpop.f32.mrf.mxu3 }
 0x6e0   : > { %v12369_v39 = vadd.f32 %v3238_v4, %v15133_v52  ;;  %v3328_v30 = vmax.f32 %v12385_v45, 0.0  ;;  %v3323_v52 = vmax.f32 %v12411_v11, 0.0  ;;  %v3321_v0 = vmax.f32 %v12421_v23, 0.0 }
 0x6e2   : > { %v3330_v15 = vmax.f32 %v12369_v39, 0.0 }
 0x6e4   : > { %v3355_v1 = vpack.c.bf16 %v3330_v15, %v3329_v41  ;;  %v15153_v15 = vld [vmem:[#allocation25_spill] sm:$0xff] }
 0x6e5   : > { %v3240_v32 = vpop.f32.mrf.mxu0 }
 0x6e6   : > { %v3241_v47 = vadd.f32 %v3240_v32, %v3152_v49  ;;  %v15140_v49 = vld [vmem:[#allocation7_spill] sm:$0xff] }
 0x6e7   : > { %v12395_v9 = vadd.f32 %v3228_v14, %v15140_v49 }
 0x6e8   : > { %3279 = vmatmul.bf16.gmra.mxu0 %v8045_v42  ;;  %v12365_v51 = vadd.f32 %v3241_v47, %v15131_v6  ;;  %v15139_v42 = vld [vmem:[#allocation8_spill] sm:$0xff]  ;;  %v12399_v47 = vadd.f32 %v3226_v16, %v15141_v19  ;;  %v15144_v6 = vld [vmem:[#allocation14_spill] sm:$0xff] }
 0x6e9   : > { %v12389_v32 = vadd.f32 %v3231_v2, %v15139_v42  ;;  %v3326_v4 = vmax.f32 %v12395_v9, 0.0 }
 0x6ea   : > { %v3331_v50 = vmax.f32 %v12365_v51, 0.0  ;;  %v3325_v16 = vmax.f32 %v12399_v47, 0.0 }
 0x6eb   : > { %v3327_v27 = vmax.f32 %v12389_v32, 0.0 }
 0x6ed   : > { %v3242_v58 = vpop.f32.mrf.mxu0 }
 0x6ee   : > { %v3243_v37 = vadd.f32 %v3242_v58, %v3154_v12  ;;  %v12404_v12 = vadd.f32 %v12330_v34, %v15142_v24  ;;  %v3354_v58 = vpack.c.bf16 %v3328_v30, %v3327_v27  ;;  %v3353_v34 = vpack.c.bf16 %v3326_v4, %v3325_v16  ;;  %v3171_v30 = vpop.f32.mrf.mxu3  ;;  %v15155_v27 = vld [vmem:[#allocation90_spill] sm:$0xff] }
 0x6ef   : > { %v3167_v24 = vadd.f32 %v3166_v53, %v15155_v27  ;;  %v9358_v27 = vld [vmem:[%s14773_s3 + $0x244] sm:$0xf0] }
 0x6f0   : > { %v12372_v57 = vadd.f32 %v3243_v37, %v15134_v43  ;;  %v12416_v37 = vadd.f32 %v12318_v54, %v15144_v6  ;;  %v3324_v25 = vmax.f32 %v12404_v12, 0.0  ;;  %v15146_v43 = vld [vmem:[#allocation94_spill] sm:$0xff]  ;;  %v8120_v6 = vld [vmem:[%s14773_s3 + $0x210] sm:$0xf] }
 0x6f1   : > { %v3162_v31 = vadd.f32 %v3161_v62, %v15146_v43  ;;  %v15151_v62 = vld [vmem:[#allocation24_spill] sm:$0xff] }
 0x6f2   : > { %v3332_v56 = vmax.f32 %v12372_v57, 0.0  ;;  %v3322_v2 = vmax.f32 %v12416_v37, 0.0  ;;  %v3352_v54 = vpack.c.bf16 %v3324_v25, %v3323_v52  ;;  %v12441_v14 = vadd.f32 %v12292_v21, %v15151_v62  ;;  %v8112_v21 = vld [vmem:[%s14773_s3 + $0x200] sm:$0xf]  ;;  %v9352_v25 = vld [vmem:[%s14773_s3 + $0x214] sm:$0xf0] }
 0x6f3   : > { %v15156_v52 = vld [vmem:[#allocation89_spill] sm:$0xff] }
 0x6f4   : > { %v3356_v38 = vpack.c.bf16 %v3332_v56, %v3331_v50  ;;  %v15149_v56 = vld [vmem:[#allocation21_spill] sm:$0xff]  ;;  %15152 = vst [vmem:[#allocation17_spill] sm:$0xff] %v12441_v14  ;;  %v3351_v17 = vpack.c.bf16 %v3322_v2, %v3321_v0  ;;  %v3172_v53 = vadd.f32 %v3171_v30, %v15156_v52  ;;  %v15157_v0 = vld [vmem:[#allocation82_spill] sm:$0xff] }
 0x6f5   : > { %v3245_v26 = vpop.f32.mrf.mxu0  ;;  %v12434_v48 = vadd.f32 %v12301_v29, %v15149_v56  ;;  %v3318_v29 = vmax.f32 %v12441_v14, 0.0 }
 0x6f6   : > { %v12392_v63 = vadd.f32 %v3245_v26, %v3157_v18  ;;  %3751 = vmatpush.bf16.msrb.mxu1 %v3356_v38  ;;  %v12446_v38 = vadd.f32 %v12289_v22, %v15153_v15  ;;  %v9350_v22 = vld [vmem:[%s14773_s3 + $0x204] sm:$0xf0]  ;;  %v12462_v35 = vpop.f32.mrf.mxu3 }
 0x6f7   : > { %15150 = vst [vmem:[#allocation41_spill] sm:$0xff] %v12434_v48  ;;  %v3319_v26 = vmax.f32 %v12434_v48, 0.0  ;;  %v8113_v19 = vor.u32 %v9350_v22, %v8112_v21 }
 0x6f8   : > { %15154 = vst [vmem:[#allocation18_spill] sm:$0xff] %v12446_v38  ;;  %v3317_v49 = vmax.f32 %v12446_v38, 0.0  ;;  %v15162_v38 = vld [vmem:[#allocation79_spill] sm:$0xff] }
 0x6f9   : > { %v3350_v42 = vpack.c.bf16 %v3320_v10, %v3319_v26 }
 0x6fa   : > { %3752 = vmatpush.bf16.msrb.mxu1 %v3355_v1  ;;  %v3349_v1 = vpack.c.bf16 %v3318_v29, %v3317_v49  ;;  %v8136_v29 = vld [vmem:[%s14773_s3 + $0x230] sm:$0xf] }
 0x6fd   : > { %v12407_v36 = vpop.f32.mrf.mxu0 }
 0x6fe   : > { %3753 = vmatpush.bf16.msrb.mxu1 %v3354_v58  ;;  %v3176_v5 = vpop.f32.mrf.mxu3 }
 0x6ff   : > { %v3177_v62 = vadd.f32 %v3176_v5, %v15157_v0  ;;  %v9360_v5 = vld [vmem:[%s14773_s3 + $0x254] sm:$0xf0]  ;;  %v15159_v0 = vld [vmem:[#allocation75_spill] sm:$0xff] }
 0x702   : > { %3754 = vmatpush.bf16.msrb.mxu1 %v3353_v34  ;;  %v8121_v34 = vor.u32 %v9352_v25, %v8120_v6 }
 0x705   : > { %v3250_v50 = vpop.f32.mrf.mxu0 }
 0x706   : > { %v12437_v18 = vadd.f32 %v3250_v50, %v3162_v31  ;;  %3755 = vmatpush.bf16.msrb.mxu1 %v3352_v54  ;;  %v3178_v61 = vpop.f32.mrf.mxu3  ;;  %v8128_v54 = vld [vmem:[%s14773_s3 + $0x220] sm:$0xf]  ;;  %v9354_v50 = vld [vmem:[%s14773_s3 + $0x224] sm:$0xf0] }
 0x707   : > { %v8129_v56 = vor.u32 %v9354_v50, %v8128_v54  ;;  %v15158_v54 = vld [vmem:[#allocation71_spill] sm:$0xff] }
 0x70a   : > { %3756 = vmatpush.bf16.msrb.mxu1 %v3351_v17 }
 0x70d   : > { %v12450_v41 = vpop.f32.mrf.mxu0 }
 0x70e   : > { %3757 = vmatpush.bf16.msrb.mxu1 %v3350_v42  ;;  %v3181_v15 = vpop.f32.mrf.mxu3  ;;  %v9356_v42 = vld [vmem:[%s14773_s3 + $0x234] sm:$0xf0] }
 0x70f   : > { %v8137_v21 = vor.u32 %v9356_v42, %v8136_v29  ;;  %v15160_v29 = vld [vmem:[#allocation77_spill] sm:$0xff] }
 0x712   : > { %3758 = vmatpush.bf16.msrb.mxu1 %v3349_v1 }
 0x715   : > { %v3255_v4 = vpop.f32.mrf.mxu0  ;;  %3759 = vmatmul.bf16.vlgmr.msrb.gmra.mxu1 %v8113_v19  ;;  %v8144_v19 = vld [vmem:[%s14773_s3 + $0x240] sm:$0xf] }
 0x716   : > { %v12460_v58 = vadd.f32 %v3255_v4, %v3167_v24  ;;  %v3183_v49 = vpop.f32.mrf.mxu3  ;;  %v8145_v24 = vor.u32 %v9358_v27, %v8144_v19 }
 0x717   : > { %v3184_v14 = vadd.f32 %v3183_v49, %v15162_v38 }
 0x71d   : > { %v12464_v16 = vpop.f32.mrf.mxu0 }
 0x71e   : > { %v3186_v30 = vpop.f32.mrf.mxu3 }
 0x71f   : > { %v3187_v42 = vadd.f32 %v3186_v30, %v15160_v29  ;;  %v15163_v30 = vld [vmem:[#allocation78_spill] sm:$0xff] }
 0x725   : > { %v3260_v43 = vpop.f32.mrf.mxu0  ;;  %3764 = vmatmul.bf16.gmra.mxu1 %v8121_v34  ;;  %v8152_v34 = vld [vmem:[%s14773_s3 + $0x250] sm:$0xf] }
 0x726   : > { %v12473_v31 = vadd.f32 %v3260_v43, %v3172_v53  ;;  %v3188_v4 = vpop.f32.mrf.mxu3  ;;  %v8153_v53 = vor.u32 %v9360_v5, %v8152_v34  ;;  %v8160_v5 = vld [vmem:[%s14773_s3 + $0x260] sm:$0xf] }
 0x72d   : > { %v12475_v2 = vpop.f32.mrf.mxu0 }
 0x72e   : > { %v3191_v52 = vpop.f32.mrf.mxu3 }
 0x72f   : > { %v3192_v50 = vadd.f32 %v3191_v52, %v15158_v54  ;;  %v3182_v52 = vadd.f32 %v3181_v15, %v15163_v30 }
 0x735   : > { %v3265_v10 = vpop.f32.mrf.mxu0  ;;  %3769 = vmatmul.bf16.gmra.mxu1 %v8129_v56 }
 0x736   : > { %v3266_v17 = vadd.f32 %v3265_v10, %v3177_v62  ;;  %v3193_v56 = vpop.f32.mrf.mxu3  ;;  %v3189_v62 = vadd.f32 %v3188_v4, %v15159_v0  ;;  %v9362_v4 = vld [vmem:[%s14773_s3 + $0x264] sm:$0xf0] }
 0x738   : > { %v12547_v29 = vadd.f32 %v3266_v17, %v11854_v28  ;;  %v9364_v17 = vld [vmem:[%s14773_s3 + $0x274] sm:$0xf0] }
 0x73a   : > { %15170 = vst [vmem:[#allocation46_spill] sm:$0xff] %v12547_v29  ;;  %v3341_v28 = vmax.f32 %v12547_v29, 0.0 }
 0x73d   : > { %v3267_v26 = vpop.f32.mrf.mxu0 }
 0x745   : > { %v3270_v22 = vpop.f32.mrf.mxu0  ;;  %3774 = vmatmul.bf16.gmra.mxu1 %v8137_v21  ;;  %v15161_v21 = vld [vmem:[#allocation74_spill] sm:$0xff] }
 0x746   : > { %v3194_v19 = vadd.f32 %v3193_v56, %v15161_v21 }
 0x74d   : > { %v3272_v1 = vpop.f32.mrf.mxu0 }
 0x755   : > { %v3275_v6 = vpop.f32.mrf.mxu0  ;;  %3779 = vmatmul.bf16.gmra.mxu1 %v8145_v24 }
 0x756   : > { %v3276_v48 = vadd.f32 %v3275_v6, %v3187_v42  ;;  %v8161_v6 = vor.u32 %v9362_v4, %v8160_v5  ;;  %v15171_v42 = vld [vmem:[#allocation48_spill] sm:$0xff]  ;;  %v15176_v5 = vld [vmem:[#allocation42_spill] sm:$0xff] }
 0x758   : > { %v12525_v54 = vadd.f32 %v3276_v48, %v11832_v7 }
 0x75a   : > { %v3345_v7 = vmax.f32 %v12525_v54, 0.0 }
 0x75d   : > { %v3277_v25 = vpop.f32.mrf.mxu0 }
 0x75e   : > { %v3278_v27 = vadd.f32 %v3277_v25, %v3189_v62  ;;  %v15169_v62 = vld [vmem:[#allocation91_spill] sm:$0xff] }
 0x760   : > { %v12518_v25 = vadd.f32 %v3278_v27, %v11825_v59 }
 0x762   : > { %v3346_v59 = vmax.f32 %v12518_v25, 0.0 }
 0x765   : > { %v3280_v43 = vpop.f32.mrf.mxu0  ;;  %3784 = vmatmul.bf16.gmra.mxu1 %v8153_v53  ;;  %v3273_v53 = vadd.f32 %v3272_v1, %v3184_v14  ;;  %v3363_v1 = vpack.c.bf16 %v3346_v59, %v3345_v7  ;;  %v15183_v59 = vld [vmem:[#allocation38_spill] sm:$0xff]  ;;  %v15187_v7 = vld [vmem:[#allocation40_spill] sm:$0xff] }
 0x766   : > { %v3281_v10 = vadd.f32 %v3280_v43, %v3192_v50  ;;  %v3271_v43 = vadd.f32 %v3270_v22, %v3182_v52  ;;  %v15178_v52 = vld [vmem:[#allocation96_spill] sm:$0xff] }
 0x767   : > { %v12530_v14 = vadd.f32 %v3273_v53, %v11837_v55  ;;  %v3159_v53 = vadd.f32 %v12351_v40, %v15178_v52 }
 0x768   : > { %v12508_v20 = vadd.f32 %v3281_v10, %v11815_v44  ;;  %v15164_v44 = vld [vmem:[#allocation86_spill] sm:$0xff]  ;;  %v12536_v22 = vadd.f32 %v3271_v43, %v11843_v46  ;;  %v3169_v10 = vadd.f32 %v12430_v8, %v15169_v62 }
 0x769   : > { %v3179_v49 = vadd.f32 %v3178_v61, %v15164_v44  ;;  %15165 = vst [vmem:[#allocation43_spill] sm:$0xff] %v12530_v14  ;;  %v3344_v55 = vmax.f32 %v12530_v14, 0.0  ;;  %v15179_v44 = vld [vmem:[#allocation36_spill] sm:$0xff]  ;;  %v3248_v43 = vadd.f32 %v12407_v36, %v3159_v53  ;;  %v8200_v53 = vld [vmem:[%s14773_s3 + $0x2b0] sm:$0xf] }
 0x76a   : > { %v3347_v50 = vmax.f32 %v12508_v20, 0.0  ;;  %15167 = vst [vmem:[#allocation20_spill] sm:$0xff] %v12536_v22  ;;  %v3343_v46 = vmax.f32 %v12536_v22, 0.0 }
 0x76b   : > { %v3268_v0 = vadd.f32 %v3267_v26, %v3179_v49  ;;  %v12577_v49 = vadd.f32 %v12460_v58, %v15179_v44  ;;  %v15185_v58 = vld [vmem:[#allocation37_spill] sm:$0xff]  ;;  %v9372_v44 = vld [vmem:[%s14773_s3 + $0x2b4] sm:$0xf0] }
 0x76d   : > { %v3282_v24 = vpop.f32.mrf.mxu0  ;;  %v12541_v26 = vadd.f32 %v3268_v0, %v11848_v13  ;;  %15180 = vst [vmem:[#allocation27_spill] sm:$0xff] %v12577_v49  ;;  %v3337_v40 = vmax.f32 %v12577_v49, 0.0 }
 0x76e   : > { %v3283_v34 = vadd.f32 %v3282_v24, %v3194_v19  ;;  %v15173_v19 = vld [vmem:[#allocation95_spill] sm:$0xff]  ;;  %v15174_v24 = vld [vmem:[#allocation45_spill] sm:$0xff] }
 0x76f   : > { %15168 = vst [vmem:[#allocation22_spill] sm:$0xff] %v12541_v26  ;;  %v3342_v13 = vmax.f32 %v12541_v26, 0.0  ;;  %v3164_v27 = vadd.f32 %v12376_v3, %v15173_v19  ;;  %v12559_v8 = vadd.f32 %v12473_v31, %v15174_v24  ;;  %v8184_v19 = vld [vmem:[%s14773_s3 + $0x290] sm:$0xf]  ;;  %v9351_v24 = vld [vmem:[%s14773_s3 + $0x214] sm:$0xf] }
 0x770   : > { %v12521_v38 = vadd.f32 %v3283_v34, %v11828_v60  ;;  %v15166_v60 = vld [vmem:[#allocation87_spill] sm:$0xff] }
 0x771   : > { %v3174_v61 = vadd.f32 %v12462_v35, %v15166_v60  ;;  %v3258_v35 = vadd.f32 %v12464_v16, %v3169_v10  ;;  %15175 = vst [vmem:[#allocation26_spill] sm:$0xff] %v12559_v8  ;;  %v8168_v16 = vld [vmem:[%s14773_s3 + $0x270] sm:$0xf]  ;;  %v3253_v34 = vadd.f32 %v12450_v41, %v3164_v27  ;;  %v3361_v31 = vpack.c.bf16 %v3342_v13, %v3341_v28  ;;  %v15181_v41 = vld [vmem:[#allocation39_spill] sm:$0xff]  ;;  %v9368_v27 = vld [vmem:[%s14773_s3 + $0x294] sm:$0xf0] }
 0x772   : > { %v3348_v56 = vmax.f32 %v12521_v38, 0.0  ;;  %v8169_v30 = vor.u32 %v9364_v17, %v8168_v16  ;;  %v12591_v60 = vadd.f32 %v3248_v43, %v15185_v58  ;;  %v8176_v10 = vld [vmem:[%s14773_s3 + $0x280] sm:$0xf]  ;;  %v8122_v28 = vld [vmem:[%s14773_s3 + $0x218] sm:$0xf0]  ;;  %v8185_v16 = vor.u32 %v9368_v27, %v8184_v19 }
 0x773   : > { %v3263_v48 = vadd.f32 %v12475_v2, %v3174_v61  ;;  %v3362_v2 = vpack.c.bf16 %v3344_v55, %v3343_v46  ;;  %v12570_v4 = vadd.f32 %v3258_v35, %v15176_v5  ;;  %v9366_v46 = vld [vmem:[%s14773_s3 + $0x284] sm:$0xf0]  ;;  %v8114_v35 = vld [vmem:[%s14773_s3 + $0x208] sm:$0xf0]  ;;  %v8125_v17 = vor.u32 %v9351_v24, %v8122_v28  ;;  %v8138_v43 = vld [vmem:[%s14773_s3 + $0x238] sm:$0xf0] }
 0x774   : > { %v3364_v15 = vpack.c.bf16 %v3348_v56, %v3347_v50  ;;  %v12582_v50 = vadd.f32 %v3253_v34, %v15181_v41  ;;  %15186 = vst [vmem:[#allocation28_spill] sm:$0xff] %v12591_v60  ;;  %v8177_v13 = vor.u32 %v9366_v46, %v8176_v10  ;;  %v8192_v34 = vld [vmem:[%s14773_s3 + $0x2a0] sm:$0xf]  ;;  %v9370_v5 = vld [vmem:[%s14773_s3 + $0x2a4] sm:$0xf0] }
 0x775   : > { %3789 = vmatmul.bf16.gmra.mxu1 %v8161_v6  ;;  %v12552_v21 = vadd.f32 %v3263_v48, %v15171_v42  ;;  %15177 = vst [vmem:[#allocation47_spill] sm:$0xff] %v12570_v4  ;;  %v3339_v6 = vmax.f32 %v12559_v8, 0.0  ;;  %v3338_v56 = vmax.f32 %v12570_v4, 0.0  ;;  %v12596_v48 = vadd.f32 %v12392_v63, %v15187_v7  ;;  %v9349_v63 = vld [vmem:[%s14773_s3 + $0x204] sm:$0xf] }
 0x776   : > { %3840 = vmatpush.bf16.msrb.mxu2 %v3364_v15  ;;  %15182 = vst [vmem:[#allocation29_spill] sm:$0xff] %v12582_v50  ;;  %v12587_v15 = vadd.f32 %v12437_v18, %v15183_v59  ;;  %v3336_v61 = vmax.f32 %v12582_v50, 0.0  ;;  %v9374_v58 = vld [vmem:[%s14773_s3 + $0x2c4] sm:$0xf0]  ;;  %v9376_v10 = vld [vmem:[%s14773_s3 + $0x2d4] sm:$0xf0] }
 0x777   : > { %15172 = vst [vmem:[#allocation23_spill] sm:$0xff] %v12552_v21  ;;  %v3340_v3 = vmax.f32 %v12552_v21, 0.0  ;;  %v3359_v36 = vpack.c.bf16 %v3338_v56, %v3337_v40  ;;  %v3333_v62 = vmax.f32 %v12596_v48, 0.0  ;;  %v8201_v56 = vor.u32 %v9372_v44, %v8200_v53  ;;  %v8208_v40 = vld [vmem:[%s14773_s3 + $0x2c0] sm:$0xf]  ;;  %v15216_v21 = vld [vmem:[#allocation116_spill] sm:$0xff] }
 0x778   : > { %15184 = vst [vmem:[#allocation50_spill] sm:$0xff] %v12587_v15  ;;  %v3335_v55 = vmax.f32 %v12587_v15, 0.0  ;;  %v8209_v7 = vor.u32 %v9374_v58, %v8208_v40  ;;  %v9359_v46 = vld [vmem:[%s14773_s3 + $0x254] sm:$0xf]  ;;  %v9378_v19 = vld [vmem:[%s14773_s3 + $0x2e4] sm:$0xf0] }
 0x779   : > { %v3360_v0 = vpack.c.bf16 %v3340_v3, %v3339_v6  ;;  %15188 = vst [vmem:[#allocation30_spill] sm:$0xff] %v12596_v48  ;;  %v9353_v3 = vld [vmem:[%s14773_s3 + $0x224] sm:$0xf]  ;;  %v9355_v6 = vld [vmem:[%s14773_s3 + $0x234] sm:$0xf] }
 0x77a   : > { %3841 = vmatpush.bf16.msrb.mxu2 %v3363_v1  ;;  %v3334_v1 = vmax.f32 %v12591_v60, 0.0  ;;  %v3358_v18 = vpack.c.bf16 %v3336_v61, %v3335_v55  ;;  %v9357_v61 = vld [vmem:[%s14773_s3 + $0x244] sm:$0xf]  ;;  %v8162_v24 = vld [vmem:[%s14773_s3 + $0x268] sm:$0xf0]  ;;  %v15202_v48 = vld [vmem:[#allocation105_spill] sm:$0xff] }
 0x77b   : > { %v9361_v27 = vld [vmem:[%s14773_s3 + $0x264] sm:$0xf] }
 0x77c   : > { %v3357_v42 = vpack.c.bf16 %v3334_v1, %v3333_v62  ;;  %v8216_v62 = vld [vmem:[%s14773_s3 + $0x2d0] sm:$0xf] }
 0x77e   : > { %3842 = vmatpush.bf16.msrb.mxu2 %v3362_v2  ;;  %v8117_v2 = vor.u32 %v9349_v63, %v8114_v35  ;;  %v8154_v63 = vld [vmem:[%s14773_s3 + $0x258] sm:$0xf0]  ;;  %v8217_v35 = vor.u32 %v9376_v10, %v8216_v62 }
 0x782   : > { %3843 = vmatpush.bf16.msrb.mxu2 %v3361_v31  ;;  %v8130_v31 = vld [vmem:[%s14773_s3 + $0x228] sm:$0xf0] }
 0x783   : > { %v8133_v52 = vor.u32 %v9353_v3, %v8130_v31  ;;  %v9380_v3 = vld [vmem:[%s14773_s3 + $0x2f4] sm:$0xf0]  ;;  %v9363_v31 = vld [vmem:[%s14773_s3 + $0x274] sm:$0xf] }
 0x785   : > { %3794 = vmatmul.bf16.gmra.mxu1 %v8169_v30  ;;  %v8193_v30 = vor.u32 %v9370_v5, %v8192_v34  ;;  %v8232_v5 = vld [vmem:[%s14773_s3 + $0x2f0] sm:$0xf] }
 0x786   : > { %3844 = vmatpush.bf16.msrb.mxu2 %v3360_v0  ;;  %v8141_v0 = vor.u32 %v9355_v6, %v8138_v43  ;;  %v9365_v6 = vld [vmem:[%s14773_s3 + $0x284] sm:$0xf]  ;;  %v8178_v43 = vld [vmem:[%s14773_s3 + $0x288] sm:$0xf0] }
 0x78a   : > { %3845 = vmatpush.bf16.msrb.mxu2 %v3359_v36  ;;  %v8146_v36 = vld [vmem:[%s14773_s3 + $0x248] sm:$0xf0] }
 0x78b   : > { %v8149_v55 = vor.u32 %v9357_v61, %v8146_v36  ;;  %v9367_v36 = vld [vmem:[%s14773_s3 + $0x294] sm:$0xf] }
 0x78e   : > { %3846 = vmatpush.bf16.msrb.mxu2 %v3358_v18 }
 0x792   : > { %3847 = vmatpush.bf16.msrb.mxu2 %v3357_v42  ;;  %v3760_v41 = vpop.f32.mrf.mxu1  ;;  %v8157_v42 = vor.u32 %v9359_v46, %v8154_v63 }
 0x795   : > { %3799 = vmatmul.bf16.gmra.mxu1 %v8177_v13  ;;  %3848 = vmatmul.bf16.vlgmr.msrb.gmra.mxu2 %v8117_v2  ;;  %v8224_v2 = vld [vmem:[%s14773_s3 + $0x2e0] sm:$0xf] }
 0x79a   : > { %v3762_v59 = vpop.f32.mrf.mxu1 }
 0x7a2   : > { %v3765_v1 = vpop.f32.mrf.mxu1 }
 0x7a5   : > { %3804 = vmatmul.bf16.gmra.mxu1 %v8185_v16  ;;  %3853 = vmatmul.bf16.gmra.mxu2 %v8125_v17  ;;  %v8225_v16 = vor.u32 %v9378_v19, %v8224_v2  ;;  %v8165_v17 = vor.u32 %v9361_v27, %v8162_v24  ;;  %v15191_v19 = vld [vmem:[#allocation120_spill] sm:$0xff] }
 0x7a6   : > { %v3766_v27 = vadd.f32 %v3765_v1, %v15191_v19  ;;  %v15195_v19 = vld [vmem:[#allocation109_spill] sm:$0xff] }
 0x7aa   : > { %v3767_v18 = vpop.f32.mrf.mxu1 }
 0x7b2   : > { %v3770_v13 = vpop.f32.mrf.mxu1 }
 0x7b5   : > { %3809 = vmatmul.bf16.gmra.mxu1 %v8193_v30  ;;  %3858 = vmatmul.bf16.gmra.mxu2 %v8133_v52  ;;  %v8170_v30 = vld [vmem:[%s14773_s3 + $0x278] sm:$0xf0]  ;;  %v8233_v52 = vor.u32 %v9380_v3, %v8232_v5 }
 0x7b6   : > { %v8173_v53 = vor.u32 %v9363_v31, %v8170_v30  ;;  %v15192_v5 = vld [vmem:[#allocation118_spill] sm:$0xff] }
 0x7b7   : > { %v3768_v3 = vadd.f32 %v3767_v18, %v15192_v5  ;;  %v9371_v18 = vld [vmem:[%s14773_s3 + $0x2b4] sm:$0xf]  ;;  %v15196_v5 = vld [vmem:[#allocation110_spill] sm:$0xff] }
 0x7ba   : > { %v3772_v28 = vpop.f32.mrf.mxu1 }
 0x7c2   : > { %v3775_v34 = vpop.f32.mrf.mxu1 }
 0x7c5   : > { %3814 = vmatmul.bf16.gmra.mxu1 %v8201_v56  ;;  %3863 = vmatmul.bf16.gmra.mxu2 %v8141_v0  ;;  %v8181_v56 = vor.u32 %v9365_v6, %v8178_v43  ;;  %v15189_v0 = vld [vmem:[#allocation121_spill] sm:$0xff] }
 0x7c6   : > { %v3761_v40 = vadd.f32 %v3760_v41, %v15189_v0 }
 0x7ca   : > { %v3777_v44 = vpop.f32.mrf.mxu1 }
 0x7d2   : > { %v3780_v41 = vpop.f32.mrf.mxu1 }
 0x7d5   : > { %3819 = vmatmul.bf16.gmra.mxu1 %v8209_v7  ;;  %3868 = vmatmul.bf16.gmra.mxu2 %v8149_v55  ;;  %v8186_v7 = vld [vmem:[%s14773_s3 + $0x298] sm:$0xf0] }
 0x7d6   : > { %v15190_v55 = vld [vmem:[#allocation122_spill] sm:$0xff]  ;;  %v8189_v63 = vor.u32 %v9367_v36, %v8186_v7  ;;  %v15194_v7 = vld [vmem:[#allocation117_spill] sm:$0xff] }
 0x7d7   : > { %v3763_v62 = vadd.f32 %v3762_v59, %v15190_v55  ;;  %v8194_v59 = vld [vmem:[%s14773_s3 + $0x2a8] sm:$0xf0]  ;;  %v8202_v36 = vld [vmem:[%s14773_s3 + $0x2b8] sm:$0xf0]  ;;  %v3773_v55 = vadd.f32 %v3772_v28, %v15194_v7 }
 0x7d8   : > { %v8210_v28 = vld [vmem:[%s14773_s3 + $0x2c8] sm:$0xf0] }
 0x7da   : > { %v12721_v31 = vpop.f32.mrf.mxu1 }
 0x7e5   : > { %3824 = vmatmul.bf16.gmra.mxu1 %v8217_v35  ;;  %3873 = vmatmul.bf16.gmra.mxu2 %v8157_v42 }
 0x7f5   : > { %3829 = vmatmul.bf16.gmra.mxu1 %v8225_v16  ;;  %3878 = vmatmul.bf16.gmra.mxu2 %v8165_v17  ;;  %v9369_v17 = vld [vmem:[%s14773_s3 + $0x2a4] sm:$0xf] }
 0x805   : > { %3834 = vmatmul.bf16.gmra.mxu1 %v8233_v52  ;;  %3883 = vmatmul.bf16.gmra.mxu2 %v8173_v53  ;;  %v8197_v53 = vor.u32 %v9369_v17, %v8194_v59  ;;  %v9373_v59 = vld [vmem:[%s14773_s3 + $0x2c4] sm:$0xf] }
 0x815   : > { %3888 = vmatmul.bf16.gmra.mxu2 %v8181_v56  ;;  %v15193_v56 = vld [vmem:[#allocation113_spill] sm:$0xff] }
 0x816   : > { %v3771_v0 = vadd.f32 %v3770_v13, %v15193_v56  ;;  %v15197_v56 = vld [vmem:[#allocation108_spill] sm:$0xff] }
 0x818   : > { %v3849_v58 = vpop.f32.mrf.mxu2 }
 0x819   : > { %v3850_v61 = vadd.f32 %v3849_v58, %v3761_v40 }
 0x81b   : > { %v3929_v35 = vmax.f32 %v3850_v61, 0.0  ;;  %v12726_v61 = vpop.f32.mrf.mxu1 }
 0x820   : > { %v3851_v10 = vpop.f32.mrf.mxu2 }
 0x821   : > { %v3852_v46 = vadd.f32 %v3851_v10, %v3763_v62 }
 0x823   : > { %v3930_v42 = vmax.f32 %v3852_v46, 0.0  ;;  %v8205_v46 = vor.u32 %v9371_v18, %v8202_v36  ;;  %v3787_v13 = vpop.f32.mrf.mxu1  ;;  %v9375_v36 = vld [vmem:[%s14773_s3 + $0x2d4] sm:$0xf] }
 0x824   : > { %v3788_v60 = vadd.f32 %v3787_v13, %v15202_v48 }
 0x825   : > { %3893 = vmatmul.bf16.gmra.mxu2 %v8189_v63  ;;  %v12711_v2 = vpack.c.bf16 %v3930_v42, %v3929_v35 }
 0x828   : > { %v3854_v24 = vpop.f32.mrf.mxu2 }
 0x829   : > { %v3855_v16 = vadd.f32 %v3854_v24, %v3766_v27  ;;  %v3776_v27 = vadd.f32 %v3775_v34, %v15195_v19 }
 0x82b   : > { %v3931_v6 = vmax.f32 %v3855_v16, 0.0  ;;  %v3790_v17 = vpop.f32.mrf.mxu1 }
 0x830   : > { %v3856_v30 = vpop.f32.mrf.mxu2 }
 0x831   : > { %v3857_v52 = vadd.f32 %v3856_v30, %v3768_v3  ;;  %v3778_v3 = vadd.f32 %v3777_v44, %v15196_v5  ;;  %v8218_v44 = vld [vmem:[%s14773_s3 + $0x2d8] sm:$0xf0] }
 0x833   : > { %v3932_v43 = vmax.f32 %v3857_v52, 0.0 }
 0x835   : > { %3898 = vmatmul.bf16.gmra.mxu2 %v8197_v53  ;;  %v12723_v1 = vpack.c.bf16 %v3932_v43, %v3931_v6  ;;  %v8213_v53 = vor.u32 %v9373_v59, %v8210_v28  ;;  %v8234_v59 = vld [vmem:[%s14773_s3 + $0x2f8] sm:$0xf0] }
 0x838   : > { %v3859_v40 = vpop.f32.mrf.mxu2 }
 0x839   : > { %v3860_v58 = vadd.f32 %v3859_v40, %v3771_v0  ;;  %v3781_v0 = vadd.f32 %v3780_v41, %v15197_v56  ;;  %v3792_v40 = vpop.f32.mrf.mxu1  ;;  %v9377_v41 = vld [vmem:[%s14773_s3 + $0x2e4] sm:$0xf] }
 0x83b   : > { %v3933_v63 = vmax.f32 %v3860_v58, 0.0 }
 0x840   : > { %v3861_v62 = vpop.f32.mrf.mxu2 }
 0x841   : > { %v3862_v10 = vadd.f32 %v3861_v62, %v3773_v55  ;;  %v8221_v55 = vor.u32 %v9375_v36, %v8218_v44  ;;  %v3795_v62 = vpop.f32.mrf.mxu1 }
 0x843   : > { %v3934_v35 = vmax.f32 %v3862_v10, 0.0 }
 0x845   : > { %3903 = vmatmul.bf16.gmra.mxu2 %v8205_v46  ;;  %v12735_v42 = vpack.c.bf16 %v3934_v35, %v3933_v63  ;;  %v8226_v63 = vld [vmem:[%s14773_s3 + $0x2e8] sm:$0xf0] }
 0x846   : > { %v8229_v19 = vor.u32 %v9377_v41, %v8226_v63 }
 0x848   : > { %v3864_v24 = vpop.f32.mrf.mxu2 }
 0x849   : > { %v3865_v16 = vadd.f32 %v3864_v24, %v3776_v27  ;;  %v3797_v46 = vpop.f32.mrf.mxu1 }
 0x84b   : > { %v3935_v6 = vmax.f32 %v3865_v16, 0.0  ;;  %v9379_v16 = vld [vmem:[%s14773_s3 + $0x2f4] sm:$0xf] }
 0x850   : > { %v3866_v30 = vpop.f32.mrf.mxu2 }
 0x851   : > { %v3867_v52 = vadd.f32 %v3866_v30, %v3778_v3  ;;  %v3800_v27 = vpop.f32.mrf.mxu1  ;;  %v8237_v3 = vor.u32 %v9379_v16, %v8234_v59 }
 0x853   : > { %v3936_v43 = vmax.f32 %v3867_v52, 0.0 }
 0x855   : > { %3908 = vmatmul.bf16.gmra.mxu2 %v8213_v53  ;;  %v12745_v34 = vpack.c.bf16 %v3936_v43, %v3935_v6  ;;  %v15198_v53 = vld [vmem:[#allocation98_spill] sm:$0xff]  ;;  %v15199_v43 = vld [vmem:[#allocation100_spill] sm:$0xff] }
 0x856   : > { %v3796_v6 = vadd.f32 %v3795_v62, %v15198_v53  ;;  %v3793_v56 = vadd.f32 %v3792_v40, %v15199_v43 }
 0x858   : > { %v3869_v58 = vpop.f32.mrf.mxu2 }
 0x859   : > { %v3870_v18 = vadd.f32 %v3869_v58, %v3781_v0  ;;  %v12766_v28 = vpop.f32.mrf.mxu1  ;;  %v15200_v0 = vld [vmem:[#allocation99_spill] sm:$0xff] }
 0x85a   : > { %v3798_v58 = vadd.f32 %v3797_v46, %v15200_v0  ;;  %v15204_v46 = vld [vmem:[#allocation106_spill] sm:$0xff] }
 0x860   : > { %v3871_v7 = vpop.f32.mrf.mxu2 }
 0x861   : > { %v3805_v52 = vpop.f32.mrf.mxu1 }
 0x865   : > { %3913 = vmatmul.bf16.gmra.mxu2 %v8221_v55  ;;  %v15201_v55 = vld [vmem:[#allocation102_spill] sm:$0xff] }
 0x866   : > { %v3791_v41 = vadd.f32 %v3790_v17, %v15201_v55 }
 0x868   : > { %v3874_v10 = vpop.f32.mrf.mxu2 }
 0x869   : > { %v12773_v59 = vpop.f32.mrf.mxu1 }
 0x870   : > { %v3876_v35 = vpop.f32.mrf.mxu2 }
 0x871   : > { %v3877_v53 = vadd.f32 %v3876_v35, %v3788_v60  ;;  %v3810_v35 = vpop.f32.mrf.mxu1 }
 0x875   : > { %3918 = vmatmul.bf16.gmra.mxu2 %v8229_v19 }
 0x878   : > { %v3879_v24 = vpop.f32.mrf.mxu2 }
 0x879   : > { %v3880_v15 = vadd.f32 %v3879_v24, %v3791_v41  ;;  %v3940_v24 = vmax.f32 %v3877_v53, 0.0  ;;  %v9382_v41 = vld [vmem:[%s14775_s5 + $0x204] sm:$0xf0]  ;;  %v9384_v53 = vld [vmem:[%s14775_s5 + $0x214] sm:$0xf0] }
 0x880   : > { %v3881_v5 = vpop.f32.mrf.mxu2 }
 0x881   : > { %v3882_v63 = vadd.f32 %v3881_v5, %v3793_v56  ;;  %v3941_v56 = vmax.f32 %v3880_v15, 0.0 }
 0x883   : > { %v3942_v40 = vmax.f32 %v3882_v63, 0.0 }
 0x885   : > { %3923 = vmatmul.bf16.gmra.mxu2 %v8237_v3  ;;  %v15203_v3 = vld [vmem:[#allocation101_spill] sm:$0xff] }
 0x886   : > { %v3786_v62 = vadd.f32 %v12726_v61, %v15203_v3 }
 0x888   : > { %v3884_v30 = vpop.f32.mrf.mxu2  ;;  %v3875_v5 = vadd.f32 %v3874_v10, %v3786_v62  ;;  %v15206_v10 = vld [vmem:[#allocation125_spill] sm:$0xff] }
 0x889   : > { %v3885_v36 = vadd.f32 %v3884_v30, %v3796_v6  ;;  %v3783_v30 = vadd.f32 %v12721_v31, %v15204_v46  ;;  %v15205_v6 = vld [vmem:[#allocation127_spill] sm:$0xff]  ;;  %v3806_v15 = vadd.f32 %v3805_v52, %v15206_v10  ;;  %v8312_v62 = vld [vmem:[%s14775_s5 + $0x210] sm:$0xf] }
 0x88a   : > { %v3801_v17 = vadd.f32 %v3800_v27, %v15205_v6  ;;  %v15208_v46 = vld [vmem:[#allocation119_spill] sm:$0xff] }
 0x88b   : > { %v3943_v50 = vmax.f32 %v3885_v36, 0.0  ;;  %v3872_v13 = vadd.f32 %v3871_v7, %v3783_v30  ;;  %v3939_v36 = vmax.f32 %v3875_v5, 0.0  ;;  %v12786_v7 = vpop.f32.mrf.mxu1  ;;  %v8320_v5 = vld [vmem:[%s14775_s5 + $0x220] sm:$0xf] }
 0x88d   : > { %v3938_v61 = vmax.f32 %v3872_v13, 0.0  ;;  %v3966_v60 = vpack.c.bf16 %v3940_v24, %v3939_v36 }
 0x890   : > { %v3886_v44 = vpop.f32.mrf.mxu2 }
 0x891   : > { %v3887_v19 = vadd.f32 %v3886_v44, %v3798_v58  ;;  %v3967_v58 = vpack.c.bf16 %v3942_v40, %v3941_v56  ;;  %v9386_v56 = vld [vmem:[%s14775_s5 + $0x224] sm:$0xf0] }
 0x892   : > { %v8321_v24 = vor.u32 %v9386_v56, %v8320_v5  ;;  %v15210_v56 = vld [vmem:[#allocation103_spill] sm:$0xff] }
 0x893   : > { %v3944_v16 = vmax.f32 %v3887_v19, 0.0  ;;  %v15207_v19 = vld [vmem:[#allocation126_spill] sm:$0xff] }
 0x895   : > { %v3968_v43 = vpack.c.bf16 %v3944_v16, %v3943_v50  ;;  %v3937_v50 = vmax.f32 %v3870_v18, 0.0  ;;  %v8304_v18 = vld [vmem:[%s14775_s5 + $0x200] sm:$0xf]  ;;  %v3811_v16 = vadd.f32 %v3810_v35, %v15207_v19 }
 0x896   : > { %v8305_v63 = vor.u32 %v9382_v41, %v8304_v18 }
 0x897   : > { %4363 = vmatpush.bf16.msrb.mxu3 %v3968_v43  ;;  %v3965_v31 = vpack.c.bf16 %v3938_v61, %v3937_v50  ;;  %v8313_v43 = vor.u32 %v9384_v53, %v8312_v62  ;;  %v8328_v50 = vld [vmem:[%s14775_s5 + $0x230] sm:$0xf] }
 0x898   : > { %v3889_v48 = vpop.f32.mrf.mxu2  ;;  %v8344_v53 = vld [vmem:[%s14775_s5 + $0x250] sm:$0xf] }
 0x899   : > { %v12780_v0 = vadd.f32 %v3889_v48, %v3801_v17 }
 0x89b   : > { %4364 = vmatpush.bf16.msrb.mxu3 %v3967_v58  ;;  %v15209_v58 = vld [vmem:[#allocation115_spill] sm:$0xff] }
 0x89f   : > { %4365 = vmatpush.bf16.msrb.mxu3 %v3966_v60 }
 0x8a0   : > { %v12782_v44 = vpop.f32.mrf.mxu2 }
 0x8a3   : > { %4366 = vmatpush.bf16.msrb.mxu3 %v3965_v31  ;;  %v9388_v31 = vld [vmem:[%s14775_s5 + $0x234] sm:$0xf0] }
 0x8a7   : > { %4367 = vmatpush.bf16.msrb.mxu3 %v12745_v34  ;;  %v3815_v34 = vpop.f32.mrf.mxu1 }
 0x8a8   : > { %v3894_v27 = vpop.f32.mrf.mxu2  ;;  %v3816_v30 = vadd.f32 %v3815_v34, %v15208_v46  ;;  %v8336_v34 = vld [vmem:[%s14775_s5 + $0x240] sm:$0xf] }
 0x8a9   : > { %v12788_v55 = vadd.f32 %v3894_v27, %v3806_v15  ;;  %v8329_v15 = vor.u32 %v9388_v31, %v8328_v50 }
 0x8ab   : > { %4368 = vmatpush.bf16.msrb.mxu3 %v12735_v42 }
 0x8af   : > { %4369 = vmatpush.bf16.msrb.mxu3 %v12723_v1  ;;  %v12804_v1 = vpop.f32.mrf.mxu1 }
 0x8b0   : > { %v12798_v52 = vpop.f32.mrf.mxu2 }
 0x8b3   : > { %4370 = vmatpush.bf16.msrb.mxu3 %v12711_v2 }
 0x8b6   : > { %4371 = vmatmul.bf16.vlgmr.msrb.gmra.mxu3 %v8305_v63  ;;  %v9390_v63 = vld [vmem:[%s14775_s5 + $0x244] sm:$0xf0] }
 0x8b7   : > { %v3820_v2 = vpop.f32.mrf.mxu1 }
 0x8b8   : > { %v3899_v42 = vpop.f32.mrf.mxu2  ;;  %v3821_v36 = vadd.f32 %v3820_v2, %v15209_v58  ;;  %v15211_v58 = vld [vmem:[#allocation111_spill] sm:$0xff] }
 0x8b9   : > { %v12802_v3 = vadd.f32 %v3899_v42, %v3811_v16  ;;  %v8337_v16 = vor.u32 %v9390_v63, %v8336_v34  ;;  %v9394_v34 = vld [vmem:[%s14775_s5 + $0x264] sm:$0xf0] }
 0x8bf   : > { %v3822_v48 = vpop.f32.mrf.mxu1 }
 0x8c0   : > { %v12812_v40 = vpop.f32.mrf.mxu2  ;;  %v3823_v29 = vadd.f32 %v3822_v48, %v15216_v21 }
 0x8c6   : > { %4376 = vmatmul.bf16.gmra.mxu3 %v8313_v43  ;;  %v9392_v43 = vld [vmem:[%s14775_s5 + $0x254] sm:$0xf0] }
 0x8c7   : > { %v3825_v35 = vpop.f32.mrf.mxu1 }
 0x8c8   : > { %v3904_v6 = vpop.f32.mrf.mxu2 }
 0x8c9   : > { %v12815_v17 = vadd.f32 %v3904_v6, %v3816_v30  ;;  %v8345_v30 = vor.u32 %v9392_v43, %v8344_v53 }
 0x8cf   : > { %v3827_v27 = vpop.f32.mrf.mxu1 }
 0x8d0   : > { %v3906_v13 = vpop.f32.mrf.mxu2 }
 0x8d6   : > { %4381 = vmatmul.bf16.gmra.mxu3 %v8321_v24 }
 0x8d7   : > { %v3830_v41 = vpop.f32.mrf.mxu1 }
 0x8d8   : > { %v3909_v61 = vpop.f32.mrf.mxu2 }
 0x8d9   : > { %v12824_v60 = vadd.f32 %v3909_v61, %v3821_v36  ;;  %v15212_v61 = vld [vmem:[#allocation104_spill] sm:$0xff] }
 0x8df   : > { %v3832_v42 = vpop.f32.mrf.mxu1 }
 0x8e0   : > { %v3911_v10 = vpop.f32.mrf.mxu2  ;;  %v3833_v36 = vadd.f32 %v3832_v42, %v15211_v58 }
 0x8e6   : > { %4386 = vmatmul.bf16.gmra.mxu3 %v8329_v15  ;;  %v8352_v15 = vld [vmem:[%s14775_s5 + $0x260] sm:$0xf] }
 0x8e7   : > { %v3835_v46 = vpop.f32.mrf.mxu1  ;;  %v8353_v49 = vor.u32 %v9394_v34, %v8352_v15 }
 0x8e8   : > { %v3914_v18 = vpop.f32.mrf.mxu2  ;;  %v3836_v24 = vadd.f32 %v3835_v46, %v15210_v56  ;;  %v15214_v46 = vld [vmem:[#allocation112_spill] sm:$0xff] }
 0x8e9   : > { %v3828_v56 = vadd.f32 %v3827_v27, %v15214_v46  ;;  %v8368_v46 = vld [vmem:[%s14775_s5 + $0x280] sm:$0xf] }
 0x8ef   : > { %v3837_v5 = vpop.f32.mrf.mxu1 }
 0x8f0   : > { %v3916_v19 = vpop.f32.mrf.mxu2  ;;  %v3838_v50 = vadd.f32 %v3837_v5, %v15212_v61 }
 0x8f1   : > { %v3917_v61 = vadd.f32 %v3916_v19, %v3828_v56  ;;  %v15218_v19 = vld [vmem:[#allocation124_spill] sm:$0xff] }
 0x8f2   : > { %v3813_v34 = vadd.f32 %v12786_v7, %v15218_v19  ;;  %v3951_v7 = vmax.f32 %v12815_v17, 0.0  ;;  %v8330_v19 = vld [vmem:[%s14775_s5 + $0x238] sm:$0xf0] }
 0x8f6   : > { %4391 = vmatmul.bf16.gmra.mxu3 %v8337_v16  ;;  %v15213_v16 = vld [vmem:[#allocation107_spill] sm:$0xff] }
 0x8f7   : > { %v3831_v53 = vadd.f32 %v3830_v41, %v15213_v16  ;;  %v3912_v41 = vadd.f32 %v3911_v10, %v3823_v29  ;;  %v8360_v29 = vld [vmem:[%s14775_s5 + $0x270] sm:$0xf]  ;;  %v3949_v16 = vmax.f32 %v12802_v3, 0.0 }
 0x8f8   : > { %v3919_v62 = vpop.f32.mrf.mxu2 }
 0x8f9   : > { %v3920_v42 = vadd.f32 %v3919_v62, %v3831_v53  ;;  %v3954_v15 = vmax.f32 %v3912_v41, 0.0  ;;  %v8384_v41 = vld [vmem:[%s14775_s5 + $0x2a0] sm:$0xf] }
 0x8fb   : > { %v3957_v22 = vmax.f32 %v3920_v42, 0.0  ;;  %v8376_v42 = vld [vmem:[%s14775_s5 + $0x290] sm:$0xf] }
 0x900   : > { %v3921_v2 = vpop.f32.mrf.mxu2 }
 0x901   : > { %v3922_v43 = vadd.f32 %v3921_v2, %v3833_v36  ;;  %v3956_v2 = vmax.f32 %v3917_v61, 0.0 }
 0x903   : > { %v3958_v4 = vmax.f32 %v3922_v43, 0.0 }
 0x905   : > { %v3975_v36 = vpack.c.bf16 %v3958_v4, %v3957_v22  ;;  %v9396_v22 = vld [vmem:[%s14775_s5 + $0x274] sm:$0xf0] }
 0x906   : > { %4396 = vmatmul.bf16.gmra.mxu3 %v8345_v30  ;;  %v8361_v4 = vor.u32 %v9396_v22, %v8360_v29 }
 0x908   : > { %v3924_v6 = vpop.f32.mrf.mxu2 }
 0x909   : > { %v3925_v31 = vadd.f32 %v3924_v6, %v3836_v24  ;;  %v15215_v6 = vld [vmem:[#allocation114_spill] sm:$0xff] }
 0x90a   : > { %v3826_v24 = vadd.f32 %v3825_v35, %v15215_v6  ;;  %v8314_v6 = vld [vmem:[%s14775_s5 + $0x218] sm:$0xf0] }
 0x90b   : > { %v3959_v58 = vmax.f32 %v3925_v31, 0.0 }
 0x90c   : > { %v3915_v26 = vadd.f32 %v3914_v18, %v3826_v24  ;;  %v15220_v18 = vld [vmem:[#allocation128_spill] sm:$0xff] }
 0x90e   : > { %v3955_v62 = vmax.f32 %v3915_v26, 0.0  ;;  %v3902_v26 = vadd.f32 %v12812_v40, %v3813_v34 }
 0x910   : > { %v3926_v63 = vpop.f32.mrf.mxu2  ;;  %v3974_v35 = vpack.c.bf16 %v3956_v2, %v3955_v62  ;;  %v9402_v2 = vld [vmem:[%s14775_s5 + $0x2a4] sm:$0xf0] }
 0x911   : > { %v3927_v30 = vadd.f32 %v3926_v63, %v3838_v50  ;;  %v15217_v50 = vld [vmem:[#allocation123_spill] sm:$0xff]  ;;  %v3803_v63 = vadd.f32 %v12766_v28, %v15220_v18  ;;  %v9398_v28 = vld [vmem:[%s14775_s5 + $0x284] sm:$0xf0]  ;;  %v9408_v18 = vld [vmem:[%s14775_s5 + $0x2d4] sm:$0xf0] }
 0x912   : > { %v3818_v27 = vadd.f32 %v12804_v1, %v15217_v50  ;;  %v15219_v1 = vld [vmem:[#allocation129_spill] sm:$0xff]  ;;  %v8369_v56 = vor.u32 %v9398_v28, %v8368_v46  ;;  %v8322_v50 = vld [vmem:[%s14775_s5 + $0x228] sm:$0xf0]  ;;  %v9393_v46 = vld [vmem:[%s14775_s5 + $0x264] sm:$0xf] }
 0x913   : > { %v3960_v5 = vmax.f32 %v3927_v30, 0.0  ;;  %v3808_v48 = vadd.f32 %v12773_v59, %v15219_v1  ;;  %v3892_v40 = vadd.f32 %v12782_v44, %v3803_v63  ;;  %v3947_v59 = vmax.f32 %v12788_v55, 0.0  ;;  %v9381_v44 = vld [vmem:[%s14775_s5 + $0x204] sm:$0xf]  ;;  %v8306_v55 = vld [vmem:[%s14775_s5 + $0x208] sm:$0xf0] }
 0x914   : > { %v3907_v31 = vadd.f32 %v3906_v13, %v3818_v27  ;;  %v8385_v27 = vor.u32 %v9402_v2, %v8384_v41  ;;  %v9391_v63 = vld [vmem:[%s14775_s5 + $0x254] sm:$0xf]  ;;  %v8354_v28 = vld [vmem:[%s14775_s5 + $0x268] sm:$0xf0]  ;;  %v8362_v2 = vld [vmem:[%s14775_s5 + $0x278] sm:$0xf0] }
 0x915   : > { %v3976_v8 = vpack.c.bf16 %v3960_v5, %v3959_v58  ;;  %v3897_v13 = vadd.f32 %v12798_v52, %v3808_v48  ;;  %v3946_v17 = vmax.f32 %v3892_v40, 0.0  ;;  %v3945_v52 = vmax.f32 %v12780_v0, 0.0  ;;  %v9400_v58 = vld [vmem:[%s14775_s5 + $0x294] sm:$0xf0]  ;;  %v9383_v5 = vld [vmem:[%s14775_s5 + $0x214] sm:$0xf] }
 0x916   : > { %4401 = vmatmul.bf16.gmra.mxu3 %v8353_v49  ;;  %v3953_v49 = vmax.f32 %v12824_v60, 0.0  ;;  %v3952_v21 = vmax.f32 %v3907_v31, 0.0  ;;  %v3950_v60 = vmax.f32 %v3902_v26, 0.0  ;;  %v8309_v0 = vor.u32 %v9381_v44, %v8306_v55  ;;  %v8392_v31 = vld [vmem:[%s14775_s5 + $0x2b0] sm:$0xf] }
 0x917   : > { %4452 = vmatpush.bf16.msrb.mxu0 %v3976_v8  ;;  %v3948_v53 = vmax.f32 %v3897_v13, 0.0  ;;  %v3969_v3 = vpack.c.bf16 %v3946_v17, %v3945_v52  ;;  %v8377_v24 = vor.u32 %v9400_v58, %v8376_v42  ;;  %v8317_v61 = vor.u32 %v9383_v5, %v8314_v6  ;;  %v8400_v26 = vld [vmem:[%s14775_s5 + $0x2c0] sm:$0xf]  ;;  %v9410_v52 = vld [vmem:[%s14775_s5 + $0x2e4] sm:$0xf0]  ;;  %v12975_v42 = vpop.permute.xlu2 %4085 }
 0x918   : > { %v3973_v8 = vpack.c.bf16 %v3954_v15, %v3953_v49  ;;  %v3972_v10 = vpack.c.bf16 %v3952_v21, %v3951_v7  ;;  %v3971_v43 = vpack.c.bf16 %v3950_v60, %v3949_v16  ;;  %v9404_v15 = vld [vmem:[%s14775_s5 + $0x2b4] sm:$0xf0]  ;;  %v9406_v21 = vld [vmem:[%s14775_s5 + $0x2c4] sm:$0xf0]  ;;  %v8408_v60 = vld [vmem:[%s14775_s5 + $0x2d0] sm:$0xf] }
 0x919   : > { %v3970_v30 = vpack.c.bf16 %v3948_v53, %v3947_v59  ;;  %v8393_v49 = vor.u32 %v9404_v15, %v8392_v31  ;;  %v8401_v1 = vor.u32 %v9406_v21, %v8400_v26  ;;  %v8346_v16 = vld [vmem:[%s14775_s5 + $0x258] sm:$0xf0]  ;;  %v8409_v40 = vor.u32 %v9408_v18, %v8408_v60  ;;  %v9395_v41 = vld [vmem:[%s14775_s5 + $0x274] sm:$0xf] }
 0x91a   : > { %v8349_v53 = vor.u32 %v9391_v63, %v8346_v16 }
 0x91b   : > { %4453 = vmatpush.bf16.msrb.mxu0 %v3975_v36  ;;  %v9385_v36 = vld [vmem:[%s14775_s5 + $0x224] sm:$0xf] }
 0x91c   : > { %v8325_v62 = vor.u32 %v9385_v36, %v8322_v50  ;;  %v8365_v50 = vor.u32 %v9395_v41, %v8362_v2  ;;  %v9401_v41 = vld [vmem:[%s14775_s5 + $0x2a4] sm:$0xf] }
 0x91f   : > { %4454 = vmatpush.bf16.msrb.mxu0 %v3974_v35  ;;  %v9387_v35 = vld [vmem:[%s14775_s5 + $0x234] sm:$0xf] }
 0x920   : > { %v8333_v29 = vor.u32 %v9387_v35, %v8330_v19 }
 0x923   : > { %4455 = vmatpush.bf16.msrb.mxu0 %v3973_v8  ;;  %v9389_v8 = vld [vmem:[%s14775_s5 + $0x244] sm:$0xf] }
 0x926   : > { %4406 = vmatmul.bf16.gmra.mxu3 %v8361_v4  ;;  %v8338_v4 = vld [vmem:[%s14775_s5 + $0x248] sm:$0xf0] }
 0x927   : > { %4456 = vmatpush.bf16.msrb.mxu0 %v3972_v10  ;;  %v8341_v48 = vor.u32 %v9389_v8, %v8338_v4  ;;  %v12944_v10 = vpop.permute.xlu0 %4090 }
 0x92b   : > { %4457 = vmatpush.bf16.msrb.mxu0 %v3971_v43  ;;  %v12955_v43 = vpop.permute.xlu1 %4155 }
 0x92f   : > { %4458 = vmatpush.bf16.msrb.mxu0 %v3970_v30  ;;  %v12957_v17 = vpop.permute.xlu0 %4075  ;;  %v8416_v30 = vld [vmem:[%s14775_s5 + $0x2e0] sm:$0xf] }
 0x933   : > { %4459 = vmatpush.bf16.msrb.mxu0 %v3969_v3  ;;  %v12971_v44 = vpop.permute.xlu1 %4080  ;;  %v8417_v3 = vor.u32 %v9410_v52, %v8416_v30 }
 0x936   : > { %4411 = vmatmul.bf16.gmra.mxu3 %v8369_v56  ;;  %4460 = vmatmul.bf16.vlgmr.msrb.gmra.mxu0 %v8309_v0  ;;  %v8357_v56 = vor.u32 %v9393_v46, %v8354_v28 }
 0x937   : > { %v12973_v0 = vpop.permute.xlu0 %4150 }
 0x938   : > { %15221 = vst [vmem:[#allocation52_spill] sm:$0xff] %v12973_v0 }
 0x939   : > { %v4372_v34 = vpop.f32.mrf.mxu3 }
 0x93b   : > { %v4066_v58 = vpop.permute.xlu1 %4065 }
 0x93f   : > { %v12977_v6 = vpop.permute.xlu0 %4135 }
 0x941   : > { %v4374_v22 = vpop.f32.mrf.mxu3 }
 0x946   : > { %4416 = vmatmul.bf16.gmra.mxu3 %v8377_v24  ;;  %4465 = vmatmul.bf16.gmra.mxu0 %v8317_v61  ;;  %v8424_v24 = vld [vmem:[%s14775_s5 + $0x2f0] sm:$0xf]  ;;  %v9412_v61 = vld [vmem:[%s14775_s5 + $0x2f4] sm:$0xf0] }
 0x947   : > { %v8425_v36 = vor.u32 %v9412_v61, %v8424_v24  ;;  %v4061_v15 = vpop.permute.xlu0 %4060 }
 0x949   : > { %v4377_v7 = vpop.f32.mrf.mxu3 }
 0x94f   : > { %v4046_v26 = vpop.permute.xlu0 %4045 }
 0x950   : > { %v4373_v21 = vadd.f32 %v4372_v34, %v4046_v26 }
 0x951   : > { %v12939_v13 = vpop.f32.mrf.mxu3 }
 0x956   : > { %4421 = vmatmul.bf16.gmra.mxu3 %v8385_v27  ;;  %4470 = vmatmul.bf16.gmra.mxu0 %v8325_v62  ;;  %v12991_v27 = vpop.permute.xlu2 %4160  ;;  %v12993_v62 = vpop.permute.xlu1 %4140 }
 0x957   : > { %15222 = vst [vmem:[#allocation31_spill] sm:$0xff] %v12991_v27 }
 0x958   : > { %15223 = vst [vmem:[#allocation33_spill] sm:$0xff] %v12993_v62 }
 0x959   : > { %v4382_v59 = vpop.f32.mrf.mxu3 }
 0x95a   : > { %v4383_v2 = vadd.f32 %v4382_v59, %v4066_v58 }
 0x95e   : > { %v12995_v35 = vpop.permute.xlu2 %4145  ;;  %v12997_v19 = vpop.permute.xlu1 %4125 }
 0x961   : > { %v4384_v55 = vpop.f32.mrf.mxu3 }
 0x966   : > { %4426 = vmatmul.bf16.gmra.mxu3 %v8393_v49  ;;  %4475 = vmatmul.bf16.gmra.mxu0 %v8333_v29  ;;  %v9397_v49 = vld [vmem:[%s14775_s5 + $0x284] sm:$0xf]  ;;  %v8370_v29 = vld [vmem:[%s14775_s5 + $0x288] sm:$0xf0]  ;;  %v4051_v60 = vpop.permute.xlu1 %4050 }
 0x967   : > { %v8373_v8 = vor.u32 %v9397_v49, %v8370_v29  ;;  %v4375_v18 = vadd.f32 %v4374_v22, %v4051_v60  ;;  %v4380_v22 = vadd.f32 %v12939_v13, %v4061_v15 }
 0x969   : > { %v4387_v5 = vpop.f32.mrf.mxu3 }
 0x96a   : > { %v4388_v59 = vadd.f32 %v4387_v5, %v12957_v17 }
 0x971   : > { %v4389_v31 = vpop.f32.mrf.mxu3 }
 0x976   : > { %4431 = vmatmul.bf16.gmra.mxu3 %v8401_v1  ;;  %4480 = vmatmul.bf16.gmra.mxu0 %v8341_v48  ;;  %v4071_v48 = vpop.permute.xlu2 %4070 }
 0x977   : > { %v4385_v13 = vadd.f32 %v4384_v55, %v4071_v48  ;;  %v4390_v48 = vadd.f32 %v4389_v31, %v12971_v44  ;;  %v9407_v31 = vld [vmem:[%s14775_s5 + $0x2d4] sm:$0xf] }
 0x979   : > { %v4392_v30 = vpop.f32.mrf.mxu3 }
 0x97a   : > { %v4393_v17 = vadd.f32 %v4392_v30, %v12975_v42  ;;  %v9409_v30 = vld [vmem:[%s14775_s5 + $0x2e4] sm:$0xf] }
 0x97e   : > { %v4056_v34 = vpop.permute.xlu2 %4055 }
 0x97f   : > { %v4378_v52 = vadd.f32 %v4377_v7, %v4056_v34  ;;  %v8386_v7 = vld [vmem:[%s14775_s5 + $0x2a8] sm:$0xf0] }
 0x980   : > { %v8402_v34 = vld [vmem:[%s14775_s5 + $0x2c8] sm:$0xf0] }
 0x986   : > { %4436 = vmatmul.bf16.gmra.mxu3 %v8409_v40  ;;  %4485 = vmatmul.bf16.gmra.mxu0 %v8349_v53  ;;  %v9399_v40 = vld [vmem:[%s14775_s5 + $0x294] sm:$0xf]  ;;  %v8378_v53 = vld [vmem:[%s14775_s5 + $0x298] sm:$0xf0] }
 0x987   : > { %v8381_v46 = vor.u32 %v9399_v40, %v8378_v53  ;;  %v9405_v53 = vld [vmem:[%s14775_s5 + $0x2c4] sm:$0xf] }
 0x988   : > { %v8405_v5 = vor.u32 %v9405_v53, %v8402_v34  ;;  %v15225_v53 = vld [vmem:[#allocation131_spill] sm:$0xff] }
 0x996   : > { %4441 = vmatmul.bf16.gmra.mxu3 %v8417_v3  ;;  %4490 = vmatmul.bf16.gmra.mxu0 %v8357_v56  ;;  %v13018_v56 = vpop.f32.mrf.mxu3 }
 0x99e   : > { %v4397_v29 = vpop.f32.mrf.mxu3 }
 0x9a6   : > { %4446 = vmatmul.bf16.gmra.mxu3 %v8425_v36  ;;  %4495 = vmatmul.bf16.gmra.mxu0 %v8365_v50  ;;  %v8389_v36 = vor.u32 %v9401_v41, %v8386_v7 }
 0x9b3   : > { %v4461_v4 = vpop.f32.mrf.mxu0 }
 0x9b4   : > { %v13005_v1 = vadd.f32 %v4461_v4, %v4373_v21  ;;  %v4399_v21 = vpop.f32.mrf.mxu3  ;;  %v8394_v4 = vld [vmem:[%s14775_s5 + $0x2b8] sm:$0xf0] }
 0x9b6   : > { %4500 = vmatmul.bf16.gmra.mxu0 %v8373_v8  ;;  %v9403_v8 = vld [vmem:[%s14775_s5 + $0x2b4] sm:$0xf] }
 0x9b7   : > { %v8397_v58 = vor.u32 %v9403_v8, %v8394_v4 }
 0x9bb   : > { %v4463_v63 = vpop.f32.mrf.mxu0 }
 0x9bc   : > { %v13007_v16 = vadd.f32 %v4463_v63, %v4375_v18  ;;  %v4402_v55 = vpop.f32.mrf.mxu3 }
 0x9c3   : > { %v4466_v28 = vpop.f32.mrf.mxu0 }
 0x9c4   : > { %v13015_v3 = vadd.f32 %v4466_v28, %v4378_v52  ;;  %v4404_v52 = vpop.f32.mrf.mxu3 }
 0x9c6   : > { %4505 = vmatmul.bf16.gmra.mxu0 %v8381_v46 }
 0x9cb   : > { %v4468_v24 = vpop.f32.mrf.mxu0 }
 0x9cc   : > { %v13020_v61 = vadd.f32 %v4468_v24, %v4380_v22  ;;  %v4407_v44 = vpop.f32.mrf.mxu3  ;;  %v8410_v24 = vld [vmem:[%s14775_s5 + $0x2d8] sm:$0xf0] }
 0x9cd   : > { %v8413_v41 = vor.u32 %v9407_v31, %v8410_v24  ;;  %v4408_v34 = vadd.f32 %v4407_v44, %v15225_v53  ;;  %v15227_v31 = vld [vmem:[#allocation138_spill] sm:$0xff] }
 0x9ce   : > { %v4403_v24 = vadd.f32 %v4402_v55, %v15227_v31  ;;  %v4395_v55 = vadd.f32 %v13018_v56, %v12944_v10 }
 0x9d3   : > { %v4471_v50 = vpop.f32.mrf.mxu0 }
 0x9d4   : > { %v13028_v49 = vadd.f32 %v4471_v50, %v4383_v2  ;;  %v4409_v2 = vpop.f32.mrf.mxu3 }
 0x9d6   : > { %4510 = vmatmul.bf16.gmra.mxu0 %v8389_v36  ;;  %v8418_v36 = vld [vmem:[%s14775_s5 + $0x2e8] sm:$0xf0] }
 0x9db   : > { %v4473_v15 = vpop.f32.mrf.mxu0 }
 0x9dc   : > { %v13030_v26 = vadd.f32 %v4473_v15, %v4385_v13  ;;  %v4412_v50 = vpop.f32.mrf.mxu3  ;;  %v8421_v13 = vor.u32 %v9409_v30, %v8418_v36 }
 0x9e3   : > { %v4476_v60 = vpop.f32.mrf.mxu0 }
 0x9e4   : > { %v13039_v18 = vadd.f32 %v4476_v60, %v4388_v59  ;;  %v13063_v8 = vpop.f32.mrf.mxu3  ;;  %v9411_v59 = vld [vmem:[%s14775_s5 + $0x2f4] sm:$0xf] }
 0x9e5   : > { %15224 = vst [vmem:[#allocation32_spill] sm:$0xff] %v13063_v8  ;;  %v15229_v8 = vld [vmem:[#allocation139_spill] sm:$0xff] }
 0x9e6   : > { %4515 = vmatmul.bf16.gmra.mxu0 %v8397_v58  ;;  %v8426_v58 = vld [vmem:[%s14775_s5 + $0x2f8] sm:$0xf0]  ;;  %v4400_v62 = vadd.f32 %v4399_v21, %v15229_v8 }
 0x9e7   : > { %v8429_v60 = vor.u32 %v9411_v59, %v8426_v58  ;;  %v15230_v58 = vld [vmem:[#allocation12_spill] sm:$0xff] }
 0x9e8   : > { %v4398_v14 = vadd.f32 %v4397_v29, %v15230_v58 }
 0x9eb   : > { %v4478_v63 = vpop.f32.mrf.mxu0 }
 0x9ec   : > { %v13042_v40 = vadd.f32 %v4478_v63, %v4390_v48  ;;  %v4417_v63 = vpop.f32.mrf.mxu3 }
 0x9f3   : > { %v4481_v46 = vpop.f32.mrf.mxu0 }
 0x9f4   : > { %v4482_v28 = vadd.f32 %v4481_v46, %v4393_v17  ;;  %v15226_v17 = vld [vmem:[#allocation137_spill] sm:$0xff] }
 0x9f6   : > { %4520 = vmatmul.bf16.gmra.mxu0 %v8405_v5  ;;  %v4405_v5 = vadd.f32 %v4404_v52, %v15226_v17 }
 0x9fb   : > { %v4483_v22 = vpop.f32.mrf.mxu0 }
 0xa03   : > { %v4486_v7 = vpop.f32.mrf.mxu0 }
 0xa04   : > { %v4487_v21 = vadd.f32 %v4486_v7, %v4398_v14 }
 0xa06   : > { %4525 = vmatmul.bf16.gmra.mxu0 %v8413_v41  ;;  %v15228_v41 = vld [vmem:[#allocation135_spill] sm:$0xff]  ;;  %v13101_v56 = vadd.f32 %v4487_v21, %v12389_v32  ;;  %v13116_v32 = vadd.f32 %v13042_v40, %v12404_v12  ;;  %v13133_v40 = vadd.f32 %v13028_v49, %v12421_v23 }
 0xa07   : > { %v4410_v30 = vadd.f32 %v4409_v2, %v15228_v41  ;;  %v13088_v2 = vpop.f32.mrf.mxu3 }
 0xa08   : > { %v4583_v7 = vmax.f32 %v13101_v56, 0.0  ;;  %v4577_v23 = vmax.f32 %v13133_v40, 0.0 }
 0xa0b   : > { %v4488_v42 = vpop.f32.mrf.mxu0 }
 0xa0c   : > { %v4489_v44 = vadd.f32 %v4488_v42, %v4400_v62  ;;  %v4413_v62 = vadd.f32 %v4412_v50, %v12997_v19 }
 0xa0e   : > { %v13097_v42 = vadd.f32 %v4489_v44, %v12385_v45  ;;  %v13111_v45 = vadd.f32 %v4482_v28, %v12399_v47  ;;  %v13128_v28 = vadd.f32 %v13030_v26, %v12416_v37 }
 0xa0f   : > { %v4422_v50 = vpop.f32.mrf.mxu3 }
 0xa10   : > { %v4584_v19 = vmax.f32 %v13097_v42, 0.0  ;;  %v4581_v47 = vmax.f32 %v13111_v45, 0.0 }
 0xa13   : > { %v4491_v15 = vpop.f32.mrf.mxu0 }
 0xa14   : > { %v4492_v0 = vadd.f32 %v4491_v15, %v4403_v24  ;;  %v15232_v24 = vld [vmem:[#allocation41_spill] sm:$0xff] }
 0xa15   : > { %v13146_v41 = vadd.f32 %v13015_v3, %v15232_v24  ;;  %v8520_v24 = vld [vmem:[%s14773_s3 + $0x330] sm:$0xf] }
 0xa16   : > { %4530 = vmatmul.bf16.gmra.mxu0 %v8421_v13  ;;  %v13091_v15 = vadd.f32 %v4492_v0, %v12379_v33 }
 0xa17   : > { %v13142_v26 = vpop.f32.mrf.mxu3  ;;  %15233 = vst [vmem:[#allocation35_spill] sm:$0xff] %v13146_v41 }
 0xa18   : > { %v4585_v33 = vmax.f32 %v13091_v15, 0.0 }
 0xa1b   : > { %v4493_v4 = vpop.f32.mrf.mxu0 }
 0xa1c   : > { %v4494_v36 = vadd.f32 %v4493_v4, %v4405_v5 }
 0xa1f   : > { %v4427_v21 = vpop.f32.mrf.mxu3 }
 0xa23   : > { %v4496_v48 = vpop.f32.mrf.mxu0 }
 0xa24   : > { %v4497_v46 = vadd.f32 %v4496_v48, %v4408_v34  ;;  %v4610_v48 = vpack.c.bf16 %v4584_v19, %v4583_v7  ;;  %v4580_v34 = vmax.f32 %v13116_v32, 0.0  ;;  %v9416_v19 = vld [vmem:[%s14773_s3 + $0x314] sm:$0xf0] }
 0xa26   : > { %4535 = vmatmul.bf16.gmra.mxu0 %v8429_v60  ;;  %v13077_v27 = vadd.f32 %v4497_v46, %v12365_v51  ;;  %v13081_v60 = vadd.f32 %v4494_v36, %v12369_v39  ;;  %v4484_v39 = vadd.f32 %v4483_v22, %v4395_v55  ;;  %v4578_v46 = vmax.f32 %v13128_v28, 0.0  ;;  %v15236_v36 = vld [vmem:[#allocation18_spill] sm:$0xff] }
 0xa28   : > { %v4587_v51 = vmax.f32 %v13077_v27, 0.0  ;;  %v13107_v0 = vadd.f32 %v4484_v39, %v12395_v9  ;;  %v13123_v9 = vadd.f32 %v13039_v18, %v12411_v11  ;;  %v4418_v11 = vadd.f32 %v4417_v63, %v12977_v6  ;;  %v15231_v18 = vld [vmem:[#allocation15_spill] sm:$0xff]  ;;  %v15234_v6 = vld [vmem:[#allocation17_spill] sm:$0xff] }
 0xa29   : > { %v13139_v5 = vadd.f32 %v13020_v61, %v15231_v18  ;;  %v13153_v63 = vadd.f32 %v13007_v16, %v15234_v6  ;;  %v8496_v16 = vld [vmem:[%s14773_s3 + $0x300] sm:$0xf] }
 0xa2a   : > { %v4582_v4 = vmax.f32 %v13107_v0, 0.0  ;;  %v4579_v17 = vmax.f32 %v13123_v9, 0.0 }
 0xa2b   : > { %v4498_v13 = vpop.f32.mrf.mxu0  ;;  %15235 = vst [vmem:[#allocation34_spill] sm:$0xff] %v13153_v63  ;;  %v4576_v61 = vmax.f32 %v13139_v5, 0.0  ;;  %v4574_v3 = vmax.f32 %v13153_v63, 0.0 }
 0xa2c   : > { %v4499_v59 = vadd.f32 %v4498_v13, %v4410_v30  ;;  %v4609_v12 = vpack.c.bf16 %v4582_v4, %v4581_v47  ;;  %v4608_v37 = vpack.c.bf16 %v4580_v34, %v4579_v17  ;;  %v4607_v30 = vpack.c.bf16 %v4578_v46, %v4577_v23  ;;  %v8512_v34 = vld [vmem:[%s14773_s3 + $0x320] sm:$0xf]  ;;  %v9420_v23 = vld [vmem:[%s14773_s3 + $0x334] sm:$0xf0] }
 0xa2d   : > { %v13158_v13 = vadd.f32 %v13005_v1, %v15236_v36  ;;  %v9414_v1 = vld [vmem:[%s14773_s3 + $0x304] sm:$0xf0] }
 0xa2e   : > { %v13084_v52 = vadd.f32 %v4499_v59, %v12372_v57  ;;  %v4586_v57 = vmax.f32 %v13081_v60, 0.0  ;;  %v4575_v59 = vmax.f32 %v13146_v41, 0.0 }
 0xa2f   : > { %15237 = vst [vmem:[#allocation68_spill] sm:$0xff] %v13158_v13  ;;  %v4573_v55 = vmax.f32 %v13158_v13, 0.0 }
 0xa30   : > { %v4588_v29 = vmax.f32 %v13084_v52, 0.0  ;;  %v4611_v22 = vpack.c.bf16 %v4586_v57, %v4585_v33  ;;  %v4606_v58 = vpack.c.bf16 %v4576_v61, %v4575_v59  ;;  %v8504_v33 = vld [vmem:[%s14773_s3 + $0x310] sm:$0xf]  ;;  %v8521_v61 = vor.u32 %v9420_v23, %v8520_v24  ;;  %v15243_v23 = vld [vmem:[#allocation140_spill] sm:$0xff] }
 0xa32   : > { %v4612_v8 = vpack.c.bf16 %v4588_v29, %v4587_v51  ;;  %v4605_v51 = vpack.c.bf16 %v4574_v3, %v4573_v55  ;;  %v8497_v29 = vor.u32 %v9414_v1, %v8496_v16  ;;  %v8528_v3 = vld [vmem:[%s14773_s3 + $0x340] sm:$0xf] }
 0xa33   : > { %v4501_v10 = vpop.f32.mrf.mxu0 }
 0xa34   : > { %v13104_v14 = vadd.f32 %v4501_v10, %v4413_v62  ;;  %5007 = vmatpush.bf16.msra.mxu1 %v4612_v8  ;;  %v4423_v62 = vadd.f32 %v4422_v50, %v12995_v35  ;;  %v13174_v8 = vpop.f32.mrf.mxu3  ;;  %v4428_v35 = vadd.f32 %v4427_v21, %v12955_v43 }
 0xa38   : > { %5008 = vmatpush.bf16.msra.mxu1 %v4611_v22  ;;  %v8505_v22 = vor.u32 %v9416_v19, %v8504_v33  ;;  %v15239_v19 = vld [vmem:[#allocation132_spill] sm:$0xff] }
 0xa3b   : > { %v13119_v53 = vpop.f32.mrf.mxu0 }
 0xa3c   : > { %5009 = vmatpush.bf16.msra.mxu1 %v4610_v48  ;;  %v4432_v7 = vpop.f32.mrf.mxu3 }
 0xa40   : > { %5010 = vmatpush.bf16.msra.mxu1 %v4609_v12  ;;  %v9418_v12 = vld [vmem:[%s14773_s3 + $0x324] sm:$0xf0] }
 0xa41   : > { %v8513_v17 = vor.u32 %v9418_v12, %v8512_v34  ;;  %v15241_v12 = vld [vmem:[#allocation133_spill] sm:$0xff] }
 0xa43   : > { %v4506_v31 = vpop.f32.mrf.mxu0 }
 0xa44   : > { %v13149_v49 = vadd.f32 %v4506_v31, %v4418_v11  ;;  %5011 = vmatpush.bf16.msra.mxu1 %v4608_v37  ;;  %v4434_v48 = vpop.f32.mrf.mxu3  ;;  %v15238_v11 = vld [vmem:[#allocation19_spill] sm:$0xff] }
 0xa45   : > { %v4433_v18 = vadd.f32 %v4432_v7, %v15238_v11  ;;  %v15242_v11 = vld [vmem:[#allocation130_spill] sm:$0xff] }
 0xa48   : > { %5012 = vmatpush.bf16.msra.mxu1 %v4607_v30 }
 0xa4b   : > { %v13162_v44 = vpop.f32.mrf.mxu0 }
 0xa4c   : > { %5013 = vmatpush.bf16.msra.mxu1 %v4606_v58  ;;  %v4437_v37 = vpop.f32.mrf.mxu3  ;;  %v9422_v58 = vld [vmem:[%s14773_s3 + $0x344] sm:$0xf0] }
 0xa4d   : > { %v8529_v55 = vor.u32 %v9422_v58, %v8528_v3 }
 0xa50   : > { %5014 = vmatpush.bf16.msra.mxu1 %v4605_v51  ;;  %v8536_v51 = vld [vmem:[%s14773_s3 + $0x350] sm:$0xf] }
 0xa53   : > { %v4511_v39 = vpop.f32.mrf.mxu0  ;;  %5015 = vmatmul.bf16.vlgmr.msra.gmra.mxu1 %v8497_v29  ;;  %v9424_v29 = vld [vmem:[%s14773_s3 + $0x354] sm:$0xf0] }
 0xa54   : > { %v13172_v57 = vadd.f32 %v4511_v39, %v4423_v62  ;;  %v4439_v6 = vpop.f32.mrf.mxu3  ;;  %v8537_v39 = vor.u32 %v9424_v29, %v8536_v51  ;;  %v8544_v51 = vld [vmem:[%s14773_s3 + $0x360] sm:$0xf] }
 0xa5b   : > { %v13176_v10 = vpop.f32.mrf.mxu0 }
 0xa5c   : > { %v4442_v36 = vpop.f32.mrf.mxu3 }
 0xa63   : > { %v4516_v50 = vpop.f32.mrf.mxu0  ;;  %5020 = vmatmul.bf16.gmra.mxu1 %v8505_v22 }
 0xa64   : > { %v13185_v4 = vadd.f32 %v4516_v50, %v4428_v35  ;;  %v4444_v16 = vpop.f32.mrf.mxu3  ;;  %v15240_v35 = vld [vmem:[#allocation134_spill] sm:$0xff] }
 0xa65   : > { %v4445_v50 = vadd.f32 %v4444_v16, %v15240_v35  ;;  %v9426_v16 = vld [vmem:[%s14773_s3 + $0x364] sm:$0xf0] }
 0xa6b   : > { %v13187_v47 = vpop.f32.mrf.mxu0 }
 0xa6c   : > { %v4447_v62 = vpop.f32.mrf.mxu3 }
 0xa6d   : > { %v4448_v22 = vadd.f32 %v4447_v62, %v15239_v19 }
 0xa73   : > { %v4521_v46 = vpop.f32.mrf.mxu0  ;;  %5025 = vmatmul.bf16.gmra.mxu1 %v8513_v17  ;;  %v4443_v17 = vadd.f32 %v4442_v36, %v15241_v12  ;;  %v15245_v36 = vld [vmem:[#allocation44_spill] sm:$0xff] }
 0xa74   : > { %v4522_v43 = vadd.f32 %v4521_v46, %v4433_v18  ;;  %v4449_v7 = vpop.f32.mrf.mxu3  ;;  %v4438_v29 = vadd.f32 %v4437_v37, %v15245_v36  ;;  %v15250_v37 = vld [vmem:[#allocation43_spill] sm:$0xff]  ;;  %v15262_v36 = vld [vmem:[#allocation33_spill] sm:$0xff] }
 0xa75   : > { %v4450_v18 = vadd.f32 %v4449_v7, %v15242_v11 }
 0xa7b   : > { %v4523_v31 = vpop.f32.mrf.mxu0 }
 0xa83   : > { %v4526_v30 = vpop.f32.mrf.mxu0  ;;  %5030 = vmatmul.bf16.gmra.mxu1 %v8521_v61  ;;  %v4440_v61 = vadd.f32 %v4439_v6, %v15243_v23  ;;  %v15258_v23 = vld [vmem:[#allocation46_spill] sm:$0xff] }
 0xa8b   : > { %v4528_v59 = vpop.f32.mrf.mxu0 }
 0xa8c   : > { %v4529_v62 = vadd.f32 %v4528_v59, %v4440_v61  ;;  %v13259_v61 = vadd.f32 %v4522_v43, %v15258_v23  ;;  %v15276_v23 = vld [vmem:[#allocation30_spill] sm:$0xff] }
 0xa8e   : > { %v13242_v59 = vadd.f32 %v4529_v62, %v15250_v37  ;;  %15259 = vst [vmem:[#allocation54_spill] sm:$0xff] %v13259_v61  ;;  %v15263_v62 = vld [vmem:[#allocation26_spill] sm:$0xff]  ;;  %v4597_v43 = vmax.f32 %v13259_v61, 0.0 }
 0xa90   : > { %15251 = vst [vmem:[#allocation55_spill] sm:$0xff] %v13242_v59  ;;  %v4600_v11 = vmax.f32 %v13242_v59, 0.0 }
 0xa93   : > { %v4531_v1 = vpop.f32.mrf.mxu0  ;;  %5035 = vmatmul.bf16.gmra.mxu1 %v8529_v55 }
 0xa94   : > { %v4532_v3 = vadd.f32 %v4531_v1, %v4443_v17  ;;  %v15255_v17 = vld [vmem:[#allocation22_spill] sm:$0xff] }
 0xa96   : > { %v13237_v19 = vadd.f32 %v4532_v3, %v12525_v54 }
 0xa98   : > { %15249 = vst [vmem:[#allocation60_spill] sm:$0xff] %v13237_v19  ;;  %v4601_v54 = vmax.f32 %v13237_v19, 0.0 }
 0xa9b   : > { %v4533_v21 = vpop.f32.mrf.mxu0 }
 0xa9c   : > { %v4534_v46 = vadd.f32 %v4533_v21, %v4445_v50 }
 0xa9e   : > { %v13230_v21 = vadd.f32 %v4534_v46, %v12518_v25  ;;  %v15257_v46 = vld [vmem:[#allocation52_spill] sm:$0xff] }
 0xaa0   : > { %15246 = vst [vmem:[#allocation67_spill] sm:$0xff] %v13230_v21  ;;  %v4602_v25 = vmax.f32 %v13230_v21, 0.0 }
 0xaa3   : > { %v4536_v33 = vpop.f32.mrf.mxu0  ;;  %5040 = vmatmul.bf16.gmra.mxu1 %v8537_v39  ;;  %v8545_v39 = vor.u32 %v9426_v16, %v8544_v51 }
 0xaa4   : > { %v4537_v34 = vadd.f32 %v4536_v33, %v4448_v22  ;;  %v4527_v33 = vadd.f32 %v4526_v30, %v4438_v29  ;;  %v4420_v29 = vadd.f32 %v13088_v2, %v15262_v36  ;;  %v9430_v36 = vld [vmem:[%s14773_s3 + $0x384] sm:$0xf0] }
 0xaa6   : > { %v13220_v58 = vadd.f32 %v4537_v34, %v12508_v20  ;;  %v15248_v20 = vld [vmem:[#allocation141_spill] sm:$0xff]  ;;  %v15253_v34 = vld [vmem:[#allocation20_spill] sm:$0xff] }
 0xaa7   : > { %v4435_v1 = vadd.f32 %v4434_v48, %v15248_v20  ;;  %v13248_v30 = vadd.f32 %v4527_v33, %v15253_v34  ;;  %v9428_v20 = vld [vmem:[%s14773_s3 + $0x374] sm:$0xf0] }
 0xaa8   : > { %15244 = vst [vmem:[#allocation69_spill] sm:$0xff] %v13220_v58  ;;  %v4603_v22 = vmax.f32 %v13220_v58, 0.0 }
 0xaa9   : > { %v4524_v35 = vadd.f32 %v4523_v31, %v4435_v1  ;;  %15254 = vst [vmem:[#allocation58_spill] sm:$0xff] %v13248_v30  ;;  %v4509_v1 = vadd.f32 %v13162_v44, %v4420_v29  ;;  %v15270_v44 = vld [vmem:[#allocation29_spill] sm:$0xff]  ;;  %v8498_v29 = vld [vmem:[%s14773_s3 + $0x308] sm:$0xf0] }
 0xaab   : > { %v4538_v24 = vpop.f32.mrf.mxu0  ;;  %v13253_v31 = vadd.f32 %v4524_v35, %v15255_v17  ;;  %v15267_v35 = vld [vmem:[#allocation32_spill] sm:$0xff]  ;;  %v13293_v34 = vadd.f32 %v4509_v1, %v15270_v44  ;;  %v15272_v17 = vld [vmem:[#allocation50_spill] sm:$0xff]  ;;  %v8584_v44 = vld [vmem:[%s14773_s3 + $0x3b0] sm:$0xf] }
 0xaac   : > { %v4539_v55 = vadd.f32 %v4538_v24, %v4450_v18  ;;  %v4619_v18 = vpack.c.bf16 %v4602_v25, %v4601_v54  ;;  %v4425_v24 = vadd.f32 %v13142_v26, %v15257_v46  ;;  %v13271_v26 = vadd.f32 %v13185_v4, %v15263_v62  ;;  %v15268_v25 = vld [vmem:[#allocation27_spill] sm:$0xff]  ;;  %v9432_v1 = vld [vmem:[%s14773_s3 + $0x394] sm:$0xf0] }
 0xaad   : > { %15256 = vst [vmem:[#allocation53_spill] sm:$0xff] %v13253_v31 }
 0xaae   : > { %v13233_v6 = vadd.f32 %v4539_v55, %v12521_v38  ;;  %v15252_v38 = vld [vmem:[#allocation31_spill] sm:$0xff]  ;;  %v4514_v3 = vadd.f32 %v13176_v10, %v4425_v24  ;;  %15264 = vst [vmem:[#allocation56_spill] sm:$0xff] %v13271_v26  ;;  %v8552_v10 = vld [vmem:[%s14773_s3 + $0x370] sm:$0xf]  ;;  %v4592_v24 = vmax.f32 %v13293_v34, 0.0 }
 0xaaf   : > { %v4430_v48 = vadd.f32 %v13174_v8, %v15252_v38  ;;  %v4599_v8 = vmax.f32 %v13248_v30, 0.0  ;;  %v15260_v55 = vld [vmem:[#allocation23_spill] sm:$0xff]  ;;  %v4595_v38 = vmax.f32 %v13271_v26, 0.0  ;;  %15271 = vst [vmem:[#allocation63_spill] sm:$0xff] %v13293_v34  ;;  %v9431_v26 = vld [vmem:[%s14773_s3 + $0x394] sm:$0xf] }
 0xab0   : > { %15247 = vst [vmem:[#allocation65_spill] sm:$0xff] %v13233_v6  ;;  %v4604_v7 = vmax.f32 %v13233_v6, 0.0  ;;  %v9433_v6 = vld [vmem:[%s14773_s3 + $0x3a4] sm:$0xf] }
 0xab1   : > { %v4519_v12 = vadd.f32 %v13187_v47, %v4430_v48  ;;  %v4598_v47 = vmax.f32 %v13253_v31, 0.0  ;;  %v4618_v16 = vpack.c.bf16 %v4600_v11, %v4599_v8  ;;  %v13298_v11 = vadd.f32 %v13149_v49, %v15272_v17  ;;  %v8522_v17 = vld [vmem:[%s14773_s3 + $0x338] sm:$0xf0] }
 0xab2   : > { %v4620_v50 = vpack.c.bf16 %v4604_v7, %v4603_v22  ;;  %v4131_v22 = vpop.permute.xlu2 %4130  ;;  %v8553_v7 = vor.u32 %v9428_v20, %v8552_v10  ;;  %v13307_v8 = vadd.f32 %v13104_v14, %v15276_v23  ;;  %v9413_v14 = vld [vmem:[%s14773_s3 + $0x304] sm:$0xf]  ;;  %v8568_v20 = vld [vmem:[%s14773_s3 + $0x390] sm:$0xf] }
 0xab3   : > { %5045 = vmatmul.bf16.gmra.mxu1 %v8545_v39  ;;  %v13264_v51 = vadd.f32 %v4519_v12, %v15260_v55  ;;  %v15265_v39 = vld [vmem:[#allocation47_spill] sm:$0xff]  ;;  %v4617_v4 = vpack.c.bf16 %v4598_v47, %v4597_v43  ;;  %v4415_v37 = vadd.f32 %v15267_v35, %v4131_v22  ;;  %15273 = vst [vmem:[#allocation59_spill] sm:$0xff] %v13298_v11  ;;  %v9434_v35 = vld [vmem:[%s14773_s3 + $0x3a4] sm:$0xf0] }
 0xab4   : > { %5096 = vmatpush.bf16.msra.mxu2 %v4620_v50  ;;  %v13282_v33 = vadd.f32 %v4514_v3, %v15265_v39  ;;  %v13288_v50 = vadd.f32 %v13172_v57, %v15268_v25  ;;  %v15274_v57 = vld [vmem:[#allocation28_spill] sm:$0xff]  ;;  %15277 = vst [vmem:[#allocation70_spill] sm:$0xff] %v13307_v8  ;;  %v4591_v3 = vmax.f32 %v13298_v11, 0.0  ;;  %v4589_v47 = vmax.f32 %v13307_v8, 0.0  ;;  %v9415_v39 = vld [vmem:[%s14773_s3 + $0x314] sm:$0xf] }
 0xab5   : > { %15261 = vst [vmem:[#allocation57_spill] sm:$0xff] %v13264_v51  ;;  %v4596_v2 = vmax.f32 %v13264_v51, 0.0  ;;  %v4504_v48 = vadd.f32 %v13119_v53, %v4415_v37  ;;  %v8501_v10 = vor.u32 %v9413_v14, %v8498_v29  ;;  %v9417_v37 = vld [vmem:[%s14773_s3 + $0x324] sm:$0xf]  ;;  %v8514_v25 = vld [vmem:[%s14773_s3 + $0x328] sm:$0xf0] }
 0xab6   : > { %15266 = vst [vmem:[#allocation64_spill] sm:$0xff] %v13282_v33  ;;  %v4594_v54 = vmax.f32 %v13282_v33, 0.0  ;;  %v4614_v49 = vpack.c.bf16 %v4592_v24, %v4591_v3  ;;  %v8592_v3 = vld [vmem:[%s14773_s3 + $0x3c0] sm:$0xf] }
 0xab7   : > { %15269 = vst [vmem:[#allocation61_spill] sm:$0xff] %v13288_v50  ;;  %v4616_v12 = vpack.c.bf16 %v4596_v2, %v4595_v38  ;;  %v13302_v46 = vadd.f32 %v4504_v48, %v15274_v57  ;;  %v8506_v2 = vld [vmem:[%s14773_s3 + $0x318] sm:$0xf0]  ;;  %v8517_v48 = vor.u32 %v9417_v37, %v8514_v25 }
 0xab8   : > { %5097 = vmatpush.bf16.msra.mxu2 %v4619_v18  ;;  %v4593_v18 = vmax.f32 %v13288_v50, 0.0  ;;  %v8509_v22 = vor.u32 %v9415_v39, %v8506_v2  ;;  %v9440_v39 = vld [vmem:[%s14773_s3 + $0x3d4] sm:$0xf0]  ;;  %v9423_v2 = vld [vmem:[%s14773_s3 + $0x354] sm:$0xf] }
 0xab9   : > { %15275 = vst [vmem:[#allocation62_spill] sm:$0xff] %v13302_v46  ;;  %v4590_v55 = vmax.f32 %v13302_v46, 0.0  ;;  %v9429_v46 = vld [vmem:[%s14773_s3 + $0x384] sm:$0xf] }
 0xaba   : > { %v4615_v53 = vpack.c.bf16 %v4594_v54, %v4593_v18  ;;  %v9436_v54 = vld [vmem:[%s14773_s3 + $0x3b4] sm:$0xf0] }
 0xabb   : > { %v4613_v62 = vpack.c.bf16 %v4590_v55, %v4589_v47  ;;  %v8585_v57 = vor.u32 %v9436_v54, %v8584_v44  ;;  %v13369_v55 = vpop.permute.xlu0 %4764  ;;  %v9421_v47 = vld [vmem:[%s14773_s3 + $0x344] sm:$0xf]  ;;  %v8608_v44 = vld [vmem:[%s14773_s3 + $0x3e0] sm:$0xf] }
 0xabc   : > { %5098 = vmatpush.bf16.msra.mxu2 %v4618_v16  ;;  %v8560_v16 = vld [vmem:[%s14773_s3 + $0x380] sm:$0xf] }
 0xabd   : > { %v8561_v43 = vor.u32 %v9430_v36, %v8560_v16  ;;  %v8530_v16 = vld [vmem:[%s14773_s3 + $0x348] sm:$0xf0] }
 0xabe   : > { %v8533_v29 = vor.u32 %v9421_v47, %v8530_v16 }
 0xac0   : > { %5099 = vmatpush.bf16.msra.mxu2 %v4617_v4  ;;  %v8569_v4 = vor.u32 %v9432_v1, %v8568_v20  ;;  %v8600_v1 = vld [vmem:[%s14773_s3 + $0x3d0] sm:$0xf] }
 0xac3   : > { %5050 = vmatmul.bf16.gmra.mxu1 %v8553_v7  ;;  %v8576_v7 = vld [vmem:[%s14773_s3 + $0x3a0] sm:$0xf] }
 0xac4   : > { %5100 = vmatpush.bf16.msra.mxu2 %v4616_v12  ;;  %v8577_v38 = vor.u32 %v9434_v35, %v8576_v7  ;;  %v9419_v12 = vld [vmem:[%s14773_s3 + $0x334] sm:$0xf] }
 0xac5   : > { %v8525_v24 = vor.u32 %v9419_v12, %v8522_v17  ;;  %v9442_v12 = vld [vmem:[%s14773_s3 + $0x3e4] sm:$0xf0]  ;;  %v9425_v17 = vld [vmem:[%s14773_s3 + $0x364] sm:$0xf] }
 0xac8   : > { %5101 = vmatpush.bf16.msra.mxu2 %v4615_v53  ;;  %v13362_v53 = vpop.permute.xlu2 %4759 }
 0xacc   : > { %5102 = vmatpush.bf16.msra.mxu2 %v4614_v49  ;;  %v9438_v49 = vld [vmem:[%s14773_s3 + $0x3c4] sm:$0xf0] }
 0xacd   : > { %v8593_v14 = vor.u32 %v9438_v49, %v8592_v3  ;;  %v8609_v3 = vor.u32 %v9442_v12, %v8608_v44 }
 0xad0   : > { %5103 = vmatpush.bf16.msra.mxu2 %v4613_v62  ;;  %v13360_v18 = vpop.f32.mrf.mxu1  ;;  %v13380_v36 = vpop.permute.xlu2 %4754 }
 0xad3   : > { %5055 = vmatmul.bf16.gmra.mxu1 %v8561_v43  ;;  %5104 = vmatmul.bf16.vlgmr.msra.gmra.mxu2 %v8501_v10  ;;  %v13384_v43 = vpop.permute.xlu0 %4739 }
 0xad8   : > { %v13364_v23 = vpop.f32.mrf.mxu1  ;;  %v13386_v10 = vpop.permute.xlu2 %4839 }
 0xadb   : > { %v13402_v35 = vpop.permute.xlu0 %4844 }
 0xae0   : > { %v13382_v62 = vpop.f32.mrf.mxu1  ;;  %v13404_v37 = vpop.permute.xlu2 %4734 }
 0xae3   : > { %5060 = vmatmul.bf16.gmra.mxu1 %v8569_v4  ;;  %5109 = vmatmul.bf16.gmra.mxu2 %v8509_v22  ;;  %v8538_v4 = vld [vmem:[%s14773_s3 + $0x358] sm:$0xf0]  ;;  %v8601_v22 = vor.u32 %v9440_v39, %v8600_v1  ;;  %v8616_v1 = vld [vmem:[%s14773_s3 + $0x3f0] sm:$0xf] }
 0xae4   : > { %v8541_v7 = vor.u32 %v9423_v2, %v8538_v4  ;;  %v9444_v2 = vld [vmem:[%s14773_s3 + $0x3f4] sm:$0xf0]  ;;  %v9427_v4 = vld [vmem:[%s14773_s3 + $0x374] sm:$0xf] }
 0xae5   : > { %v8617_v44 = vor.u32 %v9444_v2, %v8616_v1  ;;  %v8562_v1 = vld [vmem:[%s14773_s3 + $0x388] sm:$0xf0] }
 0xae6   : > { %v8565_v2 = vor.u32 %v9429_v46, %v8562_v1  ;;  %v8570_v46 = vld [vmem:[%s14773_s3 + $0x398] sm:$0xf0] }
 0xae8   : > { %v13388_v20 = vpop.f32.mrf.mxu1  ;;  %v13415_v54 = vpop.permute.xlu2 %4719 }
 0xaf0   : > { %v13406_v25 = vpop.f32.mrf.mxu1 }
 0xaf3   : > { %5065 = vmatmul.bf16.gmra.mxu1 %v8577_v38  ;;  %5114 = vmatmul.bf16.gmra.mxu2 %v8517_v48  ;;  %v13408_v38 = vpop.permute.xlu1 %4749  ;;  %v13410_v48 = vpop.permute.xlu0 %4829 }
 0xafb   : > { %v13428_v47 = vpop.permute.xlu1 %4744  ;;  %v13430_v16 = vpop.permute.xlu0 %4724 }
 0xb03   : > { %5070 = vmatmul.bf16.gmra.mxu1 %v8585_v57  ;;  %5119 = vmatmul.bf16.gmra.mxu2 %v8525_v24  ;;  %v8546_v57 = vld [vmem:[%s14773_s3 + $0x368] sm:$0xf0]  ;;  %v13426_v24 = vpop.f32.mrf.mxu1  ;;  %v13439_v39 = vpop.permute.xlu1 %4729 }
 0xb04   : > { %v8549_v49 = vor.u32 %v9425_v17, %v8546_v57 }
 0xb13   : > { %5075 = vmatmul.bf16.gmra.mxu1 %v8593_v14  ;;  %5124 = vmatmul.bf16.gmra.mxu2 %v8533_v29  ;;  %v13432_v14 = vpop.permute.xlu2 %4824  ;;  %v13434_v29 = vpop.f32.mrf.mxu1 }
 0xb1b   : > { %v13450_v17 = vpop.permute.xlu2 %4809  ;;  %v13452_v57 = vpop.f32.mrf.mxu1 }
 0xb23   : > { %5080 = vmatmul.bf16.gmra.mxu1 %v8601_v22  ;;  %5129 = vmatmul.bf16.gmra.mxu2 %v8541_v7  ;;  %v8554_v22 = vld [vmem:[%s14773_s3 + $0x378] sm:$0xf0]  ;;  %v4710_v7 = vpop.permute.xlu0 %4709  ;;  %v4705_v8 = vpop.permute.xlu2 %4704 }
 0xb24   : > { %v8557_v12 = vor.u32 %v9427_v4, %v8554_v22 }
 0xb33   : > { %5085 = vmatmul.bf16.gmra.mxu1 %v8609_v3  ;;  %5134 = vmatmul.bf16.gmra.mxu2 %v8549_v49  ;;  %v13454_v3 = vpop.permute.xlu1 %4834  ;;  %v13456_v49 = vpop.permute.xlu0 %4814 }
 0xb3b   : > { %v13464_v4 = vpop.permute.xlu1 %4819  ;;  %v13466_v22 = vpop.permute.xlu0 %4799 }
 0xb43   : > { %5090 = vmatmul.bf16.gmra.mxu1 %v8617_v44  ;;  %5139 = vmatmul.bf16.gmra.mxu2 %v8557_v12  ;;  %v4690_v44 = vpop.permute.xlu2 %4689  ;;  %v4715_v50 = vpop.permute.xlu1 %4714 }
 0xb44   : > { %v5017_v12 = vadd.f32 %v13360_v18, %v4690_v44  ;;  %v4695_v33 = vpop.permute.xlu0 %4694  ;;  %v5036_v44 = vpop.f32.mrf.mxu1 }
 0xb45   : > { %v5019_v1 = vadd.f32 %v13364_v23, %v4695_v33 }
 0xb53   : > { %5144 = vmatmul.bf16.gmra.mxu2 %v8565_v2  ;;  %v8573_v2 = vor.u32 %v9431_v26, %v8570_v46  ;;  %v5024_v26 = vadd.f32 %v13388_v20, %v4705_v8  ;;  %v9435_v8 = vld [vmem:[%s14773_s3 + $0x3b4] sm:$0xf]  ;;  %v8586_v20 = vld [vmem:[%s14773_s3 + $0x3b8] sm:$0xf0] }
 0xb56   : > { %v5105_v11 = vpop.f32.mrf.mxu2 }
 0xb57   : > { %v5106_v34 = vadd.f32 %v5105_v11, %v5017_v12  ;;  %v4700_v11 = vpop.permute.xlu1 %4699 }
 0xb58   : > { %v5022_v12 = vadd.f32 %v13382_v62, %v4700_v11 }
 0xb59   : > { %v5185_v31 = vmax.f32 %v5106_v34, 0.0 }
 0xb5e   : > { %v5107_v51 = vpop.f32.mrf.mxu2 }
 0xb5f   : > { %v5108_v61 = vadd.f32 %v5107_v51, %v5019_v1  ;;  %v8578_v51 = vld [vmem:[%s14773_s3 + $0x3a8] sm:$0xf0] }
 0xb60   : > { %v8581_v33 = vor.u32 %v9433_v6, %v8578_v51  ;;  %v5029_v6 = vadd.f32 %v13426_v24, %v4715_v50  ;;  %v8594_v50 = vld [vmem:[%s14773_s3 + $0x3c8] sm:$0xf0]  ;;  %v5034_v24 = vadd.f32 %v13452_v57, %v13430_v16  ;;  %v8602_v16 = vld [vmem:[%s14773_s3 + $0x3d8] sm:$0xf0] }
 0xb61   : > { %v5186_v30 = vmax.f32 %v5108_v61, 0.0  ;;  %v13486_v61 = vpop.f32.mrf.mxu1 }
 0xb63   : > { %5149 = vmatmul.bf16.gmra.mxu2 %v8573_v2  ;;  %v13476_v18 = vpack.c.bf16 %v5186_v30, %v5185_v31 }
 0xb66   : > { %v5110_v59 = vpop.f32.mrf.mxu2 }
 0xb67   : > { %v5111_v19 = vadd.f32 %v5110_v59, %v5022_v12  ;;  %v5027_v59 = vadd.f32 %v13406_v25, %v4710_v7  ;;  %v8589_v12 = vor.u32 %v9435_v8, %v8586_v20 }
 0xb69   : > { %v5187_v34 = vmax.f32 %v5111_v19, 0.0  ;;  %v13491_v2 = vpop.f32.mrf.mxu1 }
 0xb6e   : > { %v5112_v30 = vpop.f32.mrf.mxu2 }
 0xb6f   : > { %v5113_v31 = vadd.f32 %v5112_v30, %v5024_v26  ;;  %v5032_v30 = vadd.f32 %v13434_v29, %v13415_v54  ;;  %v5037_v29 = vadd.f32 %v5036_v44, %v13439_v39  ;;  %v9441_v39 = vld [vmem:[%s14773_s3 + $0x3e4] sm:$0xf]  ;;  %v8610_v44 = vld [vmem:[%s14773_s3 + $0x3e8] sm:$0xf0] }
 0xb71   : > { %v5188_v23 = vmax.f32 %v5113_v31, 0.0  ;;  %v5043_v25 = vpop.f32.mrf.mxu1 }
 0xb72   : > { %v5044_v63 = vadd.f32 %v5043_v25, %v13428_v47 }
 0xb73   : > { %5154 = vmatmul.bf16.gmra.mxu2 %v8581_v33  ;;  %v13488_v62 = vpack.c.bf16 %v5188_v23, %v5187_v34  ;;  %v9437_v23 = vld [vmem:[%s14773_s3 + $0x3c4] sm:$0xf] }
 0xb76   : > { %v5115_v46 = vpop.f32.mrf.mxu2 }
 0xb77   : > { %v5116_v1 = vadd.f32 %v5115_v46, %v5027_v59 }
 0xb79   : > { %v5189_v51 = vmax.f32 %v5116_v1, 0.0  ;;  %v5046_v34 = vpop.f32.mrf.mxu1  ;;  %v8597_v1 = vor.u32 %v9437_v23, %v8594_v50  ;;  %v8613_v23 = vor.u32 %v9441_v39, %v8610_v44 }
 0xb7a   : > { %v5047_v21 = vadd.f32 %v5046_v34, %v13408_v38 }
 0xb7e   : > { %v5117_v19 = vpop.f32.mrf.mxu2 }
 0xb7f   : > { %v5118_v11 = vadd.f32 %v5117_v19, %v5029_v6 }
 0xb81   : > { %v5190_v26 = vmax.f32 %v5118_v11, 0.0  ;;  %v5048_v6 = vpop.f32.mrf.mxu1 }
 0xb83   : > { %5159 = vmatmul.bf16.gmra.mxu2 %v8589_v12  ;;  %v13500_v7 = vpack.c.bf16 %v5190_v26, %v5189_v51  ;;  %v9439_v12 = vld [vmem:[%s14773_s3 + $0x3d4] sm:$0xf] }
 0xb84   : > { %v8605_v51 = vor.u32 %v9439_v12, %v8602_v16  ;;  %v13535_v12 = vpop.permute.xlu2 %4794 }
 0xb86   : > { %v5120_v31 = vpop.f32.mrf.mxu2 }
 0xb87   : > { %v5121_v33 = vadd.f32 %v5120_v31, %v5032_v30 }
 0xb89   : > { %v5191_v8 = vmax.f32 %v5121_v33, 0.0  ;;  %v5051_v26 = vpop.f32.mrf.mxu1 }
 0xb8a   : > { %v5052_v16 = vadd.f32 %v5051_v26, %v13362_v53  ;;  %v5042_v53 = vadd.f32 %v13491_v2, %v13384_v43 }
 0xb8e   : > { %v5122_v59 = vpop.f32.mrf.mxu2 }
 0xb8f   : > { %v5123_v46 = vadd.f32 %v5122_v59, %v5034_v24  ;;  %v9443_v59 = vld [vmem:[%s14773_s3 + $0x3f4] sm:$0xf] }
 0xb91   : > { %v5192_v20 = vmax.f32 %v5123_v46, 0.0  ;;  %v5053_v31 = vpop.f32.mrf.mxu1  ;;  %v8618_v46 = vld [vmem:[%s14773_s3 + $0x3f8] sm:$0xf0] }
 0xb92   : > { %v5054_v39 = vadd.f32 %v5053_v31, %v13369_v55  ;;  %v4770_v55 = vpop.permute.xlu2 %4769  ;;  %v5039_v31 = vadd.f32 %v13486_v61, %v13404_v37  ;;  %v4780_v61 = vpop.permute.xlu0 %4779 }
 0xb93   : > { %5164 = vmatmul.bf16.gmra.mxu2 %v8597_v1  ;;  %v13512_v54 = vpack.c.bf16 %v5192_v20, %v5191_v8  ;;  %v8621_v20 = vor.u32 %v9443_v59, %v8618_v46 }
 0xb96   : > { %v5125_v19 = vpop.f32.mrf.mxu2 }
 0xb97   : > { %v5126_v11 = vadd.f32 %v5125_v19, %v5037_v29 }
 0xb99   : > { %v5056_v50 = vpop.f32.mrf.mxu1  ;;  %v5193_v2 = vmax.f32 %v5126_v11, 0.0  ;;  %v8688_v11 = vld [vmem:[%s14775_s5 + $0x300] sm:$0xf] }
 0xb9a   : > { %v5057_v38 = vadd.f32 %v5056_v50, %v4770_v55 }
 0xb9e   : > { %v5127_v57 = vpop.f32.mrf.mxu2 }
 0xba1   : > { %v13533_v1 = vpop.f32.mrf.mxu1 }
 0xba3   : > { %5169 = vmatmul.bf16.gmra.mxu2 %v8605_v51  ;;  %v5049_v51 = vadd.f32 %v5048_v6, %v13380_v36 }
 0xba6   : > { %v5130_v30 = vpop.f32.mrf.mxu2 }
 0xba7   : > { %v5131_v34 = vadd.f32 %v5130_v30, %v5042_v53  ;;  %v9448_v53 = vld [vmem:[%s14775_s5 + $0x314] sm:$0xf0] }
 0xba9   : > { %v5061_v19 = vpop.f32.mrf.mxu1 }
 0xbaa   : > { %v5062_v30 = vadd.f32 %v5061_v19, %v4780_v61  ;;  %v9446_v19 = vld [vmem:[%s14775_s5 + $0x304] sm:$0xf0] }
 0xbae   : > { %v5132_v33 = vpop.f32.mrf.mxu2 }
 0xbaf   : > { %v5133_v26 = vadd.f32 %v5132_v33, %v5044_v63 }
 0xbb1   : > { %v13542_v41 = vpop.f32.mrf.mxu1  ;;  %v5196_v25 = vmax.f32 %v5133_v26, 0.0 }
 0xbb3   : > { %5174 = vmatmul.bf16.gmra.mxu2 %v8613_v23 }
 0xbb6   : > { %v5135_v24 = vpop.f32.mrf.mxu2 }
 0xbb7   : > { %v5136_v59 = vadd.f32 %v5135_v24, %v5047_v21  ;;  %v5128_v21 = vadd.f32 %v5127_v57, %v5039_v31 }
 0xbb9   : > { %v5194_v43 = vmax.f32 %v5128_v21, 0.0 }
 0xbbb   : > { %v5221_v37 = vpack.c.bf16 %v5194_v43, %v5193_v2  ;;  %v8712_v43 = vld [vmem:[%s14775_s5 + $0x330] sm:$0xf] }
 0xbbe   : > { %v5137_v8 = vpop.f32.mrf.mxu2 }
 0xbbf   : > { %v5138_v58 = vadd.f32 %v5137_v8, %v5049_v51  ;;  %v5197_v8 = vmax.f32 %v5136_v59, 0.0  ;;  %v13558_v51 = vpop.permute.xlu1 %4804 }
 0xbc1   : > { %v5198_v36 = vmax.f32 %v5138_v58, 0.0  ;;  %v5066_v58 = vpop.f32.mrf.mxu1 }
 0xbc3   : > { %5179 = vmatmul.bf16.gmra.mxu2 %v8621_v20  ;;  %v5223_v24 = vpack.c.bf16 %v5198_v36, %v5197_v8 }
 0xbc6   : > { %v5140_v29 = vpop.f32.mrf.mxu2 }
 0xbc7   : > { %v5141_v44 = vadd.f32 %v5140_v29, %v5052_v16  ;;  %v5195_v29 = vmax.f32 %v5131_v34, 0.0  ;;  %v9450_v34 = vld [vmem:[%s14775_s5 + $0x324] sm:$0xf0] }
 0xbc9   : > { %v5199_v46 = vmax.f32 %v5141_v44, 0.0  ;;  %v5222_v63 = vpack.c.bf16 %v5196_v25, %v5195_v29  ;;  %v13553_v57 = vpop.f32.mrf.mxu1  ;;  %v8689_v44 = vor.u32 %v9446_v19, %v8688_v11 }
 0xbce   : > { %v5142_v23 = vpop.f32.mrf.mxu2 }
 0xbcf   : > { %v5143_v13 = vadd.f32 %v5142_v23, %v5054_v39  ;;  %v4790_v23 = vpop.permute.xlu1 %4789 }
 0xbd1   : > { %v5200_v20 = vmax.f32 %v5143_v13, 0.0  ;;  %v5071_v39 = vpop.f32.mrf.mxu1 }
 0xbd3   : > { %v5224_v6 = vpack.c.bf16 %v5200_v20, %v5199_v46  ;;  %v8696_v20 = vld [vmem:[%s14775_s5 + $0x310] sm:$0xf] }
 0xbd4   : > { %v8697_v36 = vor.u32 %v9448_v53, %v8696_v20 }
 0xbd5   : > { %5619 = vmatpush.bf16.msra.mxu3 %v5224_v6  ;;  %v5072_v6 = vadd.f32 %v5071_v39, %v13466_v22 }
 0xbd6   : > { %v5145_v47 = vpop.f32.mrf.mxu2 }
 0xbd7   : > { %v13548_v13 = vadd.f32 %v5145_v47, %v5057_v38  ;;  %v8704_v38 = vld [vmem:[%s14775_s5 + $0x320] sm:$0xf] }
 0xbd8   : > { %v8705_v21 = vor.u32 %v9450_v34, %v8704_v38 }
 0xbd9   : > { %5620 = vmatpush.bf16.msra.mxu3 %v5223_v24 }
 0xbdd   : > { %5621 = vmatpush.bf16.msra.mxu3 %v5222_v63  ;;  %v9452_v63 = vld [vmem:[%s14775_s5 + $0x334] sm:$0xf0] }
 0xbde   : > { %v13550_v33 = vpop.f32.mrf.mxu2  ;;  %v8713_v2 = vor.u32 %v9452_v63, %v8712_v43 }
 0xbe1   : > { %5622 = vmatpush.bf16.msra.mxu3 %v5221_v37 }
 0xbe5   : > { %5623 = vmatpush.bf16.msra.mxu3 %v13512_v54 }
 0xbe6   : > { %v5150_v50 = vpop.f32.mrf.mxu2 }
 0xbe7   : > { %v13555_v16 = vadd.f32 %v5150_v50, %v5062_v30  ;;  %v9454_v50 = vld [vmem:[%s14775_s5 + $0x344] sm:$0xf0] }
 0xbe9   : > { %5624 = vmatpush.bf16.msra.mxu3 %v13500_v7  ;;  %v5067_v7 = vadd.f32 %v5066_v58, %v4790_v23  ;;  %v8728_v23 = vld [vmem:[%s14775_s5 + $0x350] sm:$0xf] }
 0xbed   : > { %5625 = vmatpush.bf16.msra.mxu3 %v13488_v62  ;;  %v13572_v62 = vpop.f32.mrf.mxu1 }
 0xbee   : > { %v13567_v54 = vpop.f32.mrf.mxu2 }
 0xbf1   : > { %5626 = vmatpush.bf16.msra.mxu3 %v13476_v18 }
 0xbf4   : > { %5627 = vmatmul.bf16.vlgmr.msra.gmra.mxu3 %v8689_v44 }
 0xbf5   : > { %v5076_v18 = vpop.f32.mrf.mxu1 }
 0xbf6   : > { %v5155_v59 = vpop.f32.mrf.mxu2  ;;  %v5077_v25 = vadd.f32 %v5076_v18, %v13450_v17  ;;  %v8720_v17 = vld [vmem:[%s14775_s5 + $0x340] sm:$0xf] }
 0xbf7   : > { %v13570_v46 = vadd.f32 %v5155_v59, %v5067_v7  ;;  %v8721_v19 = vor.u32 %v9454_v50, %v8720_v17  ;;  %v9456_v7 = vld [vmem:[%s14775_s5 + $0x354] sm:$0xf0] }
 0xbf8   : > { %v8729_v53 = vor.u32 %v9456_v7, %v8728_v23 }
 0xbfd   : > { %v5078_v8 = vpop.f32.mrf.mxu1 }
 0xbfe   : > { %v13580_v26 = vpop.f32.mrf.mxu2 }
 0xc04   : > { %5632 = vmatmul.bf16.gmra.mxu3 %v8697_v36 }
 0xc05   : > { %v5081_v22 = vpop.f32.mrf.mxu1 }
 0xc06   : > { %v5160_v55 = vpop.f32.mrf.mxu2 }
 0xc07   : > { %v13583_v31 = vadd.f32 %v5160_v55, %v5072_v6 }
 0xc0d   : > { %v5083_v37 = vpop.f32.mrf.mxu1 }
 0xc0e   : > { %v5162_v47 = vpop.f32.mrf.mxu2 }
 0xc14   : > { %5637 = vmatmul.bf16.gmra.mxu3 %v8705_v21  ;;  %v8736_v21 = vld [vmem:[%s14775_s5 + $0x360] sm:$0xf] }
 0xc15   : > { %v5086_v30 = vpop.f32.mrf.mxu1 }
 0xc16   : > { %v5165_v24 = vpop.f32.mrf.mxu2  ;;  %v5087_v43 = vadd.f32 %v5086_v30, %v13410_v48 }
 0xc17   : > { %v13592_v29 = vadd.f32 %v5165_v24, %v5077_v25  ;;  %v9458_v25 = vld [vmem:[%s14775_s5 + $0x364] sm:$0xf0] }
 0xc18   : > { %v8737_v17 = vor.u32 %v9458_v25, %v8736_v21  ;;  %v5205_v21 = vmax.f32 %v13570_v46, 0.0 }
 0xc1d   : > { %v5088_v39 = vpop.f32.mrf.mxu1 }
 0xc1e   : > { %v5167_v58 = vpop.f32.mrf.mxu2  ;;  %v5089_v55 = vadd.f32 %v5088_v39, %v13454_v3 }
 0xc24   : > { %5642 = vmatmul.bf16.gmra.mxu3 %v8713_v2 }
 0xc25   : > { %v5091_v20 = vpop.f32.mrf.mxu1 }
 0xc26   : > { %v5170_v61 = vpop.f32.mrf.mxu2  ;;  %v5092_v6 = vadd.f32 %v5091_v20, %v13386_v10  ;;  %v5084_v10 = vadd.f32 %v5083_v37, %v13432_v14  ;;  %v5079_v20 = vadd.f32 %v5078_v8, %v13456_v49  ;;  %v5074_v14 = vadd.f32 %v13572_v62, %v13558_v51  ;;  %v8744_v49 = vld [vmem:[%s14775_s5 + $0x370] sm:$0xf]  ;;  %v9460_v8 = vld [vmem:[%s14775_s5 + $0x374] sm:$0xf0] }
 0xc28   : > { %v5168_v48 = vadd.f32 %v5167_v58, %v5079_v20  ;;  %v4785_v58 = vpop.permute.xlu1 %4784  ;;  %v9449_v20 = vld [vmem:[%s14775_s5 + $0x324] sm:$0xf] }
 0xc2d   : > { %v5093_v18 = vpop.f32.mrf.mxu1 }
 0xc2e   : > { %v5172_v11 = vpop.f32.mrf.mxu2  ;;  %v5094_v38 = vadd.f32 %v5093_v18, %v13402_v35  ;;  %v5210_v18 = vmax.f32 %v5168_v48, 0.0 }
 0xc2f   : > { %v5173_v39 = vadd.f32 %v5172_v11, %v5084_v10  ;;  %v5209_v11 = vmax.f32 %v13592_v29, 0.0  ;;  %v9464_v10 = vld [vmem:[%s14775_s5 + $0x394] sm:$0xf0] }
 0xc31   : > { %v5212_v30 = vmax.f32 %v5173_v39, 0.0  ;;  %v13669_v39 = vpop.permute.xlu1 %5451 }
 0xc34   : > { %5647 = vmatmul.bf16.gmra.mxu3 %v8721_v19  ;;  %v5082_v19 = vadd.f32 %v5081_v22, %v13464_v4  ;;  %v5069_v22 = vadd.f32 %v13553_v57, %v13535_v12  ;;  %v5207_v12 = vmax.f32 %v13583_v31, 0.0 }
 0xc36   : > { %v5175_v44 = vpop.f32.mrf.mxu2  ;;  %v5158_v51 = vadd.f32 %v13580_v26, %v5069_v22 }
 0xc37   : > { %v5176_v3 = vadd.f32 %v5175_v44, %v5087_v43  ;;  %v5163_v44 = vadd.f32 %v5162_v47, %v5074_v14  ;;  %v5229_v47 = vpack.c.bf16 %v5210_v18, %v5209_v11  ;;  %v8776_v14 = vld [vmem:[%s14775_s5 + $0x3b0] sm:$0xf]  ;;  %v9451_v18 = vld [vmem:[%s14775_s5 + $0x334] sm:$0xf] }
 0xc38   : > { %v5206_v29 = vmax.f32 %v5158_v51, 0.0 }
 0xc39   : > { %v5208_v62 = vmax.f32 %v5163_v44, 0.0  ;;  %v9468_v44 = vld [vmem:[%s14775_s5 + $0x3b4] sm:$0xf0] }
 0xc3e   : > { %v5177_v59 = vpop.f32.mrf.mxu2 }
 0xc3f   : > { %v5178_v63 = vadd.f32 %v5177_v59, %v5089_v55  ;;  %v5228_v55 = vpack.c.bf16 %v5208_v62, %v5207_v12  ;;  %v8722_v12 = vld [vmem:[%s14775_s5 + $0x348] sm:$0xf0] }
 0xc41   : > { %v5214_v23 = vmax.f32 %v5178_v63, 0.0  ;;  %v8752_v63 = vld [vmem:[%s14775_s5 + $0x380] sm:$0xf] }
 0xc44   : > { %5652 = vmatmul.bf16.gmra.mxu3 %v8729_v53  ;;  %v5171_v53 = vadd.f32 %v5170_v61, %v5082_v19  ;;  %v8745_v61 = vor.u32 %v9460_v8, %v8744_v49  ;;  %v8777_v49 = vor.u32 %v9468_v44, %v8776_v14 }
 0xc46   : > { %v5180_v36 = vpop.f32.mrf.mxu2  ;;  %v5211_v37 = vmax.f32 %v5171_v53, 0.0  ;;  %v8706_v53 = vld [vmem:[%s14775_s5 + $0x328] sm:$0xf0] }
 0xc47   : > { %v5181_v34 = vadd.f32 %v5180_v36, %v5092_v6  ;;  %v5213_v36 = vmax.f32 %v5176_v3, 0.0  ;;  %v5064_v6 = vadd.f32 %v13542_v41, %v4785_v58  ;;  %v5203_v41 = vmax.f32 %v13555_v16, 0.0  ;;  %v8690_v16 = vld [vmem:[%s14775_s5 + $0x308] sm:$0xf0]  ;;  %v9447_v3 = vld [vmem:[%s14775_s5 + $0x314] sm:$0xf] }
 0xc48   : > { %v5230_v4 = vpack.c.bf16 %v5212_v30, %v5211_v37  ;;  %v8709_v48 = vor.u32 %v9449_v20, %v8706_v53  ;;  %v13683_v30 = vpop.permute.xlu2 %5456  ;;  %v8784_v58 = vld [vmem:[%s14775_s5 + $0x3c0] sm:$0xf] }
 0xc49   : > { %v5215_v50 = vmax.f32 %v5181_v34, 0.0  ;;  %v5231_v59 = vpack.c.bf16 %v5214_v23, %v5213_v36  ;;  %v5153_v57 = vadd.f32 %v13567_v54, %v5064_v6  ;;  %v5201_v54 = vmax.f32 %v13548_v13, 0.0  ;;  %v8768_v23 = vld [vmem:[%s14775_s5 + $0x3a0] sm:$0xf]  ;;  %15278 = vst [vmem:[#allocation66_spill] sm:$0xff] %v13683_v30 }
 0xc4a   : > { %v9453_v6 = vld [vmem:[%s14775_s5 + $0x344] sm:$0xf] }
 0xc4b   : > { %v5204_v25 = vmax.f32 %v5153_v57, 0.0 }
 0xc4d   : > { %v5226_v43 = vpack.c.bf16 %v5204_v25, %v5203_v41  ;;  %v8792_v41 = vld [vmem:[%s14775_s5 + $0x3d0] sm:$0xf] }
 0xc4e   : > { %v5182_v24 = vpop.f32.mrf.mxu2 }
 0xc4f   : > { %v5183_v2 = vadd.f32 %v5182_v24, %v5094_v38  ;;  %v4775_v38 = vpop.permute.xlu0 %4774  ;;  %v5227_v24 = vpack.c.bf16 %v5206_v29, %v5205_v21 }
 0xc50   : > { %v5059_v34 = vadd.f32 %v13533_v1, %v4775_v38  ;;  %v9462_v1 = vld [vmem:[%s14775_s5 + $0x384] sm:$0xf0]  ;;  %v13690_v37 = vpop.permute.xlu2 %5441 }
 0xc51   : > { %v5216_v35 = vmax.f32 %v5183_v2, 0.0  ;;  %v8753_v2 = vor.u32 %v9462_v1, %v8752_v63  ;;  %15279 = vst [vmem:[#allocation93_spill] sm:$0xff] %v13690_v37  ;;  %v8730_v63 = vld [vmem:[%s14775_s5 + $0x358] sm:$0xf0] }
 0xc52   : > { %v5148_v26 = vadd.f32 %v13550_v33, %v5059_v34  ;;  %v9445_v33 = vld [vmem:[%s14775_s5 + $0x304] sm:$0xf] }
 0xc53   : > { %v5232_v7 = vpack.c.bf16 %v5216_v35, %v5215_v50  ;;  %v8693_v13 = vor.u32 %v9445_v33, %v8690_v16  ;;  %v8698_v50 = vld [vmem:[%s14775_s5 + $0x318] sm:$0xf0] }
 0xc54   : > { %5657 = vmatmul.bf16.gmra.mxu3 %v8737_v17  ;;  %v5202_v31 = vmax.f32 %v5148_v26, 0.0  ;;  %v8760_v17 = vld [vmem:[%s14775_s5 + $0x390] sm:$0xf]  ;;  %v8701_v19 = vor.u32 %v9447_v3, %v8698_v50  ;;  %v9474_v3 = vld [vmem:[%s14775_s5 + $0x3e4] sm:$0xf0] }
 0xc55   : > { %5708 = vmatpush.bf16.msra.mxu0 %v5232_v7  ;;  %v8761_v35 = vor.u32 %v9464_v10, %v8760_v17  ;;  %v9466_v7 = vld [vmem:[%s14775_s5 + $0x3a4] sm:$0xf0]  ;;  %v8800_v17 = vld [vmem:[%s14775_s5 + $0x3e0] sm:$0xf]  ;;  %v9457_v50 = vld [vmem:[%s14775_s5 + $0x364] sm:$0xf] }
 0xc56   : > { %v5225_v46 = vpack.c.bf16 %v5202_v31, %v5201_v54  ;;  %v8769_v36 = vor.u32 %v9466_v7, %v8768_v23  ;;  %v9455_v54 = vld [vmem:[%s14775_s5 + $0x354] sm:$0xf]  ;;  %v8801_v7 = vor.u32 %v9474_v3, %v8800_v17 }
 0xc57   : > { %v13723_v57 = vpop.permute.xlu0 %5371  ;;  %v8733_v33 = vor.u32 %v9455_v54, %v8730_v63  ;;  %v9461_v54 = vld [vmem:[%s14775_s5 + $0x384] sm:$0xf]  ;;  %v8754_v63 = vld [vmem:[%s14775_s5 + $0x388] sm:$0xf0] }
 0xc58   : > { %v13705_v51 = vpop.permute.xlu2 %5366  ;;  %v8757_v17 = vor.u32 %v9461_v54, %v8754_v63 }
 0xc59   : > { %5709 = vmatpush.bf16.msra.mxu0 %v5231_v59  ;;  %v13685_v59 = vpop.permute.xlu1 %5376 }
 0xc5d   : > { %5710 = vmatpush.bf16.msra.mxu0 %v5230_v4  ;;  %v8714_v4 = vld [vmem:[%s14775_s5 + $0x338] sm:$0xf0] }
 0xc5e   : > { %v8717_v8 = vor.u32 %v9451_v18, %v8714_v4  ;;  %v8808_v18 = vld [vmem:[%s14775_s5 + $0x3f0] sm:$0xf]  ;;  %v9476_v4 = vld [vmem:[%s14775_s5 + $0x3f4] sm:$0xf0] }
 0xc5f   : > { %v13731_v26 = vpop.permute.xlu0 %5446 }
 0xc60   : > { %v13725_v38 = vpop.permute.xlu2 %5351 }
 0xc61   : > { %5711 = vmatpush.bf16.msra.mxu0 %v5229_v47  ;;  %v13703_v11 = vpop.permute.xlu1 %5361 }
 0xc64   : > { %5662 = vmatmul.bf16.gmra.mxu3 %v8745_v61  ;;  %v9470_v61 = vld [vmem:[%s14775_s5 + $0x3c4] sm:$0xf0] }
 0xc65   : > { %5712 = vmatpush.bf16.msra.mxu0 %v5228_v55  ;;  %v8785_v29 = vor.u32 %v9470_v61, %v8784_v58  ;;  %v8725_v55 = vor.u32 %v9453_v6, %v8722_v12  ;;  %v8809_v58 = vor.u32 %v9476_v4, %v8808_v18 }
 0xc67   : > { %v13751_v16 = vpop.permute.xlu0 %5431 }
 0xc68   : > { %v13733_v25 = vpop.permute.xlu2 %5426  ;;  %15282 = vst [vmem:[#allocation84_spill] sm:$0xff] %v13751_v16 }
 0xc69   : > { %5713 = vmatpush.bf16.msra.mxu0 %v5227_v24  ;;  %v13709_v47 = vpop.permute.xlu1 %5436  ;;  %15281 = vst [vmem:[#allocation92_spill] sm:$0xff] %v13733_v25 }
 0xc6a   : > { %15280 = vst [vmem:[#allocation88_spill] sm:$0xff] %v13709_v47 }
 0xc6d   : > { %5714 = vmatpush.bf16.msra.mxu0 %v5226_v43  ;;  %v9472_v43 = vld [vmem:[%s14775_s5 + $0x3d4] sm:$0xf0] }
 0xc6e   : > { %v8793_v1 = vor.u32 %v9472_v43, %v8792_v41 }
 0xc6f   : > { %v13760_v10 = vpop.permute.xlu0 %5356 }
 0xc71   : > { %5715 = vmatpush.bf16.msra.mxu0 %v5225_v46  ;;  %v13729_v21 = vpop.permute.xlu1 %5421  ;;  %v13753_v46 = vpop.permute.xlu2 %5411 }
 0xc74   : > { %5667 = vmatmul.bf16.gmra.mxu3 %v8753_v2  ;;  %5716 = vmatmul.bf16.vlgmr.msra.gmra.mxu0 %v8693_v13 }
 0xc77   : > { %v13701_v22 = vpop.f32.mrf.mxu3 }
 0xc79   : > { %v13740_v31 = vpop.permute.xlu1 %5346 }
 0xc7f   : > { %v13707_v62 = vpop.f32.mrf.mxu3 }
 0xc81   : > { %v13755_v13 = vpop.permute.xlu1 %5331 }
 0xc84   : > { %5672 = vmatmul.bf16.gmra.mxu3 %v8761_v35  ;;  %5721 = vmatmul.bf16.gmra.mxu0 %v8701_v19  ;;  %v8738_v35 = vld [vmem:[%s14775_s5 + $0x368] sm:$0xf0]  ;;  %v13771_v19 = vpop.permute.xlu2 %5336 }
 0xc85   : > { %v8741_v20 = vor.u32 %v9457_v50, %v8738_v35 }
 0xc87   : > { %v13727_v34 = vpop.f32.mrf.mxu3 }
 0xc89   : > { %v13773_v53 = vpop.permute.xlu1 %5406 }
 0xc8a   : > { %15283 = vst [vmem:[#allocation72_spill] sm:$0xff] %v13773_v53 }
 0xc8f   : > { %v13735_v24 = vpop.f32.mrf.mxu3 }
 0xc91   : > { %v13777_v44 = vpop.permute.xlu1 %5391 }
 0xc94   : > { %5677 = vmatmul.bf16.gmra.mxu3 %v8769_v36  ;;  %5726 = vmatmul.bf16.gmra.mxu0 %v8709_v48  ;;  %v13775_v36 = vpop.permute.xlu0 %5341  ;;  %v5322_v48 = vpop.permute.xlu2 %5321 }
 0xc97   : > { %v5638_v2 = vpop.f32.mrf.mxu3 }
 0xc9c   : > { %v13791_v6 = vpop.permute.xlu0 %5416  ;;  %v13793_v12 = vpop.permute.xlu2 %5396 }
 0xc9d   : > { %15284 = vst [vmem:[#allocation80_spill] sm:$0xff] %v13791_v6 }
 0xc9e   : > { %15285 = vst [vmem:[#allocation76_spill] sm:$0xff] %v13793_v12 }
 0xc9f   : > { %v5640_v23 = vpop.f32.mrf.mxu3 }
 0xca4   : > { %5682 = vmatmul.bf16.gmra.mxu3 %v8777_v49  ;;  %5731 = vmatmul.bf16.gmra.mxu0 %v8717_v8  ;;  %v9459_v49 = vld [vmem:[%s14775_s5 + $0x374] sm:$0xf]  ;;  %v8746_v8 = vld [vmem:[%s14775_s5 + $0x378] sm:$0xf0]  ;;  %v13795_v41 = vpop.permute.xlu0 %5401  ;;  %v13797_v43 = vpop.permute.xlu2 %5381 }
 0xca5   : > { %v8749_v61 = vor.u32 %v9459_v49, %v8746_v8  ;;  %v9463_v49 = vld [vmem:[%s14775_s5 + $0x394] sm:$0xf] }
 0xca7   : > { %v5643_v14 = vpop.f32.mrf.mxu3 }
 0xcac   : > { %v5327_v35 = vpop.permute.xlu0 %5326 }
 0xcb4   : > { %5687 = vmatmul.bf16.gmra.mxu3 %v8785_v29  ;;  %5736 = vmatmul.bf16.gmra.mxu0 %v8725_v55  ;;  %v5645_v29 = vpop.f32.mrf.mxu3  ;;  %v5317_v55 = vpop.permute.xlu1 %5316 }
 0xcb5   : > { %v5312_v8 = vpop.permute.xlu0 %5311 }
 0xcc4   : > { %5692 = vmatmul.bf16.gmra.mxu3 %v8793_v1  ;;  %5741 = vmatmul.bf16.gmra.mxu0 %v8733_v33  ;;  %v5302_v1 = vpop.permute.xlu1 %5301 }
 0xcc5   : > { %v5629_v33 = vadd.f32 %v13701_v22, %v5302_v1  ;;  %v8762_v22 = vld [vmem:[%s14775_s5 + $0x398] sm:$0xf0] }
 0xcc6   : > { %v8765_v54 = vor.u32 %v9463_v49, %v8762_v22 }
 0xcd4   : > { %5697 = vmatmul.bf16.gmra.mxu3 %v8801_v7  ;;  %5746 = vmatmul.bf16.gmra.mxu0 %v8741_v20  ;;  %v5307_v7 = vpop.permute.xlu2 %5306 }
 0xcd5   : > { %v5631_v20 = vadd.f32 %v13707_v62, %v5307_v7  ;;  %v5636_v62 = vadd.f32 %v13735_v24, %v5317_v55  ;;  %v9465_v7 = vld [vmem:[%s14775_s5 + $0x3a4] sm:$0xf]  ;;  %v5641_v24 = vadd.f32 %v5640_v23, %v5327_v35  ;;  %v5646_v35 = vadd.f32 %v5645_v29, %v13771_v19  ;;  %v9471_v29 = vld [vmem:[%s14775_s5 + $0x3d4] sm:$0xf] }
 0xce4   : > { %5702 = vmatmul.bf16.gmra.mxu3 %v8809_v58  ;;  %5751 = vmatmul.bf16.gmra.mxu0 %v8749_v61  ;;  %v5648_v58 = vpop.f32.mrf.mxu3  ;;  %v5634_v61 = vadd.f32 %v13727_v34, %v5312_v8  ;;  %v8770_v34 = vld [vmem:[%s14775_s5 + $0x3a8] sm:$0xf0] }
 0xcf1   : > { %v5717_v3 = vpop.f32.mrf.mxu0 }
 0xcf2   : > { %v13806_v50 = vadd.f32 %v5717_v3, %v5629_v33  ;;  %v13821_v33 = vpop.f32.mrf.mxu3 }
 0xcf4   : > { %5756 = vmatmul.bf16.gmra.mxu0 %v8757_v17 }
 0xcf9   : > { %v5719_v18 = vpop.f32.mrf.mxu0 }
 0xcfa   : > { %v13809_v4 = vadd.f32 %v5719_v18, %v5631_v20  ;;  %v5639_v20 = vadd.f32 %v5638_v2, %v5322_v48  ;;  %v8773_v18 = vor.u32 %v9465_v7, %v8770_v34  ;;  %v5653_v8 = vpop.f32.mrf.mxu3  ;;  %v5644_v2 = vadd.f32 %v5643_v14, %v13755_v13 }
 0xcfb   : > { %v5649_v13 = vadd.f32 %v5648_v58, %v13775_v36  ;;  %v9473_v58 = vld [vmem:[%s14775_s5 + $0x3e4] sm:$0xf] }
 0xd01   : > { %v5722_v63 = vpop.f32.mrf.mxu0 }
 0xd02   : > { %v13818_v1 = vadd.f32 %v5722_v63, %v5634_v61  ;;  %v9467_v63 = vld [vmem:[%s14775_s5 + $0x3b4] sm:$0xf] }
 0xd04   : > { %5761 = vmatmul.bf16.gmra.mxu0 %v8765_v54  ;;  %v5655_v54 = vpop.f32.mrf.mxu3 }
 0xd05   : > { %v5656_v47 = vadd.f32 %v5655_v54, %v13760_v10 }
 0xd09   : > { %v5724_v17 = vpop.f32.mrf.mxu0 }
 0xd0a   : > { %v13823_v3 = vadd.f32 %v5724_v17, %v5636_v62  ;;  %v8778_v62 = vld [vmem:[%s14775_s5 + $0x3b8] sm:$0xf0] }
 0xd0b   : > { %v8781_v48 = vor.u32 %v9467_v63, %v8778_v62 }
 0xd0c   : > { %v5658_v23 = vpop.f32.mrf.mxu3 }
 0xd11   : > { %v5727_v49 = vpop.f32.mrf.mxu0 }
 0xd12   : > { %v13831_v22 = vadd.f32 %v5727_v49, %v5639_v20  ;;  %v8786_v49 = vld [vmem:[%s14775_s5 + $0x3c8] sm:$0xf0] }
 0xd14   : > { %5766 = vmatmul.bf16.gmra.mxu0 %v8773_v18  ;;  %v9469_v18 = vld [vmem:[%s14775_s5 + $0x3c4] sm:$0xf] }
 0xd15   : > { %v8789_v14 = vor.u32 %v9469_v18, %v8786_v49 }
 0xd19   : > { %v5729_v55 = vpop.f32.mrf.mxu0 }
 0xd1a   : > { %v13833_v61 = vadd.f32 %v5729_v55, %v5641_v24  ;;  %v5660_v24 = vpop.f32.mrf.mxu3 }
 0xd21   : > { %v5732_v17 = vpop.f32.mrf.mxu0 }
 0xd22   : > { %v13842_v7 = vadd.f32 %v5732_v17, %v5644_v2  ;;  %v5663_v19 = vpop.f32.mrf.mxu3  ;;  %v8794_v2 = vld [vmem:[%s14775_s5 + $0x3d8] sm:$0xf0] }
 0xd23   : > { %v5664_v6 = vadd.f32 %v5663_v19, %v13723_v57 }
 0xd24   : > { %5771 = vmatmul.bf16.gmra.mxu0 %v8781_v48  ;;  %v8797_v48 = vor.u32 %v9471_v29, %v8794_v2  ;;  %v9475_v29 = vld [vmem:[%s14775_s5 + $0x3f4] sm:$0xf]  ;;  %v8810_v2 = vld [vmem:[%s14775_s5 + $0x3f8] sm:$0xf0] }
 0xd29   : > { %v5734_v34 = vpop.f32.mrf.mxu0 }
 0xd2a   : > { %v13845_v20 = vadd.f32 %v5734_v34, %v5646_v35  ;;  %v5665_v35 = vpop.f32.mrf.mxu3  ;;  %v8802_v34 = vld [vmem:[%s14775_s5 + $0x3e8] sm:$0xf0] }
 0xd2b   : > { %v8805_v49 = vor.u32 %v9473_v58, %v8802_v34  ;;  %v5661_v58 = vadd.f32 %v5660_v24, %v13705_v51 }
 0xd31   : > { %v5737_v55 = vpop.f32.mrf.mxu0 }
 0xd32   : > { %v5738_v63 = vadd.f32 %v5737_v55, %v5649_v13  ;;  %v5668_v18 = vpop.f32.mrf.mxu3 }
 0xd34   : > { %5776 = vmatmul.bf16.gmra.mxu0 %v8789_v14 }
 0xd39   : > { %v5739_v62 = vpop.f32.mrf.mxu0 }
 0xd3a   : > { %v13866_v14 = vpop.f32.mrf.mxu3 }
 0xd3b   : > { %15286 = vst [vmem:[#allocation73_spill] sm:$0xff] %v13866_v14  ;;  %v5666_v14 = vadd.f32 %v5665_v35, %v13685_v59  ;;  %v5651_v59 = vadd.f32 %v13821_v33, %v13740_v31 }
 0xd41   : > { %v5742_v17 = vpop.f32.mrf.mxu0 }
 0xd42   : > { %v5673_v53 = vpop.f32.mrf.mxu3 }
 0xd44   : > { %5781 = vmatmul.bf16.gmra.mxu0 %v8797_v48  ;;  %v8813_v48 = vor.u32 %v9475_v29, %v8810_v2  ;;  %v5654_v2 = vadd.f32 %v5653_v8, %v13725_v38 }
 0xd46   : > { %v5743_v10 = vadd.f32 %v5742_v17, %v5654_v2 }
 0xd49   : > { %v5744_v36 = vpop.f32.mrf.mxu0 }
 0xd4a   : > { %v5745_v57 = vadd.f32 %v5744_v36, %v5656_v47  ;;  %v5669_v47 = vadd.f32 %v5668_v18, %v13797_v43 }
 0xd51   : > { %v5747_v13 = vpop.f32.mrf.mxu0 }
 0xd54   : > { %5786 = vmatmul.bf16.gmra.mxu0 %v8805_v49  ;;  %v5659_v49 = vadd.f32 %v5658_v23, %v13703_v11  ;;  %v13891_v11 = vpop.f32.mrf.mxu3 }
 0xd56   : > { %v5748_v30 = vadd.f32 %v5747_v13, %v5659_v49 }
 0xd59   : > { %v5749_v55 = vpop.f32.mrf.mxu0 }
 0xd5a   : > { %v5750_v25 = vadd.f32 %v5749_v55, %v5661_v58 }
 0xd5c   : > { %v13884_v19 = vadd.f32 %v5750_v25, %v13081_v60  ;;  %v5740_v60 = vadd.f32 %v5739_v62, %v5651_v59  ;;  %v13900_v25 = vadd.f32 %v5745_v57, %v13097_v42  ;;  %v13914_v42 = vadd.f32 %v5738_v63, %v13111_v45  ;;  %v5678_v23 = vpop.f32.mrf.mxu3 }
 0xd5d   : > { %v13931_v63 = vadd.f32 %v13833_v61, %v13128_v28 }
 0xd5e   : > { %15287 = vst [vmem:[#allocation81_spill] sm:$0xff] %v13900_v25  ;;  %v13910_v33 = vadd.f32 %v5740_v60, %v13107_v0  ;;  %v5840_v43 = vmax.f32 %v13900_v25, 0.0  ;;  %v13926_v0 = vadd.f32 %v13842_v7, %v13123_v9  ;;  %v5837_v45 = vmax.f32 %v13914_v42, 0.0 }
 0xd5f   : > { %15290 = vst [vmem:[#allocation9_spill] sm:$0xff] %v13914_v42  ;;  %v5674_v9 = vadd.f32 %v5673_v53, %v13777_v44  ;;  %v13942_v7 = vadd.f32 %v13823_v3, %v13139_v5  ;;  %v5834_v18 = vmax.f32 %v13931_v63, 0.0  ;;  %v15292_v53 = vld [vmem:[#allocation34_spill] sm:$0xff] }
 0xd60   : > { %15289 = vst [vmem:[#allocation83_spill] sm:$0xff] %v13910_v33  ;;  %v5838_v24 = vmax.f32 %v13910_v33, 0.0  ;;  %v5835_v36 = vmax.f32 %v13926_v0, 0.0  ;;  %v13956_v44 = vadd.f32 %v13809_v4, %v15292_v53  ;;  %v8880_v4 = vld [vmem:[%s14773_s3 + $0x400] sm:$0xf] }
 0xd61   : > { %v5752_v12 = vpop.f32.mrf.mxu0  ;;  %v5832_v5 = vmax.f32 %v13942_v7, 0.0 }
 0xd62   : > { %v5753_v34 = vadd.f32 %v5752_v12, %v5664_v6  ;;  %v13894_v6 = vadd.f32 %v5748_v30, %v13091_v15  ;;  %v13904_v12 = vadd.f32 %v5743_v10, %v13101_v56  ;;  %v13919_v56 = vadd.f32 %v13845_v20, %v13116_v32 }
 0xd63   : > { %v5865_v32 = vpack.c.bf16 %v5838_v24, %v5837_v45  ;;  %v13936_v20 = vadd.f32 %v13831_v22, %v13133_v40  ;;  %v9482_v45 = vld [vmem:[%s14773_s3 + $0x424] sm:$0xf0] }
 0xd64   : > { %5791 = vmatmul.bf16.gmra.mxu0 %v8813_v48  ;;  %v13880_v37 = vadd.f32 %v5753_v34, %v13077_v27  ;;  %15288 = vst [vmem:[#allocation136_spill] sm:$0xff] %v13904_v12  ;;  %v5841_v15 = vmax.f32 %v13894_v6, 0.0  ;;  %v5839_v54 = vmax.f32 %v13904_v12, 0.0  ;;  %v5836_v35 = vmax.f32 %v13919_v56, 0.0  ;;  %v13945_v61 = vpop.f32.mrf.mxu3  ;;  %v15293_v48 = vld [vmem:[#allocation68_spill] sm:$0xff] }
 0xd65   : > { %v5833_v40 = vmax.f32 %v13936_v20, 0.0  ;;  %v13961_v58 = vadd.f32 %v13806_v50, %v15293_v48  ;;  %v9478_v50 = vld [vmem:[%s14773_s3 + $0x404] sm:$0xf0] }
 0xd66   : > { %v5843_v27 = vmax.f32 %v13880_v37, 0.0  ;;  %v5866_v62 = vpack.c.bf16 %v5840_v43, %v5839_v54  ;;  %v5864_v28 = vpack.c.bf16 %v5836_v35, %v5835_v36  ;;  %v8881_v10 = vor.u32 %v9478_v50, %v8880_v4  ;;  %v9486_v48 = vld [vmem:[%s14773_s3 + $0x444] sm:$0xf0]  ;;  %v8920_v4 = vld [vmem:[%s14773_s3 + $0x450] sm:$0xf] }
 0xd67   : > { %v5863_v3 = vpack.c.bf16 %v5834_v18, %v5833_v40  ;;  %v5829_v2 = vmax.f32 %v13961_v58, 0.0  ;;  %v9488_v50 = vld [vmem:[%s14773_s3 + $0x454] sm:$0xf0] }
 0xd69   : > { %v5754_v16 = vpop.f32.mrf.mxu0 }
 0xd6a   : > { %v5755_v29 = vadd.f32 %v5754_v16, %v5666_v14  ;;  %v15291_v14 = vld [vmem:[#allocation35_spill] sm:$0xff] }
 0xd6b   : > { %v13949_v55 = vadd.f32 %v13818_v1, %v15291_v14  ;;  %v5830_v1 = vmax.f32 %v13956_v44, 0.0 }
 0xd6c   : > { %v13887_v51 = vadd.f32 %v5755_v29, %v13084_v52  ;;  %v5842_v52 = vmax.f32 %v13884_v19, 0.0  ;;  %v5683_v57 = vpop.f32.mrf.mxu3 }
 0xd6d   : > { %v5831_v34 = vmax.f32 %v13949_v55, 0.0  ;;  %v5861_v59 = vpack.c.bf16 %v5830_v1, %v5829_v2 }
 0xd6e   : > { %v5844_v38 = vmax.f32 %v13887_v51, 0.0  ;;  %v5867_v8 = vpack.c.bf16 %v5842_v52, %v5841_v15 }
 0xd6f   : > { %v5862_v49 = vpack.c.bf16 %v5832_v5, %v5831_v34 }
 0xd70   : > { %v5868_v16 = vpack.c.bf16 %v5844_v38, %v5843_v27  ;;  %v5679_v27 = vadd.f32 %v5678_v23, %v13795_v41  ;;  %v5684_v41 = vadd.f32 %v5683_v57, %v13753_v46 }
 0xd71   : > { %v5757_v31 = vpop.f32.mrf.mxu0 }
 0xd72   : > { %v13907_v30 = vadd.f32 %v5757_v31, %v5669_v47  ;;  %6263 = vmatpush.bf16.msrb.mxu1 %v5868_v16  ;;  %v8888_v16 = vld [vmem:[%s14773_s3 + $0x410] sm:$0xf]  ;;  %v9480_v31 = vld [vmem:[%s14773_s3 + $0x414] sm:$0xf0] }
 0xd73   : > { %v8889_v15 = vor.u32 %v9480_v31, %v8888_v16 }
 0xd74   : > { %v13977_v60 = vpop.f32.mrf.mxu3 }
 0xd76   : > { %6264 = vmatpush.bf16.msrb.mxu1 %v5867_v8 }
 0xd79   : > { %v13922_v17 = vpop.f32.mrf.mxu0 }
 0xd7a   : > { %6265 = vmatpush.bf16.msrb.mxu1 %v5866_v62  ;;  %v8896_v62 = vld [vmem:[%s14773_s3 + $0x420] sm:$0xf] }
 0xd7b   : > { %v8897_v35 = vor.u32 %v9482_v45, %v8896_v62 }
 0xd7c   : > { %v5688_v43 = vpop.f32.mrf.mxu3 }
 0xd7e   : > { %6266 = vmatpush.bf16.msrb.mxu1 %v5865_v32  ;;  %v5689_v32 = vadd.f32 %v5688_v43, %v13729_v21  ;;  %v8912_v21 = vld [vmem:[%s14773_s3 + $0x440] sm:$0xf] }
 0xd7f   : > { %v8913_v34 = vor.u32 %v9486_v48, %v8912_v21 }
 0xd81   : > { %v5762_v13 = vpop.f32.mrf.mxu0 }
 0xd82   : > { %v13952_v22 = vadd.f32 %v5762_v13, %v5674_v9  ;;  %6267 = vmatpush.bf16.msrb.mxu1 %v5864_v28  ;;  %v8904_v28 = vld [vmem:[%s14773_s3 + $0x430] sm:$0xf]  ;;  %v9484_v13 = vld [vmem:[%s14773_s3 + $0x434] sm:$0xf0] }
 0xd83   : > { %v8905_v40 = vor.u32 %v9484_v13, %v8904_v28  ;;  %v15297_v28 = vld [vmem:[#allocation69_spill] sm:$0xff] }
 0xd84   : > { %v5690_v23 = vpop.f32.mrf.mxu3 }
 0xd86   : > { %6268 = vmatpush.bf16.msrb.mxu1 %v5863_v3 }
 0xd89   : > { %v13965_v29 = vpop.f32.mrf.mxu0 }
 0xd8a   : > { %6269 = vmatpush.bf16.msrb.mxu1 %v5862_v49 }
 0xd8c   : > { %v5693_v9 = vpop.f32.mrf.mxu3 }
 0xd8e   : > { %6270 = vmatpush.bf16.msrb.mxu1 %v5861_v59  ;;  %v8921_v59 = vor.u32 %v9488_v50, %v8920_v4 }
 0xd91   : > { %v5767_v38 = vpop.f32.mrf.mxu0  ;;  %6271 = vmatmul.bf16.vlgmr.msrb.gmra.mxu1 %v8881_v10 }
 0xd92   : > { %v13975_v47 = vadd.f32 %v5767_v38, %v5679_v27 }
 0xd94   : > { %v5695_v14 = vpop.f32.mrf.mxu3 }
 0xd99   : > { %v13979_v52 = vpop.f32.mrf.mxu0 }
 0xd9c   : > { %v5698_v5 = vpop.f32.mrf.mxu3 }
 0xda1   : > { %v5772_v8 = vpop.f32.mrf.mxu0  ;;  %6276 = vmatmul.bf16.gmra.mxu1 %v8889_v15  ;;  %v15294_v15 = vld [vmem:[#allocation93_spill] sm:$0xff] }
 0xda2   : > { %v13988_v54 = vadd.f32 %v5772_v8, %v5684_v41  ;;  %v5699_v43 = vadd.f32 %v5698_v5, %v15294_v15  ;;  %v15295_v41 = vld [vmem:[#allocation66_spill] sm:$0xff]  ;;  %v15299_v5 = vld [vmem:[#allocation84_spill] sm:$0xff] }
 0xda3   : > { %v5694_v21 = vadd.f32 %v5693_v9, %v15299_v5  ;;  %v15307_v9 = vld [vmem:[#allocation55_spill] sm:$0xff]  ;;  %v15317_v5 = vld [vmem:[#allocation57_spill] sm:$0xff] }
 0xda4   : > { %v5700_v1 = vpop.f32.mrf.mxu3 }
 0xda5   : > { %v5701_v16 = vadd.f32 %v5700_v1, %v13731_v26  ;;  %v9490_v26 = vld [vmem:[%s14773_s3 + $0x464] sm:$0xf0] }
 0xda9   : > { %v13990_v24 = vpop.f32.mrf.mxu0 }
 0xdac   : > { %v5703_v57 = vpop.f32.mrf.mxu3 }
 0xdad   : > { %v5704_v27 = vadd.f32 %v5703_v57, %v13669_v39  ;;  %v8928_v39 = vld [vmem:[%s14773_s3 + $0x460] sm:$0xf] }
 0xdae   : > { %v8929_v50 = vor.u32 %v9490_v26, %v8928_v39 }
 0xdb1   : > { %v5777_v36 = vpop.f32.mrf.mxu0  ;;  %6281 = vmatmul.bf16.gmra.mxu1 %v8897_v35  ;;  %v15296_v35 = vld [vmem:[#allocation88_spill] sm:$0xff] }
 0xdb2   : > { %v5778_v46 = vadd.f32 %v5777_v36, %v5689_v32  ;;  %v5696_v32 = vadd.f32 %v5695_v14, %v15296_v35  ;;  %v15302_v14 = vld [vmem:[#allocation65_spill] sm:$0xff] }
 0xdb4   : > { %v5705_v38 = vpop.f32.mrf.mxu3 }
 0xdb5   : > { %v5706_v8 = vadd.f32 %v5705_v38, %v15295_v41  ;;  %v15310_v41 = vld [vmem:[#allocation58_spill] sm:$0xff] }
 0xdb9   : > { %v5779_v18 = vpop.f32.mrf.mxu0 }
 0xdc1   : > { %v5782_v53 = vpop.f32.mrf.mxu0  ;;  %6286 = vmatmul.bf16.gmra.mxu1 %v8905_v40 }
 0xdc2   : > { %v5783_v57 = vadd.f32 %v5782_v53, %v5694_v21 }
 0xdc4   : > { %v14051_v53 = vadd.f32 %v5783_v57, %v15310_v41  ;;  %v15322_v57 = vld [vmem:[#allocation64_spill] sm:$0xff] }
 0xdc6   : > { %15311 = vst [vmem:[#allocation8_spill] sm:$0xff] %v14051_v53 }
 0xdc9   : > { %v5784_v3 = vpop.f32.mrf.mxu0 }
 0xdca   : > { %v5785_v48 = vadd.f32 %v5784_v3, %v5696_v32 }
 0xdcc   : > { %v14045_v3 = vadd.f32 %v5785_v48, %v15307_v9 }
 0xdce   : > { %15308 = vst [vmem:[#allocation51_spill] sm:$0xff] %v14045_v3  ;;  %v5856_v35 = vmax.f32 %v14045_v3, 0.0 }
 0xdd1   : > { %v5787_v49 = vpop.f32.mrf.mxu0  ;;  %6291 = vmatmul.bf16.gmra.mxu1 %v8913_v34  ;;  %v15300_v34 = vld [vmem:[#allocation67_spill] sm:$0xff] }
 0xdd2   : > { %v5788_v36 = vadd.f32 %v5787_v49, %v5699_v43  ;;  %v15309_v43 = vld [vmem:[#allocation80_spill] sm:$0xff] }
 0xdd9   : > { %v5789_v2 = vpop.f32.mrf.mxu0 }
 0xdda   : > { %v5790_v62 = vadd.f32 %v5789_v2, %v5701_v16  ;;  %v15304_v2 = vld [vmem:[#allocation92_spill] sm:$0xff] }
 0xddb   : > { %v5691_v4 = vadd.f32 %v5690_v23, %v15304_v2  ;;  %v5686_v23 = vadd.f32 %v13977_v60, %v15309_v43  ;;  %v5855_v60 = vmax.f32 %v14051_v53, 0.0  ;;  %v15320_v2 = vld [vmem:[#allocation56_spill] sm:$0xff] }
 0xddc   : > { %v14033_v1 = vadd.f32 %v5790_v62, %v15300_v34  ;;  %v15319_v34 = vld [vmem:[#allocation76_spill] sm:$0xff] }
 0xddd   : > { %v5780_v16 = vadd.f32 %v5779_v18, %v5691_v4  ;;  %v5775_v62 = vadd.f32 %v13990_v24, %v5686_v23  ;;  %v5874_v48 = vpack.c.bf16 %v5856_v35, %v5855_v60  ;;  %v9492_v4 = vld [vmem:[%s14773_s3 + $0x474] sm:$0xf0] }
 0xdde   : > { %15301 = vst [vmem:[#allocation85_spill] sm:$0xff] %v14033_v1 }
 0xddf   : > { %v14067_v21 = vadd.f32 %v5775_v62, %v15317_v5 }
 0xde1   : > { %v5792_v10 = vpop.f32.mrf.mxu0  ;;  %6296 = vmatmul.bf16.gmra.mxu1 %v8921_v59  ;;  %v15305_v59 = vld [vmem:[#allocation60_spill] sm:$0xff]  ;;  %15318 = vst [vmem:[#allocation11_spill] sm:$0xff] %v14067_v21 }
 0xde2   : > { %v5793_v31 = vadd.f32 %v5792_v10, %v5704_v27  ;;  %v14040_v10 = vadd.f32 %v5788_v36, %v15305_v59  ;;  %v15314_v36 = vld [vmem:[#allocation72_spill] sm:$0xff] }
 0xde4   : > { %v14023_v13 = vadd.f32 %v5793_v31, %v15297_v28  ;;  %15306 = vst [vmem:[#allocation97_spill] sm:$0xff] %v14040_v10  ;;  %v5858_v31 = vmax.f32 %v14033_v1, 0.0  ;;  %v5681_v28 = vadd.f32 %v13945_v61, %v15314_v36  ;;  %v14074_v61 = vadd.f32 %v13988_v54, %v15320_v2  ;;  %v9495_v1 = vld [vmem:[%s14773_s3 + $0x494] sm:$0xf] }
 0xde6   : > { %15298 = vst [vmem:[#allocation5_spill] sm:$0xff] %v14023_v13  ;;  %v5859_v27 = vmax.f32 %v14023_v13, 0.0  ;;  %v5770_v26 = vadd.f32 %v13979_v52, %v5681_v28  ;;  %v8936_v52 = vld [vmem:[%s14773_s3 + $0x470] sm:$0xf]  ;;  %v5851_v43 = vmax.f32 %v14074_v61, 0.0 }
 0xde7   : > { %15321 = vst [vmem:[#allocation13_spill] sm:$0xff] %v14074_v61 }
 0xde8   : > { %v14085_v59 = vadd.f32 %v5770_v26, %v15322_v57  ;;  %v9479_v57 = vld [vmem:[%s14773_s3 + $0x414] sm:$0xf] }
 0xde9   : > { %v5794_v45 = vpop.f32.mrf.mxu0 }
 0xdea   : > { %v5795_v40 = vadd.f32 %v5794_v45, %v5706_v8  ;;  %v5857_v8 = vmax.f32 %v14040_v10, 0.0  ;;  %v15312_v45 = vld [vmem:[#allocation53_spill] sm:$0xff]  ;;  %15323 = vst [vmem:[#allocation14_spill] sm:$0xff] %v14085_v59 }
 0xdeb   : > { %v14056_v18 = vadd.f32 %v5780_v16, %v15312_v45  ;;  %v15324_v16 = vld [vmem:[#allocation73_spill] sm:$0xff]  ;;  %v15329_v45 = vld [vmem:[#allocation59_spill] sm:$0xff] }
 0xdec   : > { %v14036_v49 = vadd.f32 %v5795_v40, %v15302_v14  ;;  %v5875_v32 = vpack.c.bf16 %v5858_v31, %v5857_v8  ;;  %v15315_v40 = vld [vmem:[#allocation54_spill] sm:$0xff]  ;;  %v5676_v14 = vadd.f32 %v13891_v11, %v15319_v34  ;;  %v5852_v11 = vmax.f32 %v14067_v21, 0.0  ;;  %v15325_v31 = vld [vmem:[#allocation61_spill] sm:$0xff]  ;;  %v9494_v34 = vld [vmem:[%s14773_s3 + $0x484] sm:$0xf0] }
 0xded   : > { %15313 = vst [vmem:[#allocation7_spill] sm:$0xff] %v14056_v18  ;;  %v14062_v39 = vadd.f32 %v5778_v46, %v15315_v40  ;;  %v5854_v24 = vmax.f32 %v14056_v18, 0.0  ;;  %v5850_v8 = vmax.f32 %v14085_v59, 0.0  ;;  %v14101_v35 = vadd.f32 %v13952_v22, %v15329_v45  ;;  %v15333_v40 = vld [vmem:[#allocation70_spill] sm:$0xff]  ;;  %v9493_v18 = vld [vmem:[%s14773_s3 + $0x484] sm:$0xf] }
 0xdee   : > { %15303 = vst [vmem:[#allocation6_spill] sm:$0xff] %v14036_v49  ;;  %v5860_v38 = vmax.f32 %v14036_v49, 0.0  ;;  %v5872_v62 = vpack.c.bf16 %v5852_v11, %v5851_v43  ;;  %v14110_v60 = vadd.f32 %v13907_v30, %v15333_v40  ;;  %v9477_v30 = vld [vmem:[%s14773_s3 + $0x404] sm:$0xf]  ;;  %v8890_v11 = vld [vmem:[%s14773_s3 + $0x418] sm:$0xf0] }
 0xdef   : > { %15316 = vst [vmem:[#allocation10_spill] sm:$0xff] %v14062_v39  ;;  %v5853_v46 = vmax.f32 %v14062_v39, 0.0  ;;  %v5847_v26 = vmax.f32 %v14101_v35, 0.0  ;;  %v8906_v45 = vld [vmem:[%s14773_s3 + $0x438] sm:$0xf0] }
 0xdf0   : > { %v5876_v15 = vpack.c.bf16 %v5860_v38, %v5859_v27  ;;  %v5387_v27 = vpop.permute.xlu0 %5386  ;;  %v8937_v38 = vor.u32 %v9492_v4, %v8936_v52  ;;  %15330 = vst [vmem:[#allocation49_spill] sm:$0xff] %v14101_v35  ;;  %v8952_v4 = vld [vmem:[%s14773_s3 + $0x490] sm:$0xf]  ;;  %v9497_v35 = vld [vmem:[%s14773_s3 + $0x4a4] sm:$0xf] }
 0xdf1   : > { %6301 = vmatmul.bf16.gmra.mxu1 %v8929_v50  ;;  %v5765_v50 = vadd.f32 %v13965_v29, %v5676_v14  ;;  %v5873_v54 = vpack.c.bf16 %v5854_v24, %v5853_v46  ;;  %v5671_v9 = vadd.f32 %v15324_v16, %v5387_v27  ;;  %v15327_v29 = vld [vmem:[#allocation63_spill] sm:$0xff]  ;;  %15334 = vst [vmem:[#allocation24_spill] sm:$0xff] %v14110_v60  ;;  %v5845_v24 = vmax.f32 %v14110_v60, 0.0  ;;  %v8882_v14 = vld [vmem:[%s14773_s3 + $0x408] sm:$0xf0] }
 0xdf2   : > { %6352 = vmatpush.bf16.msrb.mxu2 %v5876_v15  ;;  %v14091_v15 = vadd.f32 %v13975_v47, %v15325_v31  ;;  %v15331_v47 = vld [vmem:[#allocation62_spill] sm:$0xff]  ;;  %v8885_v52 = vor.u32 %v9477_v30, %v8882_v14  ;;  %v8893_v27 = vor.u32 %v9479_v57, %v8890_v11  ;;  %v9498_v16 = vld [vmem:[%s14773_s3 + $0x4a4] sm:$0xf0]  ;;  %v8898_v31 = vld [vmem:[%s14773_s3 + $0x428] sm:$0xf0] }
 0xdf3   : > { %v5760_v23 = vadd.f32 %v13922_v17, %v5671_v9  ;;  %v14096_v41 = vadd.f32 %v5765_v50, %v15327_v29  ;;  %v9496_v50 = vld [vmem:[%s14773_s3 + $0x494] sm:$0xf0]  ;;  %v9481_v9 = vld [vmem:[%s14773_s3 + $0x424] sm:$0xf]  ;;  %v8968_v29 = vld [vmem:[%s14773_s3 + $0x4b0] sm:$0xf] }
 0xdf4   : > { %15326 = vst [vmem:[#allocation16_spill] sm:$0xff] %v14091_v15  ;;  %v9504_v57 = vld [vmem:[%s14773_s3 + $0x4d4] sm:$0xf0]  ;;  %v9487_v11 = vld [vmem:[%s14773_s3 + $0x454] sm:$0xf] }
 0xdf5   : > { %15328 = vst [vmem:[#allocation94_spill] sm:$0xff] %v14096_v41  ;;  %v14105_v36 = vadd.f32 %v5760_v23, %v15331_v47  ;;  %v5848_v28 = vmax.f32 %v14096_v41, 0.0  ;;  %v8901_v23 = vor.u32 %v9481_v9, %v8898_v31 }
 0xdf6   : > { %6353 = vmatpush.bf16.msrb.mxu2 %v5875_v32  ;;  %v5849_v32 = vmax.f32 %v14091_v15, 0.0 }
 0xdf7   : > { %15332 = vst [vmem:[#allocation21_spill] sm:$0xff] %v14105_v36  ;;  %v5846_v5 = vmax.f32 %v14105_v36, 0.0  ;;  %v5870_v22 = vpack.c.bf16 %v5848_v28, %v5847_v26  ;;  %v8976_v26 = vld [vmem:[%s14773_s3 + $0x4c0] sm:$0xf] }
 0xdf8   : > { %v5871_v17 = vpack.c.bf16 %v5850_v8, %v5849_v32  ;;  %v9500_v8 = vld [vmem:[%s14773_s3 + $0x4b4] sm:$0xf0] }
 0xdf9   : > { %v5869_v2 = vpack.c.bf16 %v5846_v5, %v5845_v24  ;;  %v8969_v47 = vor.u32 %v9500_v8, %v8968_v29  ;;  %v14172_v5 = vpop.permute.xlu1 %6020  ;;  %v9485_v24 = vld [vmem:[%s14773_s3 + $0x444] sm:$0xf]  ;;  %v8992_v29 = vld [vmem:[%s14773_s3 + $0x4e0] sm:$0xf] }
 0xdfa   : > { %6354 = vmatpush.bf16.msrb.mxu2 %v5874_v48  ;;  %v8944_v48 = vld [vmem:[%s14773_s3 + $0x480] sm:$0xf] }
 0xdfb   : > { %v8945_v46 = vor.u32 %v9494_v34, %v8944_v48  ;;  %v8914_v48 = vld [vmem:[%s14773_s3 + $0x448] sm:$0xf0] }
 0xdfc   : > { %v8917_v14 = vor.u32 %v9485_v24, %v8914_v48 }
 0xdfe   : > { %6355 = vmatpush.bf16.msrb.mxu2 %v5873_v54  ;;  %v8953_v54 = vor.u32 %v9496_v50, %v8952_v4  ;;  %v8984_v50 = vld [vmem:[%s14773_s3 + $0x4d0] sm:$0xf] }
 0xe01   : > { %6306 = vmatmul.bf16.gmra.mxu1 %v8937_v38  ;;  %v8960_v38 = vld [vmem:[%s14773_s3 + $0x4a0] sm:$0xf] }
 0xe02   : > { %6356 = vmatpush.bf16.msrb.mxu2 %v5872_v62  ;;  %v8961_v43 = vor.u32 %v9498_v16, %v8960_v38  ;;  %v9483_v62 = vld [vmem:[%s14773_s3 + $0x434] sm:$0xf] }
 0xe03   : > { %v8909_v28 = vor.u32 %v9483_v62, %v8906_v45  ;;  %v9506_v62 = vld [vmem:[%s14773_s3 + $0x4e4] sm:$0xf0]  ;;  %v9489_v45 = vld [vmem:[%s14773_s3 + $0x464] sm:$0xf] }
 0xe06   : > { %6357 = vmatpush.bf16.msrb.mxu2 %v5871_v17  ;;  %v14165_v17 = vpop.permute.xlu0 %6015 }
 0xe0a   : > { %6358 = vmatpush.bf16.msrb.mxu2 %v5870_v22  ;;  %v9502_v22 = vld [vmem:[%s14773_s3 + $0x4c4] sm:$0xf0] }
 0xe0b   : > { %v8977_v30 = vor.u32 %v9502_v22, %v8976_v26  ;;  %v8993_v26 = vor.u32 %v9506_v62, %v8992_v29 }
 0xe0e   : > { %6359 = vmatpush.bf16.msrb.mxu2 %v5869_v2  ;;  %v14163_v32 = vpop.f32.mrf.mxu1  ;;  %v14183_v34 = vpop.permute.xlu0 %6010 }
 0xe11   : > { %6311 = vmatmul.bf16.gmra.mxu1 %v8945_v46  ;;  %6360 = vmatmul.bf16.vlgmr.msrb.gmra.mxu2 %v8885_v52  ;;  %v14187_v46 = vpop.permute.xlu1 %5995 }
 0xe16   : > { %v14167_v40 = vpop.f32.mrf.mxu1  ;;  %v14189_v52 = vpop.permute.xlu0 %6095 }
 0xe19   : > { %v14205_v16 = vpop.permute.xlu1 %6100 }
 0xe1e   : > { %v14185_v2 = vpop.f32.mrf.mxu1  ;;  %v14207_v9 = vpop.permute.xlu0 %5990 }
 0xe21   : > { %6316 = vmatmul.bf16.gmra.mxu1 %v8953_v54  ;;  %6365 = vmatmul.bf16.gmra.mxu2 %v8893_v27  ;;  %v8922_v54 = vld [vmem:[%s14773_s3 + $0x458] sm:$0xf0]  ;;  %v8985_v27 = vor.u32 %v9504_v57, %v8984_v50  ;;  %v9000_v50 = vld [vmem:[%s14773_s3 + $0x4f0] sm:$0xf] }
 0xe22   : > { %v8925_v38 = vor.u32 %v9487_v11, %v8922_v54  ;;  %v9508_v11 = vld [vmem:[%s14773_s3 + $0x4f4] sm:$0xf0]  ;;  %v9491_v54 = vld [vmem:[%s14773_s3 + $0x474] sm:$0xf] }
 0xe23   : > { %v9001_v29 = vor.u32 %v9508_v11, %v9000_v50  ;;  %v8946_v50 = vld [vmem:[%s14773_s3 + $0x488] sm:$0xf0] }
 0xe24   : > { %v8949_v11 = vor.u32 %v9493_v18, %v8946_v50  ;;  %v8954_v18 = vld [vmem:[%s14773_s3 + $0x498] sm:$0xf0] }
 0xe26   : > { %v14191_v4 = vpop.f32.mrf.mxu1  ;;  %v14218_v8 = vpop.permute.xlu0 %5975 }
 0xe2e   : > { %v14209_v31 = vpop.f32.mrf.mxu1 }
 0xe31   : > { %6321 = vmatmul.bf16.gmra.mxu1 %v8961_v43  ;;  %6370 = vmatmul.bf16.gmra.mxu2 %v8901_v23  ;;  %v14211_v43 = vpop.permute.xlu2 %6005  ;;  %v14213_v23 = vpop.permute.xlu1 %6085 }
 0xe39   : > { %v14231_v24 = vpop.permute.xlu2 %6000  ;;  %v14233_v48 = vpop.permute.xlu1 %5980 }
 0xe41   : > { %6326 = vmatmul.bf16.gmra.mxu1 %v8969_v47  ;;  %6375 = vmatmul.bf16.gmra.mxu2 %v8909_v28  ;;  %v8930_v47 = vld [vmem:[%s14773_s3 + $0x468] sm:$0xf0]  ;;  %v14229_v28 = vpop.f32.mrf.mxu1  ;;  %v14242_v57 = vpop.permute.xlu2 %5985 }
 0xe42   : > { %v8933_v22 = vor.u32 %v9489_v45, %v8930_v47 }
 0xe51   : > { %6331 = vmatmul.bf16.gmra.mxu1 %v8977_v30  ;;  %6380 = vmatmul.bf16.gmra.mxu2 %v8917_v14  ;;  %v14235_v30 = vpop.permute.xlu0 %6080  ;;  %v14237_v14 = vpop.f32.mrf.mxu1 }
 0xe59   : > { %v14253_v45 = vpop.permute.xlu0 %6065  ;;  %v14255_v47 = vpop.f32.mrf.mxu1 }
 0xe61   : > { %6336 = vmatmul.bf16.gmra.mxu1 %v8985_v27  ;;  %6385 = vmatmul.bf16.gmra.mxu2 %v8925_v38  ;;  %v8938_v27 = vld [vmem:[%s14773_s3 + $0x478] sm:$0xf0]  ;;  %v5966_v38 = vpop.permute.xlu1 %5965  ;;  %v5961_v39 = vpop.permute.xlu0 %5960 }
 0xe62   : > { %v8941_v62 = vor.u32 %v9491_v54, %v8938_v27 }
 0xe71   : > { %6341 = vmatmul.bf16.gmra.mxu1 %v8993_v26  ;;  %6390 = vmatmul.bf16.gmra.mxu2 %v8933_v22  ;;  %v14257_v26 = vpop.permute.xlu2 %6090  ;;  %v14259_v22 = vpop.permute.xlu1 %6070 }
 0xe79   : > { %v14267_v54 = vpop.permute.xlu2 %6075  ;;  %v14269_v27 = vpop.permute.xlu1 %6055 }
 0xe81   : > { %6346 = vmatmul.bf16.gmra.mxu1 %v9001_v29  ;;  %6395 = vmatmul.bf16.gmra.mxu2 %v8941_v62  ;;  %v5946_v29 = vpop.permute.xlu0 %5945  ;;  %v5971_v10 = vpop.permute.xlu2 %5970 }
 0xe82   : > { %v6273_v62 = vadd.f32 %v14163_v32, %v5946_v29  ;;  %v5951_v49 = vpop.permute.xlu1 %5950  ;;  %v6292_v29 = vpop.f32.mrf.mxu1 }
 0xe83   : > { %v6275_v50 = vadd.f32 %v14167_v40, %v5951_v49 }
 0xe8a   : > { %v14289_v49 = vpop.f32.mrf.mxu1  ;;  %v6036_v12 = vpop.permute.xlu1 %6035 }
 0xe91   : > { %6400 = vmatmul.bf16.gmra.mxu2 %v8949_v11  ;;  %v8957_v11 = vor.u32 %v9495_v1, %v8954_v18  ;;  %v6280_v1 = vadd.f32 %v14191_v4, %v5961_v39  ;;  %v9499_v39 = vld [vmem:[%s14773_s3 + $0x4b4] sm:$0xf]  ;;  %v8970_v4 = vld [vmem:[%s14773_s3 + $0x4b8] sm:$0xf0] }
 0xe94   : > { %v6361_v53 = vpop.f32.mrf.mxu2 }
 0xe95   : > { %v6362_v3 = vadd.f32 %v6361_v53, %v6273_v62  ;;  %v5956_v53 = vpop.permute.xlu2 %5955 }
 0xe96   : > { %v6278_v62 = vadd.f32 %v14185_v2, %v5956_v53 }
 0xe97   : > { %v6441_v61 = vmax.f32 %v6362_v3, 0.0 }
 0xe9c   : > { %v6363_v13 = vpop.f32.mrf.mxu2 }
 0xe9d   : > { %v6364_v21 = vadd.f32 %v6363_v13, %v6275_v50  ;;  %v8962_v13 = vld [vmem:[%s14773_s3 + $0x4a8] sm:$0xf0] }
 0xe9f   : > { %v6442_v59 = vmax.f32 %v6364_v21, 0.0 }
 0xea1   : > { %6405 = vmatmul.bf16.gmra.mxu2 %v8957_v11  ;;  %v14279_v32 = vpack.c.bf16 %v6442_v59, %v6441_v61  ;;  %v8965_v61 = vor.u32 %v9497_v35, %v8962_v13  ;;  %v14294_v11 = vpop.f32.mrf.mxu1 }
 0xea4   : > { %v6366_v15 = vpop.f32.mrf.mxu2 }
 0xea5   : > { %v6367_v41 = vadd.f32 %v6366_v15, %v6278_v62  ;;  %v6283_v15 = vadd.f32 %v14209_v31, %v5966_v38  ;;  %v8973_v62 = vor.u32 %v9499_v39, %v8970_v4 }
 0xea7   : > { %v6443_v59 = vmax.f32 %v6367_v41, 0.0  ;;  %v6285_v41 = vadd.f32 %v14229_v28, %v5971_v10  ;;  %v8978_v10 = vld [vmem:[%s14773_s3 + $0x4c8] sm:$0xf0]  ;;  %v6290_v28 = vadd.f32 %v14255_v47, %v14233_v48  ;;  %v8986_v48 = vld [vmem:[%s14773_s3 + $0x4d8] sm:$0xf0] }
 0xea9   : > { %v6299_v31 = vpop.f32.mrf.mxu1 }
 0xeaa   : > { %v6300_v33 = vadd.f32 %v6299_v31, %v14231_v24 }
 0xeac   : > { %v6368_v3 = vpop.f32.mrf.mxu2 }
 0xead   : > { %v6369_v21 = vadd.f32 %v6368_v3, %v6280_v1  ;;  %v6288_v3 = vadd.f32 %v14237_v14, %v14218_v8  ;;  %v6293_v14 = vadd.f32 %v6292_v29, %v14242_v57  ;;  %v9505_v57 = vld [vmem:[%s14773_s3 + $0x4e4] sm:$0xf]  ;;  %v8994_v29 = vld [vmem:[%s14773_s3 + $0x4e8] sm:$0xf0] }
 0xeaf   : > { %v6444_v40 = vmax.f32 %v6369_v21, 0.0 }
 0xeb1   : > { %6410 = vmatmul.bf16.gmra.mxu2 %v8965_v61  ;;  %v14291_v2 = vpack.c.bf16 %v6444_v40, %v6443_v59  ;;  %v6302_v59 = vpop.f32.mrf.mxu1  ;;  %v9501_v40 = vld [vmem:[%s14773_s3 + $0x4c4] sm:$0xf] }
 0xeb2   : > { %v6303_v36 = vadd.f32 %v6302_v59, %v14211_v43 }
 0xeb4   : > { %v6371_v18 = vpop.f32.mrf.mxu2 }
 0xeb5   : > { %v6372_v50 = vadd.f32 %v6371_v18, %v6283_v15 }
 0xeb7   : > { %v6445_v13 = vmax.f32 %v6372_v50, 0.0  ;;  %v8981_v50 = vor.u32 %v9501_v40, %v8978_v10  ;;  %v8997_v40 = vor.u32 %v9505_v57, %v8994_v29 }
 0xebc   : > { %v6373_v35 = vpop.f32.mrf.mxu2 }
 0xebd   : > { %v6374_v53 = vadd.f32 %v6373_v35, %v6285_v41  ;;  %v6304_v41 = vpop.f32.mrf.mxu1 }
 0xebf   : > { %v6446_v1 = vmax.f32 %v6374_v53, 0.0 }
 0xec1   : > { %6415 = vmatmul.bf16.gmra.mxu2 %v8973_v62  ;;  %v14303_v38 = vpack.c.bf16 %v6446_v1, %v6445_v13  ;;  %v9503_v62 = vld [vmem:[%s14773_s3 + $0x4d4] sm:$0xf] }
 0xec2   : > { %v8989_v13 = vor.u32 %v9503_v62, %v8986_v48  ;;  %v14338_v62 = vpop.permute.xlu0 %6050 }
 0xec4   : > { %v6376_v21 = vpop.f32.mrf.mxu2 }
 0xec5   : > { %v6377_v61 = vadd.f32 %v6376_v21, %v6288_v3  ;;  %v6307_v1 = vpop.f32.mrf.mxu1 }
 0xec6   : > { %v6308_v48 = vadd.f32 %v6307_v1, %v14165_v17  ;;  %v6298_v17 = vadd.f32 %v14294_v11, %v14187_v46 }
 0xec7   : > { %v6447_v39 = vmax.f32 %v6377_v61, 0.0 }
 0xecc   : > { %v6378_v15 = vpop.f32.mrf.mxu2 }
 0xecd   : > { %v6379_v18 = vadd.f32 %v6378_v15, %v6290_v28  ;;  %v6309_v21 = vpop.f32.mrf.mxu1  ;;  %v9507_v15 = vld [vmem:[%s14773_s3 + $0x4f4] sm:$0xf] }
 0xece   : > { %v6310_v57 = vadd.f32 %v6309_v21, %v14172_v5  ;;  %v6026_v5 = vpop.permute.xlu0 %6025  ;;  %v6295_v21 = vadd.f32 %v14289_v49, %v14207_v9 }
 0xecf   : > { %v6448_v4 = vmax.f32 %v6379_v18, 0.0  ;;  %v9002_v18 = vld [vmem:[%s14773_s3 + $0x4f8] sm:$0xf0] }
 0xed1   : > { %6420 = vmatmul.bf16.gmra.mxu2 %v8981_v50  ;;  %v14315_v8 = vpack.c.bf16 %v6448_v4, %v6447_v39  ;;  %v9005_v4 = vor.u32 %v9507_v15, %v9002_v18 }
 0xed4   : > { %v6381_v35 = vpop.f32.mrf.mxu2 }
 0xed5   : > { %v14318_v53 = vadd.f32 %v6381_v35, %v6293_v14  ;;  %v6312_v10 = vpop.f32.mrf.mxu1 }
 0xed6   : > { %v6313_v43 = vadd.f32 %v6312_v10, %v6026_v5 }
 0xedc   : > { %v6383_v47 = vpop.f32.mrf.mxu2 }
 0xedd   : > { %v6314_v50 = vpop.f32.mrf.mxu1 }
 0xee1   : > { %6425 = vmatmul.bf16.gmra.mxu2 %v8989_v13  ;;  %v6305_v13 = vadd.f32 %v6304_v41, %v14183_v34 }
 0xee4   : > { %v6386_v3 = vpop.f32.mrf.mxu2 }
 0xee5   : > { %v6317_v35 = vpop.f32.mrf.mxu1  ;;  %v6387_v59 = vadd.f32 %v6386_v3, %v6298_v17  ;;  %v9072_v17 = vld [vmem:[%s14775_s5 + $0x400] sm:$0xf] }
 0xeec   : > { %v6388_v61 = vpop.f32.mrf.mxu2 }
 0xeed   : > { %v6319_v25 = vpop.f32.mrf.mxu1  ;;  %v6389_v1 = vadd.f32 %v6388_v61, %v6300_v33 }
 0xeef   : > { %v6452_v31 = vmax.f32 %v6389_v1, 0.0  ;;  %v9510_v1 = vld [vmem:[%s14775_s5 + $0x404] sm:$0xf0] }
 0xef1   : > { %6430 = vmatmul.bf16.gmra.mxu2 %v8997_v40 }
 0xef4   : > { %v6391_v28 = vpop.f32.mrf.mxu2 }
 0xef5   : > { %v6392_v15 = vadd.f32 %v6391_v28, %v6303_v36  ;;  %v6384_v36 = vadd.f32 %v6383_v47, %v6295_v21  ;;  %v6322_v11 = vpop.f32.mrf.mxu1 }
 0xef7   : > { %v6450_v46 = vmax.f32 %v6384_v36, 0.0 }
 0xefc   : > { %v6393_v39 = vpop.f32.mrf.mxu2 }
 0xefd   : > { %v6394_v60 = vadd.f32 %v6393_v39, %v6305_v13  ;;  %v6453_v39 = vmax.f32 %v6392_v15, 0.0  ;;  %v6449_v13 = vmax.f32 %v14318_v53, 0.0  ;;  %v6324_v15 = vpop.f32.mrf.mxu1 }
 0xeff   : > { %v6454_v34 = vmax.f32 %v6394_v60, 0.0  ;;  %v6031_v60 = vpop.permute.xlu1 %6030  ;;  %v6477_v3 = vpack.c.bf16 %v6450_v46, %v6449_v13  ;;  %v9514_v13 = vld [vmem:[%s14775_s5 + $0x424] sm:$0xf0] }
 0xf00   : > { %v6315_v61 = vadd.f32 %v6314_v50, %v6031_v60 }
 0xf01   : > { %6435 = vmatmul.bf16.gmra.mxu2 %v9005_v4 }
 0xf04   : > { %v6396_v14 = vpop.f32.mrf.mxu2 }
 0xf05   : > { %v6397_v29 = vadd.f32 %v6396_v14, %v6308_v48  ;;  %v6061_v14 = vpop.permute.xlu2 %6060  ;;  %v6451_v48 = vmax.f32 %v6387_v59, 0.0  ;;  %v6325_v59 = vadd.f32 %v6324_v15, %v14338_v62 }
 0xf07   : > { %v6455_v18 = vmax.f32 %v6397_v29, 0.0  ;;  %v6478_v33 = vpack.c.bf16 %v6452_v31, %v6451_v48 }
 0xf0c   : > { %v6398_v40 = vpop.f32.mrf.mxu2 }
 0xf0d   : > { %v6399_v42 = vadd.f32 %v6398_v40, %v6310_v57  ;;  %v6046_v47 = vpop.permute.xlu2 %6045  ;;  %v6318_v40 = vadd.f32 %v6317_v35, %v6036_v12 }
 0xf0f   : > { %v6456_v4 = vmax.f32 %v6399_v42, 0.0  ;;  %v6479_v42 = vpack.c.bf16 %v6454_v34, %v6453_v39  ;;  %v9073_v34 = vor.u32 %v9510_v1, %v9072_v17  ;;  %v9080_v39 = vld [vmem:[%s14775_s5 + $0x410] sm:$0xf] }
 0xf11   : > { %v6480_v41 = vpack.c.bf16 %v6456_v4, %v6455_v18 }
 0xf13   : > { %6875 = vmatpush.bf16.msrb.mxu3 %v6480_v41 }
 0xf14   : > { %v6401_v24 = vpop.f32.mrf.mxu2 }
 0xf15   : > { %v6402_v28 = vadd.f32 %v6401_v24, %v6313_v43  ;;  %v6041_v50 = vpop.permute.xlu2 %6040  ;;  %v9512_v24 = vld [vmem:[%s14775_s5 + $0x414] sm:$0xf0] }
 0xf16   : > { %v6320_v53 = vadd.f32 %v6319_v25, %v6041_v50  ;;  %v6323_v25 = vadd.f32 %v6322_v11, %v6046_v47  ;;  %v9516_v50 = vld [vmem:[%s14775_s5 + $0x434] sm:$0xf0] }
 0xf17   : > { %6876 = vmatpush.bf16.msrb.mxu3 %v6479_v42  ;;  %v6457_v10 = vmax.f32 %v6402_v28, 0.0 }
 0xf1b   : > { %6877 = vmatpush.bf16.msrb.mxu3 %v6478_v33 }
 0xf1c   : > { %v6403_v9 = vpop.f32.mrf.mxu2 }
 0xf1d   : > { %v6404_v49 = vadd.f32 %v6403_v9, %v6315_v61  ;;  %v9088_v61 = vld [vmem:[%s14775_s5 + $0x420] sm:$0xf] }
 0xf1f   : > { %v6458_v57 = vmax.f32 %v6404_v49, 0.0  ;;  %6878 = vmatpush.bf16.msrb.mxu3 %v6477_v3 }
 0xf21   : > { %v14350_v29 = vpack.c.bf16 %v6458_v57, %v6457_v10  ;;  %v9089_v10 = vor.u32 %v9514_v13, %v9088_v61 }
 0xf23   : > { %6879 = vmatpush.bf16.msrb.mxu3 %v14315_v8  ;;  %v6327_v8 = vpop.f32.mrf.mxu1 }
 0xf24   : > { %v6406_v18 = vpop.f32.mrf.mxu2  ;;  %v6328_v33 = vadd.f32 %v6327_v8, %v14269_v27  ;;  %v9518_v8 = vld [vmem:[%s14775_s5 + $0x444] sm:$0xf0] }
 0xf25   : > { %v6407_v4 = vadd.f32 %v6406_v18, %v6318_v40 }
 0xf27   : > { %6880 = vmatpush.bf16.msrb.mxu3 %v14303_v38  ;;  %v6459_v41 = vmax.f32 %v6407_v4, 0.0  ;;  %v9096_v4 = vld [vmem:[%s14775_s5 + $0x430] sm:$0xf] }
 0xf28   : > { %v9097_v17 = vor.u32 %v9516_v50, %v9096_v4 }
 0xf2b   : > { %6881 = vmatpush.bf16.msrb.mxu3 %v14291_v2  ;;  %v6329_v43 = vpop.f32.mrf.mxu1 }
 0xf2c   : > { %v6408_v12 = vpop.f32.mrf.mxu2  ;;  %v6330_v11 = vadd.f32 %v6329_v43, %v6061_v14 }
 0xf2d   : > { %v6409_v35 = vadd.f32 %v6408_v12, %v6320_v53 }
 0xf2f   : > { %v6460_v5 = vmax.f32 %v6409_v35, 0.0  ;;  %6882 = vmatpush.bf16.msrb.mxu3 %v14279_v32  ;;  %v9081_v32 = vor.u32 %v9512_v24, %v9080_v39 }
 0xf31   : > { %v14362_v38 = vpack.c.bf16 %v6460_v5, %v6459_v41 }
 0xf32   : > { %6883 = vmatmul.bf16.vlgmr.msrb.gmra.mxu3 %v9073_v34 }
 0xf33   : > { %v6332_v46 = vpop.f32.mrf.mxu1 }
 0xf34   : > { %v6411_v2 = vpop.f32.mrf.mxu2  ;;  %v6333_v27 = vadd.f32 %v6332_v46, %v14253_v45  ;;  %v9104_v45 = vld [vmem:[%s14775_s5 + $0x440] sm:$0xf] }
 0xf35   : > { %v6412_v21 = vadd.f32 %v6411_v2, %v6323_v25  ;;  %v9105_v41 = vor.u32 %v9518_v8, %v9104_v45  ;;  %v9112_v2 = vld [vmem:[%s14775_s5 + $0x450] sm:$0xf]  ;;  %v9120_v46 = vld [vmem:[%s14775_s5 + $0x460] sm:$0xf] }
 0xf37   : > { %v6461_v42 = vmax.f32 %v6412_v21, 0.0  ;;  %v9520_v21 = vld [vmem:[%s14775_s5 + $0x454] sm:$0xf0] }
 0xf38   : > { %v9113_v39 = vor.u32 %v9520_v21, %v9112_v2  ;;  %v14448_v2 = vpop.permute.xlu2 %6707  ;;  %v9152_v21 = vld [vmem:[%s14775_s5 + $0x4a0] sm:$0xf] }
 0xf3b   : > { %v6334_v9 = vpop.f32.mrf.mxu1 }
 0xf3c   : > { %v6413_v36 = vpop.f32.mrf.mxu2 }
 0xf3d   : > { %v6414_v31 = vadd.f32 %v6413_v36, %v6325_v59 }
 0xf3f   : > { %v6462_v28 = vmax.f32 %v6414_v31, 0.0 }
 0xf41   : > { %v14371_v48 = vpack.c.bf16 %v6462_v28, %v6461_v42 }
 0xf42   : > { %6888 = vmatmul.bf16.gmra.mxu3 %v9081_v32 }
 0xf43   : > { %v6337_v18 = vpop.f32.mrf.mxu1 }
 0xf44   : > { %v6416_v62 = vpop.f32.mrf.mxu2 }
 0xf45   : > { %v6417_v60 = vadd.f32 %v6416_v62, %v6328_v33  ;;  %v9522_v33 = vld [vmem:[%s14775_s5 + $0x464] sm:$0xf0] }
 0xf46   : > { %v9121_v13 = vor.u32 %v9522_v33, %v9120_v46  ;;  %v9532_v46 = vld [vmem:[%s14775_s5 + $0x4b4] sm:$0xf0]  ;;  %v9515_v33 = vld [vmem:[%s14775_s5 + $0x434] sm:$0xf] }
 0xf47   : > { %v6463_v57 = vmax.f32 %v6417_v60, 0.0 }
 0xf4b   : > { %v6339_v1 = vpop.f32.mrf.mxu1 }
 0xf4c   : > { %v6418_v49 = vpop.f32.mrf.mxu2 }
 0xf4d   : > { %v6419_v3 = vadd.f32 %v6418_v49, %v6330_v11 }
 0xf4f   : > { %v6464_v47 = vmax.f32 %v6419_v3, 0.0  ;;  %v6338_v3 = vadd.f32 %v6337_v18, %v14267_v54  ;;  %v9128_v54 = vld [vmem:[%s14775_s5 + $0x470] sm:$0xf] }
 0xf51   : > { %v14380_v40 = vpack.c.bf16 %v6464_v47, %v6463_v57 }
 0xf52   : > { %6893 = vmatmul.bf16.gmra.mxu3 %v9089_v10 }
 0xf53   : > { %v6342_v35 = vpop.f32.mrf.mxu1 }
 0xf54   : > { %v6421_v14 = vpop.f32.mrf.mxu2  ;;  %v6343_v60 = vadd.f32 %v6342_v35, %v14213_v23 }
 0xf55   : > { %v6422_v15 = vadd.f32 %v6421_v14, %v6333_v27  ;;  %v6335_v27 = vadd.f32 %v6334_v9, %v14259_v22  ;;  %v9524_v22 = vld [vmem:[%s14775_s5 + $0x474] sm:$0xf0] }
 0xf56   : > { %v9129_v18 = vor.u32 %v9524_v22, %v9128_v54  ;;  %v9536_v54 = vld [vmem:[%s14775_s5 + $0x4d4] sm:$0xf0]  ;;  %v9519_v22 = vld [vmem:[%s14775_s5 + $0x454] sm:$0xf] }
 0xf57   : > { %v6465_v45 = vmax.f32 %v6422_v15, 0.0  ;;  %v9136_v15 = vld [vmem:[%s14775_s5 + $0x480] sm:$0xf] }
 0xf5b   : > { %v6344_v5 = vpop.f32.mrf.mxu1 }
 0xf5c   : > { %v6423_v53 = vpop.f32.mrf.mxu2  ;;  %v6345_v32 = vadd.f32 %v6344_v5, %v14257_v26  ;;  %v9082_v5 = vld [vmem:[%s14775_s5 + $0x418] sm:$0xf0] }
 0xf5d   : > { %v6424_v23 = vadd.f32 %v6423_v53, %v6335_v27  ;;  %v9526_v53 = vld [vmem:[%s14775_s5 + $0x484] sm:$0xf0] }
 0xf5e   : > { %v9137_v8 = vor.u32 %v9526_v53, %v9136_v15 }
 0xf62   : > { %6898 = vmatmul.bf16.gmra.mxu3 %v9097_v17 }
 0xf63   : > { %v6347_v59 = vpop.f32.mrf.mxu1 }
 0xf64   : > { %v6426_v12 = vpop.f32.mrf.mxu2  ;;  %v6348_v31 = vadd.f32 %v6347_v59, %v14189_v52  ;;  %v6340_v52 = vadd.f32 %v6339_v1, %v14235_v30  ;;  %v6466_v30 = vmax.f32 %v6424_v23, 0.0  ;;  %v9513_v59 = vld [vmem:[%s14775_s5 + $0x424] sm:$0xf] }
 0xf65   : > { %v6427_v14 = vadd.f32 %v6426_v12, %v6338_v3  ;;  %v9509_v12 = vld [vmem:[%s14775_s5 + $0x404] sm:$0xf]  ;;  %v14493_v3 = vpop.permute.xlu1 %6697 }
 0xf66   : > { %v6485_v9 = vpack.c.bf16 %v6466_v30, %v6465_v45 }
 0xf67   : > { %v6467_v35 = vmax.f32 %v6427_v14, 0.0 }
 0xf6b   : > { %v6349_v36 = vpop.f32.mrf.mxu1 }
 0xf6c   : > { %v6428_v34 = vpop.f32.mrf.mxu2  ;;  %v6350_v42 = vadd.f32 %v6349_v36, %v14205_v16 }
 0xf6d   : > { %v6429_v10 = vadd.f32 %v6428_v34, %v6340_v52  ;;  %v9528_v34 = vld [vmem:[%s14775_s5 + $0x494] sm:$0xf0] }
 0xf6f   : > { %v6468_v50 = vmax.f32 %v6429_v10, 0.0  ;;  %v9534_v10 = vld [vmem:[%s14775_s5 + $0x4c4] sm:$0xf0] }
 0xf71   : > { %v6486_v1 = vpack.c.bf16 %v6468_v50, %v6467_v35 }
 0xf72   : > { %6903 = vmatmul.bf16.gmra.mxu3 %v9105_v41  ;;  %v9511_v41 = vld [vmem:[%s14775_s5 + $0x414] sm:$0xf] }
 0xf74   : > { %v6431_v25 = vpop.f32.mrf.mxu2 }
 0xf75   : > { %v6432_v26 = vadd.f32 %v6431_v25, %v6343_v60 }
 0xf77   : > { %v6469_v4 = vmax.f32 %v6432_v26, 0.0 }
 0xf7c   : > { %v6433_v43 = vpop.f32.mrf.mxu2 }
 0xf7d   : > { %v6434_v11 = vadd.f32 %v6433_v43, %v6345_v32  ;;  %v9530_v43 = vld [vmem:[%s14775_s5 + $0x4a4] sm:$0xf0]  ;;  %v14464_v32 = vpop.permute.xlu2 %6702 }
 0xf7f   : > { %v6470_v57 = vmax.f32 %v6434_v11, 0.0 }
 0xf81   : > { %v6487_v17 = vpack.c.bf16 %v6470_v57, %v6469_v4  ;;  %v9517_v57 = vld [vmem:[%s14775_s5 + $0x444] sm:$0xf] }
 0xf82   : > { %6908 = vmatmul.bf16.gmra.mxu3 %v9113_v39  ;;  %v9090_v39 = vld [vmem:[%s14775_s5 + $0x428] sm:$0xf0] }
 0xf83   : > { %v9093_v36 = vor.u32 %v9513_v59, %v9090_v39 }
 0xf84   : > { %v6436_v24 = vpop.f32.mrf.mxu2 }
 0xf85   : > { %v6437_v28 = vadd.f32 %v6436_v24, %v6348_v31  ;;  %v9153_v24 = vor.u32 %v9530_v43, %v9152_v21  ;;  %v14462_v31 = vpop.permute.xlu0 %6712  ;;  %v14482_v11 = vpop.permute.xlu2 %6687 }
 0xf87   : > { %v6471_v49 = vmax.f32 %v6437_v28, 0.0 }
 0xf8c   : > { %v6438_v62 = vpop.f32.mrf.mxu2 }
 0xf8d   : > { %v6439_v61 = vadd.f32 %v6438_v62, %v6350_v42  ;;  %v9160_v42 = vld [vmem:[%s14775_s5 + $0x4b0] sm:$0xf]  ;;  %v14469_v28 = vpop.permute.xlu0 %6627  ;;  %v9098_v62 = vld [vmem:[%s14775_s5 + $0x438] sm:$0xf0] }
 0xf8f   : > { %v6472_v16 = vmax.f32 %v6439_v61, 0.0  ;;  %v9161_v61 = vor.u32 %v9532_v46, %v9160_v42  ;;  %v9192_v46 = vld [vmem:[%s14775_s5 + $0x4f0] sm:$0xf] }
 0xf91   : > { %v6488_v47 = vpack.c.bf16 %v6472_v16, %v6471_v49  ;;  %v14488_v49 = vpop.permute.xlu2 %6622  ;;  %v9168_v16 = vld [vmem:[%s14775_s5 + $0x4c0] sm:$0xf] }
 0xf92   : > { %6913 = vmatmul.bf16.gmra.mxu3 %v9121_v13  ;;  %v9101_v13 = vor.u32 %v9515_v33, %v9098_v62  ;;  %v9169_v27 = vor.u32 %v9534_v10, %v9168_v16  ;;  %v9540_v33 = vld [vmem:[%s14775_s5 + $0x4f4] sm:$0xf0]  ;;  %v9523_v62 = vld [vmem:[%s14775_s5 + $0x474] sm:$0xf] }
 0xf93   : > { %6964 = vmatpush.bf16.msrb.mxu0 %v6488_v47  ;;  %v9106_v47 = vld [vmem:[%s14775_s5 + $0x448] sm:$0xf0]  ;;  %v9193_v16 = vor.u32 %v9540_v33, %v9192_v46 }
 0xf94   : > { %v9109_v14 = vor.u32 %v9517_v57, %v9106_v47 }
 0xf95   : > { %v14484_v52 = vpop.permute.xlu0 %6692 }
 0xf97   : > { %6965 = vmatpush.bf16.msrb.mxu0 %v6487_v17  ;;  %v14510_v17 = vpop.permute.xlu1 %6632 }
 0xf99   : > { %v14508_v50 = vpop.permute.xlu2 %6607 }
 0xf9b   : > { %6966 = vmatpush.bf16.msrb.mxu0 %v6486_v1  ;;  %v9176_v1 = vld [vmem:[%s14775_s5 + $0x4d0] sm:$0xf] }
 0xf9d   : > { %v14504_v4 = vpop.permute.xlu0 %6677 }
 0xf9f   : > { %6967 = vmatpush.bf16.msrb.mxu0 %v6485_v9  ;;  %v9114_v9 = vld [vmem:[%s14775_s5 + $0x458] sm:$0xf0]  ;;  %v14530_v53 = vpop.permute.xlu1 %6617 }
 0xfa0   : > { %v9117_v15 = vor.u32 %v9519_v22, %v9114_v9  ;;  %v9138_v22 = vld [vmem:[%s14775_s5 + $0x488] sm:$0xf0] }
 0xfa1   : > { %v14519_v45 = vpop.permute.xlu2 %6672 }
 0xfa2   : > { %6918 = vmatmul.bf16.gmra.mxu3 %v9129_v18  ;;  %v9177_v18 = vor.u32 %v9536_v54, %v9176_v1  ;;  %v9525_v54 = vld [vmem:[%s14775_s5 + $0x484] sm:$0xf] }
 0xfa3   : > { %6968 = vmatpush.bf16.msrb.mxu0 %v14380_v40  ;;  %v9074_v40 = vld [vmem:[%s14775_s5 + $0x408] sm:$0xf0] }
 0xfa5   : > { %v14512_v35 = vpop.permute.xlu0 %6612 }
 0xfa7   : > { %6969 = vmatpush.bf16.msrb.mxu0 %v14371_v48  ;;  %v9077_v48 = vor.u32 %v9509_v12, %v9074_v40 }
 0xfab   : > { %6970 = vmatpush.bf16.msrb.mxu0 %v14362_v38  ;;  %v9144_v38 = vld [vmem:[%s14775_s5 + $0x490] sm:$0xf] }
 0xfac   : > { %v9145_v25 = vor.u32 %v9528_v34, %v9144_v38  ;;  %v9184_v38 = vld [vmem:[%s14775_s5 + $0x4e0] sm:$0xf]  ;;  %v9538_v34 = vld [vmem:[%s14775_s5 + $0x4e4] sm:$0xf0] }
 0xfad   : > { %v14532_v12 = vpop.permute.xlu0 %6597  ;;  %v9185_v21 = vor.u32 %v9538_v34, %v9184_v38 }
 0xfaf   : > { %6971 = vmatpush.bf16.msrb.mxu0 %v14350_v29  ;;  %v9085_v29 = vor.u32 %v9511_v41, %v9082_v5  ;;  %v9521_v41 = vld [vmem:[%s14775_s5 + $0x464] sm:$0xf]  ;;  %v9122_v5 = vld [vmem:[%s14775_s5 + $0x468] sm:$0xf0] }
 0xfb0   : > { %v9125_v43 = vor.u32 %v9521_v41, %v9122_v5 }
 0xfb2   : > { %6923 = vmatmul.bf16.gmra.mxu3 %v9137_v8  ;;  %6972 = vmatmul.bf16.vlgmr.msrb.gmra.mxu0 %v9077_v48  ;;  %v14536_v8 = vpop.permute.xlu2 %6657  ;;  %v14538_v48 = vpop.permute.xlu1 %6682 }
 0xfb5   : > { %v14480_v60 = vpop.f32.mrf.mxu3 }
 0xfba   : > { %v14556_v59 = vpop.permute.xlu2 %6592  ;;  %v14558_v39 = vpop.permute.xlu1 %6667 }
 0xfbd   : > { %v14486_v26 = vpop.f32.mrf.mxu3 }
 0xfc2   : > { %6928 = vmatmul.bf16.gmra.mxu3 %v9145_v25  ;;  %6977 = vmatmul.bf16.gmra.mxu0 %v9085_v29  ;;  %v14552_v25 = vpop.permute.xlu0 %6662  ;;  %v6578_v42 = vpop.permute.xlu2 %6577 }
 0xfc5   : > { %v14506_v23 = vpop.f32.mrf.mxu3 }
 0xfcd   : > { %v14514_v30 = vpop.f32.mrf.mxu3 }
 0xfd2   : > { %6933 = vmatmul.bf16.gmra.mxu3 %v9153_v24  ;;  %6982 = vmatmul.bf16.gmra.mxu0 %v9093_v36  ;;  %v14560_v24 = vpop.permute.xlu0 %6647 }
 0xfd5   : > { %v14534_v40 = vpop.f32.mrf.mxu3 }
 0xfda   : > { %v6583_v57 = vpop.permute.xlu0 %6582 }
 0xfdd   : > { %v14554_v29 = vpop.f32.mrf.mxu3 }
 0xfe2   : > { %6938 = vmatmul.bf16.gmra.mxu3 %v9161_v61  ;;  %6987 = vmatmul.bf16.gmra.mxu0 %v9101_v13  ;;  %v9130_v61 = vld [vmem:[%s14775_s5 + $0x478] sm:$0xf0]  ;;  %v14576_v13 = vpop.permute.xlu1 %6602  ;;  %v6568_v1 = vpop.permute.xlu0 %6567 }
 0xfe3   : > { %v9133_v10 = vor.u32 %v9523_v62, %v9130_v61 }
 0xfe5   : > { %v14562_v36 = vpop.f32.mrf.mxu3 }
 0xfea   : > { %v6563_v5 = vpop.permute.xlu0 %6562 }
 0xfed   : > { %v14578_v47 = vpop.f32.mrf.mxu3 }
 0xff2   : > { %6943 = vmatmul.bf16.gmra.mxu3 %v9169_v27  ;;  %6992 = vmatmul.bf16.gmra.mxu0 %v9109_v14  ;;  %v14580_v27 = vpop.permute.xlu2 %6642  ;;  %v6588_v14 = vpop.permute.xlu1 %6587 }
 0xffa   : > { %v6558_v9 = vpop.permute.xlu2 %6557  ;;  %v14589_v41 = vpop.permute.xlu1 %6652 }
0x1002   : > { %6948 = vmatmul.bf16.gmra.mxu3 %v9177_v18  ;;  %6997 = vmatmul.bf16.gmra.mxu0 %v9117_v15  ;;  %v6885_v18 = vadd.f32 %v14480_v60, %v6558_v9  ;;  %v9141_v15 = vor.u32 %v9525_v54, %v9138_v22  ;;  %v14594_v61 = vpop.permute.xlu1 %6637  ;;  %v9527_v60 = vld [vmem:[%s14775_s5 + $0x494] sm:$0xf]  ;;  %v6904_v22 = vpop.f32.mrf.mxu3 }
0x1012   : > { %6953 = vmatmul.bf16.gmra.mxu3 %v9185_v21  ;;  %7002 = vmatmul.bf16.gmra.mxu0 %v9125_v43  ;;  %v6887_v21 = vadd.f32 %v14486_v26, %v6563_v5  ;;  %v6890_v26 = vadd.f32 %v14506_v23, %v6568_v1  ;;  %v9529_v23 = vld [vmem:[%s14775_s5 + $0x4a4] sm:$0xf]  ;;  %v9154_v1 = vld [vmem:[%s14775_s5 + $0x4a8] sm:$0xf0] }
0x1022   : > { %6958 = vmatmul.bf16.gmra.mxu3 %v9193_v16  ;;  %7007 = vmatmul.bf16.gmra.mxu0 %v9133_v10  ;;  %v9146_v16 = vld [vmem:[%s14775_s5 + $0x498] sm:$0xf0] }
0x1023   : > { %v9149_v9 = vor.u32 %v9527_v60, %v9146_v16  ;;  %v9157_v60 = vor.u32 %v9529_v23, %v9154_v1 }
0x102f   : > { %v6973_v38 = vpop.f32.mrf.mxu0 }
0x1030   : > { %v6974_v34 = vadd.f32 %v6973_v38, %v6885_v18 }
0x1032   : > { %7012 = vmatmul.bf16.gmra.mxu0 %v9141_v15  ;;  %v7053_v46 = vadd.f32 %v6974_v34, %v13961_v58  ;;  %v6573_v15 = vpop.permute.xlu1 %6572  ;;  %v14606_v34 = vpop.f32.mrf.mxu3 }
0x1033   : > { %v6892_v38 = vadd.f32 %v14514_v30, %v6573_v15  ;;  %v6895_v30 = vadd.f32 %v14534_v40, %v6578_v42  ;;  %v9531_v40 = vld [vmem:[%s14775_s5 + $0x4b4] sm:$0xf]  ;;  %v9162_v42 = vld [vmem:[%s14775_s5 + $0x4b8] sm:$0xf0] }
0x1034   : > { %v7085_v10 = vmax.f32 %v7053_v46, 0.0 }
0x1037   : > { %v6975_v43 = vpop.f32.mrf.mxu0 }
0x1038   : > { %v6976_v33 = vadd.f32 %v6975_v43, %v6887_v21 }
0x103a   : > { %v7054_v62 = vadd.f32 %v6976_v33, %v13956_v44 }
0x103c   : > { %v7086_v54 = vmax.f32 %v7054_v62, 0.0 }
0x103e   : > { %v14603_v58 = vpack.c.bf16 %v7086_v54, %v7085_v10  ;;  %v14619_v54 = vpop.f32.mrf.mxu3 }
0x103f   : > { %v6978_v18 = vpop.f32.mrf.mxu0 }
0x1040   : > { %v6979_v44 = vadd.f32 %v6978_v18, %v6890_v26 }
0x1042   : > { %7017 = vmatmul.bf16.gmra.mxu0 %v9149_v9  ;;  %v7055_v21 = vadd.f32 %v6979_v44, %v13949_v55 }
0x1044   : > { %v7087_v33 = vmax.f32 %v7055_v21, 0.0  ;;  %v6900_v21 = vadd.f32 %v14562_v36, %v6588_v14  ;;  %v9533_v36 = vld [vmem:[%s14775_s5 + $0x4c4] sm:$0xf]  ;;  %v9170_v14 = vld [vmem:[%s14775_s5 + $0x4c8] sm:$0xf0] }
0x1046   : > { %v6911_v15 = vpop.f32.mrf.mxu3 }
0x1047   : > { %v6980_v5 = vpop.f32.mrf.mxu0 }
0x1048   : > { %v6981_v43 = vadd.f32 %v6980_v5, %v6892_v38 }
0x104a   : > { %v7056_v46 = vadd.f32 %v6981_v43, %v13942_v7  ;;  %v6897_v7 = vadd.f32 %v14554_v29, %v6583_v57  ;;  %v9165_v29 = vor.u32 %v9531_v40, %v9162_v42  ;;  %v9537_v42 = vld [vmem:[%s14775_s5 + $0x4e4] sm:$0xf] }
0x104c   : > { %v7088_v62 = vmax.f32 %v7056_v46, 0.0  ;;  %v6902_v46 = vadd.f32 %v14578_v47, %v14556_v59 }
0x104e   : > { %v14617_v16 = vpack.c.bf16 %v7088_v62, %v7087_v33 }
0x104f   : > { %v6983_v10 = vpop.f32.mrf.mxu0 }
0x1050   : > { %v6984_v55 = vadd.f32 %v6983_v10, %v6895_v30  ;;  %v6905_v10 = vadd.f32 %v6904_v22, %v14532_v12 }
0x1052   : > { %7022 = vmatmul.bf16.gmra.mxu0 %v9157_v60  ;;  %v7057_v9 = vadd.f32 %v6984_v55, %v13936_v20  ;;  %v9173_v55 = vor.u32 %v9533_v36, %v9170_v14 }
0x1054   : > { %v7089_v38 = vmax.f32 %v7057_v9, 0.0  ;;  %v9535_v9 = vld [vmem:[%s14775_s5 + $0x4d4] sm:$0xf] }
0x1057   : > { %v6985_v26 = vpop.f32.mrf.mxu0 }
0x1058   : > { %v6986_v18 = vadd.f32 %v6985_v26, %v6897_v7 }
0x105a   : > { %v7058_v44 = vadd.f32 %v6986_v18, %v13931_v63  ;;  %v6914_v63 = vpop.f32.mrf.mxu3  ;;  %v9178_v18 = vld [vmem:[%s14775_s5 + $0x4d8] sm:$0xf0] }
0x105c   : > { %v7090_v5 = vmax.f32 %v7058_v44, 0.0  ;;  %v9181_v44 = vor.u32 %v9535_v9, %v9178_v18  ;;  %v6912_v9 = vadd.f32 %v6911_v15, %v14512_v35 }
0x105e   : > { %v14631_v57 = vpack.c.bf16 %v7090_v5, %v7089_v38  ;;  %v9186_v38 = vld [vmem:[%s14775_s5 + $0x4e8] sm:$0xf0] }
0x105f   : > { %v6988_v20 = vpop.f32.mrf.mxu0 }
0x1060   : > { %v6989_v43 = vadd.f32 %v6988_v20, %v6900_v21  ;;  %v9189_v21 = vor.u32 %v9537_v42, %v9186_v38  ;;  %v6910_v38 = vadd.f32 %v14619_v54, %v14508_v50 }
0x1062   : > { %7027 = vmatmul.bf16.gmra.mxu0 %v9165_v29  ;;  %v7059_v1 = vadd.f32 %v6989_v43, %v13926_v0  ;;  %v6916_v47 = vpop.f32.mrf.mxu3 }
0x1063   : > { %v6917_v14 = vadd.f32 %v6916_v47, %v14488_v49 }
0x1064   : > { %v7091_v30 = vmax.f32 %v7059_v1, 0.0 }
0x1067   : > { %v6990_v23 = vpop.f32.mrf.mxu0 }
0x1068   : > { %v6991_v33 = vadd.f32 %v6990_v23, %v6902_v46  ;;  %v9539_v46 = vld [vmem:[%s14775_s5 + $0x4f4] sm:$0xf]  ;;  %v9194_v23 = vld [vmem:[%s14775_s5 + $0x4f8] sm:$0xf0] }
0x1069   : > { %v9197_v1 = vor.u32 %v9539_v46, %v9194_v23 }
0x106a   : > { %v7060_v62 = vadd.f32 %v6991_v33, %v13919_v56  ;;  %v6919_v26 = vpop.f32.mrf.mxu3 }
0x106b   : > { %v6920_v36 = vadd.f32 %v6919_v26, %v14469_v28 }
0x106c   : > { %v7092_v60 = vmax.f32 %v7060_v62, 0.0 }
0x106e   : > { %v14644_v59 = vpack.c.bf16 %v7092_v60, %v7091_v30  ;;  %v6915_v60 = vadd.f32 %v6914_v63, %v14530_v53  ;;  %v6907_v53 = vadd.f32 %v14606_v34, %v14576_v13  ;;  %v15337_v13 = vld [vmem:[#allocation83_spill] sm:$0xff] }
0x106f   : > { %v6993_v0 = vpop.f32.mrf.mxu0 }
0x1070   : > { %v6994_v7 = vadd.f32 %v6993_v0, %v6905_v10 }
0x1072   : > { %7032 = vmatmul.bf16.gmra.mxu0 %v9173_v55  ;;  %v6921_v12 = vpop.f32.mrf.mxu3 }
0x1073   : > { %v6922_v10 = vadd.f32 %v6921_v12, %v14510_v17 }
0x1077   : > { %v6995_v56 = vpop.f32.mrf.mxu0 }
0x1078   : > { %v6996_v12 = vadd.f32 %v6995_v56, %v6907_v53 }
0x107a   : > { %v6924_v5 = vpop.f32.mrf.mxu3  ;;  %v7062_v34 = vadd.f32 %v6996_v12, %v15337_v13 }
0x107f   : > { %v6998_v40 = vpop.f32.mrf.mxu0 }
0x1080   : > { %v6999_v63 = vadd.f32 %v6998_v40, %v6910_v38 }
0x1082   : > { %7037 = vmatmul.bf16.gmra.mxu0 %v9181_v44  ;;  %v6926_v20 = vpop.f32.mrf.mxu3 }
0x1083   : > { %v6927_v56 = vadd.f32 %v6926_v20, %v14580_v27 }
0x1087   : > { %v7000_v22 = vpop.f32.mrf.mxu0 }
0x1088   : > { %v7001_v28 = vadd.f32 %v7000_v22, %v6912_v9 }
0x108a   : > { %v6929_v62 = vpop.f32.mrf.mxu3 }
0x108f   : > { %v7003_v29 = vpop.f32.mrf.mxu0 }
0x1090   : > { %v7004_v18 = vadd.f32 %v7003_v29, %v6915_v60  ;;  %v15339_v60 = vld [vmem:[#allocation24_spill] sm:$0xff] }
0x1092   : > { %7042 = vmatmul.bf16.gmra.mxu0 %v9189_v21  ;;  %v6931_v17 = vpop.f32.mrf.mxu3  ;;  %v7065_v47 = vadd.f32 %v7004_v18, %v13894_v6  ;;  %v15335_v21 = vld [vmem:[#allocation81_spill] sm:$0xff] }
0x1093   : > { %v7064_v29 = vadd.f32 %v7001_v28, %v15335_v21  ;;  %v15338_v6 = vld [vmem:[#allocation9_spill] sm:$0xff] }
0x1095   : > { %v7096_v40 = vmax.f32 %v7064_v29, 0.0 }
0x1097   : > { %v7005_v43 = vpop.f32.mrf.mxu0 }
0x1098   : > { %v7006_v55 = vadd.f32 %v7005_v43, %v6917_v14 }
0x109a   : > { %v7066_v26 = vadd.f32 %v7006_v55, %v13884_v19  ;;  %v15336_v19 = vld [vmem:[#allocation136_spill] sm:$0xff] }
0x109b   : > { %v7063_v43 = vadd.f32 %v6999_v63, %v15336_v19 }
0x109c   : > { %v7098_v50 = vmax.f32 %v7066_v26, 0.0  ;;  %v14693_v26 = vld [vmem:[%s14776_s6] sm:$0xff] }
0x109d   : > { %v7141_v63 = vunpack.c.l.b16 %v14693_v26 }
0x109f   : > { %v7008_v33 = vpop.f32.mrf.mxu0 }
0x10a0   : > { %v7009_v30 = vadd.f32 %v7008_v33, %v6920_v36  ;;  %v7095_v33 = vmax.f32 %v7063_v43, 0.0 }
0x10a2   : > { %7047 = vmatmul.bf16.gmra.mxu0 %v9197_v1  ;;  %v7067_v44 = vadd.f32 %v7009_v30, %v13880_v37  ;;  %v6925_v37 = vadd.f32 %v6924_v5, %v14594_v61  ;;  %v7061_v1 = vadd.f32 %v6994_v7, %v15338_v6  ;;  %v6934_v61 = vpop.f32.mrf.mxu3  ;;  %v7094_v5 = vmax.f32 %v7062_v34, 0.0 }
0x10a3   : > { %v7122_v36 = vpack.c.bf16 %v7096_v40, %v7095_v33  ;;  %v6930_v7 = vadd.f32 %v6929_v62, %v14560_v24  ;;  %v15341_v24 = vld [vmem:[#allocation49_spill] sm:$0xff]  ;;  %v6935_v21 = vadd.f32 %v6934_v61, %v14536_v8 }
0x10a4   : > { %v7099_v35 = vmax.f32 %v7067_v44, 0.0  ;;  %v7093_v30 = vmax.f32 %v7061_v1, 0.0 }
0x10a6   : > { %v7121_v18 = vpack.c.bf16 %v7094_v5, %v7093_v30 }
0x10a7   : > { %v7010_v0 = vpop.f32.mrf.mxu0 }
0x10a8   : > { %v7011_v42 = vadd.f32 %v7010_v0, %v6922_v10  ;;  %v15340_v0 = vld [vmem:[#allocation21_spill] sm:$0xff] }
0x10aa   : > { %v7068_v49 = vadd.f32 %v7011_v42, %v13887_v51  ;;  %v7097_v51 = vmax.f32 %v7065_v47, 0.0  ;;  %v6936_v28 = vpop.f32.mrf.mxu3 }
0x10ac   : > { %v7100_v15 = vmax.f32 %v7068_v49, 0.0  ;;  %v7123_v23 = vpack.c.bf16 %v7098_v50, %v7097_v51  ;;  %v6932_v49 = vadd.f32 %v6931_v17, %v14589_v41  ;;  %v15344_v51 = vld [vmem:[#allocation14_spill] sm:$0xff] }
0x10ae   : > { %v7124_v54 = vpack.c.bf16 %v7100_v15, %v7099_v35  ;;  %v15342_v15 = vld [vmem:[#allocation94_spill] sm:$0xff] }
0x10af   : > { %v7013_v22 = vpop.f32.mrf.mxu0 }
0x10b0   : > { %v7014_v46 = vadd.f32 %v7013_v22, %v6925_v37  ;;  %7147 = vmatpush.bf16.msra.mxu1 %v7124_v54  ;;  %v7143_v37 = vpack.c.b16 %v7141_v63, %v7141_v63  ;;  %v6937_v54 = vadd.f32 %v6936_v28, %v14552_v25  ;;  %v15345_v25 = vld [vmem:[#allocation13_spill] sm:$0xff] }
0x10b2   : > { %v7069_v10 = vadd.f32 %v7014_v46, %v15339_v60  ;;  %v6939_v35 = vpop.f32.mrf.mxu3 }
0x10b4   : > { %7148 = vmatpush.bf16.msra.mxu1 %v7123_v23  ;;  %v7101_v44 = vmax.f32 %v7069_v10, 0.0 }
0x10b7   : > { %v7015_v14 = vpop.f32.mrf.mxu0 }
0x10b8   : > { %v7016_v55 = vadd.f32 %v7015_v14, %v6927_v56  ;;  %7149 = vmatpush.bf16.msra.mxu1 %v7122_v36  ;;  %v15346_v36 = vld [vmem:[#allocation11_spill] sm:$0xff] }
0x10ba   : > { %v7070_v9 = vadd.f32 %v7016_v55, %v15340_v0  ;;  %v6941_v50 = vpop.f32.mrf.mxu3 }
0x10bb   : > { %v6942_v1 = vadd.f32 %v6941_v50, %v14519_v45 }
0x10bc   : > { %v7102_v42 = vmax.f32 %v7070_v9, 0.0  ;;  %7150 = vmatpush.bf16.msra.mxu1 %v7121_v18 }
0x10be   : > { %v14686_v38 = vpack.c.bf16 %v7102_v42, %v7101_v44 }
0x10bf   : > { %v7018_v27 = vpop.f32.mrf.mxu0 }
0x10c0   : > { %v7019_v20 = vadd.f32 %v7018_v27, %v6930_v7  ;;  %7151 = vmatpush.bf16.msra.mxu1 %v14644_v59 }
0x10c2   : > { %v7071_v62 = vadd.f32 %v7019_v20, %v15341_v24  ;;  %v6944_v40 = vpop.f32.mrf.mxu3 }
0x10c3   : > { %v6945_v10 = vadd.f32 %v6944_v40, %v14504_v4 }
0x10c4   : > { %7152 = vmatpush.bf16.msra.mxu1 %v14631_v57  ;;  %v7103_v57 = vmax.f32 %v7071_v62, 0.0 }
0x10c7   : > { %v7020_v53 = vpop.f32.mrf.mxu0 }
0x10c8   : > { %v7021_v47 = vadd.f32 %v7020_v53, %v6932_v49  ;;  %7153 = vmatpush.bf16.msra.mxu1 %v14617_v16  ;;  %v15343_v16 = vld [vmem:[#allocation16_spill] sm:$0xff] }
0x10ca   : > { %v7072_v59 = vadd.f32 %v7021_v47, %v15342_v15  ;;  %v6946_v33 = vpop.f32.mrf.mxu3 }
0x10cc   : > { %v7104_v12 = vmax.f32 %v7072_v59, 0.0  ;;  %7154 = vmatpush.bf16.msra.mxu1 %v14603_v58  ;;  %v6940_v58 = vadd.f32 %v6939_v35, %v14558_v39 }
0x10ce   : > { %v14702_v29 = vpack.c.bf16 %v7104_v12, %v7103_v57  ;;  %v15347_v12 = vld [vmem:[#allocation5_spill] sm:$0xff] }
0x10cf   : > { %v7023_v41 = vpop.f32.mrf.mxu0  ;;  %7155 = vmatmul.bf16.vlgmr.msra.gmra.mxu1 %v7143_v37 }
0x10d0   : > { %v7024_v17 = vadd.f32 %v7023_v41, %v6935_v21 }
0x10d2   : > { %v7073_v19 = vadd.f32 %v7024_v17, %v15343_v16  ;;  %v6949_v9 = vpop.f32.mrf.mxu3  ;;  %v6947_v16 = vadd.f32 %v6946_v33, %v14538_v48 }
0x10d3   : > { %v6950_v17 = vadd.f32 %v6949_v9, %v14482_v11 }
0x10d4   : > { %v7105_v13 = vmax.f32 %v7073_v19, 0.0  ;;  %v15350_v19 = vld [vmem:[#allocation97_spill] sm:$0xff] }
0x10d7   : > { %v7025_v22 = vpop.f32.mrf.mxu0 }
0x10d8   : > { %v7026_v43 = vadd.f32 %v7025_v22, %v6937_v54  ;;  %v15349_v22 = vld [vmem:[#allocation6_spill] sm:$0xff] }
0x10da   : > { %v7074_v46 = vadd.f32 %v7026_v43, %v15344_v51  ;;  %v6951_v44 = vpop.f32.mrf.mxu3 }
0x10db   : > { %v6952_v37 = vadd.f32 %v6951_v44, %v14484_v52  ;;  %v15351_v52 = vld [vmem:[#allocation51_spill] sm:$0xff] }
0x10dc   : > { %v7106_v34 = vmax.f32 %v7074_v46, 0.0 }
0x10de   : > { %v14708_v8 = vpack.c.bf16 %v7106_v34, %v7105_v13 }
0x10df   : > { %v7028_v23 = vpop.f32.mrf.mxu0 }
0x10e0   : > { %v7029_v6 = vadd.f32 %v7028_v23, %v6940_v58  ;;  %v15352_v58 = vld [vmem:[#allocation8_spill] sm:$0xff] }
0x10e2   : > { %v7075_v56 = vadd.f32 %v7029_v6, %v15345_v25  ;;  %v6954_v7 = vpop.f32.mrf.mxu3  ;;  %v15353_v6 = vld [vmem:[#allocation7_spill] sm:$0xff] }
0x10e3   : > { %v6955_v47 = vadd.f32 %v6954_v7, %v14493_v3 }
0x10e4   : > { %v7107_v30 = vmax.f32 %v7075_v56, 0.0  ;;  %v15354_v56 = vld [vmem:[#allocation10_spill] sm:$0xff] }
0x10e7   : > { %v7030_v61 = vpop.f32.mrf.mxu0 }
0x10e8   : > { %v7031_v5 = vadd.f32 %v7030_v61, %v6942_v1 }
0x10ea   : > { %v7076_v14 = vadd.f32 %v7031_v5, %v15346_v36  ;;  %v6956_v28 = vpop.f32.mrf.mxu3 }
0x10eb   : > { %v6957_v62 = vadd.f32 %v6956_v28, %v14464_v32 }
0x10ec   : > { %v7108_v60 = vmax.f32 %v7076_v14, 0.0 }
0x10ee   : > { %v7128_v55 = vpack.c.bf16 %v7108_v60, %v7107_v30  ;;  %v7142_v60 = vunpack.c.h.b16 %v14693_v26 }
0x10ef   : > { %v7033_v0 = vpop.f32.mrf.mxu0 }
0x10f0   : > { %v7034_v39 = vadd.f32 %v7033_v0, %v6945_v10  ;;  %v7144_v10 = vpack.c.b16 %v7142_v60, %v7142_v60 }
0x10f2   : > { %v6959_v49 = vpop.f32.mrf.mxu3  ;;  %v7077_v48 = vadd.f32 %v7034_v39, %v15354_v56 }
0x10f3   : > { %v6960_v63 = vadd.f32 %v6959_v49, %v14448_v2  ;;  %v15348_v2 = vld [vmem:[#allocation85_spill] sm:$0xff] }
0x10f4   : > { %v7109_v14 = vmax.f32 %v7077_v48, 0.0 }
0x10f7   : > { %v7035_v18 = vpop.f32.mrf.mxu0 }
0x10f8   : > { %v7036_v46 = vadd.f32 %v7035_v18, %v6947_v16 }
0x10fa   : > { %v6961_v24 = vpop.f32.mrf.mxu3  ;;  %v7078_v1 = vadd.f32 %v7036_v46, %v15353_v6 }
0x10fb   : > { %v6962_v35 = vadd.f32 %v6961_v24, %v14462_v31 }
0x10fc   : > { %v7110_v5 = vmax.f32 %v7078_v1, 0.0 }
0x10fe   : > { %v7129_v30 = vpack.c.bf16 %v7110_v5, %v7109_v14 }
0x10ff   : > { %v7038_v42 = vpop.f32.mrf.mxu0 }
0x1100   : > { %v7039_v3 = vadd.f32 %v7038_v42, %v6950_v17 }
0x1102   : > { %v7079_v23 = vadd.f32 %v7039_v3, %v15352_v58 }
0x1104   : > { %v7111_v33 = vmax.f32 %v7079_v23, 0.0 }
0x1107   : > { %v7040_v45 = vpop.f32.mrf.mxu0 }
0x1108   : > { %v7041_v50 = vadd.f32 %v7040_v45, %v6952_v37 }
0x110a   : > { %v7080_v13 = vadd.f32 %v7041_v50, %v15351_v52 }
0x110c   : > { %v7112_v61 = vmax.f32 %v7080_v13, 0.0 }
0x110e   : > { %v7130_v36 = vpack.c.bf16 %v7112_v61, %v7111_v33 }
0x110f   : > { %v7043_v27 = vpop.f32.mrf.mxu0 }
0x1110   : > { %v7044_v57 = vadd.f32 %v7043_v27, %v6955_v47 }
0x1112   : > { %v7081_v31 = vadd.f32 %v7044_v57, %v15350_v19 }
0x1114   : > { %v7113_v11 = vmax.f32 %v7081_v31, 0.0 }
0x1117   : > { %v7045_v20 = vpop.f32.mrf.mxu0 }
0x1118   : > { %v7046_v15 = vadd.f32 %v7045_v20, %v6957_v62 }
0x111a   : > { %v7082_v54 = vadd.f32 %v7046_v15, %v15348_v2 }
0x111c   : > { %v7114_v34 = vmax.f32 %v7082_v54, 0.0 }
0x111e   : > { %v7131_v25 = vpack.c.bf16 %v7114_v34, %v7113_v11 }
0x111f   : > { %v7048_v53 = vpop.f32.mrf.mxu0 }
0x1120   : > { %v7049_v4 = vadd.f32 %v7048_v53, %v6960_v63 }
0x1122   : > { %v7083_v21 = vadd.f32 %v7049_v4, %v15347_v12 }
0x1124   : > { %v7115_v43 = vmax.f32 %v7083_v21, 0.0 }
0x1127   : > { %v7050_v59 = vpop.f32.mrf.mxu0 }
0x1128   : > { %v7051_v41 = vadd.f32 %v7050_v59, %v6962_v35 }
0x112a   : > { %v7084_v32 = vadd.f32 %v7051_v41, %v15349_v22 }
0x112c   : > { %v7116_v51 = vmax.f32 %v7084_v32, 0.0 }
0x112e   : > { %v7132_v40 = vpack.c.bf16 %v7116_v51, %v7115_v43 }
0x1130   : > { %7160 = vmatpush.bf16.msra.mxu2 %v7132_v40 }
0x1134   : > { %7161 = vmatpush.bf16.msra.mxu2 %v7131_v25 }
0x1138   : > { %7162 = vmatpush.bf16.msra.mxu2 %v7130_v36 }
0x113c   : > { %7163 = vmatpush.bf16.msra.mxu2 %v7129_v30 }
0x1140   : > { %7164 = vmatpush.bf16.msra.mxu2 %v7128_v55  ;;  %v7138_v55 = vpop.permute.xlu1 %7137 }
0x1144   : > { %7165 = vmatpush.bf16.msra.mxu2 %v14708_v8 }
0x1148   : > { %7166 = vmatpush.bf16.msra.mxu2 %v14702_v29 }
0x114c   : > { %v7156_v0 = vpop.f32.mrf.mxu1  ;;  %7167 = vmatpush.bf16.msra.mxu2 %v14686_v38 }
0x114d   : > { %v7157_v26 = vadd.f32 %v7156_v0, %v7138_v55 }
0x114f   : > { %7168 = vmatmul.bf16.vlgmr.msra.gmra.mxu2 %v7144_v10 }
0x1154   : > { %v7158_v39 = vpop.f32.mrf.mxu1 }
0x11d2   : > { %v7169_v29 = vpop.f32.mrf.mxu2 }
0x11d3   : > { %v7170_v8 = vadd.f32 %v7169_v29, %v7157_v26 }
0x11d5   : > { %7173 = vst [vmem:[%s335_s12] sm:$0xff] %v7170_v8 }
0x11d6   : > { %9634 = shalt.err (!%p9631_p5)
}
0x11d7   : > { %9548 = dma.vmem_to_hbm [thread:$0]  (%p9773_p4), %s7189_s14, 128, %s7191_s16, %s7175_s19  }
0x11da   : > { %v7171_v38 = vpop.f32.mrf.mxu2 }
0x11db PF: > { %p9554_p6 = scmp.ge.s32.totalorder %s9685_s10, 2  ;;  %s7202_s22 = sand.u32 1, %s9665_s27  }
0x11dc   : > { %s7203_s25 = scalar_lea.sflag [#allocation3], %s7202_s22 }
0x11dd   : > { %p9551_p7 = pnand %p9554_p6, %p9780_p8 }
0x11df   : > { %p9552_p9 = pneg %p9551_p7 }
0x11e1   : > { %9660 = dma.done.wait (%p9552_p9), %s7203_s25, 128  }
0x11e2   : > { %9662 = vsyncadd (%p9552_p9), %s7203_s25, 4294967168  ;;  %s21_s10 = sadd.s32 1, %s9685_s10   ;;  %s15355_s27 = smov %s9669_s28 }
0x11e3   : > { %p18_p10 = scmp.ge.s32.totalorder %s21_s10, 4   ;;  %s15356_s28 = smov %s9673_s29 }
0x11e4   : > { %s15357_s29 = smov %s9786_s18  ;;  %s15358_s30 = smov %s9681_s9 }
0x11e5   : > { %s15359_s9 = smov %s15361_s13  ;;  %20 = sbr.rel (!%p18_p10) target bundleno = 6 (0x6), region = 107 }
0x11ea   :  { %7209 = vsyncpa [#allocation3], 1 }
0x11eb   :  { %7211 = vsyncpa [#allocation3 + $0x1], 1 }

</bundles_post_ra>
